<compile_context>
chip_gen: v7x
topology: tpu7x:2x2x1
jax: 0.10.0
libtpu: 0.0.40
codegen_flags: <defaults>
</compile_context>

<pallas_src>
import jax
import jax.numpy as jnp
from jax.experimental import pallas as pl
from jax.experimental.pallas import tpu as pltpu

BN_EPS = 1e-5
FEAT_DIM = 512
K_HALF = FEAT_DIM // 2            # 256
SPATIAL = 4                       # backbone output is (N, 512, 4, 4)
FLAT_K = FEAT_DIM * SPATIAL * SPATIAL   # 8192
TK = 4096                         # contraction tile for the 8192x512 Linear


# ------------------------------ Pallas kernel ------------------------------ #

def _vib_head_kernel(x_ref, w1_ref, s1_ref, t1_ref,
                     wst_ref, bst_ref, eps_ref, wfc_ref, bfc_ref,
                     feat_ref, out_ref, iden_ref, mu_ref, acc_ref):
    k = pl.program_id(0)

    @pl.when(k == 0)
    def _():
        acc_ref[...] = jnp.zeros_like(acc_ref)

    # One MXU pass of the big Linear(8192, 512); BN2d is pre-folded into W1.
    acc_ref[...] += jnp.dot(x_ref[...], w1_ref[...],
                            preferred_element_type=jnp.float32)

    @pl.when(k == pl.num_programs(0) - 1)
    def _():
        # Linear bias + BatchNorm1d folded into a single affine (s1, t1)
        feature = acc_ref[...] * s1_ref[...] + t1_ref[...]
        feat_ref[...] = feature

        # st_layer: Linear(512, 512)
        statis = jnp.dot(feature, wst_ref[...],
                         preferred_element_type=jnp.float32) + bst_ref[...]
        mu = statis[:, :K_HALF]
        z = statis[:, K_HALF:] - 5.0
        # softplus (beta=1), numerically stable: max(z,0) + log1p(exp(-|z|))
        std = jnp.maximum(z, 0.0) + jnp.log1p(jnp.exp(-jnp.abs(z)))
        res = mu + std * eps_ref[...]

        # fc_layer: Linear(256, C) + Softmax(dim=1)
        logits = jnp.dot(res, wfc_ref[...],
                         preferred_element_type=jnp.float32) + bfc_ref[...]
        zl = logits - jnp.max(logits, axis=1, keepdims=True)
        e = jnp.exp(zl)
        probs = e / jnp.sum(e, axis=1, keepdims=True)

        out_ref[...] = probs
        mu_ref[...] = mu

        # iden = argmax(out, dim=1).view(-1, 1)  (first maximal index)
        col = jax.lax.broadcasted_iota(jnp.int32, probs.shape, 1)
        colf = col.astype(jnp.float32)
        max_p = jnp.max(probs, axis=1, keepdims=True)
        sentinel = jnp.float32(probs.shape[1])
        first = jnp.min(jnp.where(probs >= max_p, colf, sentinel),
                        axis=1, keepdims=True)
        iden_ref[...] = first.astype(jnp.int32)


# --------------------------- one-time param folding ------------------------- #

def fold_params(params):
    """Offline fold (do ONCE, not per call):
       BN2d -> rows of W1 / bias, then Linear bias + BN1d -> (s1, t1)."""
    g2, b2, m2, v2 = params['bn2d']
    s2 = g2 / jnp.sqrt(v2 + BN_EPS)
    t2 = b2 - m2 * s2
    # column ordering matches torch's NCHW .view(N, -1) flatten
    s2_flat = jnp.repeat(s2, SPATIAL * SPATIAL)            # (8192,)
    t2_flat = jnp.repeat(t2, SPATIAL * SPATIAL)            # (8192,)
    w1 = params['lin1_w'] * s2_flat[:, None]                # (8192, 512)
    b1 = params['lin1_b'] + t2_flat @ params['lin1_w']      # (512,)

    g1, b1n, m1, v1 = params['bn1d']
    s1 = g1 / jnp.sqrt(v1 + BN_EPS)
    t1 = b1n - m1 * s1
    t1p = b1 * s1 + t1                                       # absorb Linear bias

    c = params['fc_w'].shape[1]
    return {
        'w1': w1,
        's1': s1.reshape(1, FEAT_DIM),
        't1': t1p.reshape(1, FEAT_DIM),
        'st_w': params['st_w'],
        'st_b': params['st_b'].reshape(1, FEAT_DIM),
        'fc_w': params['fc_w'],
        'fc_b': params['fc_b'].reshape(1, c),
    }


# ------------------------------ kernel wrapper ------------------------------ #

def ir152_vib_head(x_feat, eps, folded):
    """x_feat: (N, 512, 4, 4) backbone output; eps: (N, 256) gaussian noise."""
    n = x_feat.shape[0]
    c = folded['fc_w'].shape[1]

    # torch .view(N, -1) on an NCHW tensor
    x_flat = x_feat.reshape(n, FLAT_K)

    # advisory cost hint: this custom call is memory-bound on streaming W1
    bytes_accessed = 4 * (x_flat.size + folded['w1'].size + folded['st_w'].size
                          + folded['fc_w'].size
                          + n * (FEAT_DIM + c + K_HALF + 1))
    flops = 2 * n * (FLAT_K * FEAT_DIM + FEAT_DIM * FEAT_DIM + K_HALF * c)
    transcendentals = n * (2 * K_HALF + c)

    out_shapes = (
        jax.ShapeDtypeStruct((n, FEAT_DIM), jnp.float32),   # feature
        jax.ShapeDtypeStruct((n, c), jnp.float32),          # out (softmax)
        jax.ShapeDtypeStruct((n, 1), jnp.int32),            # iden
        jax.ShapeDtypeStruct((n, K_HALF), jnp.float32),     # mu
    )

    feature, out, iden, mu = pl.pallas_call(
        _vib_head_kernel,
        out_shape=out_shapes,
        grid=(FLAT_K // TK,),
        in_specs=[
            pl.BlockSpec((n, TK), lambda k: (0, k)),            # x chunk
            pl.BlockSpec((TK, FEAT_DIM), lambda k: (k, 0)),     # W1 chunk (folded)
            pl.BlockSpec((1, FEAT_DIM), lambda k: (0, 0)),      # BN1d scale
            pl.BlockSpec((1, FEAT_DIM), lambda k: (0, 0)),      # BN1d shift (+bias)
            pl.BlockSpec((FEAT_DIM, FEAT_DIM), lambda k: (0, 0)),  # st_layer W
            pl.BlockSpec((1, FEAT_DIM), lambda k: (0, 0)),      # st_layer b
            pl.BlockSpec((n, K_HALF), lambda k: (0, 0)),        # eps
            pl.BlockSpec((K_HALF, c), lambda k: (0, 0)),        # fc W
            pl.BlockSpec((1, c), lambda k: (0, 0)),             # fc b
        ],
        out_specs=(
            pl.BlockSpec((n, FEAT_DIM), lambda k: (0, 0)),
            pl.BlockSpec((n, c), lambda k: (0, 0)),
            pl.BlockSpec((n, 1), lambda k: (0, 0)),
            pl.BlockSpec((n, K_HALF), lambda k: (0, 0)),
        ),
        scratch_shapes=[pltpu.VMEM((n, FEAT_DIM), jnp.float32)],
        compiler_params=pltpu.CompilerParams(
            dimension_semantics=("arbitrary",),        # K is a reduction axis
            vmem_limit_bytes=32 * 1024 * 1024),
        cost_estimate=pl.CostEstimate(
            flops=flops,
            transcendentals=transcendentals,
            bytes_accessed=bytes_accessed),
    )(x_flat, folded['w1'], folded['s1'], folded['t1'],
      folded['st_w'], folded['st_b'], eps, folded['fc_w'], folded['fc_b'])
    return feature, out, iden, mu


# ------------------------- pure-JAX reference check ------------------------- #

def ir152_vib_head_reference(x_feat, eps, params):
    n = x_feat.shape[0]
    g2, b2, m2, v2 = params['bn2d']
    s2 = g2 / jnp.sqrt(v2 + BN_EPS)
    t2 = b2 - m2 * s2
    x = x_feat * s2[None, :, None, None] + t2[None, :, None, None]
    # Dropout: eval-mode identity
    flat = x.reshape(n, -1)
    f = flat @ params['lin1_w'] + params['lin1_b']
    g1, b1n, m1, v1 = params['bn1d']
    s1 = g1 / jnp.sqrt(v1 + BN_EPS)
    t1 = b1n - m1 * s1
    feature = f * s1 + t1
    statis = feature @ params['st_w'] + params['st_b']
    mu = statis[:, :K_HALF]
    std = jax.nn.softplus(statis[:, K_HALF:] - 5.0)
    res = mu + std * eps
    logits = res @ params['fc_w'] + params['fc_b']
    out = jax.nn.softmax(logits, axis=1)
    iden = jnp.argmax(out, axis=1).reshape(-1, 1).astype(jnp.int32)
    return feature, out, iden, mu


# ---------------------------- deterministic init ---------------------------- #

def init_params(key, num_classes=1000):
    ks = jax.random.split(key, 11)

    def bn(kg, kb, km, kv, cdim):
        gamma = 1.0 + 0.1 * jax.random.normal(kg, (cdim,), jnp.float32)
        beta = 0.1 * jax.random.normal(kb, (cdim,), jnp.float32)
        rmean = 0.1 * jax.random.normal(km, (cdim,), jnp.float32)
        rvar = 1.0 + 0.1 * jax.random.uniform(kv, (cdim,), jnp.float32)
        return (gamma, beta, rmean, rvar)

    params = {
        'bn2d': bn(ks[0], ks[1], ks[2], ks[3], FEAT_DIM),
        'lin1_w': jax.random.normal(ks[4], (FLAT_K, FEAT_DIM), jnp.float32)
                  / jnp.sqrt(FLAT_K),
        'lin1_b': 0.01 * jax.random.normal(ks[5], (FEAT_DIM,), jnp.float32),
        'bn1d': bn(ks[6], ks[7], ks[8], ks[9], FEAT_DIM),
    }
    k_st, k_stb, k_fc, k_fcb = jax.random.split(ks[10], 4)
    params['st_w'] = (jax.random.normal(k_st, (FEAT_DIM, FEAT_DIM), jnp.float32)
                      / jnp.sqrt(FEAT_DIM))
    params['st_b'] = 0.01 * jax.random.normal(k_stb, (FEAT_DIM,), jnp.float32)
    params['fc_w'] = (jax.random.normal(k_fc, (K_HALF, num_classes), jnp.float32)
                      / jnp.sqrt(K_HALF))
    params['fc_b'] = 0.01 * jax.random.normal(k_fcb, (num_classes,), jnp.float32)
    return params


if __name__ == "__main__":
    key = jax.random.PRNGKey(0)
    pk, xk, ek = jax.random.split(key, 3)
    num_classes = 1000
    params = init_params(pk, num_classes)

    # One-time offline fold (kept out of the per-call path on purpose).
    folded = fold_params(params)
    jax.block_until_ready(folded)

    # Backbone output feature map (see TODO at top) and reparameterization noise
    x_feat = jax.random.normal(xk, (2, FEAT_DIM, SPATIAL, SPATIAL), jnp.float32)
    eps = jax.random.normal(ek, (2, K_HALF), jnp.float32)

    feature, out, iden, mu = ir152_vib_head(x_feat, eps, folded)
    jax.block_until_ready((feature, out, iden, mu))

    f_r, o_r, i_r, m_r = ir152_vib_head_reference(x_feat, eps, params)
    assert feature.shape == (2, FEAT_DIM) and out.shape == (2, num_classes)
    assert iden.shape == (2, 1) and mu.shape == (2, K_HALF)
    assert jnp.allclose(feature, f_r, atol=1e-3, rtol=1e-3)
    assert jnp.allclose(out, o_r, atol=1e-4, rtol=1e-3)
    assert jnp.allclose(mu, m_r, atol=1e-3, rtol=1e-3)
    assert jnp.array_equal(iden, i_r)

    print("KERNEL_OK")
</pallas_src>

<mosaic_0001>
module attributes {stable_mosaic.version = 11 : i64} {
  func.func @_vib_head_kernel(%arg0: i32, %arg1: memref<2x4096xf32, #tpu.memory_space<vmem>>, %arg2: memref<4096x512xf32, #tpu.memory_space<vmem>>, %arg3: memref<1x512xf32, #tpu.memory_space<vmem>>, %arg4: memref<1x512xf32, #tpu.memory_space<vmem>>, %arg5: memref<512x512xf32, #tpu.memory_space<vmem>>, %arg6: memref<1x512xf32, #tpu.memory_space<vmem>>, %arg7: memref<2x256xf32, #tpu.memory_space<vmem>>, %arg8: memref<256x1000xf32, #tpu.memory_space<vmem>>, %arg9: memref<1x1000xf32, #tpu.memory_space<vmem>>, %arg10: memref<2x512xf32, #tpu.memory_space<vmem>>, %arg11: memref<2x1000xf32, #tpu.memory_space<vmem>>, %arg12: memref<2x1xi32, #tpu.memory_space<vmem>>, %arg13: memref<2x256xf32, #tpu.memory_space<vmem>>, %arg14: memref<2x512xf32, #tpu.memory_space<vmem>>) attributes {dimension_semantics = [#tpu.dimension_semantics<arbitrary>], iteration_bounds = array<i64: 2>, scalar_prefetch = 0 : i64, scratch_operands = 1 : i64, tpu.core_type = #tpu.core_type<tc>, window_params = [{transform_indices = @transform_0, window_bounds = array<i64: 2, 4096>}, {transform_indices = @transform_1, window_bounds = array<i64: 4096, 512>}, {pipeline_mode = #tpu.pipeline_mode<synchronous>, transform_indices = @transform_2, window_bounds = array<i64: 1, 512>}, {pipeline_mode = #tpu.pipeline_mode<synchronous>, transform_indices = @transform_3, window_bounds = array<i64: 1, 512>}, {pipeline_mode = #tpu.pipeline_mode<synchronous>, transform_indices = @transform_4, window_bounds = array<i64: 512, 512>}, {pipeline_mode = #tpu.pipeline_mode<synchronous>, transform_indices = @transform_5, window_bounds = array<i64: 1, 512>}, {pipeline_mode = #tpu.pipeline_mode<synchronous>, transform_indices = @transform_6, window_bounds = array<i64: 2, 256>}, {pipeline_mode = #tpu.pipeline_mode<synchronous>, transform_indices = @transform_7, window_bounds = array<i64: 256, 1000>}, {pipeline_mode = #tpu.pipeline_mode<synchronous>, transform_indices = @transform_8, window_bounds = array<i64: 1, 1000>}, {pipeline_mode = #tpu.pipeline_mode<synchronous>, transform_indices = @transform_9, window_bounds = array<i64: 2, 512>}, {pipeline_mode = #tpu.pipeline_mode<synchronous>, transform_indices = @transform_10, window_bounds = array<i64: 2, 1000>}, {pipeline_mode = #tpu.pipeline_mode<synchronous>, transform_indices = @transform_11, window_bounds = array<i64: 2, 1>}, {pipeline_mode = #tpu.pipeline_mode<synchronous>, transform_indices = @transform_12, window_bounds = array<i64: 2, 256>}]} {
    %c0_i32 = arith.constant 0 : i32
    %0 = arith.cmpi eq, %arg0, %c0_i32 : i32
    %1 = arith.extui %0 : i1 to i32
    %c0_i32_0 = arith.constant 0 : i32
    %2 = arith.cmpi ne, %1, %c0_i32_0 : i32
    scf.if %2 {
      %cst_9 = arith.constant 0.000000e+00 : f32
      %12 = vector.broadcast %cst_9 : f32 to vector<2x512xf32>
      %c0_10 = arith.constant 0 : index
      %c0_11 = arith.constant 0 : index
      %13 = vector.load %arg14[%c0_10, %c0_11] : memref<2x512xf32, #tpu.memory_space<vmem>>, vector<2x512xf32>
      tpu.vector_store %arg14[%c0_10, %c0_11], %12 {strides = array<i32>} : memref<2x512xf32, #tpu.memory_space<vmem>>, vector<2x512xf32>,
    } else {
    }
    %c0 = arith.constant 0 : index
    %c0_1 = arith.constant 0 : index
    %3 = vector.load %arg14[%c0, %c0_1] : memref<2x512xf32, #tpu.memory_space<vmem>>, vector<2x512xf32>
    %c0_2 = arith.constant 0 : index
    %c0_3 = arith.constant 0 : index
    %4 = vector.load %arg1[%c0_2, %c0_3] : memref<2x4096xf32, #tpu.memory_space<vmem>>, vector<2x4096xf32>
    %c0_4 = arith.constant 0 : index
    %c0_5 = arith.constant 0 : index
    %5 = vector.load %arg2[%c0_4, %c0_5] : memref<4096x512xf32, #tpu.memory_space<vmem>>, vector<4096x512xf32>
    %cst = arith.constant dense<0.000000e+00> : vector<2x512xf32>
    %6 = tpu.matmul %4, %5, %cst {dimension_numbers = #tpu.dot_dimension_numbers<[1], [0], [0], [1], [0, 0, 1, 1], [], []>} : vector<2x4096xf32>, vector<4096x512xf32>, vector<2x512xf32> -> vector<2x512xf32>
    %7 = arith.addf %3, %6 : vector<2x512xf32>
    %c0_6 = arith.constant 0 : index
    %c0_7 = arith.constant 0 : index
    %8 = vector.load %arg14[%c0_6, %c0_7] : memref<2x512xf32, #tpu.memory_space<vmem>>, vector<2x512xf32>
    tpu.vector_store %arg14[%c0_6, %c0_7], %7 {strides = array<i32>} : memref<2x512xf32, #tpu.memory_space<vmem>>, vector<2x512xf32>,
    %c1_i32 = arith.constant 1 : i32
    %9 = arith.cmpi eq, %arg0, %c1_i32 : i32
    %10 = arith.extui %9 : i1 to i32
    %c0_i32_8 = arith.constant 0 : i32
    %11 = arith.cmpi ne, %10, %c0_i32_8 : i32
    scf.if %11 {
      %c0_9 = arith.constant 0 : index
      %c0_10 = arith.constant 0 : index
      %12 = vector.load %arg14[%c0_9, %c0_10] : memref<2x512xf32, #tpu.memory_space<vmem>>, vector<2x512xf32>
      %c0_11 = arith.constant 0 : index
      %c0_12 = arith.constant 0 : index
      %13 = vector.load %arg3[%c0_11, %c0_12] : memref<1x512xf32, #tpu.memory_space<vmem>>, vector<1x512xf32>
      %14 = vector.broadcast %13 : vector<1x512xf32> to vector<2x512xf32>
      %15 = arith.mulf %12, %14 : vector<2x512xf32>
      %c0_13 = arith.constant 0 : index
      %c0_14 = arith.constant 0 : index
      %16 = vector.load %arg4[%c0_13, %c0_14] : memref<1x512xf32, #tpu.memory_space<vmem>>, vector<1x512xf32>
      %17 = vector.broadcast %16 : vector<1x512xf32> to vector<2x512xf32>
      %18 = arith.addf %15, %17 : vector<2x512xf32>
      %c0_15 = arith.constant 0 : index
      %c0_16 = arith.constant 0 : index
      %19 = vector.load %arg10[%c0_15, %c0_16] : memref<2x512xf32, #tpu.memory_space<vmem>>, vector<2x512xf32>
      tpu.vector_store %arg10[%c0_15, %c0_16], %18 {strides = array<i32>} : memref<2x512xf32, #tpu.memory_space<vmem>>, vector<2x512xf32>,
      %c0_17 = arith.constant 0 : index
      %c0_18 = arith.constant 0 : index
      %20 = vector.load %arg5[%c0_17, %c0_18] : memref<512x512xf32, #tpu.memory_space<vmem>>, vector<512x512xf32>
      %cst_19 = arith.constant dense<0.000000e+00> : vector<2x512xf32>
      %21 = tpu.matmul %18, %20, %cst_19 {dimension_numbers = #tpu.dot_dimension_numbers<[1], [0], [0], [1], [0, 0, 1, 1], [], []>} : vector<2x512xf32>, vector<512x512xf32>, vector<2x512xf32> -> vector<2x512xf32>
      %c0_20 = arith.constant 0 : index
      %c0_21 = arith.constant 0 : index
      %22 = vector.load %arg6[%c0_20, %c0_21] : memref<1x512xf32, #tpu.memory_space<vmem>>, vector<1x512xf32>
      %23 = vector.broadcast %22 : vector<1x512xf32> to vector<2x512xf32>
      %24 = arith.addf %21, %23 : vector<2x512xf32>
      %25 = vector.extract_strided_slice %24 {offsets = [0, 0], sizes = [2, 256], strides = [1, 1]} : vector<2x512xf32> to vector<2x256xf32>
      %26 = vector.extract_strided_slice %24 {offsets = [0, 256], sizes = [2, 256], strides = [1, 1]} : vector<2x512xf32> to vector<2x256xf32>
      %cst_22 = arith.constant 5.000000e+00 : f32
      %27 = vector.broadcast %cst_22 : f32 to vector<2x256xf32>
      %28 = arith.subf %26, %27 : vector<2x256xf32>
      %cst_23 = arith.constant 0.000000e+00 : f32
      %29 = vector.broadcast %cst_23 : f32 to vector<2x256xf32>
      %30 = arith.maximumf %28, %29 : vector<2x256xf32>
      %31 = math.absf %28 : vector<2x256xf32>
      %cst_24 = arith.constant 0.000000e+00 : f32
      %32 = vector.broadcast %cst_24 : f32 to vector<2x256xf32>
      %33 = arith.subf %32, %31 : vector<2x256xf32>
      %34 = math.exp %33 : vector<2x256xf32>
      %35 = math.log1p %34 : vector<2x256xf32>
      %36 = arith.addf %30, %35 : vector<2x256xf32>
      %c0_25 = arith.constant 0 : index
      %c0_26 = arith.constant 0 : index
      %37 = vector.load %arg7[%c0_25, %c0_26] : memref<2x256xf32, #tpu.memory_space<vmem>>, vector<2x256xf32>
      %38 = arith.mulf %36, %37 : vector<2x256xf32>
      %39 = arith.addf %25, %38 : vector<2x256xf32>
      %c0_27 = arith.constant 0 : index
      %c0_28 = arith.constant 0 : index
      %40 = vector.load %arg8[%c0_27, %c0_28] : memref<256x1000xf32, #tpu.memory_space<vmem>>, vector<256x1000xf32>
      %cst_29 = arith.constant dense<0.000000e+00> : vector<2x1000xf32>
      %41 = tpu.matmul %39, %40, %cst_29 {dimension_numbers = #tpu.dot_dimension_numbers<[1], [0], [0], [1], [0, 0, 1, 1], [], []>} : vector<2x256xf32>, vector<256x1000xf32>, vector<2x1000xf32> -> vector<2x1000xf32>
      %c0_30 = arith.constant 0 : index
      %c0_31 = arith.constant 0 : index
      %42 = vector.load %arg9[%c0_30, %c0_31] : memref<1x1000xf32, #tpu.memory_space<vmem>>, vector<1x1000xf32>
      %43 = vector.broadcast %42 : vector<1x1000xf32> to vector<2x1000xf32>
      %44 = arith.addf %41, %43 : vector<2x1000xf32>
      %cst_32 = arith.constant dense<0xFF800000> : vector<2xf32>
      %45 = vector.multi_reduction <maximumf>, %44, %cst_32 [1] : vector<2x1000xf32> to vector<2xf32>
      %46 = vector.shape_cast %45 : vector<2xf32> to vector<2x1xf32>
      %47 = vector.broadcast %46 : vector<2x1xf32> to vector<2x1000xf32>
      %48 = arith.subf %44, %47 : vector<2x1000xf32>
      %49 = math.exp %48 : vector<2x1000xf32>
      %cst_33 = arith.constant dense<0.000000e+00> : vector<2xf32>
      %50 = vector.multi_reduction <add>, %49, %cst_33 [1] : vector<2x1000xf32> to vector<2xf32>
      %51 = vector.shape_cast %50 : vector<2xf32> to vector<2x1xf32>
      %52 = vector.broadcast %51 : vector<2x1xf32> to vector<2x1000xf32>
      %53 = arith.divf %49, %52 : vector<2x1000xf32>
      %c0_34 = arith.constant 0 : index
      %c0_35 = arith.constant 0 : index
      %54 = vector.load %arg11[%c0_34, %c0_35] : memref<2x1000xf32, #tpu.memory_space<vmem>>, vector<2x1000xf32>
      tpu.vector_store %arg11[%c0_34, %c0_35], %53 {strides = array<i32>} : memref<2x1000xf32, #tpu.memory_space<vmem>>, vector<2x1000xf32>,
      %c0_36 = arith.constant 0 : index
      %c0_37 = arith.constant 0 : index
      %55 = vector.load %arg13[%c0_36, %c0_37] : memref<2x256xf32, #tpu.memory_space<vmem>>, vector<2x256xf32>
      tpu.vector_store %arg13[%c0_36, %c0_37], %25 {strides = array<i32>} : memref<2x256xf32, #tpu.memory_space<vmem>>, vector<2x256xf32>,
      %56 = tpu.iota {dimensions = array<i32: 1>} : vector<2x1000xi32>
      %57 = arith.sitofp %56 : vector<2x1000xi32> to vector<2x1000xf32>
      %cst_38 = arith.constant dense<0xFF800000> : vector<2xf32>
      %58 = vector.multi_reduction <maximumf>, %53, %cst_38 [1] : vector<2x1000xf32> to vector<2xf32>
      %59 = vector.shape_cast %58 : vector<2xf32> to vector<2x1xf32>
      %60 = vector.broadcast %59 : vector<2x1xf32> to vector<2x1000xf32>
      %61 = arith.cmpf oge, %53, %60 : vector<2x1000xf32>
      %cst_39 = arith.constant 1.000000e+03 : f32
      %62 = vector.broadcast %cst_39 : f32 to vector<2x1000xf32>
      %63 = arith.select %61, %57, %62 : vector<2x1000xi1>, vector<2x1000xf32>
      %cst_40 = arith.constant dense<0x7F800000> : vector<2xf32>
      %64 = vector.multi_reduction <minimumf>, %63, %cst_40 [1] : vector<2x1000xf32> to vector<2xf32>
      %65 = vector.shape_cast %64 : vector<2xf32> to vector<2x1xf32>
      %66 = arith.fptosi %65 : vector<2x1xf32> to vector<2x1xi32>
      %c0_41 = arith.constant 0 : index
      %c0_42 = arith.constant 0 : index
      %67 = vector.load %arg12[%c0_41, %c0_42] : memref<2x1xi32, #tpu.memory_space<vmem>>, vector<2x1xi32>
      tpu.vector_store %arg12[%c0_41, %c0_42], %66 {strides = array<i32>} : memref<2x1xi32, #tpu.memory_space<vmem>>, vector<2x1xi32>,
    } else {
    }
    return
  }
  func.func @transform_0(%arg0: i32) -> (i32, i32) {
    %c0_i32 = arith.constant 0 : i32
    %c0_i32_0 = arith.constant 0 : i32
    return %c0_i32, %arg0 : i32, i32
  }
  func.func @transform_1(%arg0: i32) -> (i32, i32) {
    %c0_i32 = arith.constant 0 : i32
    %c0_i32_0 = arith.constant 0 : i32
    return %arg0, %c0_i32 : i32, i32
  }
  func.func @transform_2(%arg0: i32) -> (i32, i32) {
    %c0_i32 = arith.constant 0 : i32
    %c0_i32_0 = arith.constant 0 : i32
    %c0_i32_1 = arith.constant 0 : i32
    return %c0_i32, %c0_i32_0 : i32, i32
  }
  func.func @transform_3(%arg0: i32) -> (i32, i32) {
    %c0_i32 = arith.constant 0 : i32
    %c0_i32_0 = arith.constant 0 : i32
    %c0_i32_1 = arith.constant 0 : i32
    return %c0_i32, %c0_i32_0 : i32, i32
  }
  func.func @transform_4(%arg0: i32) -> (i32, i32) {
    %c0_i32 = arith.constant 0 : i32
    %c0_i32_0 = arith.constant 0 : i32
    %c0_i32_1 = arith.constant 0 : i32
    return %c0_i32, %c0_i32_0 : i32, i32
  }
  func.func @transform_5(%arg0: i32) -> (i32, i32) {
    %c0_i32 = arith.constant 0 : i32
    %c0_i32_0 = arith.constant 0 : i32
    %c0_i32_1 = arith.constant 0 : i32
    return %c0_i32, %c0_i32_0 : i32, i32
  }
  func.func @transform_6(%arg0: i32) -> (i32, i32) {
    %c0_i32 = arith.constant 0 : i32
    %c0_i32_0 = arith.constant 0 : i32
    %c0_i32_1 = arith.constant 0 : i32
    return %c0_i32, %c0_i32_0 : i32, i32
  }
  func.func @transform_7(%arg0: i32) -> (i32, i32) {
    %c0_i32 = arith.constant 0 : i32
    %c0_i32_0 = arith.constant 0 : i32
    %c0_i32_1 = arith.constant 0 : i32
    return %c0_i32, %c0_i32_0 : i32, i32
  }
  func.func @transform_8(%arg0: i32) -> (i32, i32) {
    %c0_i32 = arith.constant 0 : i32
    %c0_i32_0 = arith.constant 0 : i32
    %c0_i32_1 = arith.constant 0 : i32
    return %c0_i32, %c0_i32_0 : i32, i32
  }
  func.func @transform_9(%arg0: i32) -> (i32, i32) {
    %c0_i32 = arith.constant 0 : i32
    %c0_i32_0 = arith.constant 0 : i32
    %c0_i32_1 = arith.constant 0 : i32
    return %c0_i32, %c0_i32_0 : i32, i32
  }
  func.func @transform_10(%arg0: i32) -> (i32, i32) {
    %c0_i32 = arith.constant 0 : i32
    %c0_i32_0 = arith.constant 0 : i32
    %c0_i32_1 = arith.constant 0 : i32
    return %c0_i32, %c0_i32_0 : i32, i32
  }
  func.func @transform_11(%arg0: i32) -> (i32, i32) {
    %c0_i32 = arith.constant 0 : i32
    %c0_i32_0 = arith.constant 0 : i32
    %c0_i32_1 = arith.constant 0 : i32
    return %c0_i32, %c0_i32_0 : i32, i32
  }
  func.func @transform_12(%arg0: i32) -> (i32, i32) {
    %c0_i32 = arith.constant 0 : i32
    %c0_i32_0 = arith.constant 0 : i32
    %c0_i32_1 = arith.constant 0 : i32
    return %c0_i32, %c0_i32_0 : i32, i32
  }
}

</mosaic_0001>

<bundles_post_ra>
// kernel: tpu_custom_call.1
= control target key start
LH: loop header
LB: loop body
LE: loop exit
PB: predicated region body
PF: predicated region fallthrough
CT: control target
= control target key end

     0   :  { %s13552_s0 = inlined_call_operand.hbm [shape: f32[2,8192], index: 0, kind: input, shape index: {}]   ;;  %s13553_s1 = inlined_call_operand.hbm [shape: f32[8192,512], index: 1, kind: input, shape index: {}]   ;;  %s13554_s2 = inlined_call_operand.hbm [shape: f32[1,512], index: 2, kind: input, shape index: {}]   ;;  %s13555_s3 = inlined_call_operand.hbm [shape: f32[1,512], index: 3, kind: input, shape index: {}]   ;;  %s13556_s4 = inlined_call_operand.hbm [shape: f32[512,512], index: 4, kind: input, shape index: {}]   ;;  %s13557_s5 = inlined_call_operand.hbm [shape: f32[1,512], index: 5, kind: input, shape index: {}]   ;;  %s13558_s6 = inlined_call_operand.hbm [shape: f32[2,256], index: 6, kind: input, shape index: {}]   ;;  %s13559_s7 = inlined_call_operand.vmem [shape: f32[256,1000], index: 7, kind: input, shape index: {}]   ;;  %s13560_s8 = inlined_call_operand.hbm [shape: f32[1,1000], index: 8, kind: input, shape index: {}]   ;;  %s13561_s9 = inlined_call_operand.hbm [shape: f32[2,512], index: 9, kind: output, shape index: {0}]   ;;  %s13562_s10 = inlined_call_operand.hbm [shape: f32[2,1000], index: 10, kind: output, shape index: {1}]   ;;  %s13563_s11 = inlined_call_operand.vmem [shape: s32[2,1], index: 11, kind: output, shape index: {2}]   ;;  %s13564_s12 = inlined_call_operand.hbm [shape: f32[2,256], index: 12, kind: output, shape index: {3}]  }
   0x1   :  { %13572 = sst [smem:[#allocation29_spill]] %s13552_s0 }
   0x2   :  { %13573 = sst [smem:[#allocation30_spill]] %s13554_s2 }
   0x3   :  { %13574 = sst [smem:[#allocation31_spill]] %s13561_s9 }
   0x4   :  { %13575 = sst [smem:[#allocation32_spill]] %s13562_s10 }
   0x5   :  { %13576 = sst [smem:[#allocation33_spill]] %s13564_s12 }
   0x6   :  { %18 = vsyncpa [#allocation4], 0 }
   0x7   :  { %20 = vsyncpa [#allocation4 + $0x1], 0 }
   0x8   :  { %21 = vsyncpa [#allocation7], 0 }
   0x9   :  { %23 = vsyncpa [#allocation7 + $0x1], 0 }
   0xa   :  { %24 = vsyncpa [#allocation10], 0 }
   0xb   :  { %25 = vsyncpa [#allocation13], 0 }
   0xc   :  { %26 = vsyncpa [#allocation16], 0 }
   0xd   :  { %27 = vsyncpa [#allocation5], 0 }
   0xe   :  { %28 = vsyncpa [#allocation19], 0  ;;  %s10034_s21 = smov 0   ;;  %s10036_s22 = smov 0  }
   0xf   :  { %s10038_s23 = smov 0   ;;  %s10040_s24 = smov 0  }
  0x10 LB: > { %s9954_s25 = smov [#allocation8]   ;;  %s10055_s27 = sadd.s32 4294967295, %s9952_s24   ;;  %s9952_s24 = sphi %s10040_s24, %s13603_s24   ;;  %s9948_s23 = sphi %s10038_s23, %s13602_s23   ;;  %s9944_s22 = sphi %s10036_s22, %s13601_s22   ;;  %s9940_s21 = sphi %s10034_s21, %s13600_s21  }
  0x11   : > { %s335_s26 = sshll.u32 %s9954_s25, 4  ;;  %p6749_p0 = scmp.ge.s32.totalorder %s9952_s24, 1  ;;  %s10061_s26 = int_to_ptr.vmem [resolvable:$true] %s335_s26 }
  0x12   : > { %p13568_p1 = scmp.eq.s32.totalorder %s10055_s27, 0  ;;  %p322_p2 = scmp.lt.s32.totalorder %s9952_s24, 3 }
  0x13   : > { %s9955_s29 = smov [#allocation9]   ;;  %s9956_s13 = smov [#allocation12]  }
  0x14   : > { %p10063_p4 = pnand %p6749_p0, %p322_p2  ;;  %s346_s30 = sshll.u32 %s9955_s29, 4  ;;  %s10069_s30 = int_to_ptr.vmem [resolvable:$true] %s346_s30 }
  0x15   : > { %s370_s14 = sshll.u32 %s9956_s13, 4  ;;  %s9957_s16 = smov [#allocation11]   ;;  %s10077_s14 = int_to_ptr.vmem [resolvable:$true] %s370_s14 }
  0x16   : > { %s13577_s28 = scalar_select %p10063_p4, 1, 0 }
  0x17   : > { %p9460_p5 = pneg %p10063_p4  ;;  %s10079_s17 = sshll.u32 %s9957_s16, 4  ;;  %s357_s17 = int_to_ptr.vmem [resolvable:$true] %s10079_s17 }
  0x18   : > { %s13579_s2 = sld [smem:[#allocation30_spill]] }
  0x19   : > { %p10073_p6 = pnand %p9460_p5, %p13568_p1 }
  0x1b   : > { %p10089_p8 = pneg %p10073_p6 }
  0x1e   : > { %s9584_s20 = scalar_lea.hbm %s13579_s2, 64 }
  0x1f   : > { %p9585_p7 = scmp.ne.s32.totalorder %s13579_s2, %s9584_s20  ;;  %p9591_p11 = scmp.lt.u32.totalorder %s9584_s20, %s13579_s2 }
  0x21   : > { %p9587_p9 = pnand %p10089_p8, %p9585_p7 }
  0x23   : > { %p9588_p10 = pneg %p9587_p9 }
  0x25   : > { %p9593_p12 = pnand %p9591_p11, %p9588_p10 }
  0x27   : > { %9596 = shalt.err (!%p9593_p12)
}
  0x28   : > { %s9597_s18 = scalar_lea.vmem %s10061_s26, 64  ;;  %p9605_p5 = scmp.lt.s32.totalorder %s10061_s26, %s10061_s26 }
  0x29   : > { %p9598_p13 = scmp.ne.s32.totalorder %s10061_s26, %s9597_s18  ;;  %p9606_p3 = scmp.lt.s32.totalorder %s9597_s18, %s9597_s18 }
  0x2b   : > { %p9600_p0 = pnand %p9598_p13, %p10089_p8  ;;  %p9607_p7 = por %p9606_p3, %p9605_p5 }
  0x2d   : > { %p9601_p2 = pneg %p9600_p0 }
  0x2f   : > { %p9608_p9 = pnand %p9607_p7, %p9601_p2 }
  0x31   : > { %9611 = shalt.err (!%p9608_p9)
}
  0x32   : > { %9463 = dma.hbm_to_vmem [thread:$0]  (!%p10073_p6), %s13579_s2, 64, %s10061_s26, [#allocation7]  }
  0x33   : > { %s9612_s29 = scalar_lea.hbm %s13555_s3, 64 }
  0x34   : > { %p9613_p10 = scmp.ne.s32.totalorder %s13555_s3, %s9612_s29  ;;  %p9619_p12 = scmp.lt.u32.totalorder %s9612_s29, %s13555_s3 }
  0x36   : > { %p9615_p3 = pnand %p9613_p10, %p10089_p8 }
  0x38   : > { %p9616_p11 = pneg %p9615_p3 }
  0x3a   : > { %p9621_p13 = pnand %p9619_p12, %p9616_p11 }
  0x3c   : > { %9624 = shalt.err (!%p9621_p13)
}
  0x3d   : > { %s9625_s26 = scalar_lea.vmem %s10069_s30, 64  ;;  %p9633_p7 = scmp.lt.s32.totalorder %s10069_s30, %s10069_s30 }
  0x3e   : > { %p9626_p0 = scmp.ne.s32.totalorder %s10069_s30, %s9625_s26  ;;  %p9634_p9 = scmp.lt.s32.totalorder %s9625_s26, %s9625_s26 }
  0x40   : > { %p9628_p2 = pnand %p9626_p0, %p10089_p8  ;;  %p9635_p10 = por %p9634_p9, %p9633_p7 }
  0x42   : > { %p9629_p5 = pneg %p9628_p2 }
  0x44   : > { %p9636_p3 = pnand %p9635_p10, %p9629_p5 }
  0x46   : > { %9639 = shalt.err (!%p9636_p3)
}
  0x47   : > { %9466 = dma.hbm_to_vmem [thread:$0]  (!%p10073_p6), %s13555_s3, 64, %s10069_s30, [#allocation10]  }
  0x48   : > { %s9640_s20 = scalar_lea.hbm %s13557_s5, 64 }
  0x49   : > { %p9641_p11 = scmp.ne.s32.totalorder %s13557_s5, %s9640_s20  ;;  %p9647_p0 = scmp.lt.u32.totalorder %s9640_s20, %s13557_s5 }
  0x4b   : > { %p9643_p12 = pnand %p9641_p11, %p10089_p8 }
  0x4d   : > { %p9644_p13 = pneg %p9643_p12 }
  0x4f   : > { %p9649_p2 = pnand %p9647_p0, %p9644_p13 }
  0x51   : > { %9652 = shalt.err (!%p9649_p2)
}
  0x52   : > { %s9653_s30 = scalar_lea.vmem %s10077_s14, 64  ;;  %p9661_p10 = scmp.lt.s32.totalorder %s10077_s14, %s10077_s14 }
  0x53   : > { %p9654_p5 = scmp.ne.s32.totalorder %s10077_s14, %s9653_s30  ;;  %p9662_p3 = scmp.lt.s32.totalorder %s9653_s30, %s9653_s30 }
  0x55   : > { %p9656_p7 = pnand %p9654_p5, %p10089_p8  ;;  %p9663_p11 = por %p9662_p3, %p9661_p10 }
  0x57   : > { %p9657_p9 = pneg %p9656_p7 }
  0x59   : > { %p9664_p12 = pnand %p9663_p11, %p9657_p9 }
  0x5b   : > { %9667 = shalt.err (!%p9664_p12)
}
  0x5c   : > { %9472 = dma.hbm_to_vmem [thread:$0]  (!%p10073_p6), %s13557_s5, 64, %s10077_s14, [#allocation13]  }
  0x5d   : > { %s9668_s19 = scalar_lea.hbm %s13556_s4, 32768 }
  0x5e   : > { %p9669_p13 = scmp.ne.s32.totalorder %s13556_s4, %s9668_s19  ;;  %p9675_p5 = scmp.lt.u32.totalorder %s9668_s19, %s13556_s4 }
  0x60   : > { %p9671_p0 = pnand %p9669_p13, %p10089_p8 }
  0x62   : > { %p9672_p2 = pneg %p9671_p0 }
  0x64   : > { %p9677_p7 = pnand %p9675_p5, %p9672_p2 }
  0x66   : > { %9680 = shalt.err (!%p9677_p7)
}
  0x67   : > { %s9681_s18 = scalar_lea.vmem %s357_s17, 32768  ;;  %p9689_p11 = scmp.lt.s32.totalorder %s357_s17, %s357_s17 }
  0x68   : > { %p9682_p9 = scmp.ne.s32.totalorder %s357_s17, %s9681_s18  ;;  %p9690_p12 = scmp.lt.s32.totalorder %s9681_s18, %s9681_s18 }
  0x6a   : > { %p9684_p10 = pnand %p9682_p9, %p10089_p8  ;;  %p9691_p1 = por %p9690_p12, %p9689_p11 }
  0x6c   : > { %p9685_p3 = pneg %p9684_p10 }
  0x6e   : > { %p9692_p4 = pnand %p9691_p1, %p9685_p3 }
  0x70   : > { %9695 = shalt.err (!%p9692_p4)
}
  0x71   : > { %s13570_s14 = smov 512   ;;  %s13571_s30 = smov 32  }
  0x72   : > { %9469 = dma.hbm_to_vmem [thread:$0]  (!%p10073_p6), %s13556_s4, 32768, %s357_s17, [#allocation10], %s13570_s14, %s13570_s14, %s13571_s30  }
  0x73   : > { %s9960_s10 = smov [#allocation14]   ;;  %s9961_s19 = smov [#allocation15]  }
  0x74   : > { %s381_s12 = sshll.u32 %s9960_s10, 4  ;;  %s395_s20 = sshll.u32 %s9961_s19, 4  ;;  %s382_s12 = int_to_ptr.vmem [resolvable:$true] %s381_s12  ;;  %s10178_s20 = int_to_ptr.vmem [resolvable:$true] %s395_s20 }
  0x75   : > { %s9696_s16 = scalar_lea.hbm %s13558_s6, 64 }
  0x76   : > { %p9697_p1 = scmp.ne.s32.totalorder %s13558_s6, %s9696_s16  ;;  %p9703_p0 = scmp.lt.u32.totalorder %s9696_s16, %s13558_s6 }
  0x78   : > { %p9699_p4 = pnand %p9697_p1, %p10089_p8 }
  0x7a   : > { %p9700_p13 = pneg %p9699_p4 }
  0x7c   : > { %p9705_p2 = pnand %p9703_p0, %p9700_p13 }
  0x7e   : > { %9708 = shalt.err (!%p9705_p2)
}
  0x7f   : > { %s9709_s9 = scalar_lea.vmem %s382_s12, 64  ;;  %p9717_p10 = scmp.lt.s32.totalorder %s382_s12, %s382_s12 }
  0x80   : > { %p9710_p5 = scmp.ne.s32.totalorder %s382_s12, %s9709_s9  ;;  %p9718_p3 = scmp.lt.s32.totalorder %s9709_s9, %s9709_s9 }
  0x82   : > { %p9712_p7 = pnand %p9710_p5, %p10089_p8  ;;  %p9719_p11 = por %p9718_p3, %p9717_p10 }
  0x84   : > { %p9713_p9 = pneg %p9712_p7 }
  0x86   : > { %p9720_p12 = pnand %p9719_p11, %p9713_p9 }
  0x88   : > { %9723 = shalt.err (!%p9720_p12)
}
  0x89   : > { %9475 = dma.hbm_to_vmem [thread:$0]  (!%p10073_p6), %s13558_s6, 64, %s382_s12, [#allocation13]  }
  0x8a   : > { %s9724_s29 = scalar_lea.hbm %s13560_s8, 128 }
  0x8b   : > { %p9725_p1 = scmp.ne.s32.totalorder %s13560_s8, %s9724_s29  ;;  %p9731_p0 = scmp.lt.u32.totalorder %s9724_s29, %s13560_s8 }
  0x8d   : > { %p9727_p4 = pnand %p9725_p1, %p10089_p8 }
  0x8f   : > { %p9728_p13 = pneg %p9727_p4 }
  0x91   : > { %p9733_p2 = pnand %p9731_p0, %p9728_p13 }
  0x93   : > { %9736 = shalt.err (!%p9733_p2)
}
  0x94   : > { %s9737_s12 = scalar_lea.vmem %s10178_s20, 128  ;;  %p9745_p10 = scmp.lt.s32.totalorder %s10178_s20, %s10178_s20 }
  0x95   : > { %p9738_p5 = scmp.ne.s32.totalorder %s10178_s20, %s9737_s12  ;;  %p9746_p3 = scmp.lt.s32.totalorder %s9737_s12, %s9737_s12 }
  0x97   : > { %p9740_p7 = pnand %p9738_p5, %p10089_p8  ;;  %p9747_p11 = por %p9746_p3, %p9745_p10 }
  0x99   : > { %p9741_p9 = pneg %p9740_p7 }
  0x9b   : > { %p9748_p12 = pnand %p9747_p11, %p9741_p9 }
  0x9d   : > { %9751 = shalt.err (!%p9748_p12)
}
  0x9e   : > { %9478 = dma.hbm_to_vmem [thread:$0]  (!%p10073_p6), %s13560_s8, 128, %s10178_s20, [#allocation16]  }
  0x9f   : > { %s10222_s13 = sadd.s32 1, %s9952_s24   ;;  %s41_s15 = sadd.s32 1, %s9948_s23 }
  0xa0   : > { %s38_s10 = ssub.s32 %s9952_s24, %s10222_s13  ;;  %p48_p8 = scmp.ne.s32.totalorder %s9948_s23, %s9944_s22 }
  0xa1   : > { %p39_p1 = scmp.eq.s32.totalorder %s38_s10, 0  ;;  %p49_p4 = scmp.eq.s32.totalorder %s9952_s24, 0 }
  0xa2   : > { %p54_p13 = scmp.ne.s32.totalorder %s9944_s22, %s9940_s21  ;;  %p9492_p0 = scmp.lt.s32.totalorder %s9952_s24, 2 }
  0xa3   : > { %s10234_s19 = scalar_select %p39_p1, %s9948_s23, %s41_s15  }
  0xa4   : > { %p50_p2 = por %p49_p4, %p48_p8  ;;  %p13581_p5 = scmp.eq.s32.totalorder %s10055_s27, 0 }
  0xa5   : > { %s10243_s29 = sand.u32 1, %s9948_s23   ;;  %s6787_s20 = sshll.u32 %s9952_s24, 10 }
  0xa6   : > { %p10238_p7 = por %p13581_p5, %p54_p13  ;;  %s6757_s16 = sshll.u32 %s10243_s29, 6 }
  0xa7   : > { %s13583_s0 = sld [smem:[#allocation29_spill]]  ;;  %s410_s17 = scalar_lea.vmem [#allocation3], %s6757_s16 }
  0xa8   : > { %s418_s12 = sshll.u32 %s410_s17, 4  ;;  %p10252_p6 = pnand %p9492_p0, %p50_p2  ;;  %s10256_s12 = int_to_ptr.vmem [resolvable:$true] %s418_s12 }
  0xa9   : > { %s6760_s2 = sshll.u32 %s10243_s29, 14  ;;  %s407_s15 = scalar_lea.sflag [#allocation4], %s10243_s29 }
  0xaa   : > { %p9754_p10 = pneg %p10252_p6 }
  0xad   : > { %s10250_s21 = scalar_lea.hbm %s13583_s0, %s6787_s20  ;;  %s9757_s18 = scalar_lea.hbm %s13583_s0, 2048 }
  0xae   : > { %s9752_s10 = scalar_lea.hbm %s10250_s21, 1024  ;;  %p9758_p12 = scmp.lt.u32.totalorder %s10250_s21, %s13583_s0 }
  0xaf   : > { %p9753_p9 = scmp.ne.s32.totalorder %s10250_s21, %s9752_s10  ;;  %p9759_p8 = scmp.lt.u32.totalorder %s9757_s18, %s9752_s10 }
  0xb0   : > { %p9761_p4 = scmp.lt.u32.totalorder %s9752_s10, %s10250_s21 }
  0xb1   : > { %p9755_p3 = pnand %p9754_p10, %p9753_p9  ;;  %p9760_p1 = por %p9759_p8, %p9758_p12 }
  0xb3   : > { %p9756_p11 = pneg %p9755_p3  ;;  %p9762_p13 = por %p9761_p4, %p9760_p1 }
  0xb5   : > { %p9763_p0 = pnand %p9762_p13, %p9756_p11 }
  0xb7   : > { %9766 = shalt.err (!%p9763_p0)
}
  0xb8   : > { %s9767_s14 = scalar_lea.vmem %s10256_s12, 1024  ;;  %s9962_s20 = smov [#allocation3]  }
  0xb9   : > { %p9768_p2 = scmp.ne.s32.totalorder %s10256_s12, %s9767_s14  ;;  %s9772_s16 = sshll.u32 %s9962_s20, 4  ;;  %s9773_s16 = int_to_ptr.vmem [resolvable:$false] %s9772_s16 }
  0xba   : > { %s9774_s26 = scalar_lea.vmem %s9773_s16, 2048  ;;  %p9775_p3 = scmp.lt.s32.totalorder %s10256_s12, %s9773_s16 }
  0xbb   : > { %p9770_p5 = pnand %p9768_p2, %p9754_p10  ;;  %p9776_p12 = scmp.lt.s32.totalorder %s9774_s26, %s9767_s14 }
  0xbd   : > { %p9771_p9 = pneg %p9770_p5  ;;  %p9777_p8 = por %p9776_p12, %p9775_p3 }
  0xbf   : > { %p9778_p1 = pnand %p9777_p8, %p9771_p9 }
  0xc1   : > { %9781 = shalt.err (!%p9778_p1)
}
  0xc2   : > { %9482 = dma.hbm_to_vmem [thread:$0]  (!%p10252_p6), %s10250_s21, 1024, %s10256_s12, %s407_s15  }
  0xc3   : > { %s429_s10 = scalar_lea.vmem [#allocation6], %s6760_s2  ;;  %s425_s17 = sand.u32 1, %s9952_s24  }
  0xc4   : > { %s437_s18 = sshll.u32 %s429_s10, 4  ;;  %s6789_s20 = sshll.u32 %s9952_s24, 18  ;;  %s10288_s18 = int_to_ptr.vmem [resolvable:$true] %s437_s18 }
  0xc5   : > { %s10294_s26 = scalar_lea.hbm %s13553_s1, %s6789_s20  ;;  %s10296_s30 = scalar_lea.sflag [#allocation7], %s425_s17 }
  0xc6   : > { %s9782_s0 = scalar_lea.hbm %s10294_s26, 262144  ;;  %s9787_s24 = scalar_lea.hbm %s13553_s1, 524288 }
  0xc7   : > { %p9783_p11 = scmp.ne.s32.totalorder %s10294_s26, %s9782_s0  ;;  %p9788_p0 = scmp.lt.u32.totalorder %s10294_s26, %s13553_s1 }
  0xc8   : > { %p9789_p2 = scmp.lt.u32.totalorder %s9787_s24, %s9782_s0  ;;  %p9791_p9 = scmp.lt.u32.totalorder %s9782_s0, %s10294_s26 }
  0xc9   : > { %p9785_p4 = pnand %p9783_p11, %p9754_p10 }
  0xca   : > { %p9790_p5 = por %p9789_p2, %p9788_p0 }
  0xcb   : > { %p9786_p13 = pneg %p9785_p4 }
  0xcc   : > { %p9792_p3 = por %p9791_p9, %p9790_p5 }
  0xce   : > { %p9793_p12 = pnand %p9792_p3, %p9786_p13 }
  0xd0   : > { %9796 = shalt.err (!%p9793_p12)
}
  0xd1   : > { %s9797_s15 = scalar_lea.vmem %s10288_s18, 262144  ;;  %s9963_s10 = smov [#allocation6]  }
  0xd2   : > { %p9798_p8 = scmp.ne.s32.totalorder %s10288_s18, %s9797_s15  ;;  %s9802_s17 = sshll.u32 %s9963_s10, 4  ;;  %s9803_s17 = int_to_ptr.vmem [resolvable:$false] %s9802_s17 }
  0xd3   : > { %s9804_s20 = scalar_lea.vmem %s9803_s17, 524288  ;;  %p9805_p4 = scmp.lt.s32.totalorder %s10288_s18, %s9803_s17 }
  0xd4   : > { %p9800_p1 = pnand %p9798_p8, %p9754_p10  ;;  %p9806_p0 = scmp.lt.s32.totalorder %s9804_s20, %s9797_s15 }
  0xd6   : > { %p9801_p11 = pneg %p9800_p1  ;;  %p9807_p2 = por %p9806_p0, %p9805_p4 }
  0xd8   : > { %p9808_p5 = pnand %p9807_p2, %p9801_p11 }
  0xda   : > { %9811 = shalt.err (!%p9808_p5)
}
  0xdb   : > { %s13585_s0 = smov 32   ;;  %s13586_s14 = smov 512  }
  0xdc   : > { %9485 = dma.hbm_to_vmem [thread:$0]  (!%p10252_p6), %s10294_s26, 262144, %s10288_s18, %s10296_s30, %s13586_s14, %s13586_s14, %s13585_s0  }
  0xdd   : > { %p13587_p10 = scmp.ne.s32.totalorder %s13577_s28, 0 }
  0xde   : > { %s451_s16 = sand.u32 (!%p13587_p10), 1, %s9944_s22  }
  0xdf   : > { %449 = sbr.rel (%p13587_p10) target bundleno = 2889 (0xb49), region = 56  ;;  %s6765_s29 = sshll.u32 (!%p13587_p10), %s451_s16, 6 }
  0xe0   : > { %s452_s21 = scalar_lea.sflag (!%p13587_p10), [#allocation4], %s451_s16  ;;  %s10328_s24 = scalar_lea.vmem (!%p13587_p10), [#allocation3], %s6765_s29 }
  0xe6   : > { %9907 = dma.done.wait (%p10238_p7), %s452_s21, 1024  }
  0xe7   : > { %9909 = vsyncadd (%p10238_p7), %s452_s21, 4294966272  ;;  %s460_s9 = sand.u32 1, %s10055_s27   ;;  %s6766_s12 = sshll.u32 %s451_s16, 14 }
  0xe8   : > { %s461_s30 = scalar_lea.sflag [#allocation7], %s460_s9  ;;  %s10335_s18 = scalar_lea.vmem [#allocation6], %s6766_s12 }
  0xe9   : > { %9911 = dma.done.wait (%p10238_p7), %s461_s30, 262144  }
  0xea   : > { %9913 = vsyncadd (%p10238_p7), %s461_s30, 4294705152  ;;  %p13588_p6 = scmp.eq.s32.totalorder %s10055_s27, 0 }
  0xec   : > { %9915 = dma.done.wait (%p13588_p6), [#allocation7], 64   ;;  %p13589_p13 = pmov %p13588_p6 }
  0xed   : > { %p13590_p9 = pmov %p13588_p6 }
  0xee   : > { %9917 = vsyncadd (%p13589_p13), [#allocation7], 4294967232 }
  0xef   : > { %9919 = dma.done.wait (%p13590_p9), [#allocation10], 32832   ;;  %p13591_p3 = pmov %p13588_p6 }
  0xf1   : > { %9921 = vsyncadd (%p13591_p3), [#allocation10], 4294934464  ;;  %p13592_p12 = pmov %p13591_p3 }
  0xf2   : > { %p13593_p8 = pmov %p13591_p3 }
  0xf3   : > { %9923 = dma.done.wait (%p13592_p12), [#allocation13], 128  }
  0xf4   : > { %9925 = vsyncadd (%p13593_p8), [#allocation13], 4294967168  ;;  %p13594_p7 = pmov %p13591_p3 }
  0xf5   : > { %p13595_p1 = pmov %p13591_p3 }
  0xf6   : > { %9927 = dma.done.wait (%p13594_p7), [#allocation16], 128  }
  0xf7   : > { %9929 = vsyncadd (%p13595_p1), [#allocation16], 4294967168  ;;  %p13596_p11 = scmp.ne.s32.totalorder %s10055_s27, 0 }
  0xf8   : > { %v9964_v0 = vmov (!%p13596_p11), 0.0  }
  0xf9   : > { %534 = sbr.rel (%p13596_p11) target bundleno = 256 (0x100), region = 92  ;;  %535 = vst [vmem:[#allocation2] sm:$0xff] (!%p13596_p11), %v9964_v0 }
 0x100 PF: > { %v546_v1 = vld [vmem:[%s10335_s18 + $0x8] sm:$0xff]  ;;  %v548_v3 = vld [vmem:[%s10335_s18 + $0x18] sm:$0xff]  ;;  %v545_v6 = vld [vmem:[%s10335_s18] sm:$0xff]  ;;  %p6774_p4 = scmp.ne.s32.totalorder %s10055_s27, 1 }
 0x101   : > { %v550_v2 = vld [vmem:[%s10335_s18 + $0x28] sm:$0xff]  ;;  %v552_v5 = vld [vmem:[%s10335_s18 + $0x38] sm:$0xff]  ;;  %v549_v7 = vld [vmem:[%s10335_s18 + $0x20] sm:$0xff]  ;;  %vm6359_vm2 = vcmask (!%p6774_p4), 1041408   ;;  %vm6370_vm3 = vcmask (!%p6774_p4), 844800   ;;  %vm6473_vm4 = vcmask (!%p6774_p4), 1043458  }
 0x102   : > { %v6790_v4 = vpack.c.bf16 %v550_v2, %v546_v1  ;;  %v7814_v8 = vpack.c.bf16 %v552_v5, %v548_v3  ;;  %v6792_v9 = vpack.c.bf16 %v549_v7, %v545_v6  ;;  %v547_v10 = vld [vmem:[%s10335_s18 + $0x10] sm:$0xff]  ;;  %v554_v12 = vld [vmem:[%s10335_s18 + $0x48] sm:$0xff]  ;;  %v556_v15 = vld [vmem:[%s10335_s18 + $0x58] sm:$0xff]  ;;  %vm6475_vm5 = vcmask (!%p6774_p4), 1045508  }
 0x103   : > { %v551_v11 = vld [vmem:[%s10335_s18 + $0x30] sm:$0xff]  ;;  %v558_v14 = vld [vmem:[%s10335_s18 + $0x68] sm:$0xff]  ;;  %v560_v16 = vld [vmem:[%s10335_s18 + $0x78] sm:$0xff]  ;;  %vm6477_vm8 = vcmask (!%p6774_p4), 850950  }
 0x104   : > { %6791 = vmatprep.subr.bf16.mxu0 %v6790_v4  ;;  %v7816_v13 = vpack.c.bf16 %v551_v11, %v547_v10  ;;  %7815 = vmatprep.subr.bf16.mxu1 %v7814_v8  ;;  %v6794_v17 = vpack.c.bf16 %v558_v14, %v554_v12  ;;  %v7818_v18 = vpack.c.bf16 %v560_v16, %v556_v15  ;;  %v553_v19 = vld [vmem:[%s10335_s18 + $0x40] sm:$0xff]  ;;  %v555_v21 = vld [vmem:[%s10335_s18 + $0x50] sm:$0xff]  ;;  %v562_v24 = vld [vmem:[%s10335_s18 + $0x88] sm:$0xff] }
 0x105   : > { %6793 = vmatpush1.bf16.msra.mxu0 %v6792_v9  ;;  %v557_v20 = vld [vmem:[%s10335_s18 + $0x60] sm:$0xff]  ;;  %v559_v23 = vld [vmem:[%s10335_s18 + $0x70] sm:$0xff]  ;;  %v566_v25 = vld [vmem:[%s10335_s18 + $0xa8] sm:$0xff] }
 0x106   : > { %7817 = vmatpush1.bf16.msra.mxu1 %v7816_v13  ;;  %v6796_v22 = vpack.c.bf16 %v557_v20, %v553_v19  ;;  %6795 = vmatprep.subr.bf16.mxu0 %v6794_v17  ;;  %v7820_v26 = vpack.c.bf16 %v559_v23, %v555_v21  ;;  %v6798_v27 = vpack.c.bf16 %v566_v25, %v562_v24  ;;  %v564_v28 = vld [vmem:[%s10335_s18 + $0x98] sm:$0xff]  ;;  %v561_v30 = vld [vmem:[%s10335_s18 + $0x80] sm:$0xff]  ;;  %v563_v33 = vld [vmem:[%s10335_s18 + $0x90] sm:$0xff] }
 0x107   : > { %7819 = vmatprep.subr.bf16.mxu1 %v7818_v18  ;;  %v568_v29 = vld [vmem:[%s10335_s18 + $0xb8] sm:$0xff]  ;;  %v565_v32 = vld [vmem:[%s10335_s18 + $0xa0] sm:$0xff]  ;;  %v567_v34 = vld [vmem:[%s10335_s18 + $0xb0] sm:$0xff] }
 0x108   : > { %v7822_v31 = vpack.c.bf16 %v568_v29, %v564_v28  ;;  %v6800_v35 = vpack.c.bf16 %v565_v32, %v561_v30  ;;  %v570_v36 = vld [vmem:[%s10335_s18 + $0xc8] sm:$0xff]  ;;  %v572_v38 = vld [vmem:[%s10335_s18 + $0xd8] sm:$0xff]  ;;  %v7824_v39 = vpack.c.bf16 %v567_v34, %v563_v33  ;;  %v569_v42 = vld [vmem:[%s10335_s18 + $0xc0] sm:$0xff] }
 0x109   : > { %6797 = vmatpush1.bf16.msra.mxu0 %v6796_v22  ;;  %v574_v37 = vld [vmem:[%s10335_s18 + $0xe8] sm:$0xff]  ;;  %v576_v41 = vld [vmem:[%s10335_s18 + $0xf8] sm:$0xff]  ;;  %v573_v43 = vld [vmem:[%s10335_s18 + $0xe0] sm:$0xff] }
 0x10a   : > { %7821 = vmatpush1.bf16.msra.mxu1 %v7820_v26  ;;  %6799 = vmatprep.subr.bf16.mxu0 %v6798_v27  ;;  %v6802_v40 = vpack.c.bf16 %v574_v37, %v570_v36  ;;  %v7826_v44 = vpack.c.bf16 %v576_v41, %v572_v38  ;;  %v571_v45 = vld [vmem:[%s10335_s18 + $0xd0] sm:$0xff]  ;;  %v578_v47 = vld [vmem:[%s10335_s18 + $0x108] sm:$0xff]  ;;  %v580_v49 = vld [vmem:[%s10335_s18 + $0x118] sm:$0xff]  ;;  %v6804_v51 = vpack.c.bf16 %v573_v43, %v569_v42 }
 0x10b   : > { %7823 = vmatprep.subr.bf16.mxu1 %v7822_v31  ;;  %v575_v46 = vld [vmem:[%s10335_s18 + $0xf0] sm:$0xff]  ;;  %v582_v48 = vld [vmem:[%s10335_s18 + $0x128] sm:$0xff]  ;;  %v584_v50 = vld [vmem:[%s10335_s18 + $0x138] sm:$0xff] }
 0x10c   : > { %v7828_v52 = vpack.c.bf16 %v575_v46, %v571_v45  ;;  %v6806_v53 = vpack.c.bf16 %v582_v48, %v578_v47  ;;  %v577_v54 = vld [vmem:[%s10335_s18 + $0x100] sm:$0xff]  ;;  %v579_v56 = vld [vmem:[%s10335_s18 + $0x110] sm:$0xff]  ;;  %v7830_v57 = vpack.c.bf16 %v584_v50, %v580_v49  ;;  %v586_v59 = vld [vmem:[%s10335_s18 + $0x148] sm:$0xff]  ;;  %v9965_v47 = vmov 1983009808  }
 0x10d   : > { %6801 = vmatpush1.bf16.msra.mxu0 %v6800_v35  ;;  %v581_v55 = vld [vmem:[%s10335_s18 + $0x120] sm:$0xff]  ;;  %v583_v58 = vld [vmem:[%s10335_s18 + $0x130] sm:$0xff]  ;;  %v590_v60 = vld [vmem:[%s10335_s18 + $0x168] sm:$0xff]  ;;  %v2603_v48 = vunpack.c.l.s4 %v9965_v47  ;;  %v2605_v49 = vlaneseq }
 0x10e   : > { %7825 = vmatpush1.bf16.msra.mxu1 %v7824_v39  ;;  %6803 = vmatprep.subr.bf16.mxu0 %v6802_v40  ;;  %v588_v61 = vld [vmem:[%s10335_s18 + $0x158] sm:$0xff]  ;;  %v6808_v63 = vpack.c.bf16 %v581_v55, %v577_v54  ;;  %v7832_v0 = vpack.c.bf16 %v583_v58, %v579_v56  ;;  %v6810_v1 = vpack.c.bf16 %v590_v60, %v586_v59  ;;  %v585_v2 = vld [vmem:[%s10335_s18 + $0x140] sm:$0xff]  ;;  %v587_v4 = vld [vmem:[%s10335_s18 + $0x150] sm:$0xff] }
 0x10f   : > { %7827 = vmatprep.subr.bf16.mxu1 %v7826_v44  ;;  %v592_v62 = vld [vmem:[%s10335_s18 + $0x178] sm:$0xff]  ;;  %v589_v3 = vld [vmem:[%s10335_s18 + $0x160] sm:$0xff]  ;;  %v591_v6 = vld [vmem:[%s10335_s18 + $0x170] sm:$0xff] }
 0x110   : > { %v7834_v5 = vpack.c.bf16 %v592_v62, %v588_v61  ;;  %v594_v7 = vld [vmem:[%s10335_s18 + $0x188] sm:$0xff]  ;;  %v596_v9 = vld [vmem:[%s10335_s18 + $0x198] sm:$0xff]  ;;  %v6812_v11 = vpack.c.bf16 %v589_v3, %v585_v2  ;;  %v7836_v12 = vpack.c.bf16 %v591_v6, %v587_v4  ;;  %v593_v14 = vld [vmem:[%s10335_s18 + $0x180] sm:$0xff]  ;;  %v2604_v62 = vunpack.c.0.s8 %v2603_v48 }
 0x111   : > { %6805 = vmatpush1.bf16.msra.mxu0 %v6804_v51  ;;  %v598_v8 = vld [vmem:[%s10335_s18 + $0x1a8] sm:$0xff]  ;;  %v600_v10 = vld [vmem:[%s10335_s18 + $0x1b8] sm:$0xff]  ;;  %v597_v15 = vld [vmem:[%s10335_s18 + $0x1a0] sm:$0xff] }
 0x112   : > { %7829 = vmatpush1.bf16.msra.mxu1 %v7828_v52  ;;  %6807 = vmatprep.subr.bf16.mxu0 %v6806_v53  ;;  %v6814_v13 = vpack.c.bf16 %v598_v8, %v594_v7  ;;  %v595_v16 = vld [vmem:[%s10335_s18 + $0x190] sm:$0xff]  ;;  %v7838_v17 = vpack.c.bf16 %v600_v10, %v596_v9  ;;  %v602_v19 = vld [vmem:[%s10335_s18 + $0x1c8] sm:$0xff]  ;;  %v604_v21 = vld [vmem:[%s10335_s18 + $0x1d8] sm:$0xff]  ;;  %v6816_v23 = vpack.c.bf16 %v597_v15, %v593_v14 }
 0x113   : > { %7831 = vmatprep.subr.bf16.mxu1 %v7830_v57  ;;  %v599_v18 = vld [vmem:[%s10335_s18 + $0x1b0] sm:$0xff]  ;;  %v606_v20 = vld [vmem:[%s10335_s18 + $0x1e8] sm:$0xff]  ;;  %v608_v22 = vld [vmem:[%s10335_s18 + $0x1f8] sm:$0xff] }
 0x114   : > { %v7840_v24 = vpack.c.bf16 %v599_v18, %v595_v16  ;;  %v6818_v25 = vpack.c.bf16 %v606_v20, %v602_v19  ;;  %v601_v26 = vld [vmem:[%s10335_s18 + $0x1c0] sm:$0xff]  ;;  %v603_v28 = vld [vmem:[%s10335_s18 + $0x1d0] sm:$0xff]  ;;  %v7842_v29 = vpack.c.bf16 %v608_v22, %v604_v21  ;;  %v610_v31 = vld [vmem:[%s10335_s18 + $0x208] sm:$0xff] }
 0x115   : > { %6809 = vmatpush1.bf16.msra.mxu0 %v6808_v63  ;;  %v605_v27 = vld [vmem:[%s10335_s18 + $0x1e0] sm:$0xff]  ;;  %v607_v30 = vld [vmem:[%s10335_s18 + $0x1f0] sm:$0xff]  ;;  %v614_v32 = vld [vmem:[%s10335_s18 + $0x228] sm:$0xff]  ;;  %v10444_v63 = vshrl.u32 %v2605_v49, 7 }
 0x116   : > { %7833 = vmatpush1.bf16.msra.mxu1 %v7832_v0  ;;  %6811 = vmatprep.subr.bf16.mxu0 %v6810_v1  ;;  %v612_v33 = vld [vmem:[%s10335_s18 + $0x218] sm:$0xff]  ;;  %v6820_v35 = vpack.c.bf16 %v605_v27, %v601_v26  ;;  %v7844_v36 = vpack.c.bf16 %v607_v30, %v603_v28  ;;  %v6822_v37 = vpack.c.bf16 %v614_v32, %v610_v31  ;;  %v609_v38 = vld [vmem:[%s10335_s18 + $0x200] sm:$0xff]  ;;  %v611_v40 = vld [vmem:[%s10335_s18 + $0x210] sm:$0xff] }
 0x117   : > { %7835 = vmatprep.subr.bf16.mxu1 %v7834_v5  ;;  %v616_v34 = vld [vmem:[%s10335_s18 + $0x238] sm:$0xff]  ;;  %v613_v39 = vld [vmem:[%s10335_s18 + $0x220] sm:$0xff]  ;;  %v615_v42 = vld [vmem:[%s10335_s18 + $0x230] sm:$0xff] }
 0x118   : > { %v7846_v41 = vpack.c.bf16 %v616_v34, %v612_v33  ;;  %v618_v43 = vld [vmem:[%s10335_s18 + $0x248] sm:$0xff]  ;;  %v620_v45 = vld [vmem:[%s10335_s18 + $0x258] sm:$0xff]  ;;  %v6824_v50 = vpack.c.bf16 %v613_v39, %v609_v38  ;;  %v7848_v51 = vpack.c.bf16 %v615_v42, %v611_v40  ;;  %v617_v53 = vld [vmem:[%s10335_s18 + $0x240] sm:$0xff] }
 0x119   : > { %6813 = vmatpush1.bf16.msra.mxu0 %v6812_v11  ;;  %v622_v44 = vld [vmem:[%s10335_s18 + $0x268] sm:$0xff]  ;;  %v624_v46 = vld [vmem:[%s10335_s18 + $0x278] sm:$0xff]  ;;  %v621_v54 = vld [vmem:[%s10335_s18 + $0x260] sm:$0xff] }
 0x11a   : > { %7837 = vmatpush1.bf16.msra.mxu1 %v7836_v12  ;;  %6815 = vmatprep.subr.bf16.mxu0 %v6814_v13  ;;  %v6826_v52 = vpack.c.bf16 %v622_v44, %v618_v43  ;;  %v619_v55 = vld [vmem:[%s10335_s18 + $0x250] sm:$0xff]  ;;  %v7850_v56 = vpack.c.bf16 %v624_v46, %v620_v45  ;;  %v626_v58 = vld [vmem:[%s10335_s18 + $0x288] sm:$0xff]  ;;  %v628_v60 = vld [vmem:[%s10335_s18 + $0x298] sm:$0xff]  ;;  %v6828_v0 = vpack.c.bf16 %v621_v54, %v617_v53 }
 0x11b   : > { %7839 = vmatprep.subr.bf16.mxu1 %v7838_v17  ;;  %v623_v57 = vld [vmem:[%s10335_s18 + $0x270] sm:$0xff]  ;;  %v630_v59 = vld [vmem:[%s10335_s18 + $0x2a8] sm:$0xff]  ;;  %v632_v61 = vld [vmem:[%s10335_s18 + $0x2b8] sm:$0xff]  ;;  %v10455_v12 = vsub.s32 %v2604_v62, %v10444_v63 }
 0x11c   : > { %v7852_v1 = vpack.c.bf16 %v623_v57, %v619_v55  ;;  %v6830_v2 = vpack.c.bf16 %v630_v59, %v626_v58  ;;  %v625_v3 = vld [vmem:[%s10335_s18 + $0x280] sm:$0xff]  ;;  %v627_v5 = vld [vmem:[%s10335_s18 + $0x290] sm:$0xff]  ;;  %v7854_v6 = vpack.c.bf16 %v632_v61, %v628_v60  ;;  %v634_v8 = vld [vmem:[%s10335_s18 + $0x2c8] sm:$0xff] }
 0x11d   : > { %6817 = vmatpush1.bf16.msra.mxu0 %v6816_v23  ;;  %v629_v4 = vld [vmem:[%s10335_s18 + $0x2a0] sm:$0xff]  ;;  %v631_v7 = vld [vmem:[%s10335_s18 + $0x2b0] sm:$0xff]  ;;  %v638_v9 = vld [vmem:[%s10335_s18 + $0x2e8] sm:$0xff] }
 0x11e   : > { %7841 = vmatpush1.bf16.msra.mxu1 %v7840_v24  ;;  %6819 = vmatprep.subr.bf16.mxu0 %v6818_v25  ;;  %v636_v10 = vld [vmem:[%s10335_s18 + $0x2d8] sm:$0xff]  ;;  %v6832_v13 = vpack.c.bf16 %v629_v4, %v625_v3  ;;  %v633_v14 = vld [vmem:[%s10335_s18 + $0x2c0] sm:$0xff]  ;;  %v7856_v15 = vpack.c.bf16 %v631_v7, %v627_v5  ;;  %v6834_v16 = vpack.c.bf16 %v638_v9, %v634_v8  ;;  %v635_v18 = vld [vmem:[%s10335_s18 + $0x2d0] sm:$0xff] }
 0x11f   : > { %7843 = vmatprep.subr.bf16.mxu1 %v7842_v29  ;;  %v640_v11 = vld [vmem:[%s10335_s18 + $0x2f8] sm:$0xff]  ;;  %v637_v17 = vld [vmem:[%s10335_s18 + $0x2e0] sm:$0xff]  ;;  %v639_v19 = vld [vmem:[%s10335_s18 + $0x2f0] sm:$0xff] }
 0x120   : > { %v7858_v20 = vpack.c.bf16 %v640_v11, %v636_v10  ;;  %v642_v21 = vld [vmem:[%s10335_s18 + $0x308] sm:$0xff]  ;;  %v10464_v23 = vld [vmem:[%s10328_s24] sm:$0xff]  ;;  %v644_v24 = vld [vmem:[%s10335_s18 + $0x318] sm:$0xff]  ;;  %v6836_v27 = vpack.c.bf16 %v637_v17, %v633_v14  ;;  %v7860_v28 = vpack.c.bf16 %v639_v19, %v635_v18 }
 0x121   : > { %6821 = vmatpush1.bf16.msra.mxu0 %v6820_v35  ;;  %v646_v22 = vld [vmem:[%s10335_s18 + $0x328] sm:$0xff]  ;;  %v648_v25 = vld [vmem:[%s10335_s18 + $0x338] sm:$0xff]  ;;  %v10470_v26 = vrot.slane %v10464_v23, %v10455_v12  ;;  %v641_v30 = vld [vmem:[%s10335_s18 + $0x300] sm:$0xff]  ;;  %v2601_v10 = vcombine.high %v10464_v23, %v10464_v23 }
 0x122   : > { %7845 = vmatpush1.bf16.msra.mxu1 %v7844_v36  ;;  %6823 = vmatprep.subr.bf16.mxu0 %v6822_v37  ;;  %v6838_v29 = vpack.c.bf16 %v646_v22, %v642_v21  ;;  %v645_v31 = vld [vmem:[%s10335_s18 + $0x320] sm:$0xff]  ;;  %v643_v32 = vld [vmem:[%s10335_s18 + $0x310] sm:$0xff]  ;;  %v7862_v34 = vpack.c.bf16 %v648_v25, %v644_v24  ;;  %v650_v36 = vld [vmem:[%s10335_s18 + $0x348] sm:$0xff] }
 0x123   : > { %7847 = vmatprep.subr.bf16.mxu1 %v7846_v41  ;;  %v2616_v33 = vcombine.high %v10470_v26, %v10470_v26  ;;  %v647_v35 = vld [vmem:[%s10335_s18 + $0x330] sm:$0xff]  ;;  %v654_v37 = vld [vmem:[%s10335_s18 + $0x368] sm:$0xff]  ;;  %v652_v38 = vld [vmem:[%s10335_s18 + $0x358] sm:$0xff]  ;;  %v6840_v40 = vpack.c.bf16 %v645_v31, %v641_v30 }
 0x124   : > { %v656_v39 = vld [vmem:[%s10335_s18 + $0x378] sm:$0xff]  ;;  %v7864_v41 = vpack.c.bf16 %v647_v35, %v643_v32  ;;  %v6842_v42 = vpack.c.bf16 %v654_v37, %v650_v36  ;;  %v649_v43 = vld [vmem:[%s10335_s18 + $0x340] sm:$0xff]  ;;  %v651_v45 = vld [vmem:[%s10335_s18 + $0x350] sm:$0xff] }
 0x125   : > { %6825 = vmatpush1.bf16.msra.mxu0 %v6824_v50  ;;  %2833 = vmatprep.mubr.f32.mxu0 %v2616_v33  ;;  %v653_v44 = vld [vmem:[%s10335_s18 + $0x360] sm:$0xff]  ;;  %v7866_v46 = vpack.c.bf16 %v656_v39, %v652_v38  ;;  %v655_v47 = vld [vmem:[%s10335_s18 + $0x370] sm:$0xff]  ;;  %v658_v48 = vld [vmem:[%s10335_s18 + $0x388] sm:$0xff] }
 0x126   : > { %7849 = vmatpush1.bf16.msra.mxu1 %v7848_v51  ;;  %6827 = vmatprep.subr.bf16.mxu0 %v6826_v52  ;;  %v662_v50 = vld [vmem:[%s10335_s18 + $0x3a8] sm:$0xff]  ;;  %v660_v51 = vld [vmem:[%s10335_s18 + $0x398] sm:$0xff]  ;;  %v6844_v53 = vpack.c.bf16 %v653_v44, %v649_v43  ;;  %v7868_v54 = vpack.c.bf16 %v655_v47, %v651_v45  ;;  %v661_v57 = vld [vmem:[%s10335_s18 + $0x3a0] sm:$0xff] }
 0x127   : > { %7851 = vmatprep.subr.bf16.mxu1 %v7850_v56  ;;  %3969 = vmatprep.mubr.f32.mxu1 %v2616_v33  ;;  %v664_v52 = vld [vmem:[%s10335_s18 + $0x3b8] sm:$0xff]  ;;  %v6846_v55 = vpack.c.bf16 %v662_v50, %v658_v48  ;;  %v657_v56 = vld [vmem:[%s10335_s18 + $0x380] sm:$0xff]  ;;  %v659_v58 = vld [vmem:[%s10335_s18 + $0x390] sm:$0xff] }
 0x128   : > { %v7870_v59 = vpack.c.bf16 %v664_v52, %v660_v51  ;;  %v663_v60 = vld [vmem:[%s10335_s18 + $0x3b0] sm:$0xff]  ;;  %v666_v61 = vld [vmem:[%s10335_s18 + $0x3c8] sm:$0xff]  ;;  %v665_v5 = vld [vmem:[%s10335_s18 + $0x3c0] sm:$0xff] }
 0x129   : > { %6829 = vmatpush1.bf16.msra.mxu0 %v6828_v0  ;;  %v670_v62 = vld [vmem:[%s10335_s18 + $0x3e8] sm:$0xff]  ;;  %v668_v0 = vld [vmem:[%s10335_s18 + $0x3d8] sm:$0xff]  ;;  %v7872_v3 = vpack.c.bf16 %v663_v60, %v659_v58  ;;  %v667_v7 = vld [vmem:[%s10335_s18 + $0x3d0] sm:$0xff] }
 0x12a   : > { %7853 = vmatpush1.bf16.msra.mxu1 %v7852_v1  ;;  %6831 = vmatprep.subr.bf16.mxu0 %v6830_v2  ;;  %v672_v1 = vld [vmem:[%s10335_s18 + $0x3f8] sm:$0xff]  ;;  %v6848_v2 = vpack.c.bf16 %v661_v57, %v657_v56  ;;  %v6850_v4 = vpack.c.bf16 %v670_v62, %v666_v61  ;;  %v671_v9 = vld [vmem:[%s10335_s18 + $0x3f0] sm:$0xff]  ;;  %v674_v11 = vld [vmem:[%s10335_s18 + $0x408] sm:$0xff] }
 0x12b   : > { %7855 = vmatprep.subr.bf16.mxu1 %v7854_v6  ;;  %v669_v6 = vld [vmem:[%s10335_s18 + $0x3e0] sm:$0xff]  ;;  %v7874_v8 = vpack.c.bf16 %v672_v1, %v668_v0  ;;  %v676_v14 = vld [vmem:[%s10335_s18 + $0x418] sm:$0xff]  ;;  %v7876_v17 = vpack.c.bf16 %v671_v9, %v667_v7  ;;  %v675_v21 = vld [vmem:[%s10335_s18 + $0x410] sm:$0xff] }
 0x12c   : > { %v673_v19 = vld [vmem:[%s10335_s18 + $0x400] sm:$0xff]  ;;  %v679_v23 = vld [vmem:[%s10335_s18 + $0x430] sm:$0xff]  ;;  %v682_v24 = vld [vmem:[%s10335_s18 + $0x448] sm:$0xff] }
 0x12d   : > { %6833 = vmatpush1.bf16.msra.mxu0 %v6832_v13  ;;  %v678_v13 = vld [vmem:[%s10335_s18 + $0x428] sm:$0xff]  ;;  %v7880_v31 = vpack.c.bf16 %v679_v23, %v675_v21  ;;  %v681_v33 = vld [vmem:[%s10335_s18 + $0x440] sm:$0xff]  ;;  %v683_v35 = vld [vmem:[%s10335_s18 + $0x450] sm:$0xff] }
 0x12e   : > { %7857 = vmatpush1.bf16.msra.mxu1 %v7856_v15  ;;  %6835 = vmatprep.subr.bf16.mxu0 %v6834_v16  ;;  %v680_v15 = vld [vmem:[%s10335_s18 + $0x438] sm:$0xff]  ;;  %v6852_v16 = vpack.c.bf16 %v669_v6, %v665_v5  ;;  %v6854_v18 = vpack.c.bf16 %v678_v13, %v674_v11  ;;  %v686_v25 = vld [vmem:[%s10335_s18 + $0x468] sm:$0xff]  ;;  %v687_v37 = vld [vmem:[%s10335_s18 + $0x470] sm:$0xff] }
 0x12f   : > { %7859 = vmatprep.subr.bf16.mxu1 %v7858_v20  ;;  %v677_v20 = vld [vmem:[%s10335_s18 + $0x420] sm:$0xff]  ;;  %v7878_v22 = vpack.c.bf16 %v680_v15, %v676_v14  ;;  %v6858_v32 = vpack.c.bf16 %v686_v25, %v682_v24  ;;  %v690_v38 = vld [vmem:[%s10335_s18 + $0x488] sm:$0xff]  ;;  %v7884_v44 = vpack.c.bf16 %v687_v37, %v683_v35  ;;  %v691_v48 = vld [vmem:[%s10335_s18 + $0x490] sm:$0xff] }
 0x130   : > { %v6856_v30 = vpack.c.bf16 %v677_v20, %v673_v19  ;;  %v694_v39 = vld [vmem:[%s10335_s18 + $0x4a8] sm:$0xff]  ;;  %v693_v47 = vld [vmem:[%s10335_s18 + $0x4a0] sm:$0xff]  ;;  %v695_v51 = vld [vmem:[%s10335_s18 + $0x4b0] sm:$0xff] }
 0x131   : > { %6837 = vmatpush1.bf16.msra.mxu0 %v6836_v27  ;;  %v10515_v27 = vrot.slane %v2601_v10, %v10455_v12  ;;  %v6862_v45 = vpack.c.bf16 %v694_v39, %v690_v38  ;;  %v698_v52 = vld [vmem:[%s10335_s18 + $0x4c8] sm:$0xff]  ;;  %v7888_v56 = vpack.c.bf16 %v695_v51, %v691_v48  ;;  %v697_v58 = vld [vmem:[%s10335_s18 + $0x4c0] sm:$0xff]  ;;  %v699_v60 = vld [vmem:[%s10335_s18 + $0x4d0] sm:$0xff] }
 0x132   : > { %7861 = vmatpush1.bf16.msra.mxu1 %v7860_v28  ;;  %6839 = vmatprep.subr.bf16.mxu0 %v6838_v29  ;;  %v684_v28 = vld [vmem:[%s10335_s18 + $0x458] sm:$0xff]  ;;  %v703_v62 = vld [vmem:[%s10335_s18 + $0x4f0] sm:$0xff]  ;;  %v706_v0 = vld [vmem:[%s10335_s18 + $0x508] sm:$0xff] }
 0x133   : > { %7863 = vmatprep.subr.bf16.mxu1 %v7862_v34  ;;  %v688_v29 = vld [vmem:[%s10335_s18 + $0x478] sm:$0xff]  ;;  %v685_v34 = vld [vmem:[%s10335_s18 + $0x460] sm:$0xff]  ;;  %v710_v1 = vld [vmem:[%s10335_s18 + $0x528] sm:$0xff]  ;;  %v7892_v5 = vpack.c.bf16 %v703_v62, %v699_v60 }
 0x134   : > { %v7882_v36 = vpack.c.bf16 %v688_v29, %v684_v28  ;;  %v6860_v43 = vpack.c.bf16 %v685_v34, %v681_v33  ;;  %v6870_v6 = vpack.c.bf16 %v710_v1, %v706_v0  ;;  %v705_v7 = vld [vmem:[%s10335_s18 + $0x500] sm:$0xff]  ;;  %v707_v9 = vld [vmem:[%s10335_s18 + $0x510] sm:$0xff]  ;;  %v714_v13 = vld [vmem:[%s10335_s18 + $0x548] sm:$0xff] }
 0x135   : > { %6841 = vmatpush1.bf16.msra.mxu0 %v6840_v40  ;;  %v2617_v40 = vcombine.high %v10515_v27, %v10515_v27  ;;  %v711_v11 = vld [vmem:[%s10335_s18 + $0x530] sm:$0xff]  ;;  %v718_v14 = vld [vmem:[%s10335_s18 + $0x568] sm:$0xff]  ;;  %v716_v15 = vld [vmem:[%s10335_s18 + $0x558] sm:$0xff] }
 0x136   : > { %7865 = vmatpush1.bf16.msra.mxu1 %v7864_v41  ;;  %6843 = vmatprep.subr.bf16.mxu0 %v6842_v42  ;;  %v692_v41 = vld [vmem:[%s10335_s18 + $0x498] sm:$0xff]  ;;  %v6874_v19 = vpack.c.bf16 %v718_v14, %v714_v13  ;;  %v713_v20 = vld [vmem:[%s10335_s18 + $0x540] sm:$0xff]  ;;  %v719_v24 = vld [vmem:[%s10335_s18 + $0x570] sm:$0xff] }
 0x137   : > { %7867 = vmatprep.subr.bf16.mxu1 %v7866_v46  ;;  %v696_v42 = vld [vmem:[%s10335_s18 + $0x4b8] sm:$0xff]  ;;  %v689_v46 = vld [vmem:[%s10335_s18 + $0x480] sm:$0xff]  ;;  %v722_v25 = vld [vmem:[%s10335_s18 + $0x588] sm:$0xff] }
 0x138   : > { %v7886_v50 = vpack.c.bf16 %v696_v42, %v692_v41  ;;  %v717_v21 = vld [vmem:[%s10335_s18 + $0x560] sm:$0xff]  ;;  %v726_v28 = vld [vmem:[%s10335_s18 + $0x5a8] sm:$0xff]  ;;  %v724_v29 = vld [vmem:[%s10335_s18 + $0x598] sm:$0xff] }
 0x139   : > { %6845 = vmatpush1.bf16.msra.mxu0 %v6844_v53  ;;  %v702_v53 = vld [vmem:[%s10335_s18 + $0x4e8] sm:$0xff]  ;;  %v6878_v33 = vpack.c.bf16 %v726_v28, %v722_v25  ;;  %v721_v34 = vld [vmem:[%s10335_s18 + $0x580] sm:$0xff]  ;;  %v727_v38 = vld [vmem:[%s10335_s18 + $0x5b0] sm:$0xff] }
 0x13a   : > { %7869 = vmatpush1.bf16.msra.mxu1 %v7868_v54  ;;  %6847 = vmatprep.subr.bf16.mxu0 %v6846_v55  ;;  %v704_v54 = vld [vmem:[%s10335_s18 + $0x4f8] sm:$0xff]  ;;  %v6864_v55 = vpack.c.bf16 %v693_v47, %v689_v46  ;;  %v6866_v57 = vpack.c.bf16 %v702_v53, %v698_v52  ;;  %v725_v35 = vld [vmem:[%s10335_s18 + $0x5a0] sm:$0xff]  ;;  %v730_v39 = vld [vmem:[%s10335_s18 + $0x5c8] sm:$0xff] }
 0x13b   : > { %7871 = vmatprep.subr.bf16.mxu1 %v7870_v59  ;;  %v701_v59 = vld [vmem:[%s10335_s18 + $0x4e0] sm:$0xff]  ;;  %v732_v41 = vld [vmem:[%s10335_s18 + $0x5d8] sm:$0xff]  ;;  %v731_v48 = vld [vmem:[%s10335_s18 + $0x5d0] sm:$0xff] }
 0x13c   : > { %v736_v42 = vld [vmem:[%s10335_s18 + $0x5f8] sm:$0xff]  ;;  %v729_v46 = vld [vmem:[%s10335_s18 + $0x5c0] sm:$0xff]  ;;  %v735_v51 = vld [vmem:[%s10335_s18 + $0x5f0] sm:$0xff] }
 0x13d   : > { %6849 = vmatpush1.bf16.msra.mxu0 %v6848_v2  ;;  %v708_v2 = vld [vmem:[%s10335_s18 + $0x518] sm:$0xff]  ;;  %v733_v47 = vld [vmem:[%s10335_s18 + $0x5e0] sm:$0xff]  ;;  %v738_v52 = vld [vmem:[%s10335_s18 + $0x608] sm:$0xff] }
 0x13e   : > { %7873 = vmatpush1.bf16.msra.mxu1 %v7872_v3  ;;  %6851 = vmatprep.subr.bf16.mxu0 %v6850_v4  ;;  %v712_v3 = vld [vmem:[%s10335_s18 + $0x538] sm:$0xff]  ;;  %v6868_v4 = vpack.c.bf16 %v701_v59, %v697_v58  ;;  %v742_v53 = vld [vmem:[%s10335_s18 + $0x628] sm:$0xff]  ;;  %v737_v58 = vld [vmem:[%s10335_s18 + $0x600] sm:$0xff] }
 0x13f   : > { %7875 = vmatprep.subr.bf16.mxu1 %v7874_v8  ;;  %v709_v8 = vld [vmem:[%s10335_s18 + $0x520] sm:$0xff]  ;;  %v7894_v10 = vpack.c.bf16 %v712_v3, %v708_v2  ;;  %v739_v60 = vld [vmem:[%s10335_s18 + $0x610] sm:$0xff]  ;;  %v746_v0 = vld [vmem:[%s10335_s18 + $0x648] sm:$0xff] }
 0x140   : > { %v741_v59 = vld [vmem:[%s10335_s18 + $0x620] sm:$0xff]  ;;  %v743_v62 = vld [vmem:[%s10335_s18 + $0x630] sm:$0xff]  ;;  %v750_v1 = vld [vmem:[%s10335_s18 + $0x668] sm:$0xff] }
 0x141   : > { %6853 = vmatpush1.bf16.msra.mxu0 %v6852_v16  ;;  %v720_v16 = vld [vmem:[%s10335_s18 + $0x578] sm:$0xff]  ;;  %v754_v13 = vld [vmem:[%s10335_s18 + $0x688] sm:$0xff]  ;;  %vm6474_vm6 = vmor (!%p6774_p4), %vm6473_vm4, %vm6359_vm2  ;;  %vm6560_vm4 = vcmask (!%p6774_p4), 1024  }
 0x142   : > { %7877 = vmatpush1.bf16.msra.mxu1 %v7876_v17  ;;  %6855 = vmatprep.subr.bf16.mxu0 %v6854_v18  ;;  %v6872_v17 = vpack.c.bf16 %v709_v8, %v705_v7  ;;  %v7896_v18 = vpack.c.bf16 %v711_v11, %v707_v9  ;;  %v7898_v23 = vpack.c.bf16 %v720_v16, %v716_v15  ;;  %v748_v2 = vld [vmem:[%s10335_s18 + $0x658] sm:$0xff]  ;;  %v745_v7 = vld [vmem:[%s10335_s18 + $0x640] sm:$0xff]  ;;  %v747_v9 = vld [vmem:[%s10335_s18 + $0x650] sm:$0xff] }
 0x143   : > { %7879 = vmatprep.subr.bf16.mxu1 %v7878_v22  ;;  %v715_v22 = vld [vmem:[%s10335_s18 + $0x550] sm:$0xff]  ;;  %v752_v3 = vld [vmem:[%s10335_s18 + $0x678] sm:$0xff]  ;;  %v749_v8 = vld [vmem:[%s10335_s18 + $0x660] sm:$0xff] }
 0x144   : > { %2834 = vmatmul.mubr.f32.vlgmr.msra.gmra.mrb[0].mxu0 %v10470_v26  ;;  %v751_v11 = vld [vmem:[%s10335_s18 + $0x670] sm:$0xff]  ;;  %v758_v14 = vld [vmem:[%s10335_s18 + $0x6a8] sm:$0xff]  ;;  %v756_v15 = vld [vmem:[%s10335_s18 + $0x698] sm:$0xff] }
 0x145   : > { %6857 = vmatpush1.bf16.msra.mxu0 %v6856_v30  ;;  %3970 = vmatmul.mubr.f32.vlgmr.msra.gmra.mrb[0].mxu1 %v10470_v26  ;;  %v700_v26 = vld [vmem:[%s10335_s18 + $0x4d8] sm:$0xff]  ;;  %v762_v25 = vld [vmem:[%s10335_s18 + $0x6c8] sm:$0xff]  ;;  %vm6476_vm7 = vmor (!%p6774_p4), %vm6475_vm5, %vm6474_vm6 }
 0x146   : > { %7881 = vmatpush1.bf16.msra.mxu1 %v7880_v31  ;;  %6859 = vmatprep.subr.bf16.mxu0 %v6858_v32  ;;  %v7890_v61 = vpack.c.bf16 %v704_v54, %v700_v26  ;;  %v728_v30 = vld [vmem:[%s10335_s18 + $0x5b8] sm:$0xff]  ;;  %v6876_v31 = vpack.c.bf16 %v717_v21, %v713_v20  ;;  %v7900_v32 = vpack.c.bf16 %v719_v24, %v715_v22  ;;  %v753_v20 = vld [vmem:[%s10335_s18 + $0x680] sm:$0xff]  ;;  %v755_v22 = vld [vmem:[%s10335_s18 + $0x690] sm:$0xff] }
 0x147   : > { %7883 = vmatprep.subr.bf16.mxu1 %v7882_v36  ;;  %2904 = vmatprep.mubr.f32.mxu0 %v2617_v40  ;;  %v723_v36 = vld [vmem:[%s10335_s18 + $0x590] sm:$0xff]  ;;  %v7902_v37 = vpack.c.bf16 %v728_v30, %v724_v29  ;;  %v740_v26 = vld [vmem:[%s10335_s18 + $0x618] sm:$0xff]  ;;  %v757_v21 = vld [vmem:[%s10335_s18 + $0x6a0] sm:$0xff] }
 0x148   : > { %4040 = vmatprep.mubr.f32.mxu1 %v2617_v40  ;;  %v734_v40 = vld [vmem:[%s10335_s18 + $0x5e8] sm:$0xff]  ;;  %v744_v54 = vld [vmem:[%s10335_s18 + $0x638] sm:$0xff]  ;;  %v759_v24 = vld [vmem:[%s10335_s18 + $0x6b0] sm:$0xff] }
 0x149   : > { %6861 = vmatpush1.bf16.msra.mxu0 %v6860_v43  ;;  %v6880_v43 = vpack.c.bf16 %v725_v35, %v721_v34  ;;  %v760_v16 = vld [vmem:[%s10335_s18 + $0x6b8] sm:$0xff]  ;;  %v766_v28 = vld [vmem:[%s10335_s18 + $0x6e8] sm:$0xff]  ;;  %v761_v34 = vld [vmem:[%s10335_s18 + $0x6c0] sm:$0xff] }
 0x14a   : > { %7885 = vmatpush1.bf16.msra.mxu1 %v7884_v44  ;;  %6863 = vmatprep.subr.bf16.mxu0 %v6862_v45  ;;  %v7904_v44 = vpack.c.bf16 %v727_v38, %v723_v36  ;;  %v6882_v45 = vpack.c.bf16 %v734_v40, %v730_v39  ;;  %v764_v29 = vld [vmem:[%s10335_s18 + $0x6d8] sm:$0xff]  ;;  %v765_v35 = vld [vmem:[%s10335_s18 + $0x6e0] sm:$0xff]  ;;  %v763_v36 = vld [vmem:[%s10335_s18 + $0x6d0] sm:$0xff] }
 0x14b   : > { %7887 = vmatprep.subr.bf16.mxu1 %v7886_v50  ;;  %v7906_v50 = vpack.c.bf16 %v736_v42, %v732_v41  ;;  %v768_v30 = vld [vmem:[%s10335_s18 + $0x6f8] sm:$0xff]  ;;  %v767_v38 = vld [vmem:[%s10335_s18 + $0x6f0] sm:$0xff]  ;;  %v770_v39 = vld [vmem:[%s10335_s18 + $0x708] sm:$0xff] }
 0x14c   : > { %v774_v40 = vld [vmem:[%s10335_s18 + $0x728] sm:$0xff]  ;;  %v772_v41 = vld [vmem:[%s10335_s18 + $0x718] sm:$0xff]  ;;  %vm6478_vm9 = vmor (!%p6774_p4), %vm6477_vm8, %vm6476_vm7 }
 0x14d   : > { %6865 = vmatpush1.bf16.msra.mxu0 %v6864_v55  ;;  %v6884_v55 = vpack.c.bf16 %v733_v47, %v729_v46  ;;  %v776_v42 = vld [vmem:[%s10335_s18 + $0x738] sm:$0xff]  ;;  %v769_v46 = vld [vmem:[%s10335_s18 + $0x700] sm:$0xff] }
 0x14e   : > { %7889 = vmatpush1.bf16.msra.mxu1 %v7888_v56  ;;  %6867 = vmatprep.subr.bf16.mxu0 %v6866_v57  ;;  %v7908_v56 = vpack.c.bf16 %v735_v51, %v731_v48  ;;  %v6886_v57 = vpack.c.bf16 %v742_v53, %v738_v52  ;;  %v773_v47 = vld [vmem:[%s10335_s18 + $0x720] sm:$0xff]  ;;  %v771_v48 = vld [vmem:[%s10335_s18 + $0x710] sm:$0xff]  ;;  %v778_v52 = vld [vmem:[%s10335_s18 + $0x748] sm:$0xff] }
 0x14f   : > { %7891 = vmatprep.subr.bf16.mxu1 %v7890_v61  ;;  %v7910_v61 = vpack.c.bf16 %v744_v54, %v740_v26  ;;  %v775_v51 = vld [vmem:[%s10335_s18 + $0x730] sm:$0xff]  ;;  %v782_v53 = vld [vmem:[%s10335_s18 + $0x768] sm:$0xff]  ;;  %v780_v26 = vld [vmem:[%s10335_s18 + $0x758] sm:$0xff] }
 0x150   : > { %v784_v54 = vld [vmem:[%s10335_s18 + $0x778] sm:$0xff] }
 0x151   : > { %6869 = vmatpush1.bf16.msra.mxu0 %v6868_v4  ;;  %v6888_v4 = vpack.c.bf16 %v741_v59, %v737_v58  ;;  %v777_v58 = vld [vmem:[%s10335_s18 + $0x740] sm:$0xff] }
 0x152   : > { %7893 = vmatpush1.bf16.msra.mxu1 %v7892_v5  ;;  %6871 = vmatprep.subr.bf16.mxu0 %v6870_v6  ;;  %v7912_v5 = vpack.c.bf16 %v743_v62, %v739_v60  ;;  %v6890_v6 = vpack.c.bf16 %v750_v1, %v746_v0  ;;  %v781_v59 = vld [vmem:[%s10335_s18 + $0x760] sm:$0xff]  ;;  %v779_v60 = vld [vmem:[%s10335_s18 + $0x750] sm:$0xff]  ;;  %v786_v0 = vld [vmem:[%s10335_s18 + $0x788] sm:$0xff] }
 0x153   : > { %7895 = vmatprep.subr.bf16.mxu1 %v7894_v10  ;;  %v7914_v10 = vpack.c.bf16 %v752_v3, %v748_v2  ;;  %v783_v62 = vld [vmem:[%s10335_s18 + $0x770] sm:$0xff]  ;;  %v790_v1 = vld [vmem:[%s10335_s18 + $0x7a8] sm:$0xff]  ;;  %v788_v2 = vld [vmem:[%s10335_s18 + $0x798] sm:$0xff] }
 0x154   : > { %v792_v3 = vld [vmem:[%s10335_s18 + $0x7b8] sm:$0xff] }
 0x155   : > { %6873 = vmatpush1.bf16.msra.mxu0 %v6872_v17  ;;  %v6892_v17 = vpack.c.bf16 %v749_v8, %v745_v7  ;;  %v785_v7 = vld [vmem:[%s10335_s18 + $0x780] sm:$0xff] }
 0x156   : > { %7897 = vmatpush1.bf16.msra.mxu1 %v7896_v18  ;;  %6875 = vmatprep.subr.bf16.mxu0 %v6874_v19  ;;  %v7916_v18 = vpack.c.bf16 %v751_v11, %v747_v9  ;;  %v6894_v19 = vpack.c.bf16 %v758_v14, %v754_v13  ;;  %v789_v8 = vld [vmem:[%s10335_s18 + $0x7a0] sm:$0xff]  ;;  %v787_v9 = vld [vmem:[%s10335_s18 + $0x790] sm:$0xff]  ;;  %v794_v13 = vld [vmem:[%s10335_s18 + $0x7c8] sm:$0xff] }
 0x157   : > { %7899 = vmatprep.subr.bf16.mxu1 %v7898_v23  ;;  %v7918_v23 = vpack.c.bf16 %v760_v16, %v756_v15  ;;  %v791_v11 = vld [vmem:[%s10335_s18 + $0x7b0] sm:$0xff]  ;;  %v798_v14 = vld [vmem:[%s10335_s18 + $0x7e8] sm:$0xff]  ;;  %v796_v15 = vld [vmem:[%s10335_s18 + $0x7d8] sm:$0xff] }
 0x158   : > { %v800_v16 = vld [vmem:[%s10335_s18 + $0x7f8] sm:$0xff] }
 0x159   : > { %6877 = vmatpush1.bf16.msra.mxu0 %v6876_v31  ;;  %v6896_v31 = vpack.c.bf16 %v757_v21, %v753_v20  ;;  %v793_v20 = vld [vmem:[%s10335_s18 + $0x7c0] sm:$0xff] }
 0x15a   : > { %7901 = vmatpush1.bf16.msra.mxu1 %v7900_v32  ;;  %6879 = vmatprep.subr.bf16.mxu0 %v6878_v33  ;;  %v7920_v32 = vpack.c.bf16 %v759_v24, %v755_v22  ;;  %v6898_v33 = vpack.c.bf16 %v766_v28, %v762_v25  ;;  %v797_v21 = vld [vmem:[%s10335_s18 + $0x7e0] sm:$0xff]  ;;  %v795_v22 = vld [vmem:[%s10335_s18 + $0x7d0] sm:$0xff]  ;;  %v802_v25 = vld [vmem:[%s10335_s18 + $0x808] sm:$0xff] }
 0x15b   : > { %7903 = vmatprep.subr.bf16.mxu1 %v7902_v37  ;;  %v7922_v37 = vpack.c.bf16 %v768_v30, %v764_v29  ;;  %v799_v24 = vld [vmem:[%s10335_s18 + $0x7f0] sm:$0xff]  ;;  %v806_v28 = vld [vmem:[%s10335_s18 + $0x828] sm:$0xff]  ;;  %v804_v29 = vld [vmem:[%s10335_s18 + $0x818] sm:$0xff] }
 0x15c   : > { %v808_v30 = vld [vmem:[%s10335_s18 + $0x838] sm:$0xff] }
 0x15d   : > { %6881 = vmatpush1.bf16.msra.mxu0 %v6880_v43  ;;  %v6900_v43 = vpack.c.bf16 %v765_v35, %v761_v34  ;;  %v801_v34 = vld [vmem:[%s10335_s18 + $0x800] sm:$0xff] }
 0x15e   : > { %7905 = vmatpush1.bf16.msra.mxu1 %v7904_v44  ;;  %6883 = vmatprep.subr.bf16.mxu0 %v6882_v45  ;;  %v7924_v44 = vpack.c.bf16 %v767_v38, %v763_v36  ;;  %v6902_v45 = vpack.c.bf16 %v774_v40, %v770_v39  ;;  %v805_v35 = vld [vmem:[%s10335_s18 + $0x820] sm:$0xff]  ;;  %v803_v36 = vld [vmem:[%s10335_s18 + $0x810] sm:$0xff]  ;;  %v810_v39 = vld [vmem:[%s10335_s18 + $0x848] sm:$0xff] }
 0x15f   : > { %7907 = vmatprep.subr.bf16.mxu1 %v7906_v50  ;;  %v7926_v50 = vpack.c.bf16 %v776_v42, %v772_v41  ;;  %v807_v38 = vld [vmem:[%s10335_s18 + $0x830] sm:$0xff]  ;;  %v814_v40 = vld [vmem:[%s10335_s18 + $0x868] sm:$0xff]  ;;  %v812_v41 = vld [vmem:[%s10335_s18 + $0x858] sm:$0xff] }
 0x160   : > { %v816_v42 = vld [vmem:[%s10335_s18 + $0x878] sm:$0xff] }
 0x161   : > { %6885 = vmatpush1.bf16.msra.mxu0 %v6884_v55  ;;  %v6904_v55 = vpack.c.bf16 %v773_v47, %v769_v46  ;;  %v6922_v46 = vpack.c.bf16 %v814_v40, %v810_v39  ;;  %v809_v47 = vld [vmem:[%s10335_s18 + $0x840] sm:$0xff]  ;;  %v847_v40 = vld [vmem:[%s10335_s18 + $0x970] sm:$0xff] }
 0x162   : > { %7909 = vmatpush1.bf16.msra.mxu1 %v7908_v56  ;;  %6887 = vmatprep.subr.bf16.mxu0 %v6886_v57  ;;  %v7928_v56 = vpack.c.bf16 %v775_v51, %v771_v48  ;;  %v6906_v57 = vpack.c.bf16 %v782_v53, %v778_v52  ;;  %v813_v48 = vld [vmem:[%s10335_s18 + $0x860] sm:$0xff]  ;;  %v7946_v52 = vpack.c.bf16 %v816_v42, %v812_v41  ;;  %v815_v53 = vld [vmem:[%s10335_s18 + $0x870] sm:$0xff]  ;;  %v850_v41 = vld [vmem:[%s10335_s18 + $0x988] sm:$0xff] }
 0x163   : > { %7911 = vmatprep.subr.bf16.mxu1 %v7910_v61  ;;  %v7930_v61 = vpack.c.bf16 %v784_v54, %v780_v26  ;;  %v818_v26 = vld [vmem:[%s10335_s18 + $0x888] sm:$0xff] }
 0x164   : > { %v822_v54 = vld [vmem:[%s10335_s18 + $0x8a8] sm:$0xff] }
 0x165   : > { %6889 = vmatpush1.bf16.msra.mxu0 %v6888_v4  ;;  %v6908_v4 = vpack.c.bf16 %v781_v59, %v777_v58  ;;  %v6924_v58 = vpack.c.bf16 %v813_v48, %v809_v47  ;;  %v854_v42 = vld [vmem:[%s10335_s18 + $0x9a8] sm:$0xff] }
 0x166   : > { %7913 = vmatpush1.bf16.msra.mxu1 %v7912_v5  ;;  %6891 = vmatprep.subr.bf16.mxu0 %v6890_v6  ;;  %v7932_v5 = vpack.c.bf16 %v783_v62, %v779_v60  ;;  %v6910_v6 = vpack.c.bf16 %v790_v1, %v786_v0  ;;  %v6926_v60 = vpack.c.bf16 %v822_v54, %v818_v26  ;;  %v821_v62 = vld [vmem:[%s10335_s18 + $0x8a0] sm:$0xff]  ;;  %v819_v0 = vld [vmem:[%s10335_s18 + $0x890] sm:$0xff] }
 0x167   : > { %7915 = vmatprep.subr.bf16.mxu1 %v7914_v10  ;;  %v7934_v10 = vpack.c.bf16 %v792_v3, %v788_v2  ;;  %v823_v2 = vld [vmem:[%s10335_s18 + $0x8b0] sm:$0xff]  ;;  %v826_v3 = vld [vmem:[%s10335_s18 + $0x8c8] sm:$0xff]  ;;  %v6942_v48 = vpack.c.bf16 %v854_v42, %v850_v41 }
 0x168   : > { %v855_v54 = vld [vmem:[%s10335_s18 + $0x9b0] sm:$0xff]  ;;  %v890_v42 = vld [vmem:[%s10335_s18 + $0xac8] sm:$0xff] }
 0x169   : > { %6893 = vmatpush1.bf16.msra.mxu0 %v6892_v17  ;;  %v6912_v17 = vpack.c.bf16 %v789_v8, %v785_v7  ;;  %v7952_v7 = vpack.c.bf16 %v823_v2, %v819_v0  ;;  %v861_v0 = vld [vmem:[%s10335_s18 + $0x9e0] sm:$0xff]  ;;  %v887_v41 = vld [vmem:[%s10335_s18 + $0xab0] sm:$0xff] }
 0x16a   : > { %7917 = vmatpush1.bf16.msra.mxu1 %v7916_v18  ;;  %6895 = vmatprep.subr.bf16.mxu0 %v6894_v19  ;;  %v7936_v18 = vpack.c.bf16 %v791_v11, %v787_v9  ;;  %v6914_v19 = vpack.c.bf16 %v798_v14, %v794_v13  ;;  %v825_v9 = vld [vmem:[%s10335_s18 + $0x8c0] sm:$0xff]  ;;  %v827_v11 = vld [vmem:[%s10335_s18 + $0x8d0] sm:$0xff] }
 0x16b   : > { %7919 = vmatprep.subr.bf16.mxu1 %v7918_v23  ;;  %v7938_v23 = vpack.c.bf16 %v800_v16, %v796_v15  ;;  %v831_v14 = vld [vmem:[%s10335_s18 + $0x8f0] sm:$0xff]  ;;  %v834_v15 = vld [vmem:[%s10335_s18 + $0x908] sm:$0xff] }
 0x16c   : > { %v838_v16 = vld [vmem:[%s10335_s18 + $0x928] sm:$0xff] }
 0x16d   : > { %6897 = vmatpush1.bf16.msra.mxu0 %v6896_v31  ;;  %v6916_v31 = vpack.c.bf16 %v797_v21, %v793_v20  ;;  %v7956_v20 = vpack.c.bf16 %v831_v14, %v827_v11  ;;  %v6934_v21 = vpack.c.bf16 %v838_v16, %v834_v15  ;;  %v869_v11 = vld [vmem:[%s10335_s18 + $0xa20] sm:$0xff]  ;;  %v871_v15 = vld [vmem:[%s10335_s18 + $0xa30] sm:$0xff]  ;;  %v874_v16 = vld [vmem:[%s10335_s18 + $0xa48] sm:$0xff] }
 0x16e   : > { %7921 = vmatpush1.bf16.msra.mxu1 %v7920_v32  ;;  %6899 = vmatprep.subr.bf16.mxu0 %v6898_v33  ;;  %v7940_v32 = vpack.c.bf16 %v799_v24, %v795_v22  ;;  %v6918_v33 = vpack.c.bf16 %v806_v28, %v802_v25  ;;  %v833_v22 = vld [vmem:[%s10335_s18 + $0x900] sm:$0xff]  ;;  %v835_v24 = vld [vmem:[%s10335_s18 + $0x910] sm:$0xff] }
 0x16f   : > { %7923 = vmatprep.subr.bf16.mxu1 %v7922_v37  ;;  %v7942_v37 = vpack.c.bf16 %v808_v30, %v804_v29  ;;  %v839_v28 = vld [vmem:[%s10335_s18 + $0x930] sm:$0xff]  ;;  %v842_v29 = vld [vmem:[%s10335_s18 + $0x948] sm:$0xff] }
 0x170   : > { %v846_v30 = vld [vmem:[%s10335_s18 + $0x968] sm:$0xff] }
 0x171   : > { %6901 = vmatpush1.bf16.msra.mxu0 %v6900_v43  ;;  %v6920_v43 = vpack.c.bf16 %v805_v35, %v801_v34  ;;  %v7960_v34 = vpack.c.bf16 %v839_v28, %v835_v24  ;;  %v6938_v35 = vpack.c.bf16 %v846_v30, %v842_v29  ;;  %v877_v24 = vld [vmem:[%s10335_s18 + $0xa60] sm:$0xff]  ;;  %v879_v29 = vld [vmem:[%s10335_s18 + $0xa70] sm:$0xff]  ;;  %v882_v30 = vld [vmem:[%s10335_s18 + $0xa88] sm:$0xff] }
 0x172   : > { %7925 = vmatpush1.bf16.msra.mxu1 %v7924_v44  ;;  %6903 = vmatprep.subr.bf16.mxu0 %v6902_v45  ;;  %v10652_v44 = vld [vmem:[%s10328_s24 + $0x8] sm:$0xff]  ;;  %v7944_v45 = vpack.c.bf16 %v807_v38, %v803_v36  ;;  %v841_v36 = vld [vmem:[%s10335_s18 + $0x940] sm:$0xff]  ;;  %v843_v38 = vld [vmem:[%s10335_s18 + $0x950] sm:$0xff] }
 0x173   : > { %7927 = vmatprep.subr.bf16.mxu1 %v7926_v50  ;;  %v811_v50 = vld [vmem:[%s10335_s18 + $0x850] sm:$0xff]  ;;  %v10659_v51 = vrot.slane %v10652_v44, %v10455_v12  ;;  %v7964_v47 = vpack.c.bf16 %v847_v40, %v843_v38  ;;  %v885_v38 = vld [vmem:[%s10335_s18 + $0xaa0] sm:$0xff] }
 0x174   : > { %v7948_v59 = vpack.c.bf16 %v815_v53, %v811_v50  ;;  %v849_v50 = vld [vmem:[%s10335_s18 + $0x980] sm:$0xff]  ;;  %v851_v53 = vld [vmem:[%s10335_s18 + $0x990] sm:$0xff] }
 0x175   : > { %6905 = vmatpush1.bf16.msra.mxu0 %v6904_v55  ;;  %v820_v55 = vld [vmem:[%s10335_s18 + $0x898] sm:$0xff] }
 0x176   : > { %7929 = vmatpush1.bf16.msra.mxu1 %v7928_v56  ;;  %6907 = vmatprep.subr.bf16.mxu0 %v6906_v57  ;;  %v824_v56 = vld [vmem:[%s10335_s18 + $0x8b8] sm:$0xff]  ;;  %v2633_v57 = vcombine.high %v10659_v51, %v10659_v51 }
 0x177   : > { %7931 = vmatprep.subr.bf16.mxu1 %v7930_v61  ;;  %v817_v61 = vld [vmem:[%s10335_s18 + $0x880] sm:$0xff]  ;;  %v7950_v1 = vpack.c.bf16 %v824_v56, %v820_v55  ;;  %v858_v55 = vld [vmem:[%s10335_s18 + $0x9c8] sm:$0xff] }
 0x178   : > { %v862_v56 = vld [vmem:[%s10335_s18 + $0x9e8] sm:$0xff] }
 0x179   : > { %6909 = vmatpush1.bf16.msra.mxu0 %v6908_v4  ;;  %v830_v4 = vld [vmem:[%s10335_s18 + $0x8e8] sm:$0xff] }
 0x17a   : > { %7933 = vmatpush1.bf16.msra.mxu1 %v7932_v5  ;;  %6911 = vmatprep.subr.bf16.mxu0 %v6910_v6  ;;  %v832_v5 = vld [vmem:[%s10335_s18 + $0x8f8] sm:$0xff]  ;;  %v6928_v6 = vpack.c.bf16 %v821_v62, %v817_v61  ;;  %v6930_v8 = vpack.c.bf16 %v830_v4, %v826_v3  ;;  %v6946_v61 = vpack.c.bf16 %v862_v56, %v858_v55  ;;  %v857_v62 = vld [vmem:[%s10335_s18 + $0x9c0] sm:$0xff]  ;;  %v863_v3 = vld [vmem:[%s10335_s18 + $0x9f0] sm:$0xff] }
 0x17b   : > { %7935 = vmatprep.subr.bf16.mxu1 %v7934_v10  ;;  %v829_v10 = vld [vmem:[%s10335_s18 + $0x8e0] sm:$0xff]  ;;  %v866_v4 = vld [vmem:[%s10335_s18 + $0xa08] sm:$0xff]  ;;  %v895_v55 = vld [vmem:[%s10335_s18 + $0xaf0] sm:$0xff] }
 0x17c   : > { %v898_v56 = vld [vmem:[%s10335_s18 + $0xb08] sm:$0xff] }
 0x17d   : > { %6913 = vmatpush1.bf16.msra.mxu0 %v6912_v17  ;;  %v836_v17 = vld [vmem:[%s10335_s18 + $0x918] sm:$0xff] }
 0x17e   : > { %7937 = vmatpush1.bf16.msra.mxu1 %v7936_v18  ;;  %6915 = vmatprep.subr.bf16.mxu0 %v6914_v19  ;;  %v840_v18 = vld [vmem:[%s10335_s18 + $0x938] sm:$0xff]  ;;  %v6932_v19 = vpack.c.bf16 %v829_v10, %v825_v9  ;;  %v865_v10 = vld [vmem:[%s10335_s18 + $0xa00] sm:$0xff] }
 0x17f   : > { %7939 = vmatprep.subr.bf16.mxu1 %v7938_v23  ;;  %v837_v23 = vld [vmem:[%s10335_s18 + $0x920] sm:$0xff]  ;;  %v7958_v25 = vpack.c.bf16 %v840_v18, %v836_v17  ;;  %v878_v17 = vld [vmem:[%s10335_s18 + $0xa68] sm:$0xff]  ;;  %v876_v18 = vld [vmem:[%s10335_s18 + $0xa58] sm:$0xff] }
 0x181   : > { %6917 = vmatpush1.bf16.msra.mxu0 %v6916_v31  ;;  %v844_v31 = vld [vmem:[%s10335_s18 + $0x958] sm:$0xff] }
 0x182   : > { %7941 = vmatpush1.bf16.msra.mxu1 %v7940_v32  ;;  %6919 = vmatprep.subr.bf16.mxu0 %v6918_v33  ;;  %v848_v32 = vld [vmem:[%s10335_s18 + $0x978] sm:$0xff]  ;;  %v6936_v33 = vpack.c.bf16 %v837_v23, %v833_v22  ;;  %v6954_v22 = vpack.c.bf16 %v878_v17, %v874_v16  ;;  %v873_v23 = vld [vmem:[%s10335_s18 + $0xa40] sm:$0xff]  ;;  %v911_v16 = vld [vmem:[%s10335_s18 + $0xb70] sm:$0xff] }
 0x183   : > { %7943 = vmatprep.subr.bf16.mxu1 %v7942_v37  ;;  %v845_v37 = vld [vmem:[%s10335_s18 + $0x960] sm:$0xff]  ;;  %v7962_v39 = vpack.c.bf16 %v848_v32, %v844_v31  ;;  %v886_v31 = vld [vmem:[%s10335_s18 + $0xaa8] sm:$0xff]  ;;  %v884_v32 = vld [vmem:[%s10335_s18 + $0xa98] sm:$0xff] }
 0x184   : > { %2905 = vmatmul.mubr.f32.vlgmr.msra.gmra.mrb[0].mxu0 %v10515_v27  ;;  %v914_v17 = vld [vmem:[%s10335_s18 + $0xb88] sm:$0xff] }
 0x185   : > { %6921 = vmatpush1.bf16.msra.mxu0 %v6920_v43  ;;  %4041 = vmatmul.mubr.f32.vlgmr.msra.gmra.mrb[0].mxu1 %v10515_v27  ;;  %v828_v27 = vld [vmem:[%s10335_s18 + $0x8d8] sm:$0xff] }
 0x186   : > { %7945 = vmatpush1.bf16.msra.mxu1 %v7944_v45  ;;  %6923 = vmatprep.subr.bf16.mxu0 %v6922_v46  ;;  %v7954_v13 = vpack.c.bf16 %v832_v5, %v828_v27  ;;  %v852_v43 = vld [vmem:[%s10335_s18 + $0x998] sm:$0xff]  ;;  %v6940_v46 = vpack.c.bf16 %v845_v37, %v841_v36  ;;  %v870_v27 = vld [vmem:[%s10335_s18 + $0xa28] sm:$0xff]  ;;  %v6958_v36 = vpack.c.bf16 %v886_v31, %v882_v30  ;;  %v881_v37 = vld [vmem:[%s10335_s18 + $0xa80] sm:$0xff] }
 0x187   : > { %7947 = vmatprep.subr.bf16.mxu1 %v7946_v52  ;;  %2975 = vmatprep.mubr.f32.mxu0 %v2633_v57  ;;  %v856_v45 = vld [vmem:[%s10335_s18 + $0x9b8] sm:$0xff]  ;;  %v853_v52 = vld [vmem:[%s10335_s18 + $0x9a0] sm:$0xff]  ;;  %v6950_v9 = vpack.c.bf16 %v870_v27, %v866_v4  ;;  %v903_v4 = vld [vmem:[%s10335_s18 + $0xb30] sm:$0xff] }
 0x188   : > { %4111 = vmatprep.mubr.f32.mxu1 %v2633_v57  ;;  %v7966_v26 = vpack.c.bf16 %v856_v45, %v852_v43  ;;  %v860_v57 = vld [vmem:[%s10335_s18 + $0x9d8] sm:$0xff]  ;;  %v894_v43 = vld [vmem:[%s10335_s18 + $0xae8] sm:$0xff]  ;;  %v919_v30 = vld [vmem:[%s10335_s18 + $0xbb0] sm:$0xff] }
 0x189   : > { %6925 = vmatpush1.bf16.msra.mxu0 %v6924_v58  ;;  %v864_v58 = vld [vmem:[%s10335_s18 + $0x9f8] sm:$0xff]  ;;  %v906_v27 = vld [vmem:[%s10335_s18 + $0xb48] sm:$0xff] }
 0x18a   : > { %7949 = vmatpush1.bf16.msra.mxu1 %v7948_v59  ;;  %6927 = vmatprep.subr.bf16.mxu0 %v6926_v60  ;;  %v6944_v59 = vpack.c.bf16 %v853_v52, %v849_v50  ;;  %v7968_v60 = vpack.c.bf16 %v855_v54, %v851_v53  ;;  %v7970_v2 = vpack.c.bf16 %v864_v58, %v860_v57  ;;  %v868_v5 = vld [vmem:[%s10335_s18 + $0xa18] sm:$0xff]  ;;  %v889_v52 = vld [vmem:[%s10335_s18 + $0xac0] sm:$0xff]  ;;  %v902_v57 = vld [vmem:[%s10335_s18 + $0xb28] sm:$0xff] }
 0x18b   : > { %7951 = vmatprep.subr.bf16.mxu1 %v7950_v1  ;;  %v859_v1 = vld [vmem:[%s10335_s18 + $0x9d0] sm:$0xff]  ;;  %v892_v45 = vld [vmem:[%s10335_s18 + $0xad8] sm:$0xff]  ;;  %v6962_v50 = vpack.c.bf16 %v894_v43, %v890_v42  ;;  %v893_v53 = vld [vmem:[%s10335_s18 + $0xae0] sm:$0xff] }
 0x18c   : > { %v900_v58 = vld [vmem:[%s10335_s18 + $0xb18] sm:$0xff]  ;;  %v922_v31 = vld [vmem:[%s10335_s18 + $0xbc8] sm:$0xff]  ;;  %v927_v42 = vld [vmem:[%s10335_s18 + $0xbf0] sm:$0xff] }
 0x18d   : > { %6929 = vmatpush1.bf16.msra.mxu0 %v6928_v6  ;;  %v872_v6 = vld [vmem:[%s10335_s18 + $0xa38] sm:$0xff]  ;;  %v930_v43 = vld [vmem:[%s10335_s18 + $0xc08] sm:$0xff] }
 0x18e   : > { %7953 = vmatpush1.bf16.msra.mxu1 %v7952_v7  ;;  %6931 = vmatprep.subr.bf16.mxu0 %v6930_v8  ;;  %v6948_v7 = vpack.c.bf16 %v861_v0, %v857_v62  ;;  %v7972_v8 = vpack.c.bf16 %v863_v3, %v859_v1  ;;  %v7974_v14 = vpack.c.bf16 %v872_v6, %v868_v5  ;;  %v897_v0 = vld [vmem:[%s10335_s18 + $0xb00] sm:$0xff]  ;;  %v910_v5 = vld [vmem:[%s10335_s18 + $0xb68] sm:$0xff]  ;;  %v908_v6 = vld [vmem:[%s10335_s18 + $0xb58] sm:$0xff] }
 0x18f   : > { %7955 = vmatprep.subr.bf16.mxu1 %v7954_v13  ;;  %v867_v13 = vld [vmem:[%s10335_s18 + $0xa10] sm:$0xff]  ;;  %v6966_v62 = vpack.c.bf16 %v902_v57, %v898_v56  ;;  %v901_v1 = vld [vmem:[%s10335_s18 + $0xb20] sm:$0xff]  ;;  %v938_v57 = vld [vmem:[%s10335_s18 + $0xc48] sm:$0xff] }
 0x191   : > { %6933 = vmatpush1.bf16.msra.mxu0 %v6932_v19  ;;  %v880_v19 = vld [vmem:[%s10335_s18 + $0xa78] sm:$0xff] }
 0x192   : > { %7957 = vmatpush1.bf16.msra.mxu1 %v7956_v20  ;;  %6935 = vmatprep.subr.bf16.mxu0 %v6934_v21  ;;  %v6952_v20 = vpack.c.bf16 %v869_v11, %v865_v10  ;;  %v7976_v21 = vpack.c.bf16 %v871_v15, %v867_v13  ;;  %v7978_v28 = vpack.c.bf16 %v880_v19, %v876_v18  ;;  %v905_v11 = vld [vmem:[%s10335_s18 + $0xb40] sm:$0xff]  ;;  %v918_v18 = vld [vmem:[%s10335_s18 + $0xba8] sm:$0xff]  ;;  %v916_v19 = vld [vmem:[%s10335_s18 + $0xb98] sm:$0xff] }
 0x193   : > { %7959 = vmatprep.subr.bf16.mxu1 %v7958_v25  ;;  %v875_v25 = vld [vmem:[%s10335_s18 + $0xa50] sm:$0xff]  ;;  %v6970_v10 = vpack.c.bf16 %v910_v5, %v906_v27  ;;  %v909_v13 = vld [vmem:[%s10335_s18 + $0xb60] sm:$0xff] }
 0x194   : > { %v943_v5 = vld [vmem:[%s10335_s18 + $0xc70] sm:$0xff] }
 0x195   : > { %6937 = vmatpush1.bf16.msra.mxu0 %v6936_v33  ;;  %v888_v33 = vld [vmem:[%s10335_s18 + $0xab8] sm:$0xff] }
 0x196   : > { %7961 = vmatpush1.bf16.msra.mxu1 %v7960_v34  ;;  %6939 = vmatprep.subr.bf16.mxu0 %v6938_v35  ;;  %v6956_v34 = vpack.c.bf16 %v877_v24, %v873_v23  ;;  %v7980_v35 = vpack.c.bf16 %v879_v29, %v875_v25  ;;  %v7982_v40 = vpack.c.bf16 %v888_v33, %v884_v32  ;;  %v913_v24 = vld [vmem:[%s10335_s18 + $0xb80] sm:$0xff]  ;;  %v926_v32 = vld [vmem:[%s10335_s18 + $0xbe8] sm:$0xff]  ;;  %v924_v33 = vld [vmem:[%s10335_s18 + $0xbd8] sm:$0xff] }
 0x197   : > { %7963 = vmatprep.subr.bf16.mxu1 %v7962_v39  ;;  %v883_v39 = vld [vmem:[%s10335_s18 + $0xa90] sm:$0xff]  ;;  %v6974_v23 = vpack.c.bf16 %v918_v18, %v914_v17  ;;  %v917_v25 = vld [vmem:[%s10335_s18 + $0xba0] sm:$0xff] }
 0x198   : > { %v947_v17 = vld [vmem:[%s10335_s18 + $0xc90] sm:$0xff] }
 0x199   : > { %6941 = vmatpush1.bf16.msra.mxu0 %v6940_v46  ;;  %v896_v46 = vld [vmem:[%s10335_s18 + $0xaf8] sm:$0xff] }
 0x19a   : > { %7965 = vmatpush1.bf16.msra.mxu1 %v7964_v47  ;;  %6943 = vmatprep.subr.bf16.mxu0 %v6942_v48  ;;  %v6960_v47 = vpack.c.bf16 %v885_v38, %v881_v37  ;;  %v7984_v48 = vpack.c.bf16 %v887_v41, %v883_v39  ;;  %v7986_v54 = vpack.c.bf16 %v896_v46, %v892_v45  ;;  %v921_v38 = vld [vmem:[%s10335_s18 + $0xbc0] sm:$0xff]  ;;  %v934_v45 = vld [vmem:[%s10335_s18 + $0xc28] sm:$0xff] }
 0x19b   : > { %7967 = vmatprep.subr.bf16.mxu1 %v7966_v26  ;;  %v891_v26 = vld [vmem:[%s10335_s18 + $0xad0] sm:$0xff]  ;;  %v6978_v37 = vpack.c.bf16 %v926_v32, %v922_v31  ;;  %v925_v39 = vld [vmem:[%s10335_s18 + $0xbe0] sm:$0xff]  ;;  %v2618_v46 = vcombine.high %v10652_v44, %v10652_v44 }
 0x19c   : > { %v935_v44 = vld [vmem:[%s10335_s18 + $0xc30] sm:$0xff] }
 0x19d   : > { %6945 = vmatpush1.bf16.msra.mxu0 %v6944_v59  ;;  %v904_v59 = vld [vmem:[%s10335_s18 + $0xb38] sm:$0xff]  ;;  %v959_v32 = vld [vmem:[%s10335_s18 + $0xcf0] sm:$0xff] }
 0x19e   : > { %7969 = vmatpush1.bf16.msra.mxu1 %v7968_v60  ;;  %6947 = vmatprep.subr.bf16.mxu0 %v6946_v61  ;;  %v6964_v60 = vpack.c.bf16 %v893_v53, %v889_v52  ;;  %v7988_v61 = vpack.c.bf16 %v895_v55, %v891_v26  ;;  %v7990_v3 = vpack.c.bf16 %v904_v59, %v900_v58  ;;  %v929_v26 = vld [vmem:[%s10335_s18 + $0xc00] sm:$0xff]  ;;  %v931_v55 = vld [vmem:[%s10335_s18 + $0xc10] sm:$0xff]  ;;  %v942_v58 = vld [vmem:[%s10335_s18 + $0xc68] sm:$0xff] }
 0x19f   : > { %7971 = vmatprep.subr.bf16.mxu1 %v7970_v2  ;;  %v899_v2 = vld [vmem:[%s10335_s18 + $0xb10] sm:$0xff]  ;;  %v6982_v53 = vpack.c.bf16 %v934_v45, %v930_v43  ;;  %v10791_v59 = vrot.slane %v2618_v46, %v10455_v12  ;;  %v970_v46 = vld [vmem:[%s10335_s18 + $0xd48] sm:$0xff] }
 0x1a0   : > { %v967_v45 = vld [vmem:[%s10335_s18 + $0xd30] sm:$0xff] }
 0x1a1   : > { %6949 = vmatpush1.bf16.msra.mxu0 %v6948_v7  ;;  %v912_v7 = vld [vmem:[%s10335_s18 + $0xb78] sm:$0xff] }
 0x1a2   : > { %7973 = vmatpush1.bf16.msra.mxu1 %v7972_v8  ;;  %6951 = vmatprep.subr.bf16.mxu0 %v6950_v9  ;;  %v6968_v8 = vpack.c.bf16 %v901_v1, %v897_v0  ;;  %v7992_v9 = vpack.c.bf16 %v903_v4, %v899_v2  ;;  %v7994_v15 = vpack.c.bf16 %v912_v7, %v908_v6  ;;  %v937_v2 = vld [vmem:[%s10335_s18 + $0xc40] sm:$0xff]  ;;  %v939_v4 = vld [vmem:[%s10335_s18 + $0xc50] sm:$0xff]  ;;  %v946_v6 = vld [vmem:[%s10335_s18 + $0xc88] sm:$0xff] }
 0x1a3   : > { %7975 = vmatprep.subr.bf16.mxu1 %v7974_v14  ;;  %v907_v14 = vld [vmem:[%s10335_s18 + $0xb50] sm:$0xff]  ;;  %v8008_v0 = vpack.c.bf16 %v935_v44, %v931_v55  ;;  %v6986_v1 = vpack.c.bf16 %v942_v58, %v938_v57  ;;  %v950_v7 = vld [vmem:[%s10335_s18 + $0xca8] sm:$0xff]  ;;  %v973_v55 = vld [vmem:[%s10335_s18 + $0xd60] sm:$0xff] }
 0x1a4   : > { %v975_v57 = vld [vmem:[%s10335_s18 + $0xd70] sm:$0xff]  ;;  %v978_v58 = vld [vmem:[%s10335_s18 + $0xd88] sm:$0xff] }
 0x1a5   : > { %6953 = vmatpush1.bf16.msra.mxu0 %v6952_v20  ;;  %v920_v20 = vld [vmem:[%s10335_s18 + $0xbb8] sm:$0xff] }
 0x1a6   : > { %7977 = vmatpush1.bf16.msra.mxu1 %v7976_v21  ;;  %6955 = vmatprep.subr.bf16.mxu0 %v6954_v22  ;;  %v6972_v21 = vpack.c.bf16 %v909_v13, %v905_v11  ;;  %v7996_v22 = vpack.c.bf16 %v911_v16, %v907_v14  ;;  %v7998_v29 = vpack.c.bf16 %v920_v20, %v916_v19  ;;  %v949_v16 = vld [vmem:[%s10335_s18 + $0xca0] sm:$0xff]  ;;  %v951_v19 = vld [vmem:[%s10335_s18 + $0xcb0] sm:$0xff]  ;;  %v954_v20 = vld [vmem:[%s10335_s18 + $0xcc8] sm:$0xff] }
 0x1a7   : > { %7979 = vmatprep.subr.bf16.mxu1 %v7978_v28  ;;  %v915_v28 = vld [vmem:[%s10335_s18 + $0xb90] sm:$0xff]  ;;  %v8012_v13 = vpack.c.bf16 %v943_v5, %v939_v4  ;;  %v6990_v14 = vpack.c.bf16 %v950_v7, %v946_v6  ;;  %v981_v4 = vld [vmem:[%s10335_s18 + $0xda0] sm:$0xff]  ;;  %v986_v7 = vld [vmem:[%s10335_s18 + $0xdc8] sm:$0xff] }
 0x1a8   : > { %v983_v6 = vld [vmem:[%s10335_s18 + $0xdb0] sm:$0xff] }
 0x1a9   : > { %6957 = vmatpush1.bf16.msra.mxu0 %v6956_v34  ;;  %v928_v34 = vld [vmem:[%s10335_s18 + $0xbf8] sm:$0xff] }
 0x1aa   : > { %7981 = vmatpush1.bf16.msra.mxu1 %v7980_v35  ;;  %6959 = vmatprep.subr.bf16.mxu0 %v6958_v36  ;;  %v6976_v35 = vpack.c.bf16 %v917_v25, %v913_v24  ;;  %v8000_v36 = vpack.c.bf16 %v919_v30, %v915_v28  ;;  %v8002_v41 = vpack.c.bf16 %v928_v34, %v924_v33  ;;  %v953_v28 = vld [vmem:[%s10335_s18 + $0xcc0] sm:$0xff]  ;;  %v955_v30 = vld [vmem:[%s10335_s18 + $0xcd0] sm:$0xff]  ;;  %v962_v33 = vld [vmem:[%s10335_s18 + $0xd08] sm:$0xff] }
 0x1ab   : > { %7983 = vmatprep.subr.bf16.mxu1 %v7982_v40  ;;  %v923_v40 = vld [vmem:[%s10335_s18 + $0xbd0] sm:$0xff]  ;;  %v8016_v24 = vpack.c.bf16 %v951_v19, %v947_v17  ;;  %v966_v34 = vld [vmem:[%s10335_s18 + $0xd28] sm:$0xff] }
 0x1ac   : > { %v8004_v52 = vpack.c.bf16 %v927_v42, %v923_v40  ;;  %v961_v40 = vld [vmem:[%s10335_s18 + $0xd00] sm:$0xff]  ;;  %v963_v42 = vld [vmem:[%s10335_s18 + $0xd10] sm:$0xff] }
 0x1ad   : > { %6961 = vmatpush1.bf16.msra.mxu0 %v6960_v47  ;;  %v932_v47 = vld [vmem:[%s10335_s18 + $0xc18] sm:$0xff]  ;;  %v987_v17 = vld [vmem:[%s10335_s18 + $0xdd0] sm:$0xff] }
 0x1ae   : > { %7985 = vmatpush1.bf16.msra.mxu1 %v7984_v48  ;;  %6963 = vmatprep.subr.bf16.mxu0 %v6962_v50  ;;  %v936_v48 = vld [vmem:[%s10335_s18 + $0xc38] sm:$0xff]  ;;  %v6980_v50 = vpack.c.bf16 %v925_v39, %v921_v38  ;;  %v8020_v38 = vpack.c.bf16 %v959_v32, %v955_v30  ;;  %v6998_v39 = vpack.c.bf16 %v966_v34, %v962_v33  ;;  %v991_v19 = vld [vmem:[%s10335_s18 + $0xdf0] sm:$0xff]  ;;  %v1002_v33 = vld [vmem:[%s10335_s18 + $0xe48] sm:$0xff] }
 0x1af   : > { %7987 = vmatprep.subr.bf16.mxu1 %v7986_v54  ;;  %v933_v54 = vld [vmem:[%s10335_s18 + $0xc20] sm:$0xff]  ;;  %v8006_v56 = vpack.c.bf16 %v936_v48, %v932_v47  ;;  %v974_v47 = vld [vmem:[%s10335_s18 + $0xd68] sm:$0xff]  ;;  %v972_v48 = vld [vmem:[%s10335_s18 + $0xd58] sm:$0xff] }
 0x1b0   : > { %v995_v30 = vld [vmem:[%s10335_s18 + $0xe10] sm:$0xff]  ;;  %v1006_v34 = vld [vmem:[%s10335_s18 + $0xe68] sm:$0xff] }
 0x1b1   : > { %6965 = vmatpush1.bf16.msra.mxu0 %v6964_v60  ;;  %v940_v60 = vld [vmem:[%s10335_s18 + $0xc58] sm:$0xff]  ;;  %v999_v32 = vld [vmem:[%s10335_s18 + $0xe30] sm:$0xff] }
 0x1b2   : > { %7989 = vmatpush1.bf16.msra.mxu1 %v7988_v61  ;;  %6967 = vmatprep.subr.bf16.mxu0 %v6966_v62  ;;  %v944_v61 = vld [vmem:[%s10335_s18 + $0xc78] sm:$0xff]  ;;  %v6984_v62 = vpack.c.bf16 %v933_v54, %v929_v26  ;;  %v7002_v26 = vpack.c.bf16 %v974_v47, %v970_v46  ;;  %v969_v54 = vld [vmem:[%s10335_s18 + $0xd40] sm:$0xff]  ;;  %v1010_v46 = vld [vmem:[%s10335_s18 + $0xe88] sm:$0xff] }
 0x1b3   : > { %7991 = vmatprep.subr.bf16.mxu1 %v7990_v3  ;;  %v941_v3 = vld [vmem:[%s10335_s18 + $0xc60] sm:$0xff]  ;;  %v8010_v27 = vpack.c.bf16 %v944_v61, %v940_v60  ;;  %v982_v60 = vld [vmem:[%s10335_s18 + $0xda8] sm:$0xff]  ;;  %v980_v61 = vld [vmem:[%s10335_s18 + $0xd98] sm:$0xff] }
 0x1b4   : > { %v6988_v11 = vpack.c.bf16 %v941_v3, %v937_v2  ;;  %v7006_v2 = vpack.c.bf16 %v982_v60, %v978_v58  ;;  %v977_v3 = vld [vmem:[%s10335_s18 + $0xd80] sm:$0xff]  ;;  %v1014_v47 = vld [vmem:[%s10335_s18 + $0xea8] sm:$0xff] }
 0x1b5   : > { %6969 = vmatpush1.bf16.msra.mxu0 %v6968_v8  ;;  %v2634_v8 = vcombine.high %v10791_v59, %v10791_v59  ;;  %v1018_v58 = vld [vmem:[%s10335_s18 + $0xec8] sm:$0xff] }
 0x1b6   : > { %7993 = vmatpush1.bf16.msra.mxu1 %v7992_v9  ;;  %6971 = vmatprep.subr.bf16.mxu0 %v6970_v10  ;;  %v948_v9 = vld [vmem:[%s10335_s18 + $0xc98] sm:$0xff]  ;;  %v1022_v60 = vld [vmem:[%s10335_s18 + $0xee8] sm:$0xff] }
 0x1b7   : > { %7995 = vmatprep.subr.bf16.mxu1 %v7994_v15  ;;  %v952_v10 = vld [vmem:[%s10335_s18 + $0xcb8] sm:$0xff]  ;;  %v945_v15 = vld [vmem:[%s10335_s18 + $0xc80] sm:$0xff] }
 0x1b8   : > { %v8014_v18 = vpack.c.bf16 %v952_v10, %v948_v9  ;;  %v988_v9 = vld [vmem:[%s10335_s18 + $0xdd8] sm:$0xff] }
 0x1b9   : > { %6973 = vmatpush1.bf16.msra.mxu0 %v6972_v21  ;;  %v958_v21 = vld [vmem:[%s10335_s18 + $0xce8] sm:$0xff]  ;;  %v992_v10 = vld [vmem:[%s10335_s18 + $0xdf8] sm:$0xff] }
 0x1ba   : > { %7997 = vmatpush1.bf16.msra.mxu1 %v7996_v22  ;;  %6975 = vmatprep.subr.bf16.mxu0 %v6974_v23  ;;  %v960_v22 = vld [vmem:[%s10335_s18 + $0xcf8] sm:$0xff]  ;;  %v6992_v23 = vpack.c.bf16 %v949_v16, %v945_v15  ;;  %v6994_v25 = vpack.c.bf16 %v958_v21, %v954_v20  ;;  %v985_v15 = vld [vmem:[%s10335_s18 + $0xdc0] sm:$0xff]  ;;  %v994_v20 = vld [vmem:[%s10335_s18 + $0xe08] sm:$0xff] }
 0x1bb   : > { %7999 = vmatprep.subr.bf16.mxu1 %v7998_v29  ;;  %v957_v29 = vld [vmem:[%s10335_s18 + $0xce0] sm:$0xff]  ;;  %v998_v21 = vld [vmem:[%s10335_s18 + $0xe28] sm:$0xff] }
 0x1bc   : > { %v989_v16 = vld [vmem:[%s10335_s18 + $0xde0] sm:$0xff] }
 0x1bd   : > { %6977 = vmatpush1.bf16.msra.mxu0 %v6976_v35  ;;  %v964_v35 = vld [vmem:[%s10335_s18 + $0xd18] sm:$0xff] }
 0x1be   : > { %8001 = vmatpush1.bf16.msra.mxu1 %v8000_v36  ;;  %6979 = vmatprep.subr.bf16.mxu0 %v6978_v37  ;;  %v968_v36 = vld [vmem:[%s10335_s18 + $0xd38] sm:$0xff]  ;;  %v6996_v37 = vpack.c.bf16 %v957_v29, %v953_v28  ;;  %v993_v28 = vld [vmem:[%s10335_s18 + $0xe00] sm:$0xff] }
 0x1bf   : > { %8003 = vmatprep.subr.bf16.mxu1 %v8002_v41  ;;  %v965_v41 = vld [vmem:[%s10335_s18 + $0xd20] sm:$0xff]  ;;  %v8022_v43 = vpack.c.bf16 %v968_v36, %v964_v35  ;;  %v1004_v35 = vld [vmem:[%s10335_s18 + $0xe58] sm:$0xff] }
 0x1c0   : > { %v997_v29 = vld [vmem:[%s10335_s18 + $0xe20] sm:$0xff]  ;;  %v1008_v36 = vld [vmem:[%s10335_s18 + $0xe78] sm:$0xff] }
 0x1c1   : > { %6981 = vmatpush1.bf16.msra.mxu0 %v6980_v50  ;;  %v976_v50 = vld [vmem:[%s10335_s18 + $0xd78] sm:$0xff] }
 0x1c2   : > { %8005 = vmatpush1.bf16.msra.mxu1 %v8004_v52  ;;  %6983 = vmatprep.subr.bf16.mxu0 %v6982_v53  ;;  %v7000_v52 = vpack.c.bf16 %v965_v41, %v961_v40  ;;  %v8024_v53 = vpack.c.bf16 %v967_v45, %v963_v42  ;;  %v8026_v44 = vpack.c.bf16 %v976_v50, %v972_v48  ;;  %v1001_v40 = vld [vmem:[%s10335_s18 + $0xe40] sm:$0xff]  ;;  %v1003_v42 = vld [vmem:[%s10335_s18 + $0xe50] sm:$0xff]  ;;  %v1012_v48 = vld [vmem:[%s10335_s18 + $0xe98] sm:$0xff] }
 0x1c3   : > { %8007 = vmatprep.subr.bf16.mxu1 %v8006_v56  ;;  %v971_v56 = vld [vmem:[%s10335_s18 + $0xd50] sm:$0xff]  ;;  %v1005_v41 = vld [vmem:[%s10335_s18 + $0xe60] sm:$0xff]  ;;  %v1016_v50 = vld [vmem:[%s10335_s18 + $0xeb8] sm:$0xff] }
 0x1c4   : > { %2976 = vmatmul.mubr.f32.vlgmr.msra.gmra.mrb[0].mxu0 %v10659_v51  ;;  %v1007_v45 = vld [vmem:[%s10335_s18 + $0xe70] sm:$0xff] }
 0x1c5   : > { %6985 = vmatpush1.bf16.msra.mxu0 %v6984_v62  ;;  %4112 = vmatmul.mubr.f32.vlgmr.msra.gmra.mrb[0].mxu1 %v10659_v51  ;;  %v956_v51 = vld [vmem:[%s10335_s18 + $0xcd8] sm:$0xff] }
 0x1c6   : > { %8009 = vmatpush1.bf16.msra.mxu1 %v8008_v0  ;;  %6987 = vmatprep.subr.bf16.mxu0 %v6986_v1  ;;  %v8018_v31 = vpack.c.bf16 %v960_v22, %v956_v51  ;;  %v984_v62 = vld [vmem:[%s10335_s18 + $0xdb8] sm:$0xff]  ;;  %v7004_v0 = vpack.c.bf16 %v973_v55, %v969_v54  ;;  %v8028_v1 = vpack.c.bf16 %v975_v57, %v971_v56  ;;  %v1009_v54 = vld [vmem:[%s10335_s18 + $0xe80] sm:$0xff]  ;;  %v1011_v56 = vld [vmem:[%s10335_s18 + $0xe90] sm:$0xff] }
 0x1c7   : > { %8011 = vmatprep.subr.bf16.mxu1 %v8010_v27  ;;  %3046 = vmatprep.mubr.f32.mxu0 %v2634_v8  ;;  %v979_v27 = vld [vmem:[%s10335_s18 + $0xd90] sm:$0xff]  ;;  %v8030_v5 = vpack.c.bf16 %v984_v62, %v980_v61  ;;  %v996_v51 = vld [vmem:[%s10335_s18 + $0xe18] sm:$0xff]  ;;  %v1013_v55 = vld [vmem:[%s10335_s18 + $0xea0] sm:$0xff] }
 0x1c8   : > { %4182 = vmatprep.mubr.f32.mxu1 %v2634_v8  ;;  %v990_v8 = vld [vmem:[%s10335_s18 + $0xde8] sm:$0xff]  ;;  %v1000_v22 = vld [vmem:[%s10335_s18 + $0xe38] sm:$0xff]  ;;  %v1015_v57 = vld [vmem:[%s10335_s18 + $0xeb0] sm:$0xff] }
 0x1c9   : > { %6989 = vmatpush1.bf16.msra.mxu0 %v6988_v11  ;;  %v7008_v11 = vpack.c.bf16 %v981_v4, %v977_v3  ;;  %v1020_v61 = vld [vmem:[%s10335_s18 + $0xed8] sm:$0xff]  ;;  %v1017_v3 = vld [vmem:[%s10335_s18 + $0xec0] sm:$0xff] }
 0x1ca   : > { %8013 = vmatpush1.bf16.msra.mxu1 %v8012_v13  ;;  %6991 = vmatprep.subr.bf16.mxu0 %v6990_v14  ;;  %v8032_v13 = vpack.c.bf16 %v983_v6, %v979_v27  ;;  %v7010_v14 = vpack.c.bf16 %v990_v8, %v986_v7  ;;  %v1024_v62 = vld [vmem:[%s10335_s18 + $0xef8] sm:$0xff]  ;;  %v1021_v4 = vld [vmem:[%s10335_s18 + $0xee0] sm:$0xff]  ;;  %v1019_v27 = vld [vmem:[%s10335_s18 + $0xed0] sm:$0xff] }
 0x1cb   : > { %8015 = vmatprep.subr.bf16.mxu1 %v8014_v18  ;;  %v8034_v18 = vpack.c.bf16 %v992_v10, %v988_v9  ;;  %v1023_v6 = vld [vmem:[%s10335_s18 + $0xef0] sm:$0xff]  ;;  %v1026_v7 = vld [vmem:[%s10335_s18 + $0xf08] sm:$0xff]  ;;  %v1028_v9 = vld [vmem:[%s10335_s18 + $0xf18] sm:$0xff] }
 0x1cc   : > { %v1030_v8 = vld [vmem:[%s10335_s18 + $0xf28] sm:$0xff]  ;;  %v1032_v10 = vld [vmem:[%s10335_s18 + $0xf38] sm:$0xff] }
 0x1cd   : > { %6993 = vmatpush1.bf16.msra.mxu0 %v6992_v23  ;;  %v7012_v23 = vpack.c.bf16 %v989_v16, %v985_v15  ;;  %v1025_v15 = vld [vmem:[%s10335_s18 + $0xf00] sm:$0xff] }
 0x1ce   : > { %8017 = vmatpush1.bf16.msra.mxu1 %v8016_v24  ;;  %6995 = vmatprep.subr.bf16.mxu0 %v6994_v25  ;;  %v8036_v24 = vpack.c.bf16 %v991_v19, %v987_v17  ;;  %v7014_v25 = vpack.c.bf16 %v998_v21, %v994_v20  ;;  %v1029_v16 = vld [vmem:[%s10335_s18 + $0xf20] sm:$0xff]  ;;  %v1027_v17 = vld [vmem:[%s10335_s18 + $0xf10] sm:$0xff]  ;;  %v1034_v20 = vld [vmem:[%s10335_s18 + $0xf48] sm:$0xff] }
 0x1cf   : > { %8019 = vmatprep.subr.bf16.mxu1 %v8018_v31  ;;  %v8038_v31 = vpack.c.bf16 %v1000_v22, %v996_v51  ;;  %v1031_v19 = vld [vmem:[%s10335_s18 + $0xf30] sm:$0xff]  ;;  %v1038_v21 = vld [vmem:[%s10335_s18 + $0xf68] sm:$0xff]  ;;  %v1036_v51 = vld [vmem:[%s10335_s18 + $0xf58] sm:$0xff] }
 0x1d0   : > { %v1040_v22 = vld [vmem:[%s10335_s18 + $0xf78] sm:$0xff] }
 0x1d1   : > { %6997 = vmatpush1.bf16.msra.mxu0 %v6996_v37  ;;  %v7016_v37 = vpack.c.bf16 %v997_v29, %v993_v28  ;;  %v1033_v28 = vld [vmem:[%s10335_s18 + $0xf40] sm:$0xff] }
 0x1d2   : > { %8021 = vmatpush1.bf16.msra.mxu1 %v8020_v38  ;;  %6999 = vmatprep.subr.bf16.mxu0 %v6998_v39  ;;  %v8040_v38 = vpack.c.bf16 %v999_v32, %v995_v30  ;;  %v7018_v39 = vpack.c.bf16 %v1006_v34, %v1002_v33  ;;  %v1037_v29 = vld [vmem:[%s10335_s18 + $0xf60] sm:$0xff]  ;;  %v1035_v30 = vld [vmem:[%s10335_s18 + $0xf50] sm:$0xff]  ;;  %v1042_v33 = vld [vmem:[%s10335_s18 + $0xf88] sm:$0xff] }
 0x1d3   : > { %8023 = vmatprep.subr.bf16.mxu1 %v8022_v43  ;;  %v8042_v43 = vpack.c.bf16 %v1008_v36, %v1004_v35  ;;  %v1039_v32 = vld [vmem:[%s10335_s18 + $0xf70] sm:$0xff]  ;;  %v1046_v34 = vld [vmem:[%s10335_s18 + $0xfa8] sm:$0xff]  ;;  %v1044_v35 = vld [vmem:[%s10335_s18 + $0xf98] sm:$0xff] }
 0x1d4   : > { %v1048_v36 = vld [vmem:[%s10335_s18 + $0xfb8] sm:$0xff] }
 0x1d5   : > { %7001 = vmatpush1.bf16.msra.mxu0 %v7000_v52  ;;  %v7020_v52 = vpack.c.bf16 %v1005_v41, %v1001_v40  ;;  %v1041_v40 = vld [vmem:[%s10335_s18 + $0xf80] sm:$0xff] }
 0x1d6   : > { %8025 = vmatpush1.bf16.msra.mxu1 %v8024_v53  ;;  %7003 = vmatprep.subr.bf16.mxu0 %v7002_v26  ;;  %v8044_v53 = vpack.c.bf16 %v1007_v45, %v1003_v42  ;;  %v7022_v26 = vpack.c.bf16 %v1014_v47, %v1010_v46  ;;  %v1045_v41 = vld [vmem:[%s10335_s18 + $0xfa0] sm:$0xff]  ;;  %v1043_v42 = vld [vmem:[%s10335_s18 + $0xf90] sm:$0xff]  ;;  %v1050_v46 = vld [vmem:[%s10335_s18 + $0xfc8] sm:$0xff] }
 0x1d7   : > { %8027 = vmatprep.subr.bf16.mxu1 %v8026_v44  ;;  %v8046_v44 = vpack.c.bf16 %v1016_v50, %v1012_v48  ;;  %v1047_v45 = vld [vmem:[%s10335_s18 + $0xfb0] sm:$0xff]  ;;  %v1054_v47 = vld [vmem:[%s10335_s18 + $0xfe8] sm:$0xff]  ;;  %v1052_v48 = vld [vmem:[%s10335_s18 + $0xfd8] sm:$0xff] }
 0x1d8   : > { %v1056_v50 = vld [vmem:[%s10335_s18 + $0xff8] sm:$0xff] }
 0x1d9   : > { %7005 = vmatpush1.bf16.msra.mxu0 %v7004_v0  ;;  %v7024_v0 = vpack.c.bf16 %v1013_v55, %v1009_v54  ;;  %v1049_v54 = vld [vmem:[%s10335_s18 + $0xfc0] sm:$0xff] }
 0x1da   : > { %8029 = vmatpush1.bf16.msra.mxu1 %v8028_v1  ;;  %7007 = vmatprep.subr.bf16.mxu0 %v7006_v2  ;;  %v8048_v1 = vpack.c.bf16 %v1015_v57, %v1011_v56  ;;  %v7026_v2 = vpack.c.bf16 %v1022_v60, %v1018_v58  ;;  %v1053_v55 = vld [vmem:[%s10335_s18 + $0xfe0] sm:$0xff]  ;;  %v1051_v56 = vld [vmem:[%s10335_s18 + $0xfd0] sm:$0xff]  ;;  %v1058_v58 = vld [vmem:[%s10335_s18 + $0x1008] sm:$0xff] }
 0x1db   : > { %8031 = vmatprep.subr.bf16.mxu1 %v8030_v5  ;;  %v8050_v5 = vpack.c.bf16 %v1024_v62, %v1020_v61  ;;  %v1055_v57 = vld [vmem:[%s10335_s18 + $0xff0] sm:$0xff]  ;;  %v1062_v60 = vld [vmem:[%s10335_s18 + $0x1028] sm:$0xff]  ;;  %v1060_v61 = vld [vmem:[%s10335_s18 + $0x1018] sm:$0xff] }
 0x1dc   : > { %v1064_v62 = vld [vmem:[%s10335_s18 + $0x1038] sm:$0xff] }
 0x1dd   : > { %7009 = vmatpush1.bf16.msra.mxu0 %v7008_v11  ;;  %v7028_v11 = vpack.c.bf16 %v1021_v4, %v1017_v3  ;;  %v7046_v3 = vpack.c.bf16 %v1062_v60, %v1058_v58  ;;  %v1057_v4 = vld [vmem:[%s10335_s18 + $0x1000] sm:$0xff]  ;;  %v1095_v60 = vld [vmem:[%s10335_s18 + $0x1130] sm:$0xff] }
 0x1de   : > { %8033 = vmatpush1.bf16.msra.mxu1 %v8032_v13  ;;  %7011 = vmatprep.subr.bf16.mxu0 %v7010_v14  ;;  %v8052_v13 = vpack.c.bf16 %v1023_v6, %v1019_v27  ;;  %v7030_v14 = vpack.c.bf16 %v1030_v8, %v1026_v7  ;;  %v1061_v27 = vld [vmem:[%s10335_s18 + $0x1020] sm:$0xff]  ;;  %v8070_v6 = vpack.c.bf16 %v1064_v62, %v1060_v61  ;;  %v1063_v7 = vld [vmem:[%s10335_s18 + $0x1030] sm:$0xff]  ;;  %v1066_v8 = vld [vmem:[%s10335_s18 + $0x1048] sm:$0xff] }
 0x1df   : > { %8035 = vmatprep.subr.bf16.mxu1 %v8034_v18  ;;  %v8054_v18 = vpack.c.bf16 %v1032_v10, %v1028_v9  ;;  %v1070_v9 = vld [vmem:[%s10335_s18 + $0x1068] sm:$0xff] }
 0x1e0   : > { %v1098_v61 = vld [vmem:[%s10335_s18 + $0x1148] sm:$0xff] }
 0x1e1   : > { %7013 = vmatpush1.bf16.msra.mxu0 %v7012_v23  ;;  %v7032_v23 = vpack.c.bf16 %v1029_v16, %v1025_v15  ;;  %v7050_v16 = vpack.c.bf16 %v1070_v9, %v1066_v8  ;;  %v1102_v62 = vld [vmem:[%s10335_s18 + $0x1168] sm:$0xff]  ;;  %v1103_v9 = vld [vmem:[%s10335_s18 + $0x1170] sm:$0xff] }
 0x1e2   : > { %8037 = vmatpush1.bf16.msra.mxu1 %v8036_v24  ;;  %7015 = vmatprep.subr.bf16.mxu0 %v7014_v25  ;;  %v8056_v24 = vpack.c.bf16 %v1031_v19, %v1027_v17  ;;  %v7034_v25 = vpack.c.bf16 %v1038_v21, %v1034_v20  ;;  %v1065_v17 = vld [vmem:[%s10335_s18 + $0x1040] sm:$0xff]  ;;  %v1067_v19 = vld [vmem:[%s10335_s18 + $0x1050] sm:$0xff] }
 0x1e3   : > { %8039 = vmatprep.subr.bf16.mxu1 %v8038_v31  ;;  %v8058_v31 = vpack.c.bf16 %v1040_v22, %v1036_v51  ;;  %v1071_v21 = vld [vmem:[%s10335_s18 + $0x1070] sm:$0xff]  ;;  %v1074_v51 = vld [vmem:[%s10335_s18 + $0x1088] sm:$0xff] }
 0x1e4   : > { %v1078_v22 = vld [vmem:[%s10335_s18 + $0x10a8] sm:$0xff] }
 0x1e5   : > { %7017 = vmatpush1.bf16.msra.mxu0 %v7016_v37  ;;  %v7036_v37 = vpack.c.bf16 %v1037_v29, %v1033_v28  ;;  %v8076_v29 = vpack.c.bf16 %v1071_v21, %v1067_v19  ;;  %v1105_v19 = vld [vmem:[%s10335_s18 + $0x1180] sm:$0xff]  ;;  %v1107_v21 = vld [vmem:[%s10335_s18 + $0x1190] sm:$0xff] }
 0x1e6   : > { %8041 = vmatpush1.bf16.msra.mxu1 %v8040_v38  ;;  %7019 = vmatprep.subr.bf16.mxu0 %v7018_v39  ;;  %v8060_v38 = vpack.c.bf16 %v1039_v32, %v1035_v30  ;;  %v7038_v39 = vpack.c.bf16 %v1046_v34, %v1042_v33  ;;  %v7054_v30 = vpack.c.bf16 %v1078_v22, %v1074_v51  ;;  %v1077_v32 = vld [vmem:[%s10335_s18 + $0x10a0] sm:$0xff]  ;;  %v1075_v33 = vld [vmem:[%s10335_s18 + $0x1090] sm:$0xff] }
 0x1e7   : > { %8043 = vmatprep.subr.bf16.mxu1 %v8042_v43  ;;  %v8062_v43 = vpack.c.bf16 %v1048_v36, %v1044_v35  ;;  %v1079_v35 = vld [vmem:[%s10335_s18 + $0x10b0] sm:$0xff]  ;;  %v1082_v36 = vld [vmem:[%s10335_s18 + $0x10c8] sm:$0xff] }
 0x1e8   : > { %v1111_v22 = vld [vmem:[%s10335_s18 + $0x11b0] sm:$0xff] }
 0x1e9   : > { %7021 = vmatpush1.bf16.msra.mxu0 %v7020_v52  ;;  %v7040_v52 = vpack.c.bf16 %v1045_v41, %v1041_v40  ;;  %v8080_v40 = vpack.c.bf16 %v1079_v35, %v1075_v33  ;;  %v1117_v33 = vld [vmem:[%s10335_s18 + $0x11e0] sm:$0xff] }
 0x1ea   : > { %8045 = vmatpush1.bf16.msra.mxu1 %v8044_v53  ;;  %7023 = vmatprep.subr.bf16.mxu0 %v7022_v26  ;;  %v8064_v53 = vpack.c.bf16 %v1047_v45, %v1043_v42  ;;  %v7042_v26 = vpack.c.bf16 %v1054_v47, %v1050_v46  ;;  %v1081_v42 = vld [vmem:[%s10335_s18 + $0x10c0] sm:$0xff]  ;;  %v1083_v45 = vld [vmem:[%s10335_s18 + $0x10d0] sm:$0xff] }
 0x1eb   : > { %8047 = vmatprep.subr.bf16.mxu1 %v8046_v44  ;;  %v8066_v44 = vpack.c.bf16 %v1056_v50, %v1052_v48  ;;  %v1087_v47 = vld [vmem:[%s10335_s18 + $0x10f0] sm:$0xff]  ;;  %v1090_v48 = vld [vmem:[%s10335_s18 + $0x1108] sm:$0xff] }
 0x1ec   : > { %v1094_v50 = vld [vmem:[%s10335_s18 + $0x1128] sm:$0xff] }
 0x1ed   : > { %7025 = vmatpush1.bf16.msra.mxu0 %v7024_v0  ;;  %v10920_v0 = vld [vmem:[%s10328_s24 + $0x10] sm:$0xff] }
 0x1ee   : > { %8049 = vmatpush1.bf16.msra.mxu1 %v8048_v1  ;;  %7027 = vmatprep.subr.bf16.mxu0 %v7026_v2  ;;  %v7044_v1 = vpack.c.bf16 %v1053_v55, %v1049_v54  ;;  %v8068_v2 = vpack.c.bf16 %v1055_v57, %v1051_v56  ;;  %v10930_v10 = vrot.slane %v10920_v0, %v10455_v12  ;;  %v1089_v56 = vld [vmem:[%s10335_s18 + $0x1100] sm:$0xff]  ;;  %v1091_v57 = vld [vmem:[%s10335_s18 + $0x1110] sm:$0xff] }
 0x1ef   : > { %8051 = vmatprep.subr.bf16.mxu1 %v8050_v5  ;;  %v1059_v5 = vld [vmem:[%s10335_s18 + $0x1010] sm:$0xff]  ;;  %v8084_v54 = vpack.c.bf16 %v1087_v47, %v1083_v45  ;;  %v7062_v55 = vpack.c.bf16 %v1094_v50, %v1090_v48  ;;  %v1125_v45 = vld [vmem:[%s10335_s18 + $0x1220] sm:$0xff]  ;;  %v1130_v50 = vld [vmem:[%s10335_s18 + $0x1248] sm:$0xff] }
 0x1f0   : > { %v8072_v15 = vpack.c.bf16 %v1063_v7, %v1059_v5  ;;  %v1097_v5 = vld [vmem:[%s10335_s18 + $0x1140] sm:$0xff]  ;;  %v1099_v7 = vld [vmem:[%s10335_s18 + $0x1150] sm:$0xff] }
 0x1f1   : > { %7029 = vmatpush1.bf16.msra.mxu0 %v7028_v11  ;;  %v1068_v11 = vld [vmem:[%s10335_s18 + $0x1058] sm:$0xff]  ;;  %v1127_v48 = vld [vmem:[%s10335_s18 + $0x1230] sm:$0xff] }
 0x1f2   : > { %8053 = vmatpush1.bf16.msra.mxu1 %v8052_v13  ;;  %7031 = vmatprep.subr.bf16.mxu0 %v7030_v14  ;;  %v1072_v13 = vld [vmem:[%s10335_s18 + $0x1078] sm:$0xff]  ;;  %v7048_v14 = vpack.c.bf16 %v1061_v27, %v1057_v4  ;;  %v8088_v4 = vpack.c.bf16 %v1095_v60, %v1091_v57  ;;  %v7066_v27 = vpack.c.bf16 %v1102_v62, %v1098_v61  ;;  %v1133_v57 = vld [vmem:[%s10335_s18 + $0x1260] sm:$0xff]  ;;  %v1135_v61 = vld [vmem:[%s10335_s18 + $0x1270] sm:$0xff] }
 0x1f3   : > { %8055 = vmatprep.subr.bf16.mxu1 %v8054_v18  ;;  %v1069_v18 = vld [vmem:[%s10335_s18 + $0x1060] sm:$0xff]  ;;  %v8074_v20 = vpack.c.bf16 %v1072_v13, %v1068_v11  ;;  %v1106_v11 = vld [vmem:[%s10335_s18 + $0x1188] sm:$0xff] }
 0x1f4   : > { %v7052_v28 = vpack.c.bf16 %v1069_v18, %v1065_v17  ;;  %v1110_v13 = vld [vmem:[%s10335_s18 + $0x11a8] sm:$0xff]  ;;  %v8092_v17 = vpack.c.bf16 %v1103_v9, %v1099_v7  ;;  %v1141_v7 = vld [vmem:[%s10335_s18 + $0x12a0] sm:$0xff] }
 0x1f5   : > { %7033 = vmatpush1.bf16.msra.mxu0 %v7032_v23  ;;  %v2650_v23 = vcombine.high %v10930_v10, %v10930_v10  ;;  %v7070_v18 = vpack.c.bf16 %v1110_v13, %v1106_v11  ;;  %v1138_v62 = vld [vmem:[%s10335_s18 + $0x1288] sm:$0xff]  ;;  %v1143_v11 = vld [vmem:[%s10335_s18 + $0x12b0] sm:$0xff] }
 0x1f6   : > { %8057 = vmatpush1.bf16.msra.mxu1 %v8056_v24  ;;  %7035 = vmatprep.subr.bf16.mxu0 %v7034_v25  ;;  %v1076_v24 = vld [vmem:[%s10335_s18 + $0x1098] sm:$0xff]  ;;  %v1146_v13 = vld [vmem:[%s10335_s18 + $0x12c8] sm:$0xff] }
 0x1f7   : > { %8059 = vmatprep.subr.bf16.mxu1 %v8058_v31  ;;  %v1080_v25 = vld [vmem:[%s10335_s18 + $0x10b8] sm:$0xff]  ;;  %v1073_v31 = vld [vmem:[%s10335_s18 + $0x1080] sm:$0xff] }
 0x1f8   : > { %v8078_v34 = vpack.c.bf16 %v1080_v25, %v1076_v24  ;;  %v1118_v24 = vld [vmem:[%s10335_s18 + $0x11e8] sm:$0xff]  ;;  %v1116_v25 = vld [vmem:[%s10335_s18 + $0x11d8] sm:$0xff] }
 0x1f9   : > { %7037 = vmatpush1.bf16.msra.mxu0 %v7036_v37  ;;  %v1086_v37 = vld [vmem:[%s10335_s18 + $0x10e8] sm:$0xff] }
 0x1fa   : > { %8061 = vmatpush1.bf16.msra.mxu1 %v8060_v38  ;;  %7039 = vmatprep.subr.bf16.mxu0 %v7038_v39  ;;  %v1088_v38 = vld [vmem:[%s10335_s18 + $0x10f8] sm:$0xff]  ;;  %v7056_v39 = vpack.c.bf16 %v1077_v32, %v1073_v31  ;;  %v7058_v41 = vpack.c.bf16 %v1086_v37, %v1082_v36  ;;  %v1113_v32 = vld [vmem:[%s10335_s18 + $0x11c0] sm:$0xff]  ;;  %v1119_v36 = vld [vmem:[%s10335_s18 + $0x11f0] sm:$0xff] }
 0x1fb   : > { %8063 = vmatprep.subr.bf16.mxu1 %v8062_v43  ;;  %v1085_v43 = vld [vmem:[%s10335_s18 + $0x10e0] sm:$0xff]  ;;  %v1122_v37 = vld [vmem:[%s10335_s18 + $0x1208] sm:$0xff] }
 0x1fd   : > { %7041 = vmatpush1.bf16.msra.mxu0 %v7040_v52  ;;  %v1092_v52 = vld [vmem:[%s10335_s18 + $0x1118] sm:$0xff] }
 0x1fe   : > { %8065 = vmatpush1.bf16.msra.mxu1 %v8064_v53  ;;  %7043 = vmatprep.subr.bf16.mxu0 %v7042_v26  ;;  %v1096_v53 = vld [vmem:[%s10335_s18 + $0x1138] sm:$0xff]  ;;  %v7060_v26 = vpack.c.bf16 %v1085_v43, %v1081_v42  ;;  %v1121_v43 = vld [vmem:[%s10335_s18 + $0x1200] sm:$0xff] }
 0x1ff   : > { %8067 = vmatprep.subr.bf16.mxu1 %v8066_v44  ;;  %v1093_v44 = vld [vmem:[%s10335_s18 + $0x1120] sm:$0xff]  ;;  %v8086_v58 = vpack.c.bf16 %v1096_v53, %v1092_v52  ;;  %v1134_v52 = vld [vmem:[%s10335_s18 + $0x1268] sm:$0xff]  ;;  %v1132_v53 = vld [vmem:[%s10335_s18 + $0x1258] sm:$0xff] }
 0x201   : > { %7045 = vmatpush1.bf16.msra.mxu0 %v7044_v1  ;;  %v1100_v1 = vld [vmem:[%s10335_s18 + $0x1158] sm:$0xff] }
 0x202   : > { %8069 = vmatpush1.bf16.msra.mxu1 %v8068_v2  ;;  %7047 = vmatprep.subr.bf16.mxu0 %v7046_v3  ;;  %v1104_v2 = vld [vmem:[%s10335_s18 + $0x1178] sm:$0xff]  ;;  %v7064_v3 = vpack.c.bf16 %v1093_v44, %v1089_v56  ;;  %v7082_v56 = vpack.c.bf16 %v1134_v52, %v1130_v50  ;;  %v1129_v44 = vld [vmem:[%s10335_s18 + $0x1240] sm:$0xff]  ;;  %v1167_v50 = vld [vmem:[%s10335_s18 + $0x1370] sm:$0xff] }
 0x203   : > { %8071 = vmatprep.subr.bf16.mxu1 %v8070_v6  ;;  %v1101_v6 = vld [vmem:[%s10335_s18 + $0x1160] sm:$0xff]  ;;  %v8090_v8 = vpack.c.bf16 %v1104_v2, %v1100_v1  ;;  %v1142_v1 = vld [vmem:[%s10335_s18 + $0x12a8] sm:$0xff]  ;;  %v1140_v2 = vld [vmem:[%s10335_s18 + $0x1298] sm:$0xff] }
 0x204   : > { %3047 = vmatmul.mubr.f32.vlgmr.msra.gmra.mrb[0].mxu0 %v10791_v59  ;;  %v1170_v52 = vld [vmem:[%s10335_s18 + $0x1388] sm:$0xff] }
 0x205   : > { %7049 = vmatpush1.bf16.msra.mxu0 %v7048_v14  ;;  %4183 = vmatmul.mubr.f32.vlgmr.msra.gmra.mrb[0].mxu1 %v10791_v59  ;;  %v1084_v59 = vld [vmem:[%s10335_s18 + $0x10d8] sm:$0xff] }
 0x206   : > { %8073 = vmatpush1.bf16.msra.mxu1 %v8072_v15  ;;  %7051 = vmatprep.subr.bf16.mxu0 %v7050_v16  ;;  %v8082_v46 = vpack.c.bf16 %v1088_v38, %v1084_v59  ;;  %v1108_v14 = vld [vmem:[%s10335_s18 + $0x1198] sm:$0xff]  ;;  %v7068_v16 = vpack.c.bf16 %v1101_v6, %v1097_v5  ;;  %v1126_v59 = vld [vmem:[%s10335_s18 + $0x1228] sm:$0xff]  ;;  %v7086_v5 = vpack.c.bf16 %v1142_v1, %v1138_v62  ;;  %v1137_v6 = vld [vmem:[%s10335_s18 + $0x1280] sm:$0xff] }
 0x207   : > { %8075 = vmatprep.subr.bf16.mxu1 %v8074_v20  ;;  %3117 = vmatprep.mubr.f32.mxu0 %v2650_v23  ;;  %v1112_v15 = vld [vmem:[%s10335_s18 + $0x11b8] sm:$0xff]  ;;  %v1109_v20 = vld [vmem:[%s10335_s18 + $0x11a0] sm:$0xff]  ;;  %v7078_v42 = vpack.c.bf16 %v1126_v59, %v1122_v37  ;;  %v1159_v37 = vld [vmem:[%s10335_s18 + $0x1330] sm:$0xff] }
 0x208   : > { %4253 = vmatprep.mubr.f32.mxu1 %v2650_v23  ;;  %v8094_v51 = vpack.c.bf16 %v1112_v15, %v1108_v14  ;;  %v1114_v23 = vld [vmem:[%s10335_s18 + $0x11c8] sm:$0xff]  ;;  %v1124_v38 = vld [vmem:[%s10335_s18 + $0x1218] sm:$0xff]  ;;  %v1175_v62 = vld [vmem:[%s10335_s18 + $0x13b0] sm:$0xff] }
 0x209   : > { %7053 = vmatpush1.bf16.msra.mxu0 %v7052_v28  ;;  %v1120_v28 = vld [vmem:[%s10335_s18 + $0x11f8] sm:$0xff]  ;;  %v7074_v31 = vpack.c.bf16 %v1118_v24, %v1114_v23  ;;  %v1150_v14 = vld [vmem:[%s10335_s18 + $0x12e8] sm:$0xff]  ;;  %v1151_v23 = vld [vmem:[%s10335_s18 + $0x12f0] sm:$0xff] }
 0x20a   : > { %8077 = vmatpush1.bf16.msra.mxu1 %v8076_v29  ;;  %7055 = vmatprep.subr.bf16.mxu0 %v7054_v30  ;;  %v7072_v29 = vpack.c.bf16 %v1109_v20, %v1105_v19  ;;  %v8096_v30 = vpack.c.bf16 %v1111_v22, %v1107_v21  ;;  %v8098_v35 = vpack.c.bf16 %v1120_v28, %v1116_v25  ;;  %v1148_v15 = vld [vmem:[%s10335_s18 + $0x12d8] sm:$0xff]  ;;  %v1145_v20 = vld [vmem:[%s10335_s18 + $0x12c0] sm:$0xff]  ;;  %v1154_v24 = vld [vmem:[%s10335_s18 + $0x1308] sm:$0xff] }
 0x20b   : > { %8079 = vmatprep.subr.bf16.mxu1 %v8078_v34  ;;  %v1115_v34 = vld [vmem:[%s10335_s18 + $0x11d0] sm:$0xff]  ;;  %v7090_v19 = vpack.c.bf16 %v1150_v14, %v1146_v13  ;;  %v1149_v21 = vld [vmem:[%s10335_s18 + $0x12e0] sm:$0xff]  ;;  %v1158_v25 = vld [vmem:[%s10335_s18 + $0x1328] sm:$0xff] }
 0x20c   : > { %v1156_v28 = vld [vmem:[%s10335_s18 + $0x1318] sm:$0xff]  ;;  %v1162_v59 = vld [vmem:[%s10335_s18 + $0x1348] sm:$0xff]  ;;  %v1183_v13 = vld [vmem:[%s10335_s18 + $0x13f0] sm:$0xff] }
 0x20d   : > { %7057 = vmatpush1.bf16.msra.mxu0 %v7056_v39  ;;  %v1128_v39 = vld [vmem:[%s10335_s18 + $0x1238] sm:$0xff]  ;;  %v1178_v1 = vld [vmem:[%s10335_s18 + $0x13c8] sm:$0xff] }
 0x20e   : > { %8081 = vmatpush1.bf16.msra.mxu1 %v8080_v40  ;;  %7059 = vmatprep.subr.bf16.mxu0 %v7058_v41  ;;  %v7076_v40 = vpack.c.bf16 %v1117_v33, %v1113_v32  ;;  %v8100_v41 = vpack.c.bf16 %v1119_v36, %v1115_v34  ;;  %v8102_v47 = vpack.c.bf16 %v1128_v39, %v1124_v38  ;;  %v1153_v33 = vld [vmem:[%s10335_s18 + $0x1300] sm:$0xff]  ;;  %v1166_v38 = vld [vmem:[%s10335_s18 + $0x1368] sm:$0xff]  ;;  %v1164_v39 = vld [vmem:[%s10335_s18 + $0x1358] sm:$0xff] }
 0x20f   : > { %8083 = vmatprep.subr.bf16.mxu1 %v8082_v46  ;;  %v1123_v46 = vld [vmem:[%s10335_s18 + $0x1210] sm:$0xff]  ;;  %v7094_v32 = vpack.c.bf16 %v1158_v25, %v1154_v24  ;;  %v1157_v34 = vld [vmem:[%s10335_s18 + $0x1320] sm:$0xff]  ;;  %v1186_v14 = vld [vmem:[%s10335_s18 + $0x1408] sm:$0xff] }
 0x210   : > { %v1194_v25 = vld [vmem:[%s10335_s18 + $0x1448] sm:$0xff] }
 0x211   : > { %7061 = vmatpush1.bf16.msra.mxu0 %v7060_v26  ;;  %v1136_v26 = vld [vmem:[%s10335_s18 + $0x1278] sm:$0xff] }
 0x212   : > { %8085 = vmatpush1.bf16.msra.mxu1 %v8084_v54  ;;  %7063 = vmatprep.subr.bf16.mxu0 %v7062_v55  ;;  %v7080_v54 = vpack.c.bf16 %v1125_v45, %v1121_v43  ;;  %v8104_v55 = vpack.c.bf16 %v1127_v48, %v1123_v46  ;;  %v8106_v60 = vpack.c.bf16 %v1136_v26, %v1132_v53  ;;  %v1161_v45 = vld [vmem:[%s10335_s18 + $0x1340] sm:$0xff]  ;;  %v1174_v53 = vld [vmem:[%s10335_s18 + $0x13a8] sm:$0xff]  ;;  %v1172_v26 = vld [vmem:[%s10335_s18 + $0x1398] sm:$0xff] }
 0x213   : > { %8087 = vmatprep.subr.bf16.mxu1 %v8086_v58  ;;  %v1131_v58 = vld [vmem:[%s10335_s18 + $0x1250] sm:$0xff]  ;;  %v7098_v43 = vpack.c.bf16 %v1166_v38, %v1162_v59  ;;  %v1165_v46 = vld [vmem:[%s10335_s18 + $0x1360] sm:$0xff] }
 0x214   : > { %v1199_v38 = vld [vmem:[%s10335_s18 + $0x1470] sm:$0xff] }
 0x215   : > { %7065 = vmatpush1.bf16.msra.mxu0 %v7064_v3  ;;  %v1144_v3 = vld [vmem:[%s10335_s18 + $0x12b8] sm:$0xff] }
 0x216   : > { %8089 = vmatpush1.bf16.msra.mxu1 %v8088_v4  ;;  %7067 = vmatprep.subr.bf16.mxu0 %v7066_v27  ;;  %v7084_v4 = vpack.c.bf16 %v1133_v57, %v1129_v44  ;;  %v8108_v27 = vpack.c.bf16 %v1135_v61, %v1131_v58  ;;  %v8110_v9 = vpack.c.bf16 %v1144_v3, %v1140_v2  ;;  %v1169_v57 = vld [vmem:[%s10335_s18 + $0x1380] sm:$0xff]  ;;  %v1182_v2 = vld [vmem:[%s10335_s18 + $0x13e8] sm:$0xff]  ;;  %v1180_v3 = vld [vmem:[%s10335_s18 + $0x13d8] sm:$0xff] }
 0x217   : > { %8091 = vmatprep.subr.bf16.mxu1 %v8090_v8  ;;  %v1139_v8 = vld [vmem:[%s10335_s18 + $0x1290] sm:$0xff]  ;;  %v7102_v44 = vpack.c.bf16 %v1174_v53, %v1170_v52  ;;  %v1173_v58 = vld [vmem:[%s10335_s18 + $0x13a0] sm:$0xff] }
 0x218   : > { %v1203_v52 = vld [vmem:[%s10335_s18 + $0x1490] sm:$0xff] }
 0x219   : > { %7069 = vmatpush1.bf16.msra.mxu0 %v7068_v16  ;;  %v1152_v16 = vld [vmem:[%s10335_s18 + $0x12f8] sm:$0xff] }
 0x21a   : > { %8093 = vmatpush1.bf16.msra.mxu1 %v8092_v17  ;;  %7071 = vmatprep.subr.bf16.mxu0 %v7070_v18  ;;  %v7088_v17 = vpack.c.bf16 %v1141_v7, %v1137_v6  ;;  %v8112_v18 = vpack.c.bf16 %v1143_v11, %v1139_v8  ;;  %v8114_v22 = vpack.c.bf16 %v1152_v16, %v1148_v15  ;;  %v1177_v7 = vld [vmem:[%s10335_s18 + $0x13c0] sm:$0xff]  ;;  %v1190_v15 = vld [vmem:[%s10335_s18 + $0x1428] sm:$0xff] }
 0x21b   : > { %8095 = vmatprep.subr.bf16.mxu1 %v8094_v51  ;;  %v1147_v51 = vld [vmem:[%s10335_s18 + $0x12d0] sm:$0xff]  ;;  %v7106_v6 = vpack.c.bf16 %v1182_v2, %v1178_v1  ;;  %v1181_v8 = vld [vmem:[%s10335_s18 + $0x13e0] sm:$0xff]  ;;  %v2635_v16 = vcombine.high %v10920_v0, %v10920_v0 }
 0x21c   : > { %v1191_v0 = vld [vmem:[%s10335_s18 + $0x1430] sm:$0xff] }
 0x21d   : > { %7073 = vmatpush1.bf16.msra.mxu0 %v7072_v29  ;;  %v1160_v29 = vld [vmem:[%s10335_s18 + $0x1338] sm:$0xff]  ;;  %v1215_v2 = vld [vmem:[%s10335_s18 + $0x14f0] sm:$0xff] }
 0x21e   : > { %8097 = vmatpush1.bf16.msra.mxu1 %v8096_v30  ;;  %7075 = vmatprep.subr.bf16.mxu0 %v7074_v31  ;;  %v7092_v30 = vpack.c.bf16 %v1149_v21, %v1145_v20  ;;  %v8116_v31 = vpack.c.bf16 %v1151_v23, %v1147_v51  ;;  %v8118_v36 = vpack.c.bf16 %v1160_v29, %v1156_v28  ;;  %v1185_v51 = vld [vmem:[%s10335_s18 + $0x1400] sm:$0xff]  ;;  %v1187_v23 = vld [vmem:[%s10335_s18 + $0x1410] sm:$0xff]  ;;  %v1198_v28 = vld [vmem:[%s10335_s18 + $0x1468] sm:$0xff] }
 0x21f   : > { %8099 = vmatprep.subr.bf16.mxu1 %v8098_v35  ;;  %v1155_v35 = vld [vmem:[%s10335_s18 + $0x1310] sm:$0xff]  ;;  %v7110_v21 = vpack.c.bf16 %v1190_v15, %v1186_v14  ;;  %v11067_v29 = vrot.slane %v2635_v16, %v10455_v12  ;;  %v1226_v16 = vld [vmem:[%s10335_s18 + $0x1548] sm:$0xff] }
 0x220   : > { %v1223_v15 = vld [vmem:[%s10335_s18 + $0x1530] sm:$0xff] }
 0x221   : > { %7077 = vmatpush1.bf16.msra.mxu0 %v7076_v40  ;;  %v1168_v40 = vld [vmem:[%s10335_s18 + $0x1378] sm:$0xff] }
 0x222   : > { %8101 = vmatpush1.bf16.msra.mxu1 %v8100_v41  ;;  %7079 = vmatprep.subr.bf16.mxu0 %v7078_v42  ;;  %v7096_v41 = vpack.c.bf16 %v1157_v34, %v1153_v33  ;;  %v8120_v42 = vpack.c.bf16 %v1159_v37, %v1155_v35  ;;  %v8122_v48 = vpack.c.bf16 %v1168_v40, %v1164_v39  ;;  %v1193_v35 = vld [vmem:[%s10335_s18 + $0x1440] sm:$0xff]  ;;  %v1195_v37 = vld [vmem:[%s10335_s18 + $0x1450] sm:$0xff]  ;;  %v1202_v39 = vld [vmem:[%s10335_s18 + $0x1488] sm:$0xff] }
 0x223   : > { %8103 = vmatprep.subr.bf16.mxu1 %v8102_v47  ;;  %v1163_v47 = vld [vmem:[%s10335_s18 + $0x1350] sm:$0xff]  ;;  %v8136_v33 = vpack.c.bf16 %v1191_v0, %v1187_v23  ;;  %v7114_v34 = vpack.c.bf16 %v1198_v28, %v1194_v25  ;;  %v1206_v40 = vld [vmem:[%s10335_s18 + $0x14a8] sm:$0xff]  ;;  %v1229_v23 = vld [vmem:[%s10335_s18 + $0x1560] sm:$0xff] }
 0x224   : > { %v1231_v25 = vld [vmem:[%s10335_s18 + $0x1570] sm:$0xff]  ;;  %v1234_v28 = vld [vmem:[%s10335_s18 + $0x1588] sm:$0xff] }
 0x225   : > { %7081 = vmatpush1.bf16.msra.mxu0 %v7080_v54  ;;  %v1176_v54 = vld [vmem:[%s10335_s18 + $0x13b8] sm:$0xff] }
 0x226   : > { %8105 = vmatpush1.bf16.msra.mxu1 %v8104_v55  ;;  %7083 = vmatprep.subr.bf16.mxu0 %v7082_v56  ;;  %v7100_v55 = vpack.c.bf16 %v1165_v46, %v1161_v45  ;;  %v8124_v56 = vpack.c.bf16 %v1167_v50, %v1163_v47  ;;  %v8126_v61 = vpack.c.bf16 %v1176_v54, %v1172_v26  ;;  %v1205_v50 = vld [vmem:[%s10335_s18 + $0x14a0] sm:$0xff]  ;;  %v1207_v26 = vld [vmem:[%s10335_s18 + $0x14b0] sm:$0xff]  ;;  %v1210_v54 = vld [vmem:[%s10335_s18 + $0x14c8] sm:$0xff] }
 0x227   : > { %8107 = vmatprep.subr.bf16.mxu1 %v8106_v60  ;;  %v1171_v60 = vld [vmem:[%s10335_s18 + $0x1390] sm:$0xff]  ;;  %v8140_v46 = vpack.c.bf16 %v1199_v38, %v1195_v37  ;;  %v7118_v47 = vpack.c.bf16 %v1206_v40, %v1202_v39  ;;  %v1237_v37 = vld [vmem:[%s10335_s18 + $0x15a0] sm:$0xff]  ;;  %v1242_v40 = vld [vmem:[%s10335_s18 + $0x15c8] sm:$0xff] }
 0x228   : > { %v1239_v39 = vld [vmem:[%s10335_s18 + $0x15b0] sm:$0xff] }
 0x229   : > { %7085 = vmatpush1.bf16.msra.mxu0 %v7084_v4  ;;  %v1184_v4 = vld [vmem:[%s10335_s18 + $0x13f8] sm:$0xff] }
 0x22a   : > { %8109 = vmatpush1.bf16.msra.mxu1 %v8108_v27  ;;  %7087 = vmatprep.subr.bf16.mxu0 %v7086_v5  ;;  %v7104_v27 = vpack.c.bf16 %v1173_v58, %v1169_v57  ;;  %v8128_v5 = vpack.c.bf16 %v1175_v62, %v1171_v60  ;;  %v8130_v11 = vpack.c.bf16 %v1184_v4, %v1180_v3  ;;  %v1209_v60 = vld [vmem:[%s10335_s18 + $0x14c0] sm:$0xff]  ;;  %v1211_v62 = vld [vmem:[%s10335_s18 + $0x14d0] sm:$0xff]  ;;  %v1218_v3 = vld [vmem:[%s10335_s18 + $0x1508] sm:$0xff] }
 0x22b   : > { %8111 = vmatprep.subr.bf16.mxu1 %v8110_v9  ;;  %v1179_v9 = vld [vmem:[%s10335_s18 + $0x13d0] sm:$0xff]  ;;  %v8144_v57 = vpack.c.bf16 %v1207_v26, %v1203_v52  ;;  %v1222_v4 = vld [vmem:[%s10335_s18 + $0x1528] sm:$0xff] }
 0x22c   : > { %v8132_v20 = vpack.c.bf16 %v1183_v13, %v1179_v9  ;;  %v1217_v9 = vld [vmem:[%s10335_s18 + $0x1500] sm:$0xff]  ;;  %v1219_v13 = vld [vmem:[%s10335_s18 + $0x1510] sm:$0xff] }
 0x22d   : > { %7089 = vmatpush1.bf16.msra.mxu0 %v7088_v17  ;;  %v1188_v17 = vld [vmem:[%s10335_s18 + $0x1418] sm:$0xff]  ;;  %v1243_v52 = vld [vmem:[%s10335_s18 + $0x15d0] sm:$0xff] }
 0x22e   : > { %8113 = vmatpush1.bf16.msra.mxu1 %v8112_v18  ;;  %7091 = vmatprep.subr.bf16.mxu0 %v7090_v19  ;;  %v1192_v18 = vld [vmem:[%s10335_s18 + $0x1438] sm:$0xff]  ;;  %v7108_v19 = vpack.c.bf16 %v1181_v8, %v1177_v7  ;;  %v8148_v7 = vpack.c.bf16 %v1215_v2, %v1211_v62  ;;  %v7126_v8 = vpack.c.bf16 %v1222_v4, %v1218_v3  ;;  %v1247_v26 = vld [vmem:[%s10335_s18 + $0x15f0] sm:$0xff]  ;;  %v1258_v3 = vld [vmem:[%s10335_s18 + $0x1648] sm:$0xff] }
 0x22f   : > { %8115 = vmatprep.subr.bf16.mxu1 %v8114_v22  ;;  %v1189_v22 = vld [vmem:[%s10335_s18 + $0x1420] sm:$0xff]  ;;  %v8134_v24 = vpack.c.bf16 %v1192_v18, %v1188_v17  ;;  %v1230_v17 = vld [vmem:[%s10335_s18 + $0x1568] sm:$0xff]  ;;  %v1228_v18 = vld [vmem:[%s10335_s18 + $0x1558] sm:$0xff] }
 0x230   : > { %v1251_v62 = vld [vmem:[%s10335_s18 + $0x1610] sm:$0xff]  ;;  %v1262_v4 = vld [vmem:[%s10335_s18 + $0x1668] sm:$0xff] }
 0x231   : > { %7093 = vmatpush1.bf16.msra.mxu0 %v7092_v30  ;;  %v1196_v30 = vld [vmem:[%s10335_s18 + $0x1458] sm:$0xff]  ;;  %v1255_v2 = vld [vmem:[%s10335_s18 + $0x1630] sm:$0xff] }
 0x232   : > { %8117 = vmatpush1.bf16.msra.mxu1 %v8116_v31  ;;  %7095 = vmatprep.subr.bf16.mxu0 %v7094_v32  ;;  %v1200_v31 = vld [vmem:[%s10335_s18 + $0x1478] sm:$0xff]  ;;  %v7112_v32 = vpack.c.bf16 %v1189_v22, %v1185_v51  ;;  %v7130_v51 = vpack.c.bf16 %v1230_v17, %v1226_v16  ;;  %v1225_v22 = vld [vmem:[%s10335_s18 + $0x1540] sm:$0xff]  ;;  %v1266_v16 = vld [vmem:[%s10335_s18 + $0x1688] sm:$0xff] }
 0x233   : > { %8119 = vmatprep.subr.bf16.mxu1 %v8118_v36  ;;  %v1197_v36 = vld [vmem:[%s10335_s18 + $0x1460] sm:$0xff]  ;;  %v8138_v59 = vpack.c.bf16 %v1200_v31, %v1196_v30  ;;  %v1238_v30 = vld [vmem:[%s10335_s18 + $0x15a8] sm:$0xff]  ;;  %v1236_v31 = vld [vmem:[%s10335_s18 + $0x1598] sm:$0xff] }
 0x234   : > { %v7116_v45 = vpack.c.bf16 %v1197_v36, %v1193_v35  ;;  %v7134_v35 = vpack.c.bf16 %v1238_v30, %v1234_v28  ;;  %v1233_v36 = vld [vmem:[%s10335_s18 + $0x1580] sm:$0xff]  ;;  %v1270_v17 = vld [vmem:[%s10335_s18 + $0x16a8] sm:$0xff] }
 0x235   : > { %7097 = vmatpush1.bf16.msra.mxu0 %v7096_v41  ;;  %v2651_v41 = vcombine.high %v11067_v29, %v11067_v29  ;;  %v1274_v28 = vld [vmem:[%s10335_s18 + $0x16c8] sm:$0xff] }
 0x236   : > { %8121 = vmatpush1.bf16.msra.mxu1 %v8120_v42  ;;  %7099 = vmatprep.subr.bf16.mxu0 %v7098_v43  ;;  %v1204_v42 = vld [vmem:[%s10335_s18 + $0x1498] sm:$0xff]  ;;  %v1278_v30 = vld [vmem:[%s10335_s18 + $0x16e8] sm:$0xff] }
 0x237   : > { %8123 = vmatprep.subr.bf16.mxu1 %v8122_v48  ;;  %v1208_v43 = vld [vmem:[%s10335_s18 + $0x14b8] sm:$0xff]  ;;  %v1201_v48 = vld [vmem:[%s10335_s18 + $0x1480] sm:$0xff] }
 0x238   : > { %v8142_v53 = vpack.c.bf16 %v1208_v43, %v1204_v42  ;;  %v1244_v42 = vld [vmem:[%s10335_s18 + $0x15d8] sm:$0xff] }
 0x239   : > { %7101 = vmatpush1.bf16.msra.mxu0 %v7100_v55  ;;  %v1214_v55 = vld [vmem:[%s10335_s18 + $0x14e8] sm:$0xff]  ;;  %v1248_v43 = vld [vmem:[%s10335_s18 + $0x15f8] sm:$0xff] }
 0x23a   : > { %8125 = vmatpush1.bf16.msra.mxu1 %v8124_v56  ;;  %7103 = vmatprep.subr.bf16.mxu0 %v7102_v44  ;;  %v1216_v56 = vld [vmem:[%s10335_s18 + $0x14f8] sm:$0xff]  ;;  %v7120_v44 = vpack.c.bf16 %v1205_v50, %v1201_v48  ;;  %v7122_v58 = vpack.c.bf16 %v1214_v55, %v1210_v54  ;;  %v1241_v48 = vld [vmem:[%s10335_s18 + $0x15c0] sm:$0xff]  ;;  %v1250_v54 = vld [vmem:[%s10335_s18 + $0x1608] sm:$0xff] }
 0x23b   : > { %8127 = vmatprep.subr.bf16.mxu1 %v8126_v61  ;;  %v1213_v61 = vld [vmem:[%s10335_s18 + $0x14e0] sm:$0xff]  ;;  %v1254_v55 = vld [vmem:[%s10335_s18 + $0x1628] sm:$0xff] }
 0x23c   : > { %v1245_v50 = vld [vmem:[%s10335_s18 + $0x15e0] sm:$0xff] }
 0x23d   : > { %7105 = vmatpush1.bf16.msra.mxu0 %v7104_v27  ;;  %v1220_v27 = vld [vmem:[%s10335_s18 + $0x1518] sm:$0xff] }
 0x23e   : > { %8129 = vmatpush1.bf16.msra.mxu1 %v8128_v5  ;;  %7107 = vmatprep.subr.bf16.mxu0 %v7106_v6  ;;  %v1224_v5 = vld [vmem:[%s10335_s18 + $0x1538] sm:$0xff]  ;;  %v7124_v6 = vpack.c.bf16 %v1213_v61, %v1209_v60  ;;  %v1249_v60 = vld [vmem:[%s10335_s18 + $0x1600] sm:$0xff] }
 0x23f   : > { %8131 = vmatprep.subr.bf16.mxu1 %v8130_v11  ;;  %v1221_v11 = vld [vmem:[%s10335_s18 + $0x1520] sm:$0xff]  ;;  %v8150_v14 = vpack.c.bf16 %v1224_v5, %v1220_v27  ;;  %v1260_v27 = vld [vmem:[%s10335_s18 + $0x1658] sm:$0xff] }
 0x240   : > { %v1253_v61 = vld [vmem:[%s10335_s18 + $0x1620] sm:$0xff]  ;;  %v1264_v5 = vld [vmem:[%s10335_s18 + $0x1678] sm:$0xff] }
 0x241   : > { %7109 = vmatpush1.bf16.msra.mxu0 %v7108_v19  ;;  %v1232_v19 = vld [vmem:[%s10335_s18 + $0x1578] sm:$0xff] }
 0x242   : > { %8133 = vmatpush1.bf16.msra.mxu1 %v8132_v20  ;;  %7111 = vmatprep.subr.bf16.mxu0 %v7110_v21  ;;  %v7128_v20 = vpack.c.bf16 %v1221_v11, %v1217_v9  ;;  %v8152_v21 = vpack.c.bf16 %v1223_v15, %v1219_v13  ;;  %v8154_v0 = vpack.c.bf16 %v1232_v19, %v1228_v18  ;;  %v1257_v9 = vld [vmem:[%s10335_s18 + $0x1640] sm:$0xff]  ;;  %v1259_v13 = vld [vmem:[%s10335_s18 + $0x1650] sm:$0xff]  ;;  %v1268_v18 = vld [vmem:[%s10335_s18 + $0x1698] sm:$0xff] }
 0x243   : > { %8135 = vmatprep.subr.bf16.mxu1 %v8134_v24  ;;  %v1227_v24 = vld [vmem:[%s10335_s18 + $0x1550] sm:$0xff]  ;;  %v1261_v11 = vld [vmem:[%s10335_s18 + $0x1660] sm:$0xff]  ;;  %v1272_v19 = vld [vmem:[%s10335_s18 + $0x16b8] sm:$0xff] }
 0x244   : > { %3118 = vmatmul.mubr.f32.vlgmr.msra.gmra.mrb[0].mxu0 %v10930_v10  ;;  %v1263_v15 = vld [vmem:[%s10335_s18 + $0x1670] sm:$0xff] }
 0x245   : > { %7113 = vmatpush1.bf16.msra.mxu0 %v7112_v32  ;;  %4254 = vmatmul.mubr.f32.vlgmr.msra.gmra.mrb[0].mxu1 %v10930_v10  ;;  %v1212_v10 = vld [vmem:[%s10335_s18 + $0x14d8] sm:$0xff] }
 0x246   : > { %8137 = vmatpush1.bf16.msra.mxu1 %v8136_v33  ;;  %7115 = vmatprep.subr.bf16.mxu0 %v7114_v34  ;;  %v8146_v1 = vpack.c.bf16 %v1216_v56, %v1212_v10  ;;  %v1240_v32 = vld [vmem:[%s10335_s18 + $0x15b8] sm:$0xff]  ;;  %v7132_v33 = vpack.c.bf16 %v1229_v23, %v1225_v22  ;;  %v8156_v34 = vpack.c.bf16 %v1231_v25, %v1227_v24  ;;  %v1265_v22 = vld [vmem:[%s10335_s18 + $0x1680] sm:$0xff]  ;;  %v1267_v24 = vld [vmem:[%s10335_s18 + $0x1690] sm:$0xff] }
 0x247   : > { %8139 = vmatprep.subr.bf16.mxu1 %v8138_v59  ;;  %3188 = vmatprep.mubr.f32.mxu0 %v2651_v41  ;;  %v1235_v59 = vld [vmem:[%s10335_s18 + $0x1590] sm:$0xff]  ;;  %v8158_v38 = vpack.c.bf16 %v1240_v32, %v1236_v31  ;;  %v1252_v10 = vld [vmem:[%s10335_s18 + $0x1618] sm:$0xff]  ;;  %v1269_v23 = vld [vmem:[%s10335_s18 + $0x16a0] sm:$0xff] }
 0x248   : > { %4324 = vmatprep.mubr.f32.mxu1 %v2651_v41  ;;  %v1246_v41 = vld [vmem:[%s10335_s18 + $0x15e8] sm:$0xff]  ;;  %v1256_v56 = vld [vmem:[%s10335_s18 + $0x1638] sm:$0xff]  ;;  %v1271_v25 = vld [vmem:[%s10335_s18 + $0x16b0] sm:$0xff] }
 0x249   : > { %7117 = vmatpush1.bf16.msra.mxu0 %v7116_v45  ;;  %v7136_v45 = vpack.c.bf16 %v1237_v37, %v1233_v36  ;;  %v1276_v31 = vld [vmem:[%s10335_s18 + $0x16d8] sm:$0xff]  ;;  %v1273_v36 = vld [vmem:[%s10335_s18 + $0x16c0] sm:$0xff] }
 0x24a   : > { %8141 = vmatpush1.bf16.msra.mxu1 %v8140_v46  ;;  %7119 = vmatprep.subr.bf16.mxu0 %v7118_v47  ;;  %v8160_v46 = vpack.c.bf16 %v1239_v39, %v1235_v59  ;;  %v7138_v47 = vpack.c.bf16 %v1246_v41, %v1242_v40  ;;  %v1280_v32 = vld [vmem:[%s10335_s18 + $0x16f8] sm:$0xff]  ;;  %v1277_v37 = vld [vmem:[%s10335_s18 + $0x16e0] sm:$0xff]  ;;  %v1275_v59 = vld [vmem:[%s10335_s18 + $0x16d0] sm:$0xff] }
 0x24b   : > { %8143 = vmatprep.subr.bf16.mxu1 %v8142_v53  ;;  %v8162_v53 = vpack.c.bf16 %v1248_v43, %v1244_v42  ;;  %v1279_v39 = vld [vmem:[%s10335_s18 + $0x16f0] sm:$0xff]  ;;  %v1282_v40 = vld [vmem:[%s10335_s18 + $0x1708] sm:$0xff]  ;;  %v1284_v42 = vld [vmem:[%s10335_s18 + $0x1718] sm:$0xff] }
 0x24c   : > { %v1286_v41 = vld [vmem:[%s10335_s18 + $0x1728] sm:$0xff]  ;;  %v1288_v43 = vld [vmem:[%s10335_s18 + $0x1738] sm:$0xff] }
 0x24d   : > { %7121 = vmatpush1.bf16.msra.mxu0 %v7120_v44  ;;  %v7140_v44 = vpack.c.bf16 %v1245_v50, %v1241_v48  ;;  %v1281_v48 = vld [vmem:[%s10335_s18 + $0x1700] sm:$0xff] }
 0x24e   : > { %8145 = vmatpush1.bf16.msra.mxu1 %v8144_v57  ;;  %7123 = vmatprep.subr.bf16.mxu0 %v7122_v58  ;;  %v8164_v57 = vpack.c.bf16 %v1247_v26, %v1243_v52  ;;  %v7142_v58 = vpack.c.bf16 %v1254_v55, %v1250_v54  ;;  %v1285_v50 = vld [vmem:[%s10335_s18 + $0x1720] sm:$0xff]  ;;  %v1283_v52 = vld [vmem:[%s10335_s18 + $0x1710] sm:$0xff]  ;;  %v1290_v54 = vld [vmem:[%s10335_s18 + $0x1748] sm:$0xff] }
 0x24f   : > { %8147 = vmatprep.subr.bf16.mxu1 %v8146_v1  ;;  %v8166_v1 = vpack.c.bf16 %v1256_v56, %v1252_v10  ;;  %v1287_v26 = vld [vmem:[%s10335_s18 + $0x1730] sm:$0xff]  ;;  %v1294_v55 = vld [vmem:[%s10335_s18 + $0x1768] sm:$0xff]  ;;  %v1292_v10 = vld [vmem:[%s10335_s18 + $0x1758] sm:$0xff] }
 0x250   : > { %v1296_v56 = vld [vmem:[%s10335_s18 + $0x1778] sm:$0xff] }
 0x251   : > { %7125 = vmatpush1.bf16.msra.mxu0 %v7124_v6  ;;  %v7144_v6 = vpack.c.bf16 %v1253_v61, %v1249_v60  ;;  %v1289_v60 = vld [vmem:[%s10335_s18 + $0x1740] sm:$0xff] }
 0x252   : > { %8149 = vmatpush1.bf16.msra.mxu1 %v8148_v7  ;;  %7127 = vmatprep.subr.bf16.mxu0 %v7126_v8  ;;  %v8168_v7 = vpack.c.bf16 %v1255_v2, %v1251_v62  ;;  %v7146_v8 = vpack.c.bf16 %v1262_v4, %v1258_v3  ;;  %v1293_v61 = vld [vmem:[%s10335_s18 + $0x1760] sm:$0xff]  ;;  %v1291_v62 = vld [vmem:[%s10335_s18 + $0x1750] sm:$0xff]  ;;  %v1298_v3 = vld [vmem:[%s10335_s18 + $0x1788] sm:$0xff] }
 0x253   : > { %8151 = vmatprep.subr.bf16.mxu1 %v8150_v14  ;;  %v8170_v14 = vpack.c.bf16 %v1264_v5, %v1260_v27  ;;  %v1295_v2 = vld [vmem:[%s10335_s18 + $0x1770] sm:$0xff]  ;;  %v1302_v4 = vld [vmem:[%s10335_s18 + $0x17a8] sm:$0xff]  ;;  %v1300_v27 = vld [vmem:[%s10335_s18 + $0x1798] sm:$0xff] }
 0x254   : > { %v1304_v5 = vld [vmem:[%s10335_s18 + $0x17b8] sm:$0xff] }
 0x255   : > { %7129 = vmatpush1.bf16.msra.mxu0 %v7128_v20  ;;  %v7148_v20 = vpack.c.bf16 %v1261_v11, %v1257_v9  ;;  %v1297_v9 = vld [vmem:[%s10335_s18 + $0x1780] sm:$0xff] }
 0x256   : > { %8153 = vmatpush1.bf16.msra.mxu1 %v8152_v21  ;;  %7131 = vmatprep.subr.bf16.mxu0 %v7130_v51  ;;  %v8172_v21 = vpack.c.bf16 %v1263_v15, %v1259_v13  ;;  %v7150_v51 = vpack.c.bf16 %v1270_v17, %v1266_v16  ;;  %v1301_v11 = vld [vmem:[%s10335_s18 + $0x17a0] sm:$0xff]  ;;  %v1299_v13 = vld [vmem:[%s10335_s18 + $0x1790] sm:$0xff]  ;;  %v1306_v16 = vld [vmem:[%s10335_s18 + $0x17c8] sm:$0xff] }
 0x257   : > { %8155 = vmatprep.subr.bf16.mxu1 %v8154_v0  ;;  %v8174_v0 = vpack.c.bf16 %v1272_v19, %v1268_v18  ;;  %v1303_v15 = vld [vmem:[%s10335_s18 + $0x17b0] sm:$0xff]  ;;  %v1310_v17 = vld [vmem:[%s10335_s18 + $0x17e8] sm:$0xff]  ;;  %v1308_v18 = vld [vmem:[%s10335_s18 + $0x17d8] sm:$0xff] }
 0x258   : > { %v1312_v19 = vld [vmem:[%s10335_s18 + $0x17f8] sm:$0xff] }
 0x259   : > { %7133 = vmatpush1.bf16.msra.mxu0 %v7132_v33  ;;  %v7152_v33 = vpack.c.bf16 %v1269_v23, %v1265_v22  ;;  %v1305_v22 = vld [vmem:[%s10335_s18 + $0x17c0] sm:$0xff] }
 0x25a   : > { %8157 = vmatpush1.bf16.msra.mxu1 %v8156_v34  ;;  %7135 = vmatprep.subr.bf16.mxu0 %v7134_v35  ;;  %v8176_v34 = vpack.c.bf16 %v1271_v25, %v1267_v24  ;;  %v7154_v35 = vpack.c.bf16 %v1278_v30, %v1274_v28  ;;  %v1309_v23 = vld [vmem:[%s10335_s18 + $0x17e0] sm:$0xff]  ;;  %v1307_v24 = vld [vmem:[%s10335_s18 + $0x17d0] sm:$0xff]  ;;  %v1314_v28 = vld [vmem:[%s10335_s18 + $0x1808] sm:$0xff] }
 0x25b   : > { %8159 = vmatprep.subr.bf16.mxu1 %v8158_v38  ;;  %v8178_v38 = vpack.c.bf16 %v1280_v32, %v1276_v31  ;;  %v1311_v25 = vld [vmem:[%s10335_s18 + $0x17f0] sm:$0xff]  ;;  %v1318_v30 = vld [vmem:[%s10335_s18 + $0x1828] sm:$0xff]  ;;  %v1316_v31 = vld [vmem:[%s10335_s18 + $0x1818] sm:$0xff] }
 0x25c   : > { %v1320_v32 = vld [vmem:[%s10335_s18 + $0x1838] sm:$0xff] }
 0x25d   : > { %7137 = vmatpush1.bf16.msra.mxu0 %v7136_v45  ;;  %v7156_v45 = vpack.c.bf16 %v1277_v37, %v1273_v36  ;;  %v7174_v36 = vpack.c.bf16 %v1318_v30, %v1314_v28  ;;  %v1313_v37 = vld [vmem:[%s10335_s18 + $0x1800] sm:$0xff]  ;;  %v1351_v30 = vld [vmem:[%s10335_s18 + $0x1930] sm:$0xff] }
 0x25e   : > { %8161 = vmatpush1.bf16.msra.mxu1 %v8160_v46  ;;  %7139 = vmatprep.subr.bf16.mxu0 %v7138_v47  ;;  %v8180_v46 = vpack.c.bf16 %v1279_v39, %v1275_v59  ;;  %v7158_v47 = vpack.c.bf16 %v1286_v41, %v1282_v40  ;;  %v1317_v59 = vld [vmem:[%s10335_s18 + $0x1820] sm:$0xff]  ;;  %v8198_v39 = vpack.c.bf16 %v1320_v32, %v1316_v31  ;;  %v1319_v40 = vld [vmem:[%s10335_s18 + $0x1830] sm:$0xff]  ;;  %v1322_v41 = vld [vmem:[%s10335_s18 + $0x1848] sm:$0xff] }
 0x25f   : > { %8163 = vmatprep.subr.bf16.mxu1 %v8162_v53  ;;  %v8182_v53 = vpack.c.bf16 %v1288_v43, %v1284_v42  ;;  %v1326_v42 = vld [vmem:[%s10335_s18 + $0x1868] sm:$0xff] }
 0x260   : > { %v1354_v31 = vld [vmem:[%s10335_s18 + $0x1948] sm:$0xff] }
 0x261   : > { %7141 = vmatpush1.bf16.msra.mxu0 %v7140_v44  ;;  %v7160_v44 = vpack.c.bf16 %v1285_v50, %v1281_v48  ;;  %v7178_v50 = vpack.c.bf16 %v1326_v42, %v1322_v41  ;;  %v1358_v32 = vld [vmem:[%s10335_s18 + $0x1968] sm:$0xff]  ;;  %v1359_v42 = vld [vmem:[%s10335_s18 + $0x1970] sm:$0xff] }
 0x262   : > { %8165 = vmatpush1.bf16.msra.mxu1 %v8164_v57  ;;  %7143 = vmatprep.subr.bf16.mxu0 %v7142_v58  ;;  %v8184_v57 = vpack.c.bf16 %v1287_v26, %v1283_v52  ;;  %v7162_v58 = vpack.c.bf16 %v1294_v55, %v1290_v54  ;;  %v1321_v52 = vld [vmem:[%s10335_s18 + $0x1840] sm:$0xff]  ;;  %v1323_v26 = vld [vmem:[%s10335_s18 + $0x1850] sm:$0xff] }
 0x263   : > { %8167 = vmatprep.subr.bf16.mxu1 %v8166_v1  ;;  %v8186_v1 = vpack.c.bf16 %v1296_v56, %v1292_v10  ;;  %v1327_v55 = vld [vmem:[%s10335_s18 + $0x1870] sm:$0xff]  ;;  %v1330_v10 = vld [vmem:[%s10335_s18 + $0x1888] sm:$0xff] }
 0x264   : > { %v1334_v56 = vld [vmem:[%s10335_s18 + $0x18a8] sm:$0xff] }
 0x265   : > { %7145 = vmatpush1.bf16.msra.mxu0 %v7144_v6  ;;  %v7164_v6 = vpack.c.bf16 %v1293_v61, %v1289_v60  ;;  %v8204_v61 = vpack.c.bf16 %v1327_v55, %v1323_v26  ;;  %v1361_v26 = vld [vmem:[%s10335_s18 + $0x1980] sm:$0xff]  ;;  %v1363_v55 = vld [vmem:[%s10335_s18 + $0x1990] sm:$0xff] }
 0x266   : > { %8169 = vmatpush1.bf16.msra.mxu1 %v8168_v7  ;;  %7147 = vmatprep.subr.bf16.mxu0 %v7146_v8  ;;  %v8188_v7 = vpack.c.bf16 %v1295_v2, %v1291_v62  ;;  %v7166_v8 = vpack.c.bf16 %v1302_v4, %v1298_v3  ;;  %v7182_v62 = vpack.c.bf16 %v1334_v56, %v1330_v10  ;;  %v1333_v2 = vld [vmem:[%s10335_s18 + $0x18a0] sm:$0xff]  ;;  %v1331_v3 = vld [vmem:[%s10335_s18 + $0x1890] sm:$0xff] }
 0x267   : > { %8171 = vmatprep.subr.bf16.mxu1 %v8170_v14  ;;  %v8190_v14 = vpack.c.bf16 %v1304_v5, %v1300_v27  ;;  %v1335_v27 = vld [vmem:[%s10335_s18 + $0x18b0] sm:$0xff]  ;;  %v1338_v5 = vld [vmem:[%s10335_s18 + $0x18c8] sm:$0xff] }
 0x268   : > { %v1367_v56 = vld [vmem:[%s10335_s18 + $0x19b0] sm:$0xff] }
 0x269   : > { %7149 = vmatpush1.bf16.msra.mxu0 %v7148_v20  ;;  %v7168_v20 = vpack.c.bf16 %v1301_v11, %v1297_v9  ;;  %v8208_v9 = vpack.c.bf16 %v1335_v27, %v1331_v3  ;;  %v1373_v3 = vld [vmem:[%s10335_s18 + $0x19e0] sm:$0xff] }
 0x26a   : > { %8173 = vmatpush1.bf16.msra.mxu1 %v8172_v21  ;;  %7151 = vmatprep.subr.bf16.mxu0 %v7150_v51  ;;  %v8192_v21 = vpack.c.bf16 %v1303_v15, %v1299_v13  ;;  %v7170_v51 = vpack.c.bf16 %v1310_v17, %v1306_v16  ;;  %v1337_v13 = vld [vmem:[%s10335_s18 + $0x18c0] sm:$0xff]  ;;  %v1339_v15 = vld [vmem:[%s10335_s18 + $0x18d0] sm:$0xff] }
 0x26b   : > { %8175 = vmatprep.subr.bf16.mxu1 %v8174_v0  ;;  %v8194_v0 = vpack.c.bf16 %v1312_v19, %v1308_v18  ;;  %v1343_v17 = vld [vmem:[%s10335_s18 + $0x18f0] sm:$0xff]  ;;  %v1346_v18 = vld [vmem:[%s10335_s18 + $0x1908] sm:$0xff] }
 0x26c   : > { %v1350_v19 = vld [vmem:[%s10335_s18 + $0x1928] sm:$0xff] }
 0x26d   : > { %7153 = vmatpush1.bf16.msra.mxu0 %v7152_v33  ;;  %v11196_v33 = vld [vmem:[%s10328_s24 + $0x18] sm:$0xff] }
 0x26e   : > { %8177 = vmatpush1.bf16.msra.mxu1 %v8176_v34  ;;  %7155 = vmatprep.subr.bf16.mxu0 %v7154_v35  ;;  %v7172_v34 = vpack.c.bf16 %v1309_v23, %v1305_v22  ;;  %v8196_v35 = vpack.c.bf16 %v1311_v25, %v1307_v24  ;;  %v11206_v43 = vrot.slane %v11196_v33, %v10455_v12  ;;  %v1345_v24 = vld [vmem:[%s10335_s18 + $0x1900] sm:$0xff]  ;;  %v1347_v25 = vld [vmem:[%s10335_s18 + $0x1910] sm:$0xff] }
 0x26f   : > { %8179 = vmatprep.subr.bf16.mxu1 %v8178_v38  ;;  %v1315_v38 = vld [vmem:[%s10335_s18 + $0x1810] sm:$0xff]  ;;  %v8212_v22 = vpack.c.bf16 %v1343_v17, %v1339_v15  ;;  %v7190_v23 = vpack.c.bf16 %v1350_v19, %v1346_v18  ;;  %v1381_v15 = vld [vmem:[%s10335_s18 + $0x1a20] sm:$0xff]  ;;  %v1386_v19 = vld [vmem:[%s10335_s18 + $0x1a48] sm:$0xff] }
 0x270   : > { %v8200_v48 = vpack.c.bf16 %v1319_v40, %v1315_v38  ;;  %v1353_v38 = vld [vmem:[%s10335_s18 + $0x1940] sm:$0xff]  ;;  %v1355_v40 = vld [vmem:[%s10335_s18 + $0x1950] sm:$0xff] }
 0x271   : > { %7157 = vmatpush1.bf16.msra.mxu0 %v7156_v45  ;;  %v1324_v45 = vld [vmem:[%s10335_s18 + $0x1858] sm:$0xff]  ;;  %v1383_v18 = vld [vmem:[%s10335_s18 + $0x1a30] sm:$0xff] }
 0x272   : > { %8181 = vmatpush1.bf16.msra.mxu1 %v8180_v46  ;;  %7159 = vmatprep.subr.bf16.mxu0 %v7158_v47  ;;  %v1328_v46 = vld [vmem:[%s10335_s18 + $0x1878] sm:$0xff]  ;;  %v7176_v47 = vpack.c.bf16 %v1317_v59, %v1313_v37  ;;  %v8216_v37 = vpack.c.bf16 %v1351_v30, %v1347_v25  ;;  %v7194_v59 = vpack.c.bf16 %v1358_v32, %v1354_v31  ;;  %v1389_v25 = vld [vmem:[%s10335_s18 + $0x1a60] sm:$0xff]  ;;  %v1391_v31 = vld [vmem:[%s10335_s18 + $0x1a70] sm:$0xff] }
 0x273   : > { %8183 = vmatprep.subr.bf16.mxu1 %v8182_v53  ;;  %v1325_v53 = vld [vmem:[%s10335_s18 + $0x1860] sm:$0xff]  ;;  %v8202_v54 = vpack.c.bf16 %v1328_v46, %v1324_v45  ;;  %v1362_v45 = vld [vmem:[%s10335_s18 + $0x1988] sm:$0xff] }
 0x274   : > { %v7180_v60 = vpack.c.bf16 %v1325_v53, %v1321_v52  ;;  %v1366_v46 = vld [vmem:[%s10335_s18 + $0x19a8] sm:$0xff]  ;;  %v8220_v52 = vpack.c.bf16 %v1359_v42, %v1355_v40  ;;  %v1397_v40 = vld [vmem:[%s10335_s18 + $0x1aa0] sm:$0xff] }
 0x275   : > { %7161 = vmatpush1.bf16.msra.mxu0 %v7160_v44  ;;  %v2667_v44 = vcombine.high %v11206_v43, %v11206_v43  ;;  %v7198_v53 = vpack.c.bf16 %v1366_v46, %v1362_v45  ;;  %v1394_v32 = vld [vmem:[%s10335_s18 + $0x1a88] sm:$0xff]  ;;  %v1399_v45 = vld [vmem:[%s10335_s18 + $0x1ab0] sm:$0xff] }
 0x276   : > { %8185 = vmatpush1.bf16.msra.mxu1 %v8184_v57  ;;  %7163 = vmatprep.subr.bf16.mxu0 %v7162_v58  ;;  %v1332_v57 = vld [vmem:[%s10335_s18 + $0x1898] sm:$0xff]  ;;  %v1402_v46 = vld [vmem:[%s10335_s18 + $0x1ac8] sm:$0xff] }
 0x277   : > { %8187 = vmatprep.subr.bf16.mxu1 %v8186_v1  ;;  %v1336_v58 = vld [vmem:[%s10335_s18 + $0x18b8] sm:$0xff]  ;;  %v1329_v1 = vld [vmem:[%s10335_s18 + $0x1880] sm:$0xff] }
 0x278   : > { %v8206_v4 = vpack.c.bf16 %v1336_v58, %v1332_v57  ;;  %v1374_v57 = vld [vmem:[%s10335_s18 + $0x19e8] sm:$0xff]  ;;  %v1372_v58 = vld [vmem:[%s10335_s18 + $0x19d8] sm:$0xff] }
 0x279   : > { %7165 = vmatpush1.bf16.msra.mxu0 %v7164_v6  ;;  %v1342_v6 = vld [vmem:[%s10335_s18 + $0x18e8] sm:$0xff] }
 0x27a   : > { %8189 = vmatpush1.bf16.msra.mxu1 %v8188_v7  ;;  %7167 = vmatprep.subr.bf16.mxu0 %v7166_v8  ;;  %v1344_v7 = vld [vmem:[%s10335_s18 + $0x18f8] sm:$0xff]  ;;  %v7184_v8 = vpack.c.bf16 %v1333_v2, %v1329_v1  ;;  %v7186_v11 = vpack.c.bf16 %v1342_v6, %v1338_v5  ;;  %v1369_v2 = vld [vmem:[%s10335_s18 + $0x19c0] sm:$0xff]  ;;  %v1375_v5 = vld [vmem:[%s10335_s18 + $0x19f0] sm:$0xff] }
 0x27b   : > { %8191 = vmatprep.subr.bf16.mxu1 %v8190_v14  ;;  %v1341_v14 = vld [vmem:[%s10335_s18 + $0x18e0] sm:$0xff]  ;;  %v1378_v6 = vld [vmem:[%s10335_s18 + $0x1a08] sm:$0xff] }
 0x27d   : > { %7169 = vmatpush1.bf16.msra.mxu0 %v7168_v20  ;;  %v1348_v20 = vld [vmem:[%s10335_s18 + $0x1918] sm:$0xff] }
 0x27e   : > { %8193 = vmatpush1.bf16.msra.mxu1 %v8192_v21  ;;  %7171 = vmatprep.subr.bf16.mxu0 %v7170_v51  ;;  %v1352_v21 = vld [vmem:[%s10335_s18 + $0x1938] sm:$0xff]  ;;  %v7188_v51 = vpack.c.bf16 %v1341_v14, %v1337_v13  ;;  %v1377_v14 = vld [vmem:[%s10335_s18 + $0x1a00] sm:$0xff] }
 0x27f   : > { %8195 = vmatprep.subr.bf16.mxu1 %v8194_v0  ;;  %v1349_v0 = vld [vmem:[%s10335_s18 + $0x1920] sm:$0xff]  ;;  %v8214_v28 = vpack.c.bf16 %v1352_v21, %v1348_v20  ;;  %v1390_v20 = vld [vmem:[%s10335_s18 + $0x1a68] sm:$0xff]  ;;  %v1388_v21 = vld [vmem:[%s10335_s18 + $0x1a58] sm:$0xff] }
 0x281   : > { %7173 = vmatpush1.bf16.msra.mxu0 %v7172_v34  ;;  %v1356_v34 = vld [vmem:[%s10335_s18 + $0x1958] sm:$0xff] }
 0x282   : > { %8197 = vmatpush1.bf16.msra.mxu1 %v8196_v35  ;;  %7175 = vmatprep.subr.bf16.mxu0 %v7174_v36  ;;  %v1360_v35 = vld [vmem:[%s10335_s18 + $0x1978] sm:$0xff]  ;;  %v7192_v36 = vpack.c.bf16 %v1349_v0, %v1345_v24  ;;  %v7210_v24 = vpack.c.bf16 %v1390_v20, %v1386_v19  ;;  %v1385_v0 = vld [vmem:[%s10335_s18 + $0x1a40] sm:$0xff]  ;;  %v1423_v19 = vld [vmem:[%s10335_s18 + $0x1b70] sm:$0xff] }
 0x283   : > { %8199 = vmatprep.subr.bf16.mxu1 %v8198_v39  ;;  %v1357_v39 = vld [vmem:[%s10335_s18 + $0x1960] sm:$0xff]  ;;  %v8218_v41 = vpack.c.bf16 %v1360_v35, %v1356_v34  ;;  %v1398_v34 = vld [vmem:[%s10335_s18 + $0x1aa8] sm:$0xff]  ;;  %v1396_v35 = vld [vmem:[%s10335_s18 + $0x1a98] sm:$0xff] }
 0x284   : > { %3189 = vmatmul.mubr.f32.vlgmr.msra.gmra.mrb[0].mxu0 %v11067_v29  ;;  %v1426_v20 = vld [vmem:[%s10335_s18 + $0x1b88] sm:$0xff] }
 0x285   : > { %7177 = vmatpush1.bf16.msra.mxu0 %v7176_v47  ;;  %4325 = vmatmul.mubr.f32.vlgmr.msra.gmra.mrb[0].mxu1 %v11067_v29  ;;  %v1340_v29 = vld [vmem:[%s10335_s18 + $0x18d8] sm:$0xff] }
 0x286   : > { %8201 = vmatpush1.bf16.msra.mxu1 %v8200_v48  ;;  %7179 = vmatprep.subr.bf16.mxu0 %v7178_v50  ;;  %v8210_v16 = vpack.c.bf16 %v1344_v7, %v1340_v29  ;;  %v1364_v47 = vld [vmem:[%s10335_s18 + $0x1998] sm:$0xff]  ;;  %v7196_v50 = vpack.c.bf16 %v1357_v39, %v1353_v38  ;;  %v1382_v29 = vld [vmem:[%s10335_s18 + $0x1a28] sm:$0xff]  ;;  %v7214_v38 = vpack.c.bf16 %v1398_v34, %v1394_v32  ;;  %v1393_v39 = vld [vmem:[%s10335_s18 + $0x1a80] sm:$0xff] }
 0x287   : > { %8203 = vmatprep.subr.bf16.mxu1 %v8202_v54  ;;  %3259 = vmatprep.mubr.f32.mxu0 %v2667_v44  ;;  %v1368_v48 = vld [vmem:[%s10335_s18 + $0x19b8] sm:$0xff]  ;;  %v1365_v54 = vld [vmem:[%s10335_s18 + $0x19a0] sm:$0xff]  ;;  %v7206_v13 = vpack.c.bf16 %v1382_v29, %v1378_v6  ;;  %v1415_v6 = vld [vmem:[%s10335_s18 + $0x1b30] sm:$0xff] }
 0x288   : > { %4395 = vmatprep.mubr.f32.mxu1 %v2667_v44  ;;  %v8222_v10 = vpack.c.bf16 %v1368_v48, %v1364_v47  ;;  %v1370_v44 = vld [vmem:[%s10335_s18 + $0x19c8] sm:$0xff]  ;;  %v1380_v7 = vld [vmem:[%s10335_s18 + $0x1a18] sm:$0xff]  ;;  %v1431_v32 = vld [vmem:[%s10335_s18 + $0x1bb0] sm:$0xff] }
 0x289   : > { %7181 = vmatpush1.bf16.msra.mxu0 %v7180_v60  ;;  %v1376_v60 = vld [vmem:[%s10335_s18 + $0x19f8] sm:$0xff]  ;;  %v7202_v1 = vpack.c.bf16 %v1374_v57, %v1370_v44  ;;  %v1406_v47 = vld [vmem:[%s10335_s18 + $0x1ae8] sm:$0xff]  ;;  %v1407_v44 = vld [vmem:[%s10335_s18 + $0x1af0] sm:$0xff] }
 0x28a   : > { %8205 = vmatpush1.bf16.msra.mxu1 %v8204_v61  ;;  %7183 = vmatprep.subr.bf16.mxu0 %v7182_v62  ;;  %v7200_v61 = vpack.c.bf16 %v1365_v54, %v1361_v26  ;;  %v8224_v62 = vpack.c.bf16 %v1367_v56, %v1363_v55  ;;  %v8226_v27 = vpack.c.bf16 %v1376_v60, %v1372_v58  ;;  %v1404_v48 = vld [vmem:[%s10335_s18 + $0x1ad8] sm:$0xff]  ;;  %v1401_v54 = vld [vmem:[%s10335_s18 + $0x1ac0] sm:$0xff]  ;;  %v1410_v57 = vld [vmem:[%s10335_s18 + $0x1b08] sm:$0xff] }
 0x28b   : > { %8207 = vmatprep.subr.bf16.mxu1 %v8206_v4  ;;  %v1371_v4 = vld [vmem:[%s10335_s18 + $0x19d0] sm:$0xff]  ;;  %v7218_v26 = vpack.c.bf16 %v1406_v47, %v1402_v46  ;;  %v1405_v55 = vld [vmem:[%s10335_s18 + $0x1ae0] sm:$0xff]  ;;  %v1414_v58 = vld [vmem:[%s10335_s18 + $0x1b28] sm:$0xff] }
 0x28c   : > { %v1412_v60 = vld [vmem:[%s10335_s18 + $0x1b18] sm:$0xff]  ;;  %v1418_v29 = vld [vmem:[%s10335_s18 + $0x1b48] sm:$0xff]  ;;  %v1439_v46 = vld [vmem:[%s10335_s18 + $0x1bf0] sm:$0xff] }
 0x28d   : > { %7185 = vmatpush1.bf16.msra.mxu0 %v7184_v8  ;;  %v1384_v8 = vld [vmem:[%s10335_s18 + $0x1a38] sm:$0xff]  ;;  %v1434_v34 = vld [vmem:[%s10335_s18 + $0x1bc8] sm:$0xff] }
 0x28e   : > { %8209 = vmatpush1.bf16.msra.mxu1 %v8208_v9  ;;  %7187 = vmatprep.subr.bf16.mxu0 %v7186_v11  ;;  %v7204_v9 = vpack.c.bf16 %v1373_v3, %v1369_v2  ;;  %v8228_v11 = vpack.c.bf16 %v1375_v5, %v1371_v4  ;;  %v8230_v17 = vpack.c.bf16 %v1384_v8, %v1380_v7  ;;  %v1409_v3 = vld [vmem:[%s10335_s18 + $0x1b00] sm:$0xff]  ;;  %v1422_v7 = vld [vmem:[%s10335_s18 + $0x1b68] sm:$0xff]  ;;  %v1420_v8 = vld [vmem:[%s10335_s18 + $0x1b58] sm:$0xff] }
 0x28f   : > { %8211 = vmatprep.subr.bf16.mxu1 %v8210_v16  ;;  %v1379_v16 = vld [vmem:[%s10335_s18 + $0x1a10] sm:$0xff]  ;;  %v7222_v2 = vpack.c.bf16 %v1414_v58, %v1410_v57  ;;  %v1413_v4 = vld [vmem:[%s10335_s18 + $0x1b20] sm:$0xff]  ;;  %v1442_v47 = vld [vmem:[%s10335_s18 + $0x1c08] sm:$0xff] }
 0x290   : > { %v1450_v58 = vld [vmem:[%s10335_s18 + $0x1c48] sm:$0xff] }
 0x291   : > { %7189 = vmatpush1.bf16.msra.mxu0 %v7188_v51  ;;  %v1392_v51 = vld [vmem:[%s10335_s18 + $0x1a78] sm:$0xff] }
 0x292   : > { %8213 = vmatpush1.bf16.msra.mxu1 %v8212_v22  ;;  %7191 = vmatprep.subr.bf16.mxu0 %v7190_v23  ;;  %v7208_v22 = vpack.c.bf16 %v1381_v15, %v1377_v14  ;;  %v8232_v23 = vpack.c.bf16 %v1383_v18, %v1379_v16  ;;  %v8234_v30 = vpack.c.bf16 %v1392_v51, %v1388_v21  ;;  %v1417_v15 = vld [vmem:[%s10335_s18 + $0x1b40] sm:$0xff]  ;;  %v1430_v21 = vld [vmem:[%s10335_s18 + $0x1ba8] sm:$0xff]  ;;  %v1428_v51 = vld [vmem:[%s10335_s18 + $0x1b98] sm:$0xff] }
 0x293   : > { %8215 = vmatprep.subr.bf16.mxu1 %v8214_v28  ;;  %v1387_v28 = vld [vmem:[%s10335_s18 + $0x1a50] sm:$0xff]  ;;  %v7226_v14 = vpack.c.bf16 %v1422_v7, %v1418_v29  ;;  %v1421_v16 = vld [vmem:[%s10335_s18 + $0x1b60] sm:$0xff] }
 0x294   : > { %v1455_v7 = vld [vmem:[%s10335_s18 + $0x1c70] sm:$0xff] }
 0x295   : > { %7193 = vmatpush1.bf16.msra.mxu0 %v7192_v36  ;;  %v1400_v36 = vld [vmem:[%s10335_s18 + $0x1ab8] sm:$0xff] }
 0x296   : > { %8217 = vmatpush1.bf16.msra.mxu1 %v8216_v37  ;;  %7195 = vmatprep.subr.bf16.mxu0 %v7194_v59  ;;  %v7212_v37 = vpack.c.bf16 %v1389_v25, %v1385_v0  ;;  %v8236_v59 = vpack.c.bf16 %v1391_v31, %v1387_v28  ;;  %v8238_v42 = vpack.c.bf16 %v1400_v36, %v1396_v35  ;;  %v1425_v25 = vld [vmem:[%s10335_s18 + $0x1b80] sm:$0xff]  ;;  %v1438_v35 = vld [vmem:[%s10335_s18 + $0x1be8] sm:$0xff]  ;;  %v1436_v36 = vld [vmem:[%s10335_s18 + $0x1bd8] sm:$0xff] }
 0x297   : > { %8219 = vmatprep.subr.bf16.mxu1 %v8218_v41  ;;  %v1395_v41 = vld [vmem:[%s10335_s18 + $0x1a90] sm:$0xff]  ;;  %v7230_v0 = vpack.c.bf16 %v1430_v21, %v1426_v20  ;;  %v1429_v28 = vld [vmem:[%s10335_s18 + $0x1ba0] sm:$0xff] }
 0x298   : > { %v1459_v20 = vld [vmem:[%s10335_s18 + $0x1c90] sm:$0xff] }
 0x299   : > { %7197 = vmatpush1.bf16.msra.mxu0 %v7196_v50  ;;  %v1408_v50 = vld [vmem:[%s10335_s18 + $0x1af8] sm:$0xff] }
 0x29a   : > { %8221 = vmatpush1.bf16.msra.mxu1 %v8220_v52  ;;  %7199 = vmatprep.subr.bf16.mxu0 %v7198_v53  ;;  %v7216_v52 = vpack.c.bf16 %v1397_v40, %v1393_v39  ;;  %v8240_v53 = vpack.c.bf16 %v1399_v45, %v1395_v41  ;;  %v8242_v56 = vpack.c.bf16 %v1408_v50, %v1404_v48  ;;  %v1433_v40 = vld [vmem:[%s10335_s18 + $0x1bc0] sm:$0xff]  ;;  %v1446_v48 = vld [vmem:[%s10335_s18 + $0x1c28] sm:$0xff] }
 0x29b   : > { %8223 = vmatprep.subr.bf16.mxu1 %v8222_v10  ;;  %v1403_v10 = vld [vmem:[%s10335_s18 + $0x1ad0] sm:$0xff]  ;;  %v7234_v39 = vpack.c.bf16 %v1438_v35, %v1434_v34  ;;  %v1437_v41 = vld [vmem:[%s10335_s18 + $0x1be0] sm:$0xff]  ;;  %v2652_v50 = vcombine.high %v11196_v33, %v11196_v33 }
 0x29c   : > { %v1447_v33 = vld [vmem:[%s10335_s18 + $0x1c30] sm:$0xff] }
 0x29d   : > { %7201 = vmatpush1.bf16.msra.mxu0 %v7200_v61  ;;  %v1416_v61 = vld [vmem:[%s10335_s18 + $0x1b38] sm:$0xff]  ;;  %v1471_v35 = vld [vmem:[%s10335_s18 + $0x1cf0] sm:$0xff] }
 0x29e   : > { %8225 = vmatpush1.bf16.msra.mxu1 %v8224_v62  ;;  %7203 = vmatprep.subr.bf16.mxu0 %v7202_v1  ;;  %v7220_v62 = vpack.c.bf16 %v1405_v55, %v1401_v54  ;;  %v8244_v1 = vpack.c.bf16 %v1407_v44, %v1403_v10  ;;  %v8246_v5 = vpack.c.bf16 %v1416_v61, %v1412_v60  ;;  %v1441_v10 = vld [vmem:[%s10335_s18 + $0x1c00] sm:$0xff]  ;;  %v1443_v44 = vld [vmem:[%s10335_s18 + $0x1c10] sm:$0xff]  ;;  %v1454_v60 = vld [vmem:[%s10335_s18 + $0x1c68] sm:$0xff] }
 0x29f   : > { %8227 = vmatprep.subr.bf16.mxu1 %v8226_v27  ;;  %v1411_v27 = vld [vmem:[%s10335_s18 + $0x1b10] sm:$0xff]  ;;  %v7238_v55 = vpack.c.bf16 %v1446_v48, %v1442_v47  ;;  %v11343_v61 = vrot.slane %v2652_v50, %v10455_v12  ;;  %v1482_v50 = vld [vmem:[%s10335_s18 + $0x1d48] sm:$0xff] }
 0x2a0   : > { %v1479_v48 = vld [vmem:[%s10335_s18 + $0x1d30] sm:$0xff] }
 0x2a1   : > { %7205 = vmatpush1.bf16.msra.mxu0 %v7204_v9  ;;  %v1424_v9 = vld [vmem:[%s10335_s18 + $0x1b78] sm:$0xff] }
 0x2a2   : > { %8229 = vmatpush1.bf16.msra.mxu1 %v8228_v11  ;;  %7207 = vmatprep.subr.bf16.mxu0 %v7206_v13  ;;  %v7224_v11 = vpack.c.bf16 %v1413_v4, %v1409_v3  ;;  %v8248_v13 = vpack.c.bf16 %v1415_v6, %v1411_v27  ;;  %v8250_v18 = vpack.c.bf16 %v1424_v9, %v1420_v8  ;;  %v1449_v27 = vld [vmem:[%s10335_s18 + $0x1c40] sm:$0xff]  ;;  %v1451_v6 = vld [vmem:[%s10335_s18 + $0x1c50] sm:$0xff]  ;;  %v1458_v8 = vld [vmem:[%s10335_s18 + $0x1c88] sm:$0xff] }
 0x2a3   : > { %8231 = vmatprep.subr.bf16.mxu1 %v8230_v17  ;;  %v1419_v17 = vld [vmem:[%s10335_s18 + $0x1b50] sm:$0xff]  ;;  %v8264_v3 = vpack.c.bf16 %v1447_v33, %v1443_v44  ;;  %v7242_v4 = vpack.c.bf16 %v1454_v60, %v1450_v58  ;;  %v1462_v9 = vld [vmem:[%s10335_s18 + $0x1ca8] sm:$0xff]  ;;  %v1485_v44 = vld [vmem:[%s10335_s18 + $0x1d60] sm:$0xff] }
 0x2a4   : > { %v1487_v58 = vld [vmem:[%s10335_s18 + $0x1d70] sm:$0xff]  ;;  %v1490_v60 = vld [vmem:[%s10335_s18 + $0x1d88] sm:$0xff] }
 0x2a5   : > { %7209 = vmatpush1.bf16.msra.mxu0 %v7208_v22  ;;  %v1432_v22 = vld [vmem:[%s10335_s18 + $0x1bb8] sm:$0xff] }
 0x2a6   : > { %8233 = vmatpush1.bf16.msra.mxu1 %v8232_v23  ;;  %7211 = vmatprep.subr.bf16.mxu0 %v7210_v24  ;;  %v7228_v23 = vpack.c.bf16 %v1421_v16, %v1417_v15  ;;  %v8252_v24 = vpack.c.bf16 %v1423_v19, %v1419_v17  ;;  %v8254_v31 = vpack.c.bf16 %v1432_v22, %v1428_v51  ;;  %v1461_v19 = vld [vmem:[%s10335_s18 + $0x1ca0] sm:$0xff]  ;;  %v1463_v51 = vld [vmem:[%s10335_s18 + $0x1cb0] sm:$0xff]  ;;  %v1466_v22 = vld [vmem:[%s10335_s18 + $0x1cc8] sm:$0xff] }
 0x2a7   : > { %8235 = vmatprep.subr.bf16.mxu1 %v8234_v30  ;;  %v1427_v30 = vld [vmem:[%s10335_s18 + $0x1b90] sm:$0xff]  ;;  %v8268_v16 = vpack.c.bf16 %v1455_v7, %v1451_v6  ;;  %v7246_v17 = vpack.c.bf16 %v1462_v9, %v1458_v8  ;;  %v1493_v6 = vld [vmem:[%s10335_s18 + $0x1da0] sm:$0xff]  ;;  %v1498_v9 = vld [vmem:[%s10335_s18 + $0x1dc8] sm:$0xff] }
 0x2a8   : > { %v1495_v8 = vld [vmem:[%s10335_s18 + $0x1db0] sm:$0xff] }
 0x2a9   : > { %7213 = vmatpush1.bf16.msra.mxu0 %v7212_v37  ;;  %v1440_v37 = vld [vmem:[%s10335_s18 + $0x1bf8] sm:$0xff] }
 0x2aa   : > { %8237 = vmatpush1.bf16.msra.mxu1 %v8236_v59  ;;  %7215 = vmatprep.subr.bf16.mxu0 %v7214_v38  ;;  %v7232_v59 = vpack.c.bf16 %v1429_v28, %v1425_v25  ;;  %v8256_v38 = vpack.c.bf16 %v1431_v32, %v1427_v30  ;;  %v8258_v45 = vpack.c.bf16 %v1440_v37, %v1436_v36  ;;  %v1465_v30 = vld [vmem:[%s10335_s18 + $0x1cc0] sm:$0xff]  ;;  %v1467_v32 = vld [vmem:[%s10335_s18 + $0x1cd0] sm:$0xff]  ;;  %v1474_v36 = vld [vmem:[%s10335_s18 + $0x1d08] sm:$0xff] }
 0x2ab   : > { %8239 = vmatprep.subr.bf16.mxu1 %v8238_v42  ;;  %v1435_v42 = vld [vmem:[%s10335_s18 + $0x1bd0] sm:$0xff]  ;;  %v8272_v25 = vpack.c.bf16 %v1463_v51, %v1459_v20  ;;  %v1478_v37 = vld [vmem:[%s10335_s18 + $0x1d28] sm:$0xff] }
 0x2ac   : > { %v8260_v54 = vpack.c.bf16 %v1439_v46, %v1435_v42  ;;  %v1473_v42 = vld [vmem:[%s10335_s18 + $0x1d00] sm:$0xff]  ;;  %v1475_v46 = vld [vmem:[%s10335_s18 + $0x1d10] sm:$0xff] }
 0x2ad   : > { %7217 = vmatpush1.bf16.msra.mxu0 %v7216_v52  ;;  %v1444_v52 = vld [vmem:[%s10335_s18 + $0x1c18] sm:$0xff]  ;;  %v1499_v20 = vld [vmem:[%s10335_s18 + $0x1dd0] sm:$0xff] }
 0x2ae   : > { %8241 = vmatpush1.bf16.msra.mxu1 %v8240_v53  ;;  %7219 = vmatprep.subr.bf16.mxu0 %v7218_v26  ;;  %v1448_v53 = vld [vmem:[%s10335_s18 + $0x1c38] sm:$0xff]  ;;  %v7236_v26 = vpack.c.bf16 %v1437_v41, %v1433_v40  ;;  %v8276_v40 = vpack.c.bf16 %v1471_v35, %v1467_v32  ;;  %v7254_v41 = vpack.c.bf16 %v1478_v37, %v1474_v36  ;;  %v1503_v51 = vld [vmem:[%s10335_s18 + $0x1df0] sm:$0xff]  ;;  %v1514_v36 = vld [vmem:[%s10335_s18 + $0x1e48] sm:$0xff] }
 0x2af   : > { %8243 = vmatprep.subr.bf16.mxu1 %v8242_v56  ;;  %v1445_v56 = vld [vmem:[%s10335_s18 + $0x1c20] sm:$0xff]  ;;  %v8262_v57 = vpack.c.bf16 %v1448_v53, %v1444_v52  ;;  %v1486_v52 = vld [vmem:[%s10335_s18 + $0x1d68] sm:$0xff]  ;;  %v1484_v53 = vld [vmem:[%s10335_s18 + $0x1d58] sm:$0xff] }
 0x2b0   : > { %v1507_v32 = vld [vmem:[%s10335_s18 + $0x1e10] sm:$0xff]  ;;  %v1518_v37 = vld [vmem:[%s10335_s18 + $0x1e68] sm:$0xff] }
 0x2b1   : > { %7221 = vmatpush1.bf16.msra.mxu0 %v7220_v62  ;;  %v1452_v62 = vld [vmem:[%s10335_s18 + $0x1c58] sm:$0xff]  ;;  %v1511_v35 = vld [vmem:[%s10335_s18 + $0x1e30] sm:$0xff] }
 0x2b2   : > { %8245 = vmatpush1.bf16.msra.mxu1 %v8244_v1  ;;  %7223 = vmatprep.subr.bf16.mxu0 %v7222_v2  ;;  %v1456_v1 = vld [vmem:[%s10335_s18 + $0x1c78] sm:$0xff]  ;;  %v7240_v2 = vpack.c.bf16 %v1445_v56, %v1441_v10  ;;  %v7258_v10 = vpack.c.bf16 %v1486_v52, %v1482_v50  ;;  %v1481_v56 = vld [vmem:[%s10335_s18 + $0x1d40] sm:$0xff]  ;;  %v1522_v50 = vld [vmem:[%s10335_s18 + $0x1e88] sm:$0xff] }
 0x2b3   : > { %8247 = vmatprep.subr.bf16.mxu1 %v8246_v5  ;;  %v1453_v5 = vld [vmem:[%s10335_s18 + $0x1c60] sm:$0xff]  ;;  %v8266_v29 = vpack.c.bf16 %v1456_v1, %v1452_v62  ;;  %v1494_v62 = vld [vmem:[%s10335_s18 + $0x1da8] sm:$0xff]  ;;  %v1492_v1 = vld [vmem:[%s10335_s18 + $0x1d98] sm:$0xff] }
 0x2b4   : > { %v7244_v15 = vpack.c.bf16 %v1453_v5, %v1449_v27  ;;  %v7262_v27 = vpack.c.bf16 %v1494_v62, %v1490_v60  ;;  %v1489_v5 = vld [vmem:[%s10335_s18 + $0x1d80] sm:$0xff]  ;;  %v1526_v52 = vld [vmem:[%s10335_s18 + $0x1ea8] sm:$0xff] }
 0x2b5   : > { %7225 = vmatpush1.bf16.msra.mxu0 %v7224_v11  ;;  %v2668_v11 = vcombine.high %v11343_v61, %v11343_v61  ;;  %v1530_v60 = vld [vmem:[%s10335_s18 + $0x1ec8] sm:$0xff] }
 0x2b6   : > { %8249 = vmatpush1.bf16.msra.mxu1 %v8248_v13  ;;  %7227 = vmatprep.subr.bf16.mxu0 %v7226_v14  ;;  %v1460_v13 = vld [vmem:[%s10335_s18 + $0x1c98] sm:$0xff]  ;;  %v1534_v62 = vld [vmem:[%s10335_s18 + $0x1ee8] sm:$0xff] }
 0x2b7   : > { %8251 = vmatprep.subr.bf16.mxu1 %v8250_v18  ;;  %v1464_v14 = vld [vmem:[%s10335_s18 + $0x1cb8] sm:$0xff]  ;;  %v1457_v18 = vld [vmem:[%s10335_s18 + $0x1c80] sm:$0xff] }
 0x2b8   : > { %v8270_v21 = vpack.c.bf16 %v1464_v14, %v1460_v13  ;;  %v1500_v13 = vld [vmem:[%s10335_s18 + $0x1dd8] sm:$0xff] }
 0x2b9   : > { %7229 = vmatpush1.bf16.msra.mxu0 %v7228_v23  ;;  %v1470_v23 = vld [vmem:[%s10335_s18 + $0x1ce8] sm:$0xff]  ;;  %v1504_v14 = vld [vmem:[%s10335_s18 + $0x1df8] sm:$0xff] }
 0x2ba   : > { %8253 = vmatpush1.bf16.msra.mxu1 %v8252_v24  ;;  %7231 = vmatprep.subr.bf16.mxu0 %v7230_v0  ;;  %v1472_v24 = vld [vmem:[%s10335_s18 + $0x1cf8] sm:$0xff]  ;;  %v7248_v0 = vpack.c.bf16 %v1461_v19, %v1457_v18  ;;  %v7250_v28 = vpack.c.bf16 %v1470_v23, %v1466_v22  ;;  %v1497_v18 = vld [vmem:[%s10335_s18 + $0x1dc0] sm:$0xff]  ;;  %v1506_v22 = vld [vmem:[%s10335_s18 + $0x1e08] sm:$0xff] }
 0x2bb   : > { %8255 = vmatprep.subr.bf16.mxu1 %v8254_v31  ;;  %v1469_v31 = vld [vmem:[%s10335_s18 + $0x1ce0] sm:$0xff]  ;;  %v1510_v23 = vld [vmem:[%s10335_s18 + $0x1e28] sm:$0xff] }
 0x2bc   : > { %v1501_v19 = vld [vmem:[%s10335_s18 + $0x1de0] sm:$0xff] }
 0x2bd   : > { %7233 = vmatpush1.bf16.msra.mxu0 %v7232_v59  ;;  %v1476_v59 = vld [vmem:[%s10335_s18 + $0x1d18] sm:$0xff] }
 0x2be   : > { %8257 = vmatpush1.bf16.msra.mxu1 %v8256_v38  ;;  %7235 = vmatprep.subr.bf16.mxu0 %v7234_v39  ;;  %v1480_v38 = vld [vmem:[%s10335_s18 + $0x1d38] sm:$0xff]  ;;  %v7252_v39 = vpack.c.bf16 %v1469_v31, %v1465_v30  ;;  %v1505_v30 = vld [vmem:[%s10335_s18 + $0x1e00] sm:$0xff] }
 0x2bf   : > { %8259 = vmatprep.subr.bf16.mxu1 %v8258_v45  ;;  %v1477_v45 = vld [vmem:[%s10335_s18 + $0x1d20] sm:$0xff]  ;;  %v8278_v47 = vpack.c.bf16 %v1480_v38, %v1476_v59  ;;  %v1516_v59 = vld [vmem:[%s10335_s18 + $0x1e58] sm:$0xff] }
 0x2c0   : > { %v1509_v31 = vld [vmem:[%s10335_s18 + $0x1e20] sm:$0xff]  ;;  %v1520_v38 = vld [vmem:[%s10335_s18 + $0x1e78] sm:$0xff] }
 0x2c1   : > { %7237 = vmatpush1.bf16.msra.mxu0 %v7236_v26  ;;  %v1488_v26 = vld [vmem:[%s10335_s18 + $0x1d78] sm:$0xff] }
 0x2c2   : > { %8261 = vmatpush1.bf16.msra.mxu1 %v8260_v54  ;;  %7239 = vmatprep.subr.bf16.mxu0 %v7238_v55  ;;  %v7256_v54 = vpack.c.bf16 %v1477_v45, %v1473_v42  ;;  %v8280_v55 = vpack.c.bf16 %v1479_v48, %v1475_v46  ;;  %v8282_v33 = vpack.c.bf16 %v1488_v26, %v1484_v53  ;;  %v1513_v42 = vld [vmem:[%s10335_s18 + $0x1e40] sm:$0xff]  ;;  %v1515_v46 = vld [vmem:[%s10335_s18 + $0x1e50] sm:$0xff]  ;;  %v1524_v53 = vld [vmem:[%s10335_s18 + $0x1e98] sm:$0xff] }
 0x2c3   : > { %8263 = vmatprep.subr.bf16.mxu1 %v8262_v57  ;;  %v1483_v57 = vld [vmem:[%s10335_s18 + $0x1d50] sm:$0xff]  ;;  %v1517_v45 = vld [vmem:[%s10335_s18 + $0x1e60] sm:$0xff]  ;;  %v1528_v26 = vld [vmem:[%s10335_s18 + $0x1eb8] sm:$0xff] }
 0x2c4   : > { %3260 = vmatmul.mubr.f32.vlgmr.msra.gmra.mrb[0].mxu0 %v11206_v43  ;;  %v1519_v48 = vld [vmem:[%s10335_s18 + $0x1e70] sm:$0xff] }
 0x2c5   : > { %7241 = vmatpush1.bf16.msra.mxu0 %v7240_v2  ;;  %4396 = vmatmul.mubr.f32.vlgmr.msra.gmra.mrb[0].mxu1 %v11206_v43  ;;  %v1468_v43 = vld [vmem:[%s10335_s18 + $0x1cd8] sm:$0xff] }
 0x2c6   : > { %8265 = vmatpush1.bf16.msra.mxu1 %v8264_v3  ;;  %7243 = vmatprep.subr.bf16.mxu0 %v7242_v4  ;;  %v8274_v34 = vpack.c.bf16 %v1472_v24, %v1468_v43  ;;  %v1496_v2 = vld [vmem:[%s10335_s18 + $0x1db8] sm:$0xff]  ;;  %v7260_v3 = vpack.c.bf16 %v1485_v44, %v1481_v56  ;;  %v8284_v4 = vpack.c.bf16 %v1487_v58, %v1483_v57  ;;  %v1521_v56 = vld [vmem:[%s10335_s18 + $0x1e80] sm:$0xff]  ;;  %v1523_v57 = vld [vmem:[%s10335_s18 + $0x1e90] sm:$0xff] }
 0x2c7   : > { %8267 = vmatprep.subr.bf16.mxu1 %v8266_v29  ;;  %3330 = vmatprep.mubr.f32.mxu0 %v2668_v11  ;;  %v1491_v29 = vld [vmem:[%s10335_s18 + $0x1d90] sm:$0xff]  ;;  %v8286_v7 = vpack.c.bf16 %v1496_v2, %v1492_v1  ;;  %v1508_v43 = vld [vmem:[%s10335_s18 + $0x1e18] sm:$0xff]  ;;  %v1525_v44 = vld [vmem:[%s10335_s18 + $0x1ea0] sm:$0xff] }
 0x2c8   : > { %4466 = vmatprep.mubr.f32.mxu1 %v2668_v11  ;;  %v1502_v11 = vld [vmem:[%s10335_s18 + $0x1de8] sm:$0xff]  ;;  %v1512_v24 = vld [vmem:[%s10335_s18 + $0x1e38] sm:$0xff]  ;;  %v1527_v58 = vld [vmem:[%s10335_s18 + $0x1eb0] sm:$0xff] }
 0x2c9   : > { %7245 = vmatpush1.bf16.msra.mxu0 %v7244_v15  ;;  %v7264_v15 = vpack.c.bf16 %v1493_v6, %v1489_v5  ;;  %v1532_v1 = vld [vmem:[%s10335_s18 + $0x1ed8] sm:$0xff]  ;;  %v1529_v5 = vld [vmem:[%s10335_s18 + $0x1ec0] sm:$0xff] }
 0x2ca   : > { %8269 = vmatpush1.bf16.msra.mxu1 %v8268_v16  ;;  %7247 = vmatprep.subr.bf16.mxu0 %v7246_v17  ;;  %v8288_v16 = vpack.c.bf16 %v1495_v8, %v1491_v29  ;;  %v7266_v17 = vpack.c.bf16 %v1502_v11, %v1498_v9  ;;  %v1536_v2 = vld [vmem:[%s10335_s18 + $0x1ef8] sm:$0xff]  ;;  %v1533_v6 = vld [vmem:[%s10335_s18 + $0x1ee0] sm:$0xff]  ;;  %v1531_v29 = vld [vmem:[%s10335_s18 + $0x1ed0] sm:$0xff] }
 0x2cb   : > { %8271 = vmatprep.subr.bf16.mxu1 %v8270_v21  ;;  %v8290_v21 = vpack.c.bf16 %v1504_v14, %v1500_v13  ;;  %v1535_v8 = vld [vmem:[%s10335_s18 + $0x1ef0] sm:$0xff]  ;;  %v1538_v9 = vld [vmem:[%s10335_s18 + $0x1f08] sm:$0xff]  ;;  %v1540_v13 = vld [vmem:[%s10335_s18 + $0x1f18] sm:$0xff] }
 0x2cc   : > { %v1542_v11 = vld [vmem:[%s10335_s18 + $0x1f28] sm:$0xff]  ;;  %v1544_v14 = vld [vmem:[%s10335_s18 + $0x1f38] sm:$0xff] }
 0x2cd   : > { %7249 = vmatpush1.bf16.msra.mxu0 %v7248_v0  ;;  %v7268_v0 = vpack.c.bf16 %v1501_v19, %v1497_v18  ;;  %v1537_v18 = vld [vmem:[%s10335_s18 + $0x1f00] sm:$0xff] }
 0x2ce   : > { %8273 = vmatpush1.bf16.msra.mxu1 %v8272_v25  ;;  %7251 = vmatprep.subr.bf16.mxu0 %v7250_v28  ;;  %v8292_v25 = vpack.c.bf16 %v1503_v51, %v1499_v20  ;;  %v7270_v28 = vpack.c.bf16 %v1510_v23, %v1506_v22  ;;  %v1541_v19 = vld [vmem:[%s10335_s18 + $0x1f20] sm:$0xff]  ;;  %v1539_v20 = vld [vmem:[%s10335_s18 + $0x1f10] sm:$0xff]  ;;  %v1546_v22 = vld [vmem:[%s10335_s18 + $0x1f48] sm:$0xff] }
 0x2cf   : > { %8275 = vmatprep.subr.bf16.mxu1 %v8274_v34  ;;  %v8294_v34 = vpack.c.bf16 %v1512_v24, %v1508_v43  ;;  %v1543_v51 = vld [vmem:[%s10335_s18 + $0x1f30] sm:$0xff]  ;;  %v1550_v23 = vld [vmem:[%s10335_s18 + $0x1f68] sm:$0xff]  ;;  %v1548_v43 = vld [vmem:[%s10335_s18 + $0x1f58] sm:$0xff] }
 0x2d0   : > { %v1552_v24 = vld [vmem:[%s10335_s18 + $0x1f78] sm:$0xff] }
 0x2d1   : > { %7253 = vmatpush1.bf16.msra.mxu0 %v7252_v39  ;;  %v7272_v39 = vpack.c.bf16 %v1509_v31, %v1505_v30  ;;  %v1545_v30 = vld [vmem:[%s10335_s18 + $0x1f40] sm:$0xff] }
 0x2d2   : > { %8277 = vmatpush1.bf16.msra.mxu1 %v8276_v40  ;;  %7255 = vmatprep.subr.bf16.mxu0 %v7254_v41  ;;  %v8296_v40 = vpack.c.bf16 %v1511_v35, %v1507_v32  ;;  %v7274_v41 = vpack.c.bf16 %v1518_v37, %v1514_v36  ;;  %v1549_v31 = vld [vmem:[%s10335_s18 + $0x1f60] sm:$0xff]  ;;  %v1547_v32 = vld [vmem:[%s10335_s18 + $0x1f50] sm:$0xff]  ;;  %v1554_v36 = vld [vmem:[%s10335_s18 + $0x1f88] sm:$0xff] }
 0x2d3   : > { %8279 = vmatprep.subr.bf16.mxu1 %v8278_v47  ;;  %v8298_v47 = vpack.c.bf16 %v1520_v38, %v1516_v59  ;;  %v1551_v35 = vld [vmem:[%s10335_s18 + $0x1f70] sm:$0xff]  ;;  %v1558_v37 = vld [vmem:[%s10335_s18 + $0x1fa8] sm:$0xff]  ;;  %v1556_v59 = vld [vmem:[%s10335_s18 + $0x1f98] sm:$0xff] }
 0x2d4   : > { %v1560_v38 = vld [vmem:[%s10335_s18 + $0x1fb8] sm:$0xff] }
 0x2d5   : > { %7257 = vmatpush1.bf16.msra.mxu0 %v7256_v54  ;;  %v7276_v54 = vpack.c.bf16 %v1517_v45, %v1513_v42  ;;  %v1553_v42 = vld [vmem:[%s10335_s18 + $0x1f80] sm:$0xff] }
 0x2d6   : > { %8281 = vmatpush1.bf16.msra.mxu1 %v8280_v55  ;;  %7259 = vmatprep.subr.bf16.mxu0 %v7258_v10  ;;  %v8300_v55 = vpack.c.bf16 %v1519_v48, %v1515_v46  ;;  %v7278_v10 = vpack.c.bf16 %v1526_v52, %v1522_v50  ;;  %v1557_v45 = vld [vmem:[%s10335_s18 + $0x1fa0] sm:$0xff]  ;;  %v1555_v46 = vld [vmem:[%s10335_s18 + $0x1f90] sm:$0xff]  ;;  %v1562_v50 = vld [vmem:[%s10335_s18 + $0x1fc8] sm:$0xff] }
 0x2d7   : > { %8283 = vmatprep.subr.bf16.mxu1 %v8282_v33  ;;  %v8302_v33 = vpack.c.bf16 %v1528_v26, %v1524_v53  ;;  %v1559_v48 = vld [vmem:[%s10335_s18 + $0x1fb0] sm:$0xff]  ;;  %v1566_v52 = vld [vmem:[%s10335_s18 + $0x1fe8] sm:$0xff]  ;;  %v1564_v53 = vld [vmem:[%s10335_s18 + $0x1fd8] sm:$0xff] }
 0x2d8   : > { %v1568_v26 = vld [vmem:[%s10335_s18 + $0x1ff8] sm:$0xff] }
 0x2d9   : > { %7261 = vmatpush1.bf16.msra.mxu0 %v7260_v3  ;;  %v7280_v3 = vpack.c.bf16 %v1525_v44, %v1521_v56  ;;  %v1561_v56 = vld [vmem:[%s10335_s18 + $0x1fc0] sm:$0xff] }
 0x2da   : > { %8285 = vmatpush1.bf16.msra.mxu1 %v8284_v4  ;;  %7263 = vmatprep.subr.bf16.mxu0 %v7262_v27  ;;  %v8304_v4 = vpack.c.bf16 %v1527_v58, %v1523_v57  ;;  %v7282_v27 = vpack.c.bf16 %v1534_v62, %v1530_v60  ;;  %v1565_v44 = vld [vmem:[%s10335_s18 + $0x1fe0] sm:$0xff]  ;;  %v1563_v57 = vld [vmem:[%s10335_s18 + $0x1fd0] sm:$0xff]  ;;  %v1570_v60 = vld [vmem:[%s10335_s18 + $0x2008] sm:$0xff] }
 0x2db   : > { %8287 = vmatprep.subr.bf16.mxu1 %v8286_v7  ;;  %v8306_v7 = vpack.c.bf16 %v1536_v2, %v1532_v1  ;;  %v1567_v58 = vld [vmem:[%s10335_s18 + $0x1ff0] sm:$0xff]  ;;  %v1574_v62 = vld [vmem:[%s10335_s18 + $0x2028] sm:$0xff]  ;;  %v1572_v1 = vld [vmem:[%s10335_s18 + $0x2018] sm:$0xff] }
 0x2dc   : > { %v1576_v2 = vld [vmem:[%s10335_s18 + $0x2038] sm:$0xff] }
 0x2dd   : > { %7265 = vmatpush1.bf16.msra.mxu0 %v7264_v15  ;;  %v7284_v15 = vpack.c.bf16 %v1533_v6, %v1529_v5  ;;  %v7302_v5 = vpack.c.bf16 %v1574_v62, %v1570_v60  ;;  %v1569_v6 = vld [vmem:[%s10335_s18 + $0x2000] sm:$0xff]  ;;  %v1607_v62 = vld [vmem:[%s10335_s18 + $0x2130] sm:$0xff] }
 0x2de   : > { %8289 = vmatpush1.bf16.msra.mxu1 %v8288_v16  ;;  %7267 = vmatprep.subr.bf16.mxu0 %v7266_v17  ;;  %v8308_v16 = vpack.c.bf16 %v1535_v8, %v1531_v29  ;;  %v7286_v17 = vpack.c.bf16 %v1542_v11, %v1538_v9  ;;  %v1573_v29 = vld [vmem:[%s10335_s18 + $0x2020] sm:$0xff]  ;;  %v8326_v8 = vpack.c.bf16 %v1576_v2, %v1572_v1  ;;  %v1575_v9 = vld [vmem:[%s10335_s18 + $0x2030] sm:$0xff]  ;;  %v1578_v11 = vld [vmem:[%s10335_s18 + $0x2048] sm:$0xff] }
 0x2df   : > { %8291 = vmatprep.subr.bf16.mxu1 %v8290_v21  ;;  %v8310_v21 = vpack.c.bf16 %v1544_v14, %v1540_v13  ;;  %v1582_v13 = vld [vmem:[%s10335_s18 + $0x2068] sm:$0xff] }
 0x2e0   : > { %v1610_v1 = vld [vmem:[%s10335_s18 + $0x2148] sm:$0xff] }
 0x2e1   : > { %7269 = vmatpush1.bf16.msra.mxu0 %v7268_v0  ;;  %v7288_v0 = vpack.c.bf16 %v1541_v19, %v1537_v18  ;;  %v7306_v19 = vpack.c.bf16 %v1582_v13, %v1578_v11  ;;  %v1614_v2 = vld [vmem:[%s10335_s18 + $0x2168] sm:$0xff]  ;;  %v1615_v13 = vld [vmem:[%s10335_s18 + $0x2170] sm:$0xff] }
 0x2e2   : > { %8293 = vmatpush1.bf16.msra.mxu1 %v8292_v25  ;;  %7271 = vmatprep.subr.bf16.mxu0 %v7270_v28  ;;  %v8312_v25 = vpack.c.bf16 %v1543_v51, %v1539_v20  ;;  %v7290_v28 = vpack.c.bf16 %v1550_v23, %v1546_v22  ;;  %v1577_v20 = vld [vmem:[%s10335_s18 + $0x2040] sm:$0xff]  ;;  %v1579_v51 = vld [vmem:[%s10335_s18 + $0x2050] sm:$0xff] }
 0x2e3   : > { %8295 = vmatprep.subr.bf16.mxu1 %v8294_v34  ;;  %v8314_v34 = vpack.c.bf16 %v1552_v24, %v1548_v43  ;;  %v1583_v23 = vld [vmem:[%s10335_s18 + $0x2070] sm:$0xff]  ;;  %v1586_v43 = vld [vmem:[%s10335_s18 + $0x2088] sm:$0xff] }
 0x2e4   : > { %v1590_v24 = vld [vmem:[%s10335_s18 + $0x20a8] sm:$0xff] }
 0x2e5   : > { %7273 = vmatpush1.bf16.msra.mxu0 %v7272_v39  ;;  %v7292_v39 = vpack.c.bf16 %v1549_v31, %v1545_v30  ;;  %v8332_v31 = vpack.c.bf16 %v1583_v23, %v1579_v51  ;;  %v1617_v51 = vld [vmem:[%s10335_s18 + $0x2180] sm:$0xff]  ;;  %v1619_v23 = vld [vmem:[%s10335_s18 + $0x2190] sm:$0xff] }
 0x2e6   : > { %8297 = vmatpush1.bf16.msra.mxu1 %v8296_v40  ;;  %7275 = vmatprep.subr.bf16.mxu0 %v7274_v41  ;;  %v8316_v40 = vpack.c.bf16 %v1551_v35, %v1547_v32  ;;  %v7294_v41 = vpack.c.bf16 %v1558_v37, %v1554_v36  ;;  %v7310_v32 = vpack.c.bf16 %v1590_v24, %v1586_v43  ;;  %v1589_v35 = vld [vmem:[%s10335_s18 + $0x20a0] sm:$0xff]  ;;  %v1587_v36 = vld [vmem:[%s10335_s18 + $0x2090] sm:$0xff] }
 0x2e7   : > { %8299 = vmatprep.subr.bf16.mxu1 %v8298_v47  ;;  %v8318_v47 = vpack.c.bf16 %v1560_v38, %v1556_v59  ;;  %v1591_v59 = vld [vmem:[%s10335_s18 + $0x20b0] sm:$0xff]  ;;  %v1594_v38 = vld [vmem:[%s10335_s18 + $0x20c8] sm:$0xff] }
 0x2e8   : > { %v1623_v24 = vld [vmem:[%s10335_s18 + $0x21b0] sm:$0xff] }
 0x2e9   : > { %7277 = vmatpush1.bf16.msra.mxu0 %v7276_v54  ;;  %v7296_v54 = vpack.c.bf16 %v1557_v45, %v1553_v42  ;;  %v8336_v42 = vpack.c.bf16 %v1591_v59, %v1587_v36  ;;  %v1629_v36 = vld [vmem:[%s10335_s18 + $0x21e0] sm:$0xff] }
 0x2ea   : > { %8301 = vmatpush1.bf16.msra.mxu1 %v8300_v55  ;;  %7279 = vmatprep.subr.bf16.mxu0 %v7278_v10  ;;  %v8320_v55 = vpack.c.bf16 %v1559_v48, %v1555_v46  ;;  %v7298_v10 = vpack.c.bf16 %v1566_v52, %v1562_v50  ;;  %v1593_v46 = vld [vmem:[%s10335_s18 + $0x20c0] sm:$0xff]  ;;  %v1595_v48 = vld [vmem:[%s10335_s18 + $0x20d0] sm:$0xff] }
 0x2eb   : > { %8303 = vmatprep.subr.bf16.mxu1 %v8302_v33  ;;  %v8322_v33 = vpack.c.bf16 %v1568_v26, %v1564_v53  ;;  %v1599_v52 = vld [vmem:[%s10335_s18 + $0x20f0] sm:$0xff]  ;;  %v1602_v53 = vld [vmem:[%s10335_s18 + $0x2108] sm:$0xff] }
 0x2ec   : > { %v1606_v26 = vld [vmem:[%s10335_s18 + $0x2128] sm:$0xff] }
 0x2ed   : > { %7281 = vmatpush1.bf16.msra.mxu0 %v7280_v3  ;;  %v11472_v3 = vld [vmem:[%s10328_s24 + $0x20] sm:$0xff] }
 0x2ee   : > { %8305 = vmatpush1.bf16.msra.mxu1 %v8304_v4  ;;  %7283 = vmatprep.subr.bf16.mxu0 %v7282_v27  ;;  %v7300_v4 = vpack.c.bf16 %v1565_v44, %v1561_v56  ;;  %v8324_v27 = vpack.c.bf16 %v1567_v58, %v1563_v57  ;;  %v11482_v14 = vrot.slane %v11472_v3, %v10455_v12  ;;  %v1601_v57 = vld [vmem:[%s10335_s18 + $0x2100] sm:$0xff]  ;;  %v1603_v58 = vld [vmem:[%s10335_s18 + $0x2110] sm:$0xff] }
 0x2ef   : > { %8307 = vmatprep.subr.bf16.mxu1 %v8306_v7  ;;  %v1571_v7 = vld [vmem:[%s10335_s18 + $0x2010] sm:$0xff]  ;;  %v8340_v56 = vpack.c.bf16 %v1599_v52, %v1595_v48  ;;  %v7318_v44 = vpack.c.bf16 %v1606_v26, %v1602_v53  ;;  %v1637_v48 = vld [vmem:[%s10335_s18 + $0x2220] sm:$0xff]  ;;  %v1642_v26 = vld [vmem:[%s10335_s18 + $0x2248] sm:$0xff] }
 0x2f0   : > { %v8328_v18 = vpack.c.bf16 %v1575_v9, %v1571_v7  ;;  %v1609_v7 = vld [vmem:[%s10335_s18 + $0x2140] sm:$0xff]  ;;  %v1611_v9 = vld [vmem:[%s10335_s18 + $0x2150] sm:$0xff] }
 0x2f1   : > { %7285 = vmatpush1.bf16.msra.mxu0 %v7284_v15  ;;  %v1580_v15 = vld [vmem:[%s10335_s18 + $0x2058] sm:$0xff]  ;;  %v1639_v53 = vld [vmem:[%s10335_s18 + $0x2230] sm:$0xff] }
 0x2f2   : > { %8309 = vmatpush1.bf16.msra.mxu1 %v8308_v16  ;;  %7287 = vmatprep.subr.bf16.mxu0 %v7286_v17  ;;  %v1584_v16 = vld [vmem:[%s10335_s18 + $0x2078] sm:$0xff]  ;;  %v7304_v17 = vpack.c.bf16 %v1573_v29, %v1569_v6  ;;  %v8344_v6 = vpack.c.bf16 %v1607_v62, %v1603_v58  ;;  %v7322_v29 = vpack.c.bf16 %v1614_v2, %v1610_v1  ;;  %v1645_v58 = vld [vmem:[%s10335_s18 + $0x2260] sm:$0xff]  ;;  %v1647_v1 = vld [vmem:[%s10335_s18 + $0x2270] sm:$0xff] }
 0x2f3   : > { %8311 = vmatprep.subr.bf16.mxu1 %v8310_v21  ;;  %v1581_v21 = vld [vmem:[%s10335_s18 + $0x2060] sm:$0xff]  ;;  %v8330_v22 = vpack.c.bf16 %v1584_v16, %v1580_v15  ;;  %v1618_v15 = vld [vmem:[%s10335_s18 + $0x2188] sm:$0xff] }
 0x2f4   : > { %v7308_v30 = vpack.c.bf16 %v1581_v21, %v1577_v20  ;;  %v1622_v16 = vld [vmem:[%s10335_s18 + $0x21a8] sm:$0xff]  ;;  %v8348_v20 = vpack.c.bf16 %v1615_v13, %v1611_v9  ;;  %v1653_v9 = vld [vmem:[%s10335_s18 + $0x22a0] sm:$0xff] }
 0x2f5   : > { %7289 = vmatpush1.bf16.msra.mxu0 %v7288_v0  ;;  %v2684_v0 = vcombine.high %v11482_v14, %v11482_v14  ;;  %v7326_v21 = vpack.c.bf16 %v1622_v16, %v1618_v15  ;;  %v1650_v2 = vld [vmem:[%s10335_s18 + $0x2288] sm:$0xff]  ;;  %v1655_v15 = vld [vmem:[%s10335_s18 + $0x22b0] sm:$0xff] }
 0x2f6   : > { %8313 = vmatpush1.bf16.msra.mxu1 %v8312_v25  ;;  %7291 = vmatprep.subr.bf16.mxu0 %v7290_v28  ;;  %v1588_v25 = vld [vmem:[%s10335_s18 + $0x2098] sm:$0xff]  ;;  %v1658_v16 = vld [vmem:[%s10335_s18 + $0x22c8] sm:$0xff] }
 0x2f7   : > { %8315 = vmatprep.subr.bf16.mxu1 %v8314_v34  ;;  %v1592_v28 = vld [vmem:[%s10335_s18 + $0x20b8] sm:$0xff]  ;;  %v1585_v34 = vld [vmem:[%s10335_s18 + $0x2080] sm:$0xff] }
 0x2f8   : > { %v8334_v37 = vpack.c.bf16 %v1592_v28, %v1588_v25  ;;  %v1630_v25 = vld [vmem:[%s10335_s18 + $0x21e8] sm:$0xff]  ;;  %v1628_v28 = vld [vmem:[%s10335_s18 + $0x21d8] sm:$0xff] }
 0x2f9   : > { %7293 = vmatpush1.bf16.msra.mxu0 %v7292_v39  ;;  %v1598_v39 = vld [vmem:[%s10335_s18 + $0x20e8] sm:$0xff] }
 0x2fa   : > { %8317 = vmatpush1.bf16.msra.mxu1 %v8316_v40  ;;  %7295 = vmatprep.subr.bf16.mxu0 %v7294_v41  ;;  %v1600_v40 = vld [vmem:[%s10335_s18 + $0x20f8] sm:$0xff]  ;;  %v7312_v41 = vpack.c.bf16 %v1589_v35, %v1585_v34  ;;  %v7314_v45 = vpack.c.bf16 %v1598_v39, %v1594_v38  ;;  %v1625_v35 = vld [vmem:[%s10335_s18 + $0x21c0] sm:$0xff]  ;;  %v1631_v38 = vld [vmem:[%s10335_s18 + $0x21f0] sm:$0xff] }
 0x2fb   : > { %8319 = vmatprep.subr.bf16.mxu1 %v8318_v47  ;;  %v1597_v47 = vld [vmem:[%s10335_s18 + $0x20e0] sm:$0xff]  ;;  %v1634_v39 = vld [vmem:[%s10335_s18 + $0x2208] sm:$0xff] }
 0x2fd   : > { %7297 = vmatpush1.bf16.msra.mxu0 %v7296_v54  ;;  %v1604_v54 = vld [vmem:[%s10335_s18 + $0x2118] sm:$0xff] }
 0x2fe   : > { %8321 = vmatpush1.bf16.msra.mxu1 %v8320_v55  ;;  %7299 = vmatprep.subr.bf16.mxu0 %v7298_v10  ;;  %v1608_v55 = vld [vmem:[%s10335_s18 + $0x2138] sm:$0xff]  ;;  %v7316_v10 = vpack.c.bf16 %v1597_v47, %v1593_v46  ;;  %v1633_v47 = vld [vmem:[%s10335_s18 + $0x2200] sm:$0xff] }
 0x2ff   : > { %8323 = vmatprep.subr.bf16.mxu1 %v8322_v33  ;;  %v1605_v33 = vld [vmem:[%s10335_s18 + $0x2120] sm:$0xff]  ;;  %v8342_v60 = vpack.c.bf16 %v1608_v55, %v1604_v54  ;;  %v1646_v54 = vld [vmem:[%s10335_s18 + $0x2268] sm:$0xff]  ;;  %v1644_v55 = vld [vmem:[%s10335_s18 + $0x2258] sm:$0xff] }
 0x301   : > { %7301 = vmatpush1.bf16.msra.mxu0 %v7300_v4  ;;  %v1612_v4 = vld [vmem:[%s10335_s18 + $0x2158] sm:$0xff] }
 0x302   : > { %8325 = vmatpush1.bf16.msra.mxu1 %v8324_v27  ;;  %7303 = vmatprep.subr.bf16.mxu0 %v7302_v5  ;;  %v1616_v27 = vld [vmem:[%s10335_s18 + $0x2178] sm:$0xff]  ;;  %v7320_v5 = vpack.c.bf16 %v1605_v33, %v1601_v57  ;;  %v7338_v57 = vpack.c.bf16 %v1646_v54, %v1642_v26  ;;  %v1641_v33 = vld [vmem:[%s10335_s18 + $0x2240] sm:$0xff]  ;;  %v1679_v26 = vld [vmem:[%s10335_s18 + $0x2370] sm:$0xff] }
 0x303   : > { %8327 = vmatprep.subr.bf16.mxu1 %v8326_v8  ;;  %v1613_v8 = vld [vmem:[%s10335_s18 + $0x2160] sm:$0xff]  ;;  %v8346_v11 = vpack.c.bf16 %v1616_v27, %v1612_v4  ;;  %v1654_v4 = vld [vmem:[%s10335_s18 + $0x22a8] sm:$0xff]  ;;  %v1652_v27 = vld [vmem:[%s10335_s18 + $0x2298] sm:$0xff] }
 0x304   : > { %3331 = vmatmul.mubr.f32.vlgmr.msra.gmra.mrb[0].mxu0 %v11343_v61  ;;  %v1682_v54 = vld [vmem:[%s10335_s18 + $0x2388] sm:$0xff] }
 0x305   : > { %7305 = vmatpush1.bf16.msra.mxu0 %v7304_v17  ;;  %4467 = vmatmul.mubr.f32.vlgmr.msra.gmra.mrb[0].mxu1 %v11343_v61  ;;  %v1596_v61 = vld [vmem:[%s10335_s18 + $0x20d8] sm:$0xff] }
 0x306   : > { %8329 = vmatpush1.bf16.msra.mxu1 %v8328_v18  ;;  %7307 = vmatprep.subr.bf16.mxu0 %v7306_v19  ;;  %v8338_v50 = vpack.c.bf16 %v1600_v40, %v1596_v61  ;;  %v1620_v17 = vld [vmem:[%s10335_s18 + $0x2198] sm:$0xff]  ;;  %v7324_v19 = vpack.c.bf16 %v1613_v8, %v1609_v7  ;;  %v1638_v61 = vld [vmem:[%s10335_s18 + $0x2228] sm:$0xff]  ;;  %v7342_v7 = vpack.c.bf16 %v1654_v4, %v1650_v2  ;;  %v1649_v8 = vld [vmem:[%s10335_s18 + $0x2280] sm:$0xff] }
 0x307   : > { %8331 = vmatprep.subr.bf16.mxu1 %v8330_v22  ;;  %3401 = vmatprep.mubr.f32.mxu0 %v2684_v0  ;;  %v1624_v18 = vld [vmem:[%s10335_s18 + $0x21b8] sm:$0xff]  ;;  %v1621_v22 = vld [vmem:[%s10335_s18 + $0x21a0] sm:$0xff]  ;;  %v7334_v46 = vpack.c.bf16 %v1638_v61, %v1634_v39  ;;  %v1671_v39 = vld [vmem:[%s10335_s18 + $0x2330] sm:$0xff] }
 0x308   : > { %4537 = vmatprep.mubr.f32.mxu1 %v2684_v0  ;;  %v8350_v43 = vpack.c.bf16 %v1624_v18, %v1620_v17  ;;  %v1626_v0 = vld [vmem:[%s10335_s18 + $0x21c8] sm:$0xff]  ;;  %v1636_v40 = vld [vmem:[%s10335_s18 + $0x2218] sm:$0xff]  ;;  %v1687_v2 = vld [vmem:[%s10335_s18 + $0x23b0] sm:$0xff] }
 0x309   : > { %7309 = vmatpush1.bf16.msra.mxu0 %v7308_v30  ;;  %v1632_v30 = vld [vmem:[%s10335_s18 + $0x21f8] sm:$0xff]  ;;  %v7330_v34 = vpack.c.bf16 %v1630_v25, %v1626_v0  ;;  %v1662_v17 = vld [vmem:[%s10335_s18 + $0x22e8] sm:$0xff]  ;;  %v1663_v0 = vld [vmem:[%s10335_s18 + $0x22f0] sm:$0xff] }
 0x30a   : > { %8333 = vmatpush1.bf16.msra.mxu1 %v8332_v31  ;;  %7311 = vmatprep.subr.bf16.mxu0 %v7310_v32  ;;  %v7328_v31 = vpack.c.bf16 %v1621_v22, %v1617_v51  ;;  %v8352_v32 = vpack.c.bf16 %v1623_v24, %v1619_v23  ;;  %v8354_v59 = vpack.c.bf16 %v1632_v30, %v1628_v28  ;;  %v1660_v18 = vld [vmem:[%s10335_s18 + $0x22d8] sm:$0xff]  ;;  %v1657_v22 = vld [vmem:[%s10335_s18 + $0x22c0] sm:$0xff]  ;;  %v1666_v25 = vld [vmem:[%s10335_s18 + $0x2308] sm:$0xff] }
 0x30b   : > { %8335 = vmatprep.subr.bf16.mxu1 %v8334_v37  ;;  %v1627_v37 = vld [vmem:[%s10335_s18 + $0x21d0] sm:$0xff]  ;;  %v7346_v51 = vpack.c.bf16 %v1662_v17, %v1658_v16  ;;  %v1661_v23 = vld [vmem:[%s10335_s18 + $0x22e0] sm:$0xff]  ;;  %v1670_v28 = vld [vmem:[%s10335_s18 + $0x2328] sm:$0xff] }
 0x30c   : > { %v1668_v30 = vld [vmem:[%s10335_s18 + $0x2318] sm:$0xff]  ;;  %v1674_v61 = vld [vmem:[%s10335_s18 + $0x2348] sm:$0xff]  ;;  %v1695_v16 = vld [vmem:[%s10335_s18 + $0x23f0] sm:$0xff] }
 0x30d   : > { %7313 = vmatpush1.bf16.msra.mxu0 %v7312_v41  ;;  %v1640_v41 = vld [vmem:[%s10335_s18 + $0x2238] sm:$0xff]  ;;  %v1690_v4 = vld [vmem:[%s10335_s18 + $0x23c8] sm:$0xff] }
 0x30e   : > { %8337 = vmatpush1.bf16.msra.mxu1 %v8336_v42  ;;  %7315 = vmatprep.subr.bf16.mxu0 %v7314_v45  ;;  %v7332_v42 = vpack.c.bf16 %v1629_v36, %v1625_v35  ;;  %v8356_v45 = vpack.c.bf16 %v1631_v38, %v1627_v37  ;;  %v8358_v52 = vpack.c.bf16 %v1640_v41, %v1636_v40  ;;  %v1665_v36 = vld [vmem:[%s10335_s18 + $0x2300] sm:$0xff]  ;;  %v1678_v40 = vld [vmem:[%s10335_s18 + $0x2368] sm:$0xff]  ;;  %v1676_v41 = vld [vmem:[%s10335_s18 + $0x2358] sm:$0xff] }
 0x30f   : > { %8339 = vmatprep.subr.bf16.mxu1 %v8338_v50  ;;  %v1635_v50 = vld [vmem:[%s10335_s18 + $0x2210] sm:$0xff]  ;;  %v7350_v35 = vpack.c.bf16 %v1670_v28, %v1666_v25  ;;  %v1669_v37 = vld [vmem:[%s10335_s18 + $0x2320] sm:$0xff]  ;;  %v1698_v17 = vld [vmem:[%s10335_s18 + $0x2408] sm:$0xff] }
 0x310   : > { %v1706_v28 = vld [vmem:[%s10335_s18 + $0x2448] sm:$0xff] }
 0x311   : > { %7317 = vmatpush1.bf16.msra.mxu0 %v7316_v10  ;;  %v1648_v10 = vld [vmem:[%s10335_s18 + $0x2278] sm:$0xff] }
 0x312   : > { %8341 = vmatpush1.bf16.msra.mxu1 %v8340_v56  ;;  %7319 = vmatprep.subr.bf16.mxu0 %v7318_v44  ;;  %v7336_v56 = vpack.c.bf16 %v1637_v48, %v1633_v47  ;;  %v8360_v44 = vpack.c.bf16 %v1639_v53, %v1635_v50  ;;  %v8362_v62 = vpack.c.bf16 %v1648_v10, %v1644_v55  ;;  %v1673_v48 = vld [vmem:[%s10335_s18 + $0x2340] sm:$0xff]  ;;  %v1686_v55 = vld [vmem:[%s10335_s18 + $0x23a8] sm:$0xff]  ;;  %v1684_v10 = vld [vmem:[%s10335_s18 + $0x2398] sm:$0xff] }
 0x313   : > { %8343 = vmatprep.subr.bf16.mxu1 %v8342_v60  ;;  %v1643_v60 = vld [vmem:[%s10335_s18 + $0x2250] sm:$0xff]  ;;  %v7354_v47 = vpack.c.bf16 %v1678_v40, %v1674_v61  ;;  %v1677_v50 = vld [vmem:[%s10335_s18 + $0x2360] sm:$0xff] }
 0x314   : > { %v1711_v40 = vld [vmem:[%s10335_s18 + $0x2470] sm:$0xff] }
 0x315   : > { %7321 = vmatpush1.bf16.msra.mxu0 %v7320_v5  ;;  %v1656_v5 = vld [vmem:[%s10335_s18 + $0x22b8] sm:$0xff] }
 0x316   : > { %8345 = vmatpush1.bf16.msra.mxu1 %v8344_v6  ;;  %7323 = vmatprep.subr.bf16.mxu0 %v7322_v29  ;;  %v7340_v6 = vpack.c.bf16 %v1645_v58, %v1641_v33  ;;  %v8364_v29 = vpack.c.bf16 %v1647_v1, %v1643_v60  ;;  %v8366_v13 = vpack.c.bf16 %v1656_v5, %v1652_v27  ;;  %v1681_v58 = vld [vmem:[%s10335_s18 + $0x2380] sm:$0xff]  ;;  %v1694_v27 = vld [vmem:[%s10335_s18 + $0x23e8] sm:$0xff]  ;;  %v1692_v5 = vld [vmem:[%s10335_s18 + $0x23d8] sm:$0xff] }
 0x317   : > { %8347 = vmatprep.subr.bf16.mxu1 %v8346_v11  ;;  %v1651_v11 = vld [vmem:[%s10335_s18 + $0x2290] sm:$0xff]  ;;  %v7358_v33 = vpack.c.bf16 %v1686_v55, %v1682_v54  ;;  %v1685_v60 = vld [vmem:[%s10335_s18 + $0x23a0] sm:$0xff] }
 0x318   : > { %v1715_v54 = vld [vmem:[%s10335_s18 + $0x2490] sm:$0xff] }
 0x319   : > { %7325 = vmatpush1.bf16.msra.mxu0 %v7324_v19  ;;  %v1664_v19 = vld [vmem:[%s10335_s18 + $0x22f8] sm:$0xff] }
 0x31a   : > { %8349 = vmatpush1.bf16.msra.mxu1 %v8348_v20  ;;  %7327 = vmatprep.subr.bf16.mxu0 %v7326_v21  ;;  %v7344_v20 = vpack.c.bf16 %v1653_v9, %v1649_v8  ;;  %v8368_v21 = vpack.c.bf16 %v1655_v15, %v1651_v11  ;;  %v8370_v24 = vpack.c.bf16 %v1664_v19, %v1660_v18  ;;  %v1689_v9 = vld [vmem:[%s10335_s18 + $0x23c0] sm:$0xff]  ;;  %v1702_v18 = vld [vmem:[%s10335_s18 + $0x2428] sm:$0xff] }
 0x31b   : > { %8351 = vmatprep.subr.bf16.mxu1 %v8350_v43  ;;  %v1659_v43 = vld [vmem:[%s10335_s18 + $0x22d0] sm:$0xff]  ;;  %v7362_v8 = vpack.c.bf16 %v1694_v27, %v1690_v4  ;;  %v1693_v11 = vld [vmem:[%s10335_s18 + $0x23e0] sm:$0xff]  ;;  %v2669_v19 = vcombine.high %v11472_v3, %v11472_v3 }
 0x31c   : > { %v1703_v3 = vld [vmem:[%s10335_s18 + $0x2430] sm:$0xff] }
 0x31d   : > { %7329 = vmatpush1.bf16.msra.mxu0 %v7328_v31  ;;  %v1672_v31 = vld [vmem:[%s10335_s18 + $0x2338] sm:$0xff]  ;;  %v1727_v27 = vld [vmem:[%s10335_s18 + $0x24f0] sm:$0xff] }
 0x31e   : > { %8353 = vmatpush1.bf16.msra.mxu1 %v8352_v32  ;;  %7331 = vmatprep.subr.bf16.mxu0 %v7330_v34  ;;  %v7348_v32 = vpack.c.bf16 %v1661_v23, %v1657_v22  ;;  %v8372_v34 = vpack.c.bf16 %v1663_v0, %v1659_v43  ;;  %v8374_v38 = vpack.c.bf16 %v1672_v31, %v1668_v30  ;;  %v1697_v43 = vld [vmem:[%s10335_s18 + $0x2400] sm:$0xff]  ;;  %v1699_v0 = vld [vmem:[%s10335_s18 + $0x2410] sm:$0xff]  ;;  %v1710_v30 = vld [vmem:[%s10335_s18 + $0x2468] sm:$0xff] }
 0x31f   : > { %8355 = vmatprep.subr.bf16.mxu1 %v8354_v59  ;;  %v1667_v59 = vld [vmem:[%s10335_s18 + $0x2310] sm:$0xff]  ;;  %v7366_v23 = vpack.c.bf16 %v1702_v18, %v1698_v17  ;;  %v11619_v31 = vrot.slane %v2669_v19, %v10455_v12  ;;  %v1738_v19 = vld [vmem:[%s10335_s18 + $0x2548] sm:$0xff] }
 0x320   : > { %v1735_v18 = vld [vmem:[%s10335_s18 + $0x2530] sm:$0xff] }
 0x321   : > { %7333 = vmatpush1.bf16.msra.mxu0 %v7332_v42  ;;  %v1680_v42 = vld [vmem:[%s10335_s18 + $0x2378] sm:$0xff] }
 0x322   : > { %8357 = vmatpush1.bf16.msra.mxu1 %v8356_v45  ;;  %7335 = vmatprep.subr.bf16.mxu0 %v7334_v46  ;;  %v7352_v45 = vpack.c.bf16 %v1669_v37, %v1665_v36  ;;  %v8376_v46 = vpack.c.bf16 %v1671_v39, %v1667_v59  ;;  %v8378_v53 = vpack.c.bf16 %v1680_v42, %v1676_v41  ;;  %v1705_v59 = vld [vmem:[%s10335_s18 + $0x2440] sm:$0xff]  ;;  %v1707_v39 = vld [vmem:[%s10335_s18 + $0x2450] sm:$0xff]  ;;  %v1714_v41 = vld [vmem:[%s10335_s18 + $0x2488] sm:$0xff] }
 0x323   : > { %8359 = vmatprep.subr.bf16.mxu1 %v8358_v52  ;;  %v1675_v52 = vld [vmem:[%s10335_s18 + $0x2350] sm:$0xff]  ;;  %v8392_v36 = vpack.c.bf16 %v1703_v3, %v1699_v0  ;;  %v7370_v37 = vpack.c.bf16 %v1710_v30, %v1706_v28  ;;  %v1718_v42 = vld [vmem:[%s10335_s18 + $0x24a8] sm:$0xff]  ;;  %v1741_v0 = vld [vmem:[%s10335_s18 + $0x2560] sm:$0xff] }
 0x324   : > { %v1743_v28 = vld [vmem:[%s10335_s18 + $0x2570] sm:$0xff]  ;;  %v1746_v30 = vld [vmem:[%s10335_s18 + $0x2588] sm:$0xff] }
 0x325   : > { %7337 = vmatpush1.bf16.msra.mxu0 %v7336_v56  ;;  %v1688_v56 = vld [vmem:[%s10335_s18 + $0x23b8] sm:$0xff] }
 0x326   : > { %8361 = vmatpush1.bf16.msra.mxu1 %v8360_v44  ;;  %7339 = vmatprep.subr.bf16.mxu0 %v7338_v57  ;;  %v7356_v44 = vpack.c.bf16 %v1677_v50, %v1673_v48  ;;  %v8380_v57 = vpack.c.bf16 %v1679_v26, %v1675_v52  ;;  %v8382_v1 = vpack.c.bf16 %v1688_v56, %v1684_v10  ;;  %v1717_v26 = vld [vmem:[%s10335_s18 + $0x24a0] sm:$0xff]  ;;  %v1719_v10 = vld [vmem:[%s10335_s18 + $0x24b0] sm:$0xff]  ;;  %v1722_v56 = vld [vmem:[%s10335_s18 + $0x24c8] sm:$0xff] }
 0x327   : > { %8363 = vmatprep.subr.bf16.mxu1 %v8362_v62  ;;  %v1683_v62 = vld [vmem:[%s10335_s18 + $0x2390] sm:$0xff]  ;;  %v8396_v50 = vpack.c.bf16 %v1711_v40, %v1707_v39  ;;  %v7374_v52 = vpack.c.bf16 %v1718_v42, %v1714_v41  ;;  %v1749_v39 = vld [vmem:[%s10335_s18 + $0x25a0] sm:$0xff]  ;;  %v1754_v42 = vld [vmem:[%s10335_s18 + $0x25c8] sm:$0xff] }
 0x328   : > { %v1751_v41 = vld [vmem:[%s10335_s18 + $0x25b0] sm:$0xff] }
 0x329   : > { %7341 = vmatpush1.bf16.msra.mxu0 %v7340_v6  ;;  %v1696_v6 = vld [vmem:[%s10335_s18 + $0x23f8] sm:$0xff] }
 0x32a   : > { %8365 = vmatpush1.bf16.msra.mxu1 %v8364_v29  ;;  %7343 = vmatprep.subr.bf16.mxu0 %v7342_v7  ;;  %v7360_v29 = vpack.c.bf16 %v1685_v60, %v1681_v58  ;;  %v8384_v7 = vpack.c.bf16 %v1687_v2, %v1683_v62  ;;  %v8386_v15 = vpack.c.bf16 %v1696_v6, %v1692_v5  ;;  %v1721_v62 = vld [vmem:[%s10335_s18 + $0x24c0] sm:$0xff]  ;;  %v1723_v2 = vld [vmem:[%s10335_s18 + $0x24d0] sm:$0xff]  ;;  %v1730_v5 = vld [vmem:[%s10335_s18 + $0x2508] sm:$0xff] }
 0x32b   : > { %8367 = vmatprep.subr.bf16.mxu1 %v8366_v13  ;;  %v1691_v13 = vld [vmem:[%s10335_s18 + $0x23d0] sm:$0xff]  ;;  %v8400_v58 = vpack.c.bf16 %v1719_v10, %v1715_v54  ;;  %v1734_v6 = vld [vmem:[%s10335_s18 + $0x2528] sm:$0xff] }
 0x32c   : > { %v8388_v22 = vpack.c.bf16 %v1695_v16, %v1691_v13  ;;  %v1729_v13 = vld [vmem:[%s10335_s18 + $0x2500] sm:$0xff]  ;;  %v1731_v16 = vld [vmem:[%s10335_s18 + $0x2510] sm:$0xff] }
 0x32d   : > { %7345 = vmatpush1.bf16.msra.mxu0 %v7344_v20  ;;  %v1700_v20 = vld [vmem:[%s10335_s18 + $0x2418] sm:$0xff]  ;;  %v1755_v54 = vld [vmem:[%s10335_s18 + $0x25d0] sm:$0xff] }
 0x32e   : > { %8369 = vmatpush1.bf16.msra.mxu1 %v8368_v21  ;;  %7347 = vmatprep.subr.bf16.mxu0 %v7346_v51  ;;  %v1704_v21 = vld [vmem:[%s10335_s18 + $0x2438] sm:$0xff]  ;;  %v7364_v51 = vpack.c.bf16 %v1693_v11, %v1689_v9  ;;  %v8404_v9 = vpack.c.bf16 %v1727_v27, %v1723_v2  ;;  %v7382_v11 = vpack.c.bf16 %v1734_v6, %v1730_v5  ;;  %v1759_v10 = vld [vmem:[%s10335_s18 + $0x25f0] sm:$0xff]  ;;  %v1770_v5 = vld [vmem:[%s10335_s18 + $0x2648] sm:$0xff] }
 0x32f   : > { %8371 = vmatprep.subr.bf16.mxu1 %v8370_v24  ;;  %v1701_v24 = vld [vmem:[%s10335_s18 + $0x2420] sm:$0xff]  ;;  %v8390_v25 = vpack.c.bf16 %v1704_v21, %v1700_v20  ;;  %v1742_v20 = vld [vmem:[%s10335_s18 + $0x2568] sm:$0xff]  ;;  %v1740_v21 = vld [vmem:[%s10335_s18 + $0x2558] sm:$0xff] }
 0x330   : > { %v1763_v2 = vld [vmem:[%s10335_s18 + $0x2610] sm:$0xff]  ;;  %v1774_v6 = vld [vmem:[%s10335_s18 + $0x2668] sm:$0xff] }
 0x331   : > { %7349 = vmatpush1.bf16.msra.mxu0 %v7348_v32  ;;  %v1708_v32 = vld [vmem:[%s10335_s18 + $0x2458] sm:$0xff]  ;;  %v1767_v27 = vld [vmem:[%s10335_s18 + $0x2630] sm:$0xff] }
 0x332   : > { %8373 = vmatpush1.bf16.msra.mxu1 %v8372_v34  ;;  %7351 = vmatprep.subr.bf16.mxu0 %v7350_v35  ;;  %v1712_v34 = vld [vmem:[%s10335_s18 + $0x2478] sm:$0xff]  ;;  %v7368_v35 = vpack.c.bf16 %v1701_v24, %v1697_v43  ;;  %v7386_v43 = vpack.c.bf16 %v1742_v20, %v1738_v19  ;;  %v1737_v24 = vld [vmem:[%s10335_s18 + $0x2540] sm:$0xff]  ;;  %v1778_v19 = vld [vmem:[%s10335_s18 + $0x2688] sm:$0xff] }
 0x333   : > { %8375 = vmatprep.subr.bf16.mxu1 %v8374_v38  ;;  %v1709_v38 = vld [vmem:[%s10335_s18 + $0x2460] sm:$0xff]  ;;  %v8394_v61 = vpack.c.bf16 %v1712_v34, %v1708_v32  ;;  %v1750_v32 = vld [vmem:[%s10335_s18 + $0x25a8] sm:$0xff]  ;;  %v1748_v34 = vld [vmem:[%s10335_s18 + $0x2598] sm:$0xff] }
 0x334   : > { %v7372_v48 = vpack.c.bf16 %v1709_v38, %v1705_v59  ;;  %v7390_v59 = vpack.c.bf16 %v1750_v32, %v1746_v30  ;;  %v1745_v38 = vld [vmem:[%s10335_s18 + $0x2580] sm:$0xff]  ;;  %v1782_v20 = vld [vmem:[%s10335_s18 + $0x26a8] sm:$0xff] }
 0x335   : > { %7353 = vmatpush1.bf16.msra.mxu0 %v7352_v45  ;;  %v2685_v45 = vcombine.high %v11619_v31, %v11619_v31  ;;  %v1786_v30 = vld [vmem:[%s10335_s18 + $0x26c8] sm:$0xff] }
 0x336   : > { %8377 = vmatpush1.bf16.msra.mxu1 %v8376_v46  ;;  %7355 = vmatprep.subr.bf16.mxu0 %v7354_v47  ;;  %v1716_v46 = vld [vmem:[%s10335_s18 + $0x2498] sm:$0xff]  ;;  %v1790_v32 = vld [vmem:[%s10335_s18 + $0x26e8] sm:$0xff] }
 0x337   : > { %8379 = vmatprep.subr.bf16.mxu1 %v8378_v53  ;;  %v1720_v47 = vld [vmem:[%s10335_s18 + $0x24b8] sm:$0xff]  ;;  %v1713_v53 = vld [vmem:[%s10335_s18 + $0x2480] sm:$0xff] }
 0x338   : > { %v8398_v55 = vpack.c.bf16 %v1720_v47, %v1716_v46  ;;  %v1756_v46 = vld [vmem:[%s10335_s18 + $0x25d8] sm:$0xff] }
 0x339   : > { %7357 = vmatpush1.bf16.msra.mxu0 %v7356_v44  ;;  %v1726_v44 = vld [vmem:[%s10335_s18 + $0x24e8] sm:$0xff]  ;;  %v1760_v47 = vld [vmem:[%s10335_s18 + $0x25f8] sm:$0xff] }
 0x33a   : > { %8381 = vmatpush1.bf16.msra.mxu1 %v8380_v57  ;;  %7359 = vmatprep.subr.bf16.mxu0 %v7358_v33  ;;  %v1728_v57 = vld [vmem:[%s10335_s18 + $0x24f8] sm:$0xff]  ;;  %v7376_v33 = vpack.c.bf16 %v1717_v26, %v1713_v53  ;;  %v7378_v60 = vpack.c.bf16 %v1726_v44, %v1722_v56  ;;  %v1753_v53 = vld [vmem:[%s10335_s18 + $0x25c0] sm:$0xff]  ;;  %v1762_v56 = vld [vmem:[%s10335_s18 + $0x2608] sm:$0xff] }
 0x33b   : > { %8383 = vmatprep.subr.bf16.mxu1 %v8382_v1  ;;  %v1725_v1 = vld [vmem:[%s10335_s18 + $0x24e0] sm:$0xff]  ;;  %v1766_v44 = vld [vmem:[%s10335_s18 + $0x2628] sm:$0xff] }
 0x33c   : > { %v1757_v26 = vld [vmem:[%s10335_s18 + $0x25e0] sm:$0xff] }
 0x33d   : > { %7361 = vmatpush1.bf16.msra.mxu0 %v7360_v29  ;;  %v1732_v29 = vld [vmem:[%s10335_s18 + $0x2518] sm:$0xff] }
 0x33e   : > { %8385 = vmatpush1.bf16.msra.mxu1 %v8384_v7  ;;  %7363 = vmatprep.subr.bf16.mxu0 %v7362_v8  ;;  %v1736_v7 = vld [vmem:[%s10335_s18 + $0x2538] sm:$0xff]  ;;  %v7380_v8 = vpack.c.bf16 %v1725_v1, %v1721_v62  ;;  %v1761_v62 = vld [vmem:[%s10335_s18 + $0x2600] sm:$0xff] }
 0x33f   : > { %8387 = vmatprep.subr.bf16.mxu1 %v8386_v15  ;;  %v1733_v15 = vld [vmem:[%s10335_s18 + $0x2520] sm:$0xff]  ;;  %v8406_v17 = vpack.c.bf16 %v1736_v7, %v1732_v29  ;;  %v1772_v29 = vld [vmem:[%s10335_s18 + $0x2658] sm:$0xff] }
 0x340   : > { %v1765_v1 = vld [vmem:[%s10335_s18 + $0x2620] sm:$0xff]  ;;  %v1776_v7 = vld [vmem:[%s10335_s18 + $0x2678] sm:$0xff] }
 0x341   : > { %7365 = vmatpush1.bf16.msra.mxu0 %v7364_v51  ;;  %v1744_v51 = vld [vmem:[%s10335_s18 + $0x2578] sm:$0xff] }
 0x342   : > { %8389 = vmatpush1.bf16.msra.mxu1 %v8388_v22  ;;  %7367 = vmatprep.subr.bf16.mxu0 %v7366_v23  ;;  %v7384_v22 = vpack.c.bf16 %v1733_v15, %v1729_v13  ;;  %v8408_v23 = vpack.c.bf16 %v1735_v18, %v1731_v16  ;;  %v8410_v3 = vpack.c.bf16 %v1744_v51, %v1740_v21  ;;  %v1769_v13 = vld [vmem:[%s10335_s18 + $0x2640] sm:$0xff]  ;;  %v1771_v16 = vld [vmem:[%s10335_s18 + $0x2650] sm:$0xff]  ;;  %v1780_v21 = vld [vmem:[%s10335_s18 + $0x2698] sm:$0xff] }
 0x343   : > { %8391 = vmatprep.subr.bf16.mxu1 %v8390_v25  ;;  %v1739_v25 = vld [vmem:[%s10335_s18 + $0x2550] sm:$0xff]  ;;  %v1773_v15 = vld [vmem:[%s10335_s18 + $0x2660] sm:$0xff]  ;;  %v1784_v51 = vld [vmem:[%s10335_s18 + $0x26b8] sm:$0xff] }
 0x344   : > { %3402 = vmatmul.mubr.f32.vlgmr.msra.gmra.mrb[0].mxu0 %v11482_v14  ;;  %v1775_v18 = vld [vmem:[%s10335_s18 + $0x2670] sm:$0xff] }
 0x345   : > { %7369 = vmatpush1.bf16.msra.mxu0 %v7368_v35  ;;  %4538 = vmatmul.mubr.f32.vlgmr.msra.gmra.mrb[0].mxu1 %v11482_v14  ;;  %v1724_v14 = vld [vmem:[%s10335_s18 + $0x24d8] sm:$0xff] }
 0x346   : > { %8393 = vmatpush1.bf16.msra.mxu1 %v8392_v36  ;;  %7371 = vmatprep.subr.bf16.mxu0 %v7370_v37  ;;  %v8402_v4 = vpack.c.bf16 %v1728_v57, %v1724_v14  ;;  %v1752_v35 = vld [vmem:[%s10335_s18 + $0x25b8] sm:$0xff]  ;;  %v7388_v36 = vpack.c.bf16 %v1741_v0, %v1737_v24  ;;  %v8412_v37 = vpack.c.bf16 %v1743_v28, %v1739_v25  ;;  %v1777_v24 = vld [vmem:[%s10335_s18 + $0x2680] sm:$0xff]  ;;  %v1779_v25 = vld [vmem:[%s10335_s18 + $0x2690] sm:$0xff] }
 0x347   : > { %8395 = vmatprep.subr.bf16.mxu1 %v8394_v61  ;;  %3472 = vmatprep.mubr.f32.mxu0 %v2685_v45  ;;  %v1747_v61 = vld [vmem:[%s10335_s18 + $0x2590] sm:$0xff]  ;;  %v8414_v40 = vpack.c.bf16 %v1752_v35, %v1748_v34  ;;  %v1764_v14 = vld [vmem:[%s10335_s18 + $0x2618] sm:$0xff]  ;;  %v1781_v0 = vld [vmem:[%s10335_s18 + $0x26a0] sm:$0xff] }
 0x348   : > { %4608 = vmatprep.mubr.f32.mxu1 %v2685_v45  ;;  %v1758_v45 = vld [vmem:[%s10335_s18 + $0x25e8] sm:$0xff]  ;;  %v1768_v57 = vld [vmem:[%s10335_s18 + $0x2638] sm:$0xff]  ;;  %v1783_v28 = vld [vmem:[%s10335_s18 + $0x26b0] sm:$0xff] }
 0x349   : > { %7373 = vmatpush1.bf16.msra.mxu0 %v7372_v48  ;;  %v7392_v48 = vpack.c.bf16 %v1749_v39, %v1745_v38  ;;  %v1788_v34 = vld [vmem:[%s10335_s18 + $0x26d8] sm:$0xff]  ;;  %v1785_v38 = vld [vmem:[%s10335_s18 + $0x26c0] sm:$0xff] }
 0x34a   : > { %8397 = vmatpush1.bf16.msra.mxu1 %v8396_v50  ;;  %7375 = vmatprep.subr.bf16.mxu0 %v7374_v52  ;;  %v8416_v50 = vpack.c.bf16 %v1751_v41, %v1747_v61  ;;  %v7394_v52 = vpack.c.bf16 %v1758_v45, %v1754_v42  ;;  %v1792_v35 = vld [vmem:[%s10335_s18 + $0x26f8] sm:$0xff]  ;;  %v1789_v39 = vld [vmem:[%s10335_s18 + $0x26e0] sm:$0xff]  ;;  %v1787_v61 = vld [vmem:[%s10335_s18 + $0x26d0] sm:$0xff] }
 0x34b   : > { %8399 = vmatprep.subr.bf16.mxu1 %v8398_v55  ;;  %v8418_v55 = vpack.c.bf16 %v1760_v47, %v1756_v46  ;;  %v1791_v41 = vld [vmem:[%s10335_s18 + $0x26f0] sm:$0xff]  ;;  %v1794_v42 = vld [vmem:[%s10335_s18 + $0x2708] sm:$0xff]  ;;  %v1796_v46 = vld [vmem:[%s10335_s18 + $0x2718] sm:$0xff] }
 0x34c   : > { %v1798_v45 = vld [vmem:[%s10335_s18 + $0x2728] sm:$0xff]  ;;  %v1800_v47 = vld [vmem:[%s10335_s18 + $0x2738] sm:$0xff] }
 0x34d   : > { %7377 = vmatpush1.bf16.msra.mxu0 %v7376_v33  ;;  %v7396_v33 = vpack.c.bf16 %v1757_v26, %v1753_v53  ;;  %v1793_v53 = vld [vmem:[%s10335_s18 + $0x2700] sm:$0xff] }
 0x34e   : > { %8401 = vmatpush1.bf16.msra.mxu1 %v8400_v58  ;;  %7379 = vmatprep.subr.bf16.mxu0 %v7378_v60  ;;  %v8420_v58 = vpack.c.bf16 %v1759_v10, %v1755_v54  ;;  %v7398_v60 = vpack.c.bf16 %v1766_v44, %v1762_v56  ;;  %v1797_v26 = vld [vmem:[%s10335_s18 + $0x2720] sm:$0xff]  ;;  %v1795_v54 = vld [vmem:[%s10335_s18 + $0x2710] sm:$0xff]  ;;  %v1802_v56 = vld [vmem:[%s10335_s18 + $0x2748] sm:$0xff] }
 0x34f   : > { %8403 = vmatprep.subr.bf16.mxu1 %v8402_v4  ;;  %v8422_v4 = vpack.c.bf16 %v1768_v57, %v1764_v14  ;;  %v1799_v10 = vld [vmem:[%s10335_s18 + $0x2730] sm:$0xff]  ;;  %v1806_v44 = vld [vmem:[%s10335_s18 + $0x2768] sm:$0xff]  ;;  %v1804_v14 = vld [vmem:[%s10335_s18 + $0x2758] sm:$0xff] }
 0x350   : > { %v1808_v57 = vld [vmem:[%s10335_s18 + $0x2778] sm:$0xff] }
 0x351   : > { %7381 = vmatpush1.bf16.msra.mxu0 %v7380_v8  ;;  %v7400_v8 = vpack.c.bf16 %v1765_v1, %v1761_v62  ;;  %v1801_v62 = vld [vmem:[%s10335_s18 + $0x2740] sm:$0xff] }
 0x352   : > { %8405 = vmatpush1.bf16.msra.mxu1 %v8404_v9  ;;  %7383 = vmatprep.subr.bf16.mxu0 %v7382_v11  ;;  %v8424_v9 = vpack.c.bf16 %v1767_v27, %v1763_v2  ;;  %v7402_v11 = vpack.c.bf16 %v1774_v6, %v1770_v5  ;;  %v1805_v1 = vld [vmem:[%s10335_s18 + $0x2760] sm:$0xff]  ;;  %v1803_v2 = vld [vmem:[%s10335_s18 + $0x2750] sm:$0xff]  ;;  %v1810_v5 = vld [vmem:[%s10335_s18 + $0x2788] sm:$0xff] }
 0x353   : > { %8407 = vmatprep.subr.bf16.mxu1 %v8406_v17  ;;  %v8426_v17 = vpack.c.bf16 %v1776_v7, %v1772_v29  ;;  %v1807_v27 = vld [vmem:[%s10335_s18 + $0x2770] sm:$0xff]  ;;  %v1814_v6 = vld [vmem:[%s10335_s18 + $0x27a8] sm:$0xff]  ;;  %v1812_v29 = vld [vmem:[%s10335_s18 + $0x2798] sm:$0xff] }
 0x354   : > { %v1816_v7 = vld [vmem:[%s10335_s18 + $0x27b8] sm:$0xff] }
 0x355   : > { %7385 = vmatpush1.bf16.msra.mxu0 %v7384_v22  ;;  %v7404_v22 = vpack.c.bf16 %v1773_v15, %v1769_v13  ;;  %v1809_v13 = vld [vmem:[%s10335_s18 + $0x2780] sm:$0xff] }
 0x356   : > { %8409 = vmatpush1.bf16.msra.mxu1 %v8408_v23  ;;  %7387 = vmatprep.subr.bf16.mxu0 %v7386_v43  ;;  %v8428_v23 = vpack.c.bf16 %v1775_v18, %v1771_v16  ;;  %v7406_v43 = vpack.c.bf16 %v1782_v20, %v1778_v19  ;;  %v1813_v15 = vld [vmem:[%s10335_s18 + $0x27a0] sm:$0xff]  ;;  %v1811_v16 = vld [vmem:[%s10335_s18 + $0x2790] sm:$0xff]  ;;  %v1818_v19 = vld [vmem:[%s10335_s18 + $0x27c8] sm:$0xff] }
 0x357   : > { %8411 = vmatprep.subr.bf16.mxu1 %v8410_v3  ;;  %v8430_v3 = vpack.c.bf16 %v1784_v51, %v1780_v21  ;;  %v1815_v18 = vld [vmem:[%s10335_s18 + $0x27b0] sm:$0xff]  ;;  %v1822_v20 = vld [vmem:[%s10335_s18 + $0x27e8] sm:$0xff]  ;;  %v1820_v21 = vld [vmem:[%s10335_s18 + $0x27d8] sm:$0xff] }
 0x358   : > { %v1824_v51 = vld [vmem:[%s10335_s18 + $0x27f8] sm:$0xff] }
 0x359   : > { %7389 = vmatpush1.bf16.msra.mxu0 %v7388_v36  ;;  %v7408_v36 = vpack.c.bf16 %v1781_v0, %v1777_v24  ;;  %v1817_v24 = vld [vmem:[%s10335_s18 + $0x27c0] sm:$0xff] }
 0x35a   : > { %8413 = vmatpush1.bf16.msra.mxu1 %v8412_v37  ;;  %7391 = vmatprep.subr.bf16.mxu0 %v7390_v59  ;;  %v8432_v37 = vpack.c.bf16 %v1783_v28, %v1779_v25  ;;  %v7410_v59 = vpack.c.bf16 %v1790_v32, %v1786_v30  ;;  %v1821_v0 = vld [vmem:[%s10335_s18 + $0x27e0] sm:$0xff]  ;;  %v1819_v25 = vld [vmem:[%s10335_s18 + $0x27d0] sm:$0xff]  ;;  %v1826_v30 = vld [vmem:[%s10335_s18 + $0x2808] sm:$0xff] }
 0x35b   : > { %8415 = vmatprep.subr.bf16.mxu1 %v8414_v40  ;;  %v8434_v40 = vpack.c.bf16 %v1792_v35, %v1788_v34  ;;  %v1823_v28 = vld [vmem:[%s10335_s18 + $0x27f0] sm:$0xff]  ;;  %v1830_v32 = vld [vmem:[%s10335_s18 + $0x2828] sm:$0xff]  ;;  %v1828_v34 = vld [vmem:[%s10335_s18 + $0x2818] sm:$0xff] }
 0x35c   : > { %v1832_v35 = vld [vmem:[%s10335_s18 + $0x2838] sm:$0xff] }
 0x35d   : > { %7393 = vmatpush1.bf16.msra.mxu0 %v7392_v48  ;;  %v7412_v48 = vpack.c.bf16 %v1789_v39, %v1785_v38  ;;  %v7430_v38 = vpack.c.bf16 %v1830_v32, %v1826_v30  ;;  %v1825_v39 = vld [vmem:[%s10335_s18 + $0x2800] sm:$0xff]  ;;  %v1863_v32 = vld [vmem:[%s10335_s18 + $0x2930] sm:$0xff] }
 0x35e   : > { %8417 = vmatpush1.bf16.msra.mxu1 %v8416_v50  ;;  %7395 = vmatprep.subr.bf16.mxu0 %v7394_v52  ;;  %v8436_v50 = vpack.c.bf16 %v1791_v41, %v1787_v61  ;;  %v7414_v52 = vpack.c.bf16 %v1798_v45, %v1794_v42  ;;  %v1829_v61 = vld [vmem:[%s10335_s18 + $0x2820] sm:$0xff]  ;;  %v8454_v41 = vpack.c.bf16 %v1832_v35, %v1828_v34  ;;  %v1831_v42 = vld [vmem:[%s10335_s18 + $0x2830] sm:$0xff]  ;;  %v1834_v45 = vld [vmem:[%s10335_s18 + $0x2848] sm:$0xff] }
 0x35f   : > { %8419 = vmatprep.subr.bf16.mxu1 %v8418_v55  ;;  %v8438_v55 = vpack.c.bf16 %v1800_v47, %v1796_v46  ;;  %v1838_v46 = vld [vmem:[%s10335_s18 + $0x2868] sm:$0xff] }
 0x360   : > { %v1866_v34 = vld [vmem:[%s10335_s18 + $0x2948] sm:$0xff] }
 0x361   : > { %7397 = vmatpush1.bf16.msra.mxu0 %v7396_v33  ;;  %v7416_v33 = vpack.c.bf16 %v1797_v26, %v1793_v53  ;;  %v7434_v26 = vpack.c.bf16 %v1838_v46, %v1834_v45  ;;  %v1870_v35 = vld [vmem:[%s10335_s18 + $0x2968] sm:$0xff]  ;;  %v1871_v46 = vld [vmem:[%s10335_s18 + $0x2970] sm:$0xff] }
 0x362   : > { %8421 = vmatpush1.bf16.msra.mxu1 %v8420_v58  ;;  %7399 = vmatprep.subr.bf16.mxu0 %v7398_v60  ;;  %v8440_v58 = vpack.c.bf16 %v1799_v10, %v1795_v54  ;;  %v7418_v60 = vpack.c.bf16 %v1806_v44, %v1802_v56  ;;  %v1833_v54 = vld [vmem:[%s10335_s18 + $0x2840] sm:$0xff]  ;;  %v1835_v10 = vld [vmem:[%s10335_s18 + $0x2850] sm:$0xff] }
 0x363   : > { %8423 = vmatprep.subr.bf16.mxu1 %v8422_v4  ;;  %v8442_v4 = vpack.c.bf16 %v1808_v57, %v1804_v14  ;;  %v1839_v44 = vld [vmem:[%s10335_s18 + $0x2870] sm:$0xff]  ;;  %v1842_v14 = vld [vmem:[%s10335_s18 + $0x2888] sm:$0xff] }
 0x364   : > { %v1846_v57 = vld [vmem:[%s10335_s18 + $0x28a8] sm:$0xff] }
 0x365   : > { %7401 = vmatpush1.bf16.msra.mxu0 %v7400_v8  ;;  %v7420_v8 = vpack.c.bf16 %v1805_v1, %v1801_v62  ;;  %v8460_v1 = vpack.c.bf16 %v1839_v44, %v1835_v10  ;;  %v1873_v10 = vld [vmem:[%s10335_s18 + $0x2980] sm:$0xff]  ;;  %v1875_v44 = vld [vmem:[%s10335_s18 + $0x2990] sm:$0xff] }
 0x366   : > { %8425 = vmatpush1.bf16.msra.mxu1 %v8424_v9  ;;  %7403 = vmatprep.subr.bf16.mxu0 %v7402_v11  ;;  %v8444_v9 = vpack.c.bf16 %v1807_v27, %v1803_v2  ;;  %v7422_v11 = vpack.c.bf16 %v1814_v6, %v1810_v5  ;;  %v7438_v2 = vpack.c.bf16 %v1846_v57, %v1842_v14  ;;  %v1845_v27 = vld [vmem:[%s10335_s18 + $0x28a0] sm:$0xff]  ;;  %v1843_v5 = vld [vmem:[%s10335_s18 + $0x2890] sm:$0xff] }
 0x367   : > { %8427 = vmatprep.subr.bf16.mxu1 %v8426_v17  ;;  %v8446_v17 = vpack.c.bf16 %v1816_v7, %v1812_v29  ;;  %v1847_v29 = vld [vmem:[%s10335_s18 + $0x28b0] sm:$0xff]  ;;  %v1850_v7 = vld [vmem:[%s10335_s18 + $0x28c8] sm:$0xff] }
 0x368   : > { %v1879_v57 = vld [vmem:[%s10335_s18 + $0x29b0] sm:$0xff] }
 0x369   : > { %7405 = vmatpush1.bf16.msra.mxu0 %v7404_v22  ;;  %v7424_v22 = vpack.c.bf16 %v1813_v15, %v1809_v13  ;;  %v8464_v13 = vpack.c.bf16 %v1847_v29, %v1843_v5  ;;  %v1885_v5 = vld [vmem:[%s10335_s18 + $0x29e0] sm:$0xff] }
 0x36a   : > { %8429 = vmatpush1.bf16.msra.mxu1 %v8428_v23  ;;  %7407 = vmatprep.subr.bf16.mxu0 %v7406_v43  ;;  %v8448_v23 = vpack.c.bf16 %v1815_v18, %v1811_v16  ;;  %v7426_v43 = vpack.c.bf16 %v1822_v20, %v1818_v19  ;;  %v1849_v16 = vld [vmem:[%s10335_s18 + $0x28c0] sm:$0xff]  ;;  %v1851_v18 = vld [vmem:[%s10335_s18 + $0x28d0] sm:$0xff] }
 0x36b   : > { %8431 = vmatprep.subr.bf16.mxu1 %v8430_v3  ;;  %v8450_v3 = vpack.c.bf16 %v1824_v51, %v1820_v21  ;;  %v1855_v20 = vld [vmem:[%s10335_s18 + $0x28f0] sm:$0xff]  ;;  %v1858_v21 = vld [vmem:[%s10335_s18 + $0x2908] sm:$0xff] }
 0x36c   : > { %v1862_v51 = vld [vmem:[%s10335_s18 + $0x2928] sm:$0xff] }
 0x36d   : > { %7409 = vmatpush1.bf16.msra.mxu0 %v7408_v36  ;;  %v11748_v36 = vld [vmem:[%s10328_s24 + $0x28] sm:$0xff] }
 0x36e   : > { %8433 = vmatpush1.bf16.msra.mxu1 %v8432_v37  ;;  %7411 = vmatprep.subr.bf16.mxu0 %v7410_v59  ;;  %v7428_v37 = vpack.c.bf16 %v1821_v0, %v1817_v24  ;;  %v8452_v59 = vpack.c.bf16 %v1823_v28, %v1819_v25  ;;  %v11758_v47 = vrot.slane %v11748_v36, %v10455_v12  ;;  %v1857_v25 = vld [vmem:[%s10335_s18 + $0x2900] sm:$0xff]  ;;  %v1859_v28 = vld [vmem:[%s10335_s18 + $0x2910] sm:$0xff] }
 0x36f   : > { %8435 = vmatprep.subr.bf16.mxu1 %v8434_v40  ;;  %v1827_v40 = vld [vmem:[%s10335_s18 + $0x2810] sm:$0xff]  ;;  %v8468_v24 = vpack.c.bf16 %v1855_v20, %v1851_v18  ;;  %v7446_v0 = vpack.c.bf16 %v1862_v51, %v1858_v21  ;;  %v1893_v18 = vld [vmem:[%s10335_s18 + $0x2a20] sm:$0xff]  ;;  %v1898_v51 = vld [vmem:[%s10335_s18 + $0x2a48] sm:$0xff] }
 0x370   : > { %v8456_v53 = vpack.c.bf16 %v1831_v42, %v1827_v40  ;;  %v1865_v40 = vld [vmem:[%s10335_s18 + $0x2940] sm:$0xff]  ;;  %v1867_v42 = vld [vmem:[%s10335_s18 + $0x2950] sm:$0xff] }
 0x371   : > { %7413 = vmatpush1.bf16.msra.mxu0 %v7412_v48  ;;  %v1836_v48 = vld [vmem:[%s10335_s18 + $0x2858] sm:$0xff]  ;;  %v1895_v21 = vld [vmem:[%s10335_s18 + $0x2a30] sm:$0xff] }
 0x372   : > { %8437 = vmatpush1.bf16.msra.mxu1 %v8436_v50  ;;  %7415 = vmatprep.subr.bf16.mxu0 %v7414_v52  ;;  %v1840_v50 = vld [vmem:[%s10335_s18 + $0x2878] sm:$0xff]  ;;  %v7432_v52 = vpack.c.bf16 %v1829_v61, %v1825_v39  ;;  %v8472_v39 = vpack.c.bf16 %v1863_v32, %v1859_v28  ;;  %v7450_v61 = vpack.c.bf16 %v1870_v35, %v1866_v34  ;;  %v1901_v28 = vld [vmem:[%s10335_s18 + $0x2a60] sm:$0xff]  ;;  %v1903_v34 = vld [vmem:[%s10335_s18 + $0x2a70] sm:$0xff] }
 0x373   : > { %8439 = vmatprep.subr.bf16.mxu1 %v8438_v55  ;;  %v1837_v55 = vld [vmem:[%s10335_s18 + $0x2860] sm:$0xff]  ;;  %v8458_v56 = vpack.c.bf16 %v1840_v50, %v1836_v48  ;;  %v1874_v48 = vld [vmem:[%s10335_s18 + $0x2988] sm:$0xff] }
 0x374   : > { %v7436_v62 = vpack.c.bf16 %v1837_v55, %v1833_v54  ;;  %v1878_v50 = vld [vmem:[%s10335_s18 + $0x29a8] sm:$0xff]  ;;  %v8476_v54 = vpack.c.bf16 %v1871_v46, %v1867_v42  ;;  %v1909_v42 = vld [vmem:[%s10335_s18 + $0x2aa0] sm:$0xff] }
 0x375   : > { %7417 = vmatpush1.bf16.msra.mxu0 %v7416_v33  ;;  %v2701_v33 = vcombine.high %v11758_v47, %v11758_v47  ;;  %v7454_v55 = vpack.c.bf16 %v1878_v50, %v1874_v48  ;;  %v1906_v35 = vld [vmem:[%s10335_s18 + $0x2a88] sm:$0xff]  ;;  %v1911_v48 = vld [vmem:[%s10335_s18 + $0x2ab0] sm:$0xff] }
 0x376   : > { %8441 = vmatpush1.bf16.msra.mxu1 %v8440_v58  ;;  %7419 = vmatprep.subr.bf16.mxu0 %v7418_v60  ;;  %v1844_v58 = vld [vmem:[%s10335_s18 + $0x2898] sm:$0xff]  ;;  %v1914_v50 = vld [vmem:[%s10335_s18 + $0x2ac8] sm:$0xff] }
 0x377   : > { %8443 = vmatprep.subr.bf16.mxu1 %v8442_v4  ;;  %v1848_v60 = vld [vmem:[%s10335_s18 + $0x28b8] sm:$0xff]  ;;  %v1841_v4 = vld [vmem:[%s10335_s18 + $0x2880] sm:$0xff] }
 0x378   : > { %v8462_v6 = vpack.c.bf16 %v1848_v60, %v1844_v58  ;;  %v1886_v58 = vld [vmem:[%s10335_s18 + $0x29e8] sm:$0xff]  ;;  %v1884_v60 = vld [vmem:[%s10335_s18 + $0x29d8] sm:$0xff] }
 0x379   : > { %7421 = vmatpush1.bf16.msra.mxu0 %v7420_v8  ;;  %v1854_v8 = vld [vmem:[%s10335_s18 + $0x28e8] sm:$0xff] }
 0x37a   : > { %8445 = vmatpush1.bf16.msra.mxu1 %v8444_v9  ;;  %7423 = vmatprep.subr.bf16.mxu0 %v7422_v11  ;;  %v1856_v9 = vld [vmem:[%s10335_s18 + $0x28f8] sm:$0xff]  ;;  %v7440_v11 = vpack.c.bf16 %v1845_v27, %v1841_v4  ;;  %v7442_v15 = vpack.c.bf16 %v1854_v8, %v1850_v7  ;;  %v1881_v27 = vld [vmem:[%s10335_s18 + $0x29c0] sm:$0xff]  ;;  %v1887_v7 = vld [vmem:[%s10335_s18 + $0x29f0] sm:$0xff] }
 0x37b   : > { %8447 = vmatprep.subr.bf16.mxu1 %v8446_v17  ;;  %v1853_v17 = vld [vmem:[%s10335_s18 + $0x28e0] sm:$0xff]  ;;  %v1890_v8 = vld [vmem:[%s10335_s18 + $0x2a08] sm:$0xff] }
 0x37d   : > { %7425 = vmatpush1.bf16.msra.mxu0 %v7424_v22  ;;  %v1860_v22 = vld [vmem:[%s10335_s18 + $0x2918] sm:$0xff] }
 0x37e   : > { %8449 = vmatpush1.bf16.msra.mxu1 %v8448_v23  ;;  %7427 = vmatprep.subr.bf16.mxu0 %v7426_v43  ;;  %v1864_v23 = vld [vmem:[%s10335_s18 + $0x2938] sm:$0xff]  ;;  %v7444_v43 = vpack.c.bf16 %v1853_v17, %v1849_v16  ;;  %v1889_v17 = vld [vmem:[%s10335_s18 + $0x2a00] sm:$0xff] }
 0x37f   : > { %8451 = vmatprep.subr.bf16.mxu1 %v8450_v3  ;;  %v1861_v3 = vld [vmem:[%s10335_s18 + $0x2920] sm:$0xff]  ;;  %v8470_v30 = vpack.c.bf16 %v1864_v23, %v1860_v22  ;;  %v1902_v22 = vld [vmem:[%s10335_s18 + $0x2a68] sm:$0xff]  ;;  %v1900_v23 = vld [vmem:[%s10335_s18 + $0x2a58] sm:$0xff] }
 0x381   : > { %7429 = vmatpush1.bf16.msra.mxu0 %v7428_v37  ;;  %v1868_v37 = vld [vmem:[%s10335_s18 + $0x2958] sm:$0xff] }
 0x382   : > { %8453 = vmatpush1.bf16.msra.mxu1 %v8452_v59  ;;  %7431 = vmatprep.subr.bf16.mxu0 %v7430_v38  ;;  %v1872_v59 = vld [vmem:[%s10335_s18 + $0x2978] sm:$0xff]  ;;  %v7448_v38 = vpack.c.bf16 %v1861_v3, %v1857_v25  ;;  %v7466_v25 = vpack.c.bf16 %v1902_v22, %v1898_v51  ;;  %v1897_v3 = vld [vmem:[%s10335_s18 + $0x2a40] sm:$0xff]  ;;  %v1935_v51 = vld [vmem:[%s10335_s18 + $0x2b70] sm:$0xff] }
 0x383   : > { %8455 = vmatprep.subr.bf16.mxu1 %v8454_v41  ;;  %v1869_v41 = vld [vmem:[%s10335_s18 + $0x2960] sm:$0xff]  ;;  %v8474_v45 = vpack.c.bf16 %v1872_v59, %v1868_v37  ;;  %v1910_v37 = vld [vmem:[%s10335_s18 + $0x2aa8] sm:$0xff]  ;;  %v1908_v59 = vld [vmem:[%s10335_s18 + $0x2a98] sm:$0xff] }
 0x384   : > { %3473 = vmatmul.mubr.f32.vlgmr.msra.gmra.mrb[0].mxu0 %v11619_v31  ;;  %v1938_v22 = vld [vmem:[%s10335_s18 + $0x2b88] sm:$0xff] }
 0x385   : > { %7433 = vmatpush1.bf16.msra.mxu0 %v7432_v52  ;;  %4609 = vmatmul.mubr.f32.vlgmr.msra.gmra.mrb[0].mxu1 %v11619_v31  ;;  %v1852_v31 = vld [vmem:[%s10335_s18 + $0x28d8] sm:$0xff] }
 0x386   : > { %8457 = vmatpush1.bf16.msra.mxu1 %v8456_v53  ;;  %7435 = vmatprep.subr.bf16.mxu0 %v7434_v26  ;;  %v8466_v19 = vpack.c.bf16 %v1856_v9, %v1852_v31  ;;  %v1876_v52 = vld [vmem:[%s10335_s18 + $0x2998] sm:$0xff]  ;;  %v7452_v26 = vpack.c.bf16 %v1869_v41, %v1865_v40  ;;  %v1894_v31 = vld [vmem:[%s10335_s18 + $0x2a28] sm:$0xff]  ;;  %v7470_v40 = vpack.c.bf16 %v1910_v37, %v1906_v35  ;;  %v1905_v41 = vld [vmem:[%s10335_s18 + $0x2a80] sm:$0xff] }
 0x387   : > { %8459 = vmatprep.subr.bf16.mxu1 %v8458_v56  ;;  %3543 = vmatprep.mubr.f32.mxu0 %v2701_v33  ;;  %v1880_v53 = vld [vmem:[%s10335_s18 + $0x29b8] sm:$0xff]  ;;  %v1877_v56 = vld [vmem:[%s10335_s18 + $0x29a0] sm:$0xff]  ;;  %v7462_v16 = vpack.c.bf16 %v1894_v31, %v1890_v8  ;;  %v1927_v8 = vld [vmem:[%s10335_s18 + $0x2b30] sm:$0xff] }
 0x388   : > { %4679 = vmatprep.mubr.f32.mxu1 %v2701_v33  ;;  %v8478_v14 = vpack.c.bf16 %v1880_v53, %v1876_v52  ;;  %v1882_v33 = vld [vmem:[%s10335_s18 + $0x29c8] sm:$0xff]  ;;  %v1892_v9 = vld [vmem:[%s10335_s18 + $0x2a18] sm:$0xff]  ;;  %v1943_v35 = vld [vmem:[%s10335_s18 + $0x2bb0] sm:$0xff] }
 0x389   : > { %7437 = vmatpush1.bf16.msra.mxu0 %v7436_v62  ;;  %v1888_v62 = vld [vmem:[%s10335_s18 + $0x29f8] sm:$0xff]  ;;  %v7458_v4 = vpack.c.bf16 %v1886_v58, %v1882_v33  ;;  %v1918_v52 = vld [vmem:[%s10335_s18 + $0x2ae8] sm:$0xff]  ;;  %v1919_v33 = vld [vmem:[%s10335_s18 + $0x2af0] sm:$0xff] }
 0x38a   : > { %8461 = vmatpush1.bf16.msra.mxu1 %v8460_v1  ;;  %7439 = vmatprep.subr.bf16.mxu0 %v7438_v2  ;;  %v7456_v1 = vpack.c.bf16 %v1877_v56, %v1873_v10  ;;  %v8480_v2 = vpack.c.bf16 %v1879_v57, %v1875_v44  ;;  %v8482_v29 = vpack.c.bf16 %v1888_v62, %v1884_v60  ;;  %v1916_v53 = vld [vmem:[%s10335_s18 + $0x2ad8] sm:$0xff]  ;;  %v1913_v56 = vld [vmem:[%s10335_s18 + $0x2ac0] sm:$0xff]  ;;  %v1922_v58 = vld [vmem:[%s10335_s18 + $0x2b08] sm:$0xff] }
 0x38b   : > { %8463 = vmatprep.subr.bf16.mxu1 %v8462_v6  ;;  %v1883_v6 = vld [vmem:[%s10335_s18 + $0x29d0] sm:$0xff]  ;;  %v7474_v10 = vpack.c.bf16 %v1918_v52, %v1914_v50  ;;  %v1917_v44 = vld [vmem:[%s10335_s18 + $0x2ae0] sm:$0xff]  ;;  %v1926_v60 = vld [vmem:[%s10335_s18 + $0x2b28] sm:$0xff] }
 0x38c   : > { %v1924_v62 = vld [vmem:[%s10335_s18 + $0x2b18] sm:$0xff]  ;;  %v1930_v31 = vld [vmem:[%s10335_s18 + $0x2b48] sm:$0xff]  ;;  %v1951_v50 = vld [vmem:[%s10335_s18 + $0x2bf0] sm:$0xff] }
 0x38d   : > { %7441 = vmatpush1.bf16.msra.mxu0 %v7440_v11  ;;  %v1896_v11 = vld [vmem:[%s10335_s18 + $0x2a38] sm:$0xff]  ;;  %v1946_v37 = vld [vmem:[%s10335_s18 + $0x2bc8] sm:$0xff] }
 0x38e   : > { %8465 = vmatpush1.bf16.msra.mxu1 %v8464_v13  ;;  %7443 = vmatprep.subr.bf16.mxu0 %v7442_v15  ;;  %v7460_v13 = vpack.c.bf16 %v1885_v5, %v1881_v27  ;;  %v8484_v15 = vpack.c.bf16 %v1887_v7, %v1883_v6  ;;  %v8486_v20 = vpack.c.bf16 %v1896_v11, %v1892_v9  ;;  %v1921_v5 = vld [vmem:[%s10335_s18 + $0x2b00] sm:$0xff]  ;;  %v1934_v9 = vld [vmem:[%s10335_s18 + $0x2b68] sm:$0xff]  ;;  %v1932_v11 = vld [vmem:[%s10335_s18 + $0x2b58] sm:$0xff] }
 0x38f   : > { %8467 = vmatprep.subr.bf16.mxu1 %v8466_v19  ;;  %v1891_v19 = vld [vmem:[%s10335_s18 + $0x2a10] sm:$0xff]  ;;  %v7478_v27 = vpack.c.bf16 %v1926_v60, %v1922_v58  ;;  %v1925_v6 = vld [vmem:[%s10335_s18 + $0x2b20] sm:$0xff]  ;;  %v1954_v52 = vld [vmem:[%s10335_s18 + $0x2c08] sm:$0xff] }
 0x390   : > { %v1962_v60 = vld [vmem:[%s10335_s18 + $0x2c48] sm:$0xff] }
 0x391   : > { %7445 = vmatpush1.bf16.msra.mxu0 %v7444_v43  ;;  %v1904_v43 = vld [vmem:[%s10335_s18 + $0x2a78] sm:$0xff] }
 0x392   : > { %8469 = vmatpush1.bf16.msra.mxu1 %v8468_v24  ;;  %7447 = vmatprep.subr.bf16.mxu0 %v7446_v0  ;;  %v7464_v24 = vpack.c.bf16 %v1893_v18, %v1889_v17  ;;  %v8488_v0 = vpack.c.bf16 %v1895_v21, %v1891_v19  ;;  %v8490_v32 = vpack.c.bf16 %v1904_v43, %v1900_v23  ;;  %v1929_v18 = vld [vmem:[%s10335_s18 + $0x2b40] sm:$0xff]  ;;  %v1942_v23 = vld [vmem:[%s10335_s18 + $0x2ba8] sm:$0xff]  ;;  %v1940_v43 = vld [vmem:[%s10335_s18 + $0x2b98] sm:$0xff] }
 0x393   : > { %8471 = vmatprep.subr.bf16.mxu1 %v8470_v30  ;;  %v1899_v30 = vld [vmem:[%s10335_s18 + $0x2a50] sm:$0xff]  ;;  %v7482_v17 = vpack.c.bf16 %v1934_v9, %v1930_v31  ;;  %v1933_v19 = vld [vmem:[%s10335_s18 + $0x2b60] sm:$0xff] }
 0x394   : > { %v1967_v9 = vld [vmem:[%s10335_s18 + $0x2c70] sm:$0xff] }
 0x395   : > { %7449 = vmatpush1.bf16.msra.mxu0 %v7448_v38  ;;  %v1912_v38 = vld [vmem:[%s10335_s18 + $0x2ab8] sm:$0xff] }
 0x396   : > { %8473 = vmatpush1.bf16.msra.mxu1 %v8472_v39  ;;  %7451 = vmatprep.subr.bf16.mxu0 %v7450_v61  ;;  %v7468_v39 = vpack.c.bf16 %v1901_v28, %v1897_v3  ;;  %v8492_v61 = vpack.c.bf16 %v1903_v34, %v1899_v30  ;;  %v8494_v46 = vpack.c.bf16 %v1912_v38, %v1908_v59  ;;  %v1937_v28 = vld [vmem:[%s10335_s18 + $0x2b80] sm:$0xff]  ;;  %v1950_v59 = vld [vmem:[%s10335_s18 + $0x2be8] sm:$0xff]  ;;  %v1948_v38 = vld [vmem:[%s10335_s18 + $0x2bd8] sm:$0xff] }
 0x397   : > { %8475 = vmatprep.subr.bf16.mxu1 %v8474_v45  ;;  %v1907_v45 = vld [vmem:[%s10335_s18 + $0x2a90] sm:$0xff]  ;;  %v7486_v3 = vpack.c.bf16 %v1942_v23, %v1938_v22  ;;  %v1941_v30 = vld [vmem:[%s10335_s18 + $0x2ba0] sm:$0xff] }
 0x398   : > { %v1971_v22 = vld [vmem:[%s10335_s18 + $0x2c90] sm:$0xff] }
 0x399   : > { %7453 = vmatpush1.bf16.msra.mxu0 %v7452_v26  ;;  %v1920_v26 = vld [vmem:[%s10335_s18 + $0x2af8] sm:$0xff] }
 0x39a   : > { %8477 = vmatpush1.bf16.msra.mxu1 %v8476_v54  ;;  %7455 = vmatprep.subr.bf16.mxu0 %v7454_v55  ;;  %v7472_v54 = vpack.c.bf16 %v1909_v42, %v1905_v41  ;;  %v8496_v55 = vpack.c.bf16 %v1911_v48, %v1907_v45  ;;  %v8498_v57 = vpack.c.bf16 %v1920_v26, %v1916_v53  ;;  %v1945_v42 = vld [vmem:[%s10335_s18 + $0x2bc0] sm:$0xff]  ;;  %v1958_v53 = vld [vmem:[%s10335_s18 + $0x2c28] sm:$0xff] }
 0x39b   : > { %8479 = vmatprep.subr.bf16.mxu1 %v8478_v14  ;;  %v1915_v14 = vld [vmem:[%s10335_s18 + $0x2ad0] sm:$0xff]  ;;  %v7490_v41 = vpack.c.bf16 %v1950_v59, %v1946_v37  ;;  %v1949_v45 = vld [vmem:[%s10335_s18 + $0x2be0] sm:$0xff]  ;;  %v2686_v26 = vcombine.high %v11748_v36, %v11748_v36 }
 0x39c   : > { %v1959_v36 = vld [vmem:[%s10335_s18 + $0x2c30] sm:$0xff] }
 0x39d   : > { %7457 = vmatpush1.bf16.msra.mxu0 %v7456_v1  ;;  %v1928_v1 = vld [vmem:[%s10335_s18 + $0x2b38] sm:$0xff]  ;;  %v1983_v59 = vld [vmem:[%s10335_s18 + $0x2cf0] sm:$0xff] }
 0x39e   : > { %8481 = vmatpush1.bf16.msra.mxu1 %v8480_v2  ;;  %7459 = vmatprep.subr.bf16.mxu0 %v7458_v4  ;;  %v7476_v2 = vpack.c.bf16 %v1917_v44, %v1913_v56  ;;  %v8500_v4 = vpack.c.bf16 %v1919_v33, %v1915_v14  ;;  %v8502_v7 = vpack.c.bf16 %v1928_v1, %v1924_v62  ;;  %v1953_v14 = vld [vmem:[%s10335_s18 + $0x2c00] sm:$0xff]  ;;  %v1955_v33 = vld [vmem:[%s10335_s18 + $0x2c10] sm:$0xff]  ;;  %v1966_v62 = vld [vmem:[%s10335_s18 + $0x2c68] sm:$0xff] }
 0x39f   : > { %8483 = vmatprep.subr.bf16.mxu1 %v8482_v29  ;;  %v1923_v29 = vld [vmem:[%s10335_s18 + $0x2b10] sm:$0xff]  ;;  %v7494_v44 = vpack.c.bf16 %v1958_v53, %v1954_v52  ;;  %v11895_v1 = vrot.slane %v2686_v26, %v10455_v12  ;;  %v1994_v26 = vld [vmem:[%s10335_s18 + $0x2d48] sm:$0xff] }
 0x3a0   : > { %v1991_v53 = vld [vmem:[%s10335_s18 + $0x2d30] sm:$0xff] }
 0x3a1   : > { %7461 = vmatpush1.bf16.msra.mxu0 %v7460_v13  ;;  %v1936_v13 = vld [vmem:[%s10335_s18 + $0x2b78] sm:$0xff] }
 0x3a2   : > { %8485 = vmatpush1.bf16.msra.mxu1 %v8484_v15  ;;  %7463 = vmatprep.subr.bf16.mxu0 %v7462_v16  ;;  %v7480_v15 = vpack.c.bf16 %v1925_v6, %v1921_v5  ;;  %v8504_v16 = vpack.c.bf16 %v1927_v8, %v1923_v29  ;;  %v8506_v21 = vpack.c.bf16 %v1936_v13, %v1932_v11  ;;  %v1961_v29 = vld [vmem:[%s10335_s18 + $0x2c40] sm:$0xff]  ;;  %v1963_v8 = vld [vmem:[%s10335_s18 + $0x2c50] sm:$0xff]  ;;  %v1970_v11 = vld [vmem:[%s10335_s18 + $0x2c88] sm:$0xff] }
 0x3a3   : > { %8487 = vmatprep.subr.bf16.mxu1 %v8486_v20  ;;  %v1931_v20 = vld [vmem:[%s10335_s18 + $0x2b50] sm:$0xff]  ;;  %v8520_v5 = vpack.c.bf16 %v1959_v36, %v1955_v33  ;;  %v7498_v6 = vpack.c.bf16 %v1966_v62, %v1962_v60  ;;  %v1974_v13 = vld [vmem:[%s10335_s18 + $0x2ca8] sm:$0xff]  ;;  %v1997_v33 = vld [vmem:[%s10335_s18 + $0x2d60] sm:$0xff] }
 0x3a4   : > { %v1999_v60 = vld [vmem:[%s10335_s18 + $0x2d70] sm:$0xff]  ;;  %v2002_v62 = vld [vmem:[%s10335_s18 + $0x2d88] sm:$0xff] }
 0x3a5   : > { %7465 = vmatpush1.bf16.msra.mxu0 %v7464_v24  ;;  %v1944_v24 = vld [vmem:[%s10335_s18 + $0x2bb8] sm:$0xff] }
 0x3a6   : > { %8489 = vmatpush1.bf16.msra.mxu1 %v8488_v0  ;;  %7467 = vmatprep.subr.bf16.mxu0 %v7466_v25  ;;  %v7484_v0 = vpack.c.bf16 %v1933_v19, %v1929_v18  ;;  %v8508_v25 = vpack.c.bf16 %v1935_v51, %v1931_v20  ;;  %v8510_v34 = vpack.c.bf16 %v1944_v24, %v1940_v43  ;;  %v1973_v51 = vld [vmem:[%s10335_s18 + $0x2ca0] sm:$0xff]  ;;  %v1975_v43 = vld [vmem:[%s10335_s18 + $0x2cb0] sm:$0xff]  ;;  %v1978_v24 = vld [vmem:[%s10335_s18 + $0x2cc8] sm:$0xff] }
 0x3a7   : > { %8491 = vmatprep.subr.bf16.mxu1 %v8490_v32  ;;  %v1939_v32 = vld [vmem:[%s10335_s18 + $0x2b90] sm:$0xff]  ;;  %v8524_v19 = vpack.c.bf16 %v1967_v9, %v1963_v8  ;;  %v7502_v20 = vpack.c.bf16 %v1974_v13, %v1970_v11  ;;  %v2005_v8 = vld [vmem:[%s10335_s18 + $0x2da0] sm:$0xff]  ;;  %v2010_v13 = vld [vmem:[%s10335_s18 + $0x2dc8] sm:$0xff] }
 0x3a8   : > { %v2007_v11 = vld [vmem:[%s10335_s18 + $0x2db0] sm:$0xff] }
 0x3a9   : > { %7469 = vmatpush1.bf16.msra.mxu0 %v7468_v39  ;;  %v1952_v39 = vld [vmem:[%s10335_s18 + $0x2bf8] sm:$0xff] }
 0x3aa   : > { %8493 = vmatpush1.bf16.msra.mxu1 %v8492_v61  ;;  %7471 = vmatprep.subr.bf16.mxu0 %v7470_v40  ;;  %v7488_v61 = vpack.c.bf16 %v1941_v30, %v1937_v28  ;;  %v8512_v40 = vpack.c.bf16 %v1943_v35, %v1939_v32  ;;  %v8514_v48 = vpack.c.bf16 %v1952_v39, %v1948_v38  ;;  %v1977_v32 = vld [vmem:[%s10335_s18 + $0x2cc0] sm:$0xff]  ;;  %v1979_v35 = vld [vmem:[%s10335_s18 + $0x2cd0] sm:$0xff]  ;;  %v1986_v38 = vld [vmem:[%s10335_s18 + $0x2d08] sm:$0xff] }
 0x3ab   : > { %8495 = vmatprep.subr.bf16.mxu1 %v8494_v46  ;;  %v1947_v46 = vld [vmem:[%s10335_s18 + $0x2bd0] sm:$0xff]  ;;  %v8528_v28 = vpack.c.bf16 %v1975_v43, %v1971_v22  ;;  %v1990_v39 = vld [vmem:[%s10335_s18 + $0x2d28] sm:$0xff] }
 0x3ac   : > { %v8516_v56 = vpack.c.bf16 %v1951_v50, %v1947_v46  ;;  %v1985_v46 = vld [vmem:[%s10335_s18 + $0x2d00] sm:$0xff]  ;;  %v1987_v50 = vld [vmem:[%s10335_s18 + $0x2d10] sm:$0xff] }
 0x3ad   : > { %7473 = vmatpush1.bf16.msra.mxu0 %v7472_v54  ;;  %v1956_v54 = vld [vmem:[%s10335_s18 + $0x2c18] sm:$0xff]  ;;  %v2011_v22 = vld [vmem:[%s10335_s18 + $0x2dd0] sm:$0xff] }
 0x3ae   : > { %8497 = vmatpush1.bf16.msra.mxu1 %v8496_v55  ;;  %7475 = vmatprep.subr.bf16.mxu0 %v7474_v10  ;;  %v1960_v55 = vld [vmem:[%s10335_s18 + $0x2c38] sm:$0xff]  ;;  %v7492_v10 = vpack.c.bf16 %v1949_v45, %v1945_v42  ;;  %v8532_v42 = vpack.c.bf16 %v1983_v59, %v1979_v35  ;;  %v7510_v45 = vpack.c.bf16 %v1990_v39, %v1986_v38  ;;  %v2015_v43 = vld [vmem:[%s10335_s18 + $0x2df0] sm:$0xff]  ;;  %v2026_v38 = vld [vmem:[%s10335_s18 + $0x2e48] sm:$0xff] }
 0x3af   : > { %8499 = vmatprep.subr.bf16.mxu1 %v8498_v57  ;;  %v1957_v57 = vld [vmem:[%s10335_s18 + $0x2c20] sm:$0xff]  ;;  %v8518_v58 = vpack.c.bf16 %v1960_v55, %v1956_v54  ;;  %v1998_v54 = vld [vmem:[%s10335_s18 + $0x2d68] sm:$0xff]  ;;  %v1996_v55 = vld [vmem:[%s10335_s18 + $0x2d58] sm:$0xff] }
 0x3b0   : > { %v2019_v35 = vld [vmem:[%s10335_s18 + $0x2e10] sm:$0xff]  ;;  %v2030_v39 = vld [vmem:[%s10335_s18 + $0x2e68] sm:$0xff] }
 0x3b1   : > { %7477 = vmatpush1.bf16.msra.mxu0 %v7476_v2  ;;  %v1964_v2 = vld [vmem:[%s10335_s18 + $0x2c58] sm:$0xff]  ;;  %v2023_v59 = vld [vmem:[%s10335_s18 + $0x2e30] sm:$0xff] }
 0x3b2   : > { %8501 = vmatpush1.bf16.msra.mxu1 %v8500_v4  ;;  %7479 = vmatprep.subr.bf16.mxu0 %v7478_v27  ;;  %v1968_v4 = vld [vmem:[%s10335_s18 + $0x2c78] sm:$0xff]  ;;  %v7496_v27 = vpack.c.bf16 %v1957_v57, %v1953_v14  ;;  %v7514_v14 = vpack.c.bf16 %v1998_v54, %v1994_v26  ;;  %v1993_v57 = vld [vmem:[%s10335_s18 + $0x2d40] sm:$0xff]  ;;  %v2034_v26 = vld [vmem:[%s10335_s18 + $0x2e88] sm:$0xff] }
 0x3b3   : > { %8503 = vmatprep.subr.bf16.mxu1 %v8502_v7  ;;  %v1965_v7 = vld [vmem:[%s10335_s18 + $0x2c60] sm:$0xff]  ;;  %v8522_v31 = vpack.c.bf16 %v1968_v4, %v1964_v2  ;;  %v2006_v2 = vld [vmem:[%s10335_s18 + $0x2da8] sm:$0xff]  ;;  %v2004_v4 = vld [vmem:[%s10335_s18 + $0x2d98] sm:$0xff] }
 0x3b4   : > { %v7500_v18 = vpack.c.bf16 %v1965_v7, %v1961_v29  ;;  %v7518_v29 = vpack.c.bf16 %v2006_v2, %v2002_v62  ;;  %v2001_v7 = vld [vmem:[%s10335_s18 + $0x2d80] sm:$0xff]  ;;  %v2038_v54 = vld [vmem:[%s10335_s18 + $0x2ea8] sm:$0xff] }
 0x3b5   : > { %7481 = vmatpush1.bf16.msra.mxu0 %v7480_v15  ;;  %v2702_v15 = vcombine.high %v11895_v1, %v11895_v1  ;;  %v2042_v62 = vld [vmem:[%s10335_s18 + $0x2ec8] sm:$0xff] }
 0x3b6   : > { %8505 = vmatpush1.bf16.msra.mxu1 %v8504_v16  ;;  %7483 = vmatprep.subr.bf16.mxu0 %v7482_v17  ;;  %v1972_v16 = vld [vmem:[%s10335_s18 + $0x2c98] sm:$0xff]  ;;  %v2046_v2 = vld [vmem:[%s10335_s18 + $0x2ee8] sm:$0xff] }
 0x3b7   : > { %8507 = vmatprep.subr.bf16.mxu1 %v8506_v21  ;;  %v1976_v17 = vld [vmem:[%s10335_s18 + $0x2cb8] sm:$0xff]  ;;  %v1969_v21 = vld [vmem:[%s10335_s18 + $0x2c80] sm:$0xff] }
 0x3b8   : > { %v8526_v23 = vpack.c.bf16 %v1976_v17, %v1972_v16  ;;  %v2012_v16 = vld [vmem:[%s10335_s18 + $0x2dd8] sm:$0xff] }
 0x3b9   : > { %7485 = vmatpush1.bf16.msra.mxu0 %v7484_v0  ;;  %v1982_v0 = vld [vmem:[%s10335_s18 + $0x2ce8] sm:$0xff]  ;;  %v2016_v17 = vld [vmem:[%s10335_s18 + $0x2df8] sm:$0xff] }
 0x3ba   : > { %8509 = vmatpush1.bf16.msra.mxu1 %v8508_v25  ;;  %7487 = vmatprep.subr.bf16.mxu0 %v7486_v3  ;;  %v1984_v25 = vld [vmem:[%s10335_s18 + $0x2cf8] sm:$0xff]  ;;  %v7504_v3 = vpack.c.bf16 %v1973_v51, %v1969_v21  ;;  %v7506_v30 = vpack.c.bf16 %v1982_v0, %v1978_v24  ;;  %v2009_v21 = vld [vmem:[%s10335_s18 + $0x2dc0] sm:$0xff]  ;;  %v2018_v24 = vld [vmem:[%s10335_s18 + $0x2e08] sm:$0xff] }
 0x3bb   : > { %8511 = vmatprep.subr.bf16.mxu1 %v8510_v34  ;;  %v1981_v34 = vld [vmem:[%s10335_s18 + $0x2ce0] sm:$0xff]  ;;  %v2022_v0 = vld [vmem:[%s10335_s18 + $0x2e28] sm:$0xff] }
 0x3bc   : > { %v2013_v51 = vld [vmem:[%s10335_s18 + $0x2de0] sm:$0xff] }
 0x3bd   : > { %7489 = vmatpush1.bf16.msra.mxu0 %v7488_v61  ;;  %v1988_v61 = vld [vmem:[%s10335_s18 + $0x2d18] sm:$0xff] }
 0x3be   : > { %8513 = vmatpush1.bf16.msra.mxu1 %v8512_v40  ;;  %7491 = vmatprep.subr.bf16.mxu0 %v7490_v41  ;;  %v1992_v40 = vld [vmem:[%s10335_s18 + $0x2d38] sm:$0xff]  ;;  %v7508_v41 = vpack.c.bf16 %v1981_v34, %v1977_v32  ;;  %v2017_v32 = vld [vmem:[%s10335_s18 + $0x2e00] sm:$0xff] }
 0x3bf   : > { %8515 = vmatprep.subr.bf16.mxu1 %v8514_v48  ;;  %v1989_v48 = vld [vmem:[%s10335_s18 + $0x2d20] sm:$0xff]  ;;  %v8534_v52 = vpack.c.bf16 %v1992_v40, %v1988_v61  ;;  %v2028_v61 = vld [vmem:[%s10335_s18 + $0x2e58] sm:$0xff] }
 0x3c0   : > { %v2021_v34 = vld [vmem:[%s10335_s18 + $0x2e20] sm:$0xff]  ;;  %v2032_v40 = vld [vmem:[%s10335_s18 + $0x2e78] sm:$0xff] }
 0x3c1   : > { %7493 = vmatpush1.bf16.msra.mxu0 %v7492_v10  ;;  %v2000_v10 = vld [vmem:[%s10335_s18 + $0x2d78] sm:$0xff] }
 0x3c2   : > { %8517 = vmatpush1.bf16.msra.mxu1 %v8516_v56  ;;  %7495 = vmatprep.subr.bf16.mxu0 %v7494_v44  ;;  %v7512_v56 = vpack.c.bf16 %v1989_v48, %v1985_v46  ;;  %v8536_v44 = vpack.c.bf16 %v1991_v53, %v1987_v50  ;;  %v8538_v36 = vpack.c.bf16 %v2000_v10, %v1996_v55  ;;  %v2025_v46 = vld [vmem:[%s10335_s18 + $0x2e40] sm:$0xff]  ;;  %v2027_v50 = vld [vmem:[%s10335_s18 + $0x2e50] sm:$0xff]  ;;  %v2036_v55 = vld [vmem:[%s10335_s18 + $0x2e98] sm:$0xff] }
 0x3c3   : > { %8519 = vmatprep.subr.bf16.mxu1 %v8518_v58  ;;  %v1995_v58 = vld [vmem:[%s10335_s18 + $0x2d50] sm:$0xff]  ;;  %v2029_v48 = vld [vmem:[%s10335_s18 + $0x2e60] sm:$0xff]  ;;  %v2040_v10 = vld [vmem:[%s10335_s18 + $0x2eb8] sm:$0xff] }
 0x3c4   : > { %3544 = vmatmul.mubr.f32.vlgmr.msra.gmra.mrb[0].mxu0 %v11758_v47  ;;  %v2031_v53 = vld [vmem:[%s10335_s18 + $0x2e70] sm:$0xff] }
 0x3c5   : > { %7497 = vmatpush1.bf16.msra.mxu0 %v7496_v27  ;;  %4680 = vmatmul.mubr.f32.vlgmr.msra.gmra.mrb[0].mxu1 %v11758_v47  ;;  %v1980_v47 = vld [vmem:[%s10335_s18 + $0x2cd8] sm:$0xff] }
 0x3c6   : > { %8521 = vmatpush1.bf16.msra.mxu1 %v8520_v5  ;;  %7499 = vmatprep.subr.bf16.mxu0 %v7498_v6  ;;  %v8530_v37 = vpack.c.bf16 %v1984_v25, %v1980_v47  ;;  %v2008_v27 = vld [vmem:[%s10335_s18 + $0x2db8] sm:$0xff]  ;;  %v7516_v5 = vpack.c.bf16 %v1997_v33, %v1993_v57  ;;  %v8540_v6 = vpack.c.bf16 %v1999_v60, %v1995_v58  ;;  %v2033_v57 = vld [vmem:[%s10335_s18 + $0x2e80] sm:$0xff]  ;;  %v2035_v58 = vld [vmem:[%s10335_s18 + $0x2e90] sm:$0xff] }
 0x3c7   : > { %8523 = vmatprep.subr.bf16.mxu1 %v8522_v31  ;;  %3614 = vmatprep.mubr.f32.mxu0 %v2702_v15  ;;  %v2003_v31 = vld [vmem:[%s10335_s18 + $0x2d90] sm:$0xff]  ;;  %v8542_v9 = vpack.c.bf16 %v2008_v27, %v2004_v4  ;;  %v2020_v47 = vld [vmem:[%s10335_s18 + $0x2e18] sm:$0xff]  ;;  %v2037_v33 = vld [vmem:[%s10335_s18 + $0x2ea0] sm:$0xff] }
 0x3c8   : > { %4750 = vmatprep.mubr.f32.mxu1 %v2702_v15  ;;  %v2014_v15 = vld [vmem:[%s10335_s18 + $0x2de8] sm:$0xff]  ;;  %v2024_v25 = vld [vmem:[%s10335_s18 + $0x2e38] sm:$0xff]  ;;  %v2039_v60 = vld [vmem:[%s10335_s18 + $0x2eb0] sm:$0xff] }
 0x3c9   : > { %7501 = vmatpush1.bf16.msra.mxu0 %v7500_v18  ;;  %v7520_v18 = vpack.c.bf16 %v2005_v8, %v2001_v7  ;;  %v2044_v4 = vld [vmem:[%s10335_s18 + $0x2ed8] sm:$0xff]  ;;  %v2041_v7 = vld [vmem:[%s10335_s18 + $0x2ec0] sm:$0xff] }
 0x3ca   : > { %8525 = vmatpush1.bf16.msra.mxu1 %v8524_v19  ;;  %7503 = vmatprep.subr.bf16.mxu0 %v7502_v20  ;;  %v8544_v19 = vpack.c.bf16 %v2007_v11, %v2003_v31  ;;  %v7522_v20 = vpack.c.bf16 %v2014_v15, %v2010_v13  ;;  %v2048_v27 = vld [vmem:[%s10335_s18 + $0x2ef8] sm:$0xff]  ;;  %v2045_v8 = vld [vmem:[%s10335_s18 + $0x2ee0] sm:$0xff]  ;;  %v2043_v31 = vld [vmem:[%s10335_s18 + $0x2ed0] sm:$0xff] }
 0x3cb   : > { %8527 = vmatprep.subr.bf16.mxu1 %v8526_v23  ;;  %v8546_v23 = vpack.c.bf16 %v2016_v17, %v2012_v16  ;;  %v2047_v11 = vld [vmem:[%s10335_s18 + $0x2ef0] sm:$0xff]  ;;  %v2050_v13 = vld [vmem:[%s10335_s18 + $0x2f08] sm:$0xff]  ;;  %v2052_v16 = vld [vmem:[%s10335_s18 + $0x2f18] sm:$0xff] }
 0x3cc   : > { %v2054_v15 = vld [vmem:[%s10335_s18 + $0x2f28] sm:$0xff]  ;;  %v2056_v17 = vld [vmem:[%s10335_s18 + $0x2f38] sm:$0xff] }
 0x3cd   : > { %7505 = vmatpush1.bf16.msra.mxu0 %v7504_v3  ;;  %v7524_v3 = vpack.c.bf16 %v2013_v51, %v2009_v21  ;;  %v2049_v21 = vld [vmem:[%s10335_s18 + $0x2f00] sm:$0xff] }
 0x3ce   : > { %8529 = vmatpush1.bf16.msra.mxu1 %v8528_v28  ;;  %7507 = vmatprep.subr.bf16.mxu0 %v7506_v30  ;;  %v8548_v28 = vpack.c.bf16 %v2015_v43, %v2011_v22  ;;  %v7526_v30 = vpack.c.bf16 %v2022_v0, %v2018_v24  ;;  %v2053_v51 = vld [vmem:[%s10335_s18 + $0x2f20] sm:$0xff]  ;;  %v2051_v22 = vld [vmem:[%s10335_s18 + $0x2f10] sm:$0xff]  ;;  %v2058_v24 = vld [vmem:[%s10335_s18 + $0x2f48] sm:$0xff] }
 0x3cf   : > { %8531 = vmatprep.subr.bf16.mxu1 %v8530_v37  ;;  %v8550_v37 = vpack.c.bf16 %v2024_v25, %v2020_v47  ;;  %v2055_v43 = vld [vmem:[%s10335_s18 + $0x2f30] sm:$0xff]  ;;  %v2062_v0 = vld [vmem:[%s10335_s18 + $0x2f68] sm:$0xff]  ;;  %v2060_v47 = vld [vmem:[%s10335_s18 + $0x2f58] sm:$0xff] }
 0x3d0   : > { %v2064_v25 = vld [vmem:[%s10335_s18 + $0x2f78] sm:$0xff] }
 0x3d1   : > { %7509 = vmatpush1.bf16.msra.mxu0 %v7508_v41  ;;  %v7528_v41 = vpack.c.bf16 %v2021_v34, %v2017_v32  ;;  %v2057_v32 = vld [vmem:[%s10335_s18 + $0x2f40] sm:$0xff] }
 0x3d2   : > { %8533 = vmatpush1.bf16.msra.mxu1 %v8532_v42  ;;  %7511 = vmatprep.subr.bf16.mxu0 %v7510_v45  ;;  %v8552_v42 = vpack.c.bf16 %v2023_v59, %v2019_v35  ;;  %v7530_v45 = vpack.c.bf16 %v2030_v39, %v2026_v38  ;;  %v2061_v34 = vld [vmem:[%s10335_s18 + $0x2f60] sm:$0xff]  ;;  %v2059_v35 = vld [vmem:[%s10335_s18 + $0x2f50] sm:$0xff]  ;;  %v2066_v38 = vld [vmem:[%s10335_s18 + $0x2f88] sm:$0xff] }
 0x3d3   : > { %8535 = vmatprep.subr.bf16.mxu1 %v8534_v52  ;;  %v8554_v52 = vpack.c.bf16 %v2032_v40, %v2028_v61  ;;  %v2063_v59 = vld [vmem:[%s10335_s18 + $0x2f70] sm:$0xff]  ;;  %v2070_v39 = vld [vmem:[%s10335_s18 + $0x2fa8] sm:$0xff]  ;;  %v2068_v61 = vld [vmem:[%s10335_s18 + $0x2f98] sm:$0xff] }
 0x3d4   : > { %v2072_v40 = vld [vmem:[%s10335_s18 + $0x2fb8] sm:$0xff] }
 0x3d5   : > { %7513 = vmatpush1.bf16.msra.mxu0 %v7512_v56  ;;  %v7532_v56 = vpack.c.bf16 %v2029_v48, %v2025_v46  ;;  %v2065_v46 = vld [vmem:[%s10335_s18 + $0x2f80] sm:$0xff] }
 0x3d6   : > { %8537 = vmatpush1.bf16.msra.mxu1 %v8536_v44  ;;  %7515 = vmatprep.subr.bf16.mxu0 %v7514_v14  ;;  %v8556_v44 = vpack.c.bf16 %v2031_v53, %v2027_v50  ;;  %v7534_v14 = vpack.c.bf16 %v2038_v54, %v2034_v26  ;;  %v2069_v48 = vld [vmem:[%s10335_s18 + $0x2fa0] sm:$0xff]  ;;  %v2067_v50 = vld [vmem:[%s10335_s18 + $0x2f90] sm:$0xff]  ;;  %v2074_v26 = vld [vmem:[%s10335_s18 + $0x2fc8] sm:$0xff] }
 0x3d7   : > { %8539 = vmatprep.subr.bf16.mxu1 %v8538_v36  ;;  %v8558_v36 = vpack.c.bf16 %v2040_v10, %v2036_v55  ;;  %v2071_v53 = vld [vmem:[%s10335_s18 + $0x2fb0] sm:$0xff]  ;;  %v2078_v54 = vld [vmem:[%s10335_s18 + $0x2fe8] sm:$0xff]  ;;  %v2076_v55 = vld [vmem:[%s10335_s18 + $0x2fd8] sm:$0xff] }
 0x3d8   : > { %v2080_v10 = vld [vmem:[%s10335_s18 + $0x2ff8] sm:$0xff] }
 0x3d9   : > { %7517 = vmatpush1.bf16.msra.mxu0 %v7516_v5  ;;  %v7536_v5 = vpack.c.bf16 %v2037_v33, %v2033_v57  ;;  %v2073_v57 = vld [vmem:[%s10335_s18 + $0x2fc0] sm:$0xff] }
 0x3da   : > { %8541 = vmatpush1.bf16.msra.mxu1 %v8540_v6  ;;  %7519 = vmatprep.subr.bf16.mxu0 %v7518_v29  ;;  %v8560_v6 = vpack.c.bf16 %v2039_v60, %v2035_v58  ;;  %v7538_v29 = vpack.c.bf16 %v2046_v2, %v2042_v62  ;;  %v2077_v33 = vld [vmem:[%s10335_s18 + $0x2fe0] sm:$0xff]  ;;  %v2075_v58 = vld [vmem:[%s10335_s18 + $0x2fd0] sm:$0xff]  ;;  %v2082_v62 = vld [vmem:[%s10335_s18 + $0x3008] sm:$0xff] }
 0x3db   : > { %8543 = vmatprep.subr.bf16.mxu1 %v8542_v9  ;;  %v8562_v9 = vpack.c.bf16 %v2048_v27, %v2044_v4  ;;  %v2079_v60 = vld [vmem:[%s10335_s18 + $0x2ff0] sm:$0xff]  ;;  %v2086_v2 = vld [vmem:[%s10335_s18 + $0x3028] sm:$0xff]  ;;  %v2084_v4 = vld [vmem:[%s10335_s18 + $0x3018] sm:$0xff] }
 0x3dc   : > { %v2088_v27 = vld [vmem:[%s10335_s18 + $0x3038] sm:$0xff] }
 0x3dd   : > { %7521 = vmatpush1.bf16.msra.mxu0 %v7520_v18  ;;  %v7540_v18 = vpack.c.bf16 %v2045_v8, %v2041_v7  ;;  %v7558_v7 = vpack.c.bf16 %v2086_v2, %v2082_v62  ;;  %v2081_v8 = vld [vmem:[%s10335_s18 + $0x3000] sm:$0xff]  ;;  %v2119_v2 = vld [vmem:[%s10335_s18 + $0x3130] sm:$0xff] }
 0x3de   : > { %8545 = vmatpush1.bf16.msra.mxu1 %v8544_v19  ;;  %7523 = vmatprep.subr.bf16.mxu0 %v7522_v20  ;;  %v8564_v19 = vpack.c.bf16 %v2047_v11, %v2043_v31  ;;  %v7542_v20 = vpack.c.bf16 %v2054_v15, %v2050_v13  ;;  %v2085_v31 = vld [vmem:[%s10335_s18 + $0x3020] sm:$0xff]  ;;  %v8582_v11 = vpack.c.bf16 %v2088_v27, %v2084_v4  ;;  %v2087_v13 = vld [vmem:[%s10335_s18 + $0x3030] sm:$0xff]  ;;  %v2090_v15 = vld [vmem:[%s10335_s18 + $0x3048] sm:$0xff] }
 0x3df   : > { %8547 = vmatprep.subr.bf16.mxu1 %v8546_v23  ;;  %v8566_v23 = vpack.c.bf16 %v2056_v17, %v2052_v16  ;;  %v2094_v16 = vld [vmem:[%s10335_s18 + $0x3068] sm:$0xff] }
 0x3e0   : > { %v2122_v4 = vld [vmem:[%s10335_s18 + $0x3148] sm:$0xff] }
 0x3e1   : > { %7525 = vmatpush1.bf16.msra.mxu0 %v7524_v3  ;;  %v7544_v3 = vpack.c.bf16 %v2053_v51, %v2049_v21  ;;  %v7562_v51 = vpack.c.bf16 %v2094_v16, %v2090_v15  ;;  %v2126_v27 = vld [vmem:[%s10335_s18 + $0x3168] sm:$0xff]  ;;  %v2127_v16 = vld [vmem:[%s10335_s18 + $0x3170] sm:$0xff] }
 0x3e2   : > { %8549 = vmatpush1.bf16.msra.mxu1 %v8548_v28  ;;  %7527 = vmatprep.subr.bf16.mxu0 %v7526_v30  ;;  %v8568_v28 = vpack.c.bf16 %v2055_v43, %v2051_v22  ;;  %v7546_v30 = vpack.c.bf16 %v2062_v0, %v2058_v24  ;;  %v2089_v22 = vld [vmem:[%s10335_s18 + $0x3040] sm:$0xff]  ;;  %v2091_v43 = vld [vmem:[%s10335_s18 + $0x3050] sm:$0xff] }
 0x3e3   : > { %8551 = vmatprep.subr.bf16.mxu1 %v8550_v37  ;;  %v8570_v37 = vpack.c.bf16 %v2064_v25, %v2060_v47  ;;  %v2095_v0 = vld [vmem:[%s10335_s18 + $0x3070] sm:$0xff]  ;;  %v2098_v47 = vld [vmem:[%s10335_s18 + $0x3088] sm:$0xff] }
 0x3e4   : > { %v2102_v25 = vld [vmem:[%s10335_s18 + $0x30a8] sm:$0xff] }
 0x3e5   : > { %7529 = vmatpush1.bf16.msra.mxu0 %v7528_v41  ;;  %v7548_v41 = vpack.c.bf16 %v2061_v34, %v2057_v32  ;;  %v8588_v34 = vpack.c.bf16 %v2095_v0, %v2091_v43  ;;  %v2129_v43 = vld [vmem:[%s10335_s18 + $0x3180] sm:$0xff]  ;;  %v2131_v0 = vld [vmem:[%s10335_s18 + $0x3190] sm:$0xff] }
 0x3e6   : > { %8553 = vmatpush1.bf16.msra.mxu1 %v8552_v42  ;;  %7531 = vmatprep.subr.bf16.mxu0 %v7530_v45  ;;  %v8572_v42 = vpack.c.bf16 %v2063_v59, %v2059_v35  ;;  %v7550_v45 = vpack.c.bf16 %v2070_v39, %v2066_v38  ;;  %v7566_v35 = vpack.c.bf16 %v2102_v25, %v2098_v47  ;;  %v2101_v59 = vld [vmem:[%s10335_s18 + $0x30a0] sm:$0xff]  ;;  %v2099_v38 = vld [vmem:[%s10335_s18 + $0x3090] sm:$0xff] }
 0x3e7   : > { %8555 = vmatprep.subr.bf16.mxu1 %v8554_v52  ;;  %v8574_v52 = vpack.c.bf16 %v2072_v40, %v2068_v61  ;;  %v2103_v61 = vld [vmem:[%s10335_s18 + $0x30b0] sm:$0xff]  ;;  %v2106_v40 = vld [vmem:[%s10335_s18 + $0x30c8] sm:$0xff] }
 0x3e8   : > { %v2135_v25 = vld [vmem:[%s10335_s18 + $0x31b0] sm:$0xff] }
 0x3e9   : > { %7533 = vmatpush1.bf16.msra.mxu0 %v7532_v56  ;;  %v7552_v56 = vpack.c.bf16 %v2069_v48, %v2065_v46  ;;  %v8592_v46 = vpack.c.bf16 %v2103_v61, %v2099_v38  ;;  %v2141_v38 = vld [vmem:[%s10335_s18 + $0x31e0] sm:$0xff] }
 0x3ea   : > { %8557 = vmatpush1.bf16.msra.mxu1 %v8556_v44  ;;  %7535 = vmatprep.subr.bf16.mxu0 %v7534_v14  ;;  %v8576_v44 = vpack.c.bf16 %v2071_v53, %v2067_v50  ;;  %v7554_v14 = vpack.c.bf16 %v2078_v54, %v2074_v26  ;;  %v2105_v50 = vld [vmem:[%s10335_s18 + $0x30c0] sm:$0xff]  ;;  %v2107_v53 = vld [vmem:[%s10335_s18 + $0x30d0] sm:$0xff] }
 0x3eb   : > { %8559 = vmatprep.subr.bf16.mxu1 %v8558_v36  ;;  %v8578_v36 = vpack.c.bf16 %v2080_v10, %v2076_v55  ;;  %v2111_v54 = vld [vmem:[%s10335_s18 + $0x30f0] sm:$0xff]  ;;  %v2114_v55 = vld [vmem:[%s10335_s18 + $0x3108] sm:$0xff] }
 0x3ec   : > { %v2118_v10 = vld [vmem:[%s10335_s18 + $0x3128] sm:$0xff] }
 0x3ed   : > { %7537 = vmatpush1.bf16.msra.mxu0 %v7536_v5  ;;  %v12024_v5 = vld [vmem:[%s10328_s24 + $0x30] sm:$0xff] }
 0x3ee   : > { %8561 = vmatpush1.bf16.msra.mxu1 %v8560_v6  ;;  %7539 = vmatprep.subr.bf16.mxu0 %v7538_v29  ;;  %v7556_v6 = vpack.c.bf16 %v2077_v33, %v2073_v57  ;;  %v8580_v29 = vpack.c.bf16 %v2079_v60, %v2075_v58  ;;  %v12034_v17 = vrot.slane %v12024_v5, %v10455_v12  ;;  %v2113_v58 = vld [vmem:[%s10335_s18 + $0x3100] sm:$0xff]  ;;  %v2115_v60 = vld [vmem:[%s10335_s18 + $0x3110] sm:$0xff] }
 0x3ef   : > { %8563 = vmatprep.subr.bf16.mxu1 %v8562_v9  ;;  %v2083_v9 = vld [vmem:[%s10335_s18 + $0x3010] sm:$0xff]  ;;  %v8596_v57 = vpack.c.bf16 %v2111_v54, %v2107_v53  ;;  %v7574_v33 = vpack.c.bf16 %v2118_v10, %v2114_v55  ;;  %v2149_v53 = vld [vmem:[%s10335_s18 + $0x3220] sm:$0xff]  ;;  %v2154_v10 = vld [vmem:[%s10335_s18 + $0x3248] sm:$0xff] }
 0x3f0   : > { %v8584_v21 = vpack.c.bf16 %v2087_v13, %v2083_v9  ;;  %v2121_v9 = vld [vmem:[%s10335_s18 + $0x3140] sm:$0xff]  ;;  %v2123_v13 = vld [vmem:[%s10335_s18 + $0x3150] sm:$0xff] }
 0x3f1   : > { %7541 = vmatpush1.bf16.msra.mxu0 %v7540_v18  ;;  %v2092_v18 = vld [vmem:[%s10335_s18 + $0x3058] sm:$0xff]  ;;  %v2151_v55 = vld [vmem:[%s10335_s18 + $0x3230] sm:$0xff] }
 0x3f2   : > { %8565 = vmatpush1.bf16.msra.mxu1 %v8564_v19  ;;  %7543 = vmatprep.subr.bf16.mxu0 %v7542_v20  ;;  %v2096_v19 = vld [vmem:[%s10335_s18 + $0x3078] sm:$0xff]  ;;  %v7560_v20 = vpack.c.bf16 %v2085_v31, %v2081_v8  ;;  %v8600_v8 = vpack.c.bf16 %v2119_v2, %v2115_v60  ;;  %v7578_v31 = vpack.c.bf16 %v2126_v27, %v2122_v4  ;;  %v2157_v60 = vld [vmem:[%s10335_s18 + $0x3260] sm:$0xff]  ;;  %v2159_v4 = vld [vmem:[%s10335_s18 + $0x3270] sm:$0xff] }
 0x3f3   : > { %8567 = vmatprep.subr.bf16.mxu1 %v8566_v23  ;;  %v2093_v23 = vld [vmem:[%s10335_s18 + $0x3060] sm:$0xff]  ;;  %v8586_v24 = vpack.c.bf16 %v2096_v19, %v2092_v18  ;;  %v2130_v18 = vld [vmem:[%s10335_s18 + $0x3188] sm:$0xff] }
 0x3f4   : > { %v7564_v32 = vpack.c.bf16 %v2093_v23, %v2089_v22  ;;  %v2134_v19 = vld [vmem:[%s10335_s18 + $0x31a8] sm:$0xff]  ;;  %v8604_v22 = vpack.c.bf16 %v2127_v16, %v2123_v13  ;;  %v2165_v13 = vld [vmem:[%s10335_s18 + $0x32a0] sm:$0xff] }
 0x3f5   : > { %7545 = vmatpush1.bf16.msra.mxu0 %v7544_v3  ;;  %v2718_v3 = vcombine.high %v12034_v17, %v12034_v17  ;;  %v7582_v23 = vpack.c.bf16 %v2134_v19, %v2130_v18  ;;  %v2162_v27 = vld [vmem:[%s10335_s18 + $0x3288] sm:$0xff]  ;;  %v2167_v18 = vld [vmem:[%s10335_s18 + $0x32b0] sm:$0xff] }
 0x3f6   : > { %8569 = vmatpush1.bf16.msra.mxu1 %v8568_v28  ;;  %7547 = vmatprep.subr.bf16.mxu0 %v7546_v30  ;;  %v2100_v28 = vld [vmem:[%s10335_s18 + $0x3098] sm:$0xff]  ;;  %v2170_v19 = vld [vmem:[%s10335_s18 + $0x32c8] sm:$0xff] }
 0x3f7   : > { %8571 = vmatprep.subr.bf16.mxu1 %v8570_v37  ;;  %v2104_v30 = vld [vmem:[%s10335_s18 + $0x30b8] sm:$0xff]  ;;  %v2097_v37 = vld [vmem:[%s10335_s18 + $0x3080] sm:$0xff] }
 0x3f8   : > { %v8590_v39 = vpack.c.bf16 %v2104_v30, %v2100_v28  ;;  %v2142_v28 = vld [vmem:[%s10335_s18 + $0x31e8] sm:$0xff]  ;;  %v2140_v30 = vld [vmem:[%s10335_s18 + $0x31d8] sm:$0xff] }
 0x3f9   : > { %7549 = vmatpush1.bf16.msra.mxu0 %v7548_v41  ;;  %v2110_v41 = vld [vmem:[%s10335_s18 + $0x30e8] sm:$0xff] }
 0x3fa   : > { %8573 = vmatpush1.bf16.msra.mxu1 %v8572_v42  ;;  %7551 = vmatprep.subr.bf16.mxu0 %v7550_v45  ;;  %v2112_v42 = vld [vmem:[%s10335_s18 + $0x30f8] sm:$0xff]  ;;  %v7568_v45 = vpack.c.bf16 %v2101_v59, %v2097_v37  ;;  %v7570_v48 = vpack.c.bf16 %v2110_v41, %v2106_v40  ;;  %v2137_v59 = vld [vmem:[%s10335_s18 + $0x31c0] sm:$0xff]  ;;  %v2143_v40 = vld [vmem:[%s10335_s18 + $0x31f0] sm:$0xff] }
 0x3fb   : > { %8575 = vmatprep.subr.bf16.mxu1 %v8574_v52  ;;  %v2109_v52 = vld [vmem:[%s10335_s18 + $0x30e0] sm:$0xff]  ;;  %v2146_v41 = vld [vmem:[%s10335_s18 + $0x3208] sm:$0xff] }
 0x3fd   : > { %7553 = vmatpush1.bf16.msra.mxu0 %v7552_v56  ;;  %v2116_v56 = vld [vmem:[%s10335_s18 + $0x3118] sm:$0xff] }
 0x3fe   : > { %8577 = vmatpush1.bf16.msra.mxu1 %v8576_v44  ;;  %7555 = vmatprep.subr.bf16.mxu0 %v7554_v14  ;;  %v2120_v44 = vld [vmem:[%s10335_s18 + $0x3138] sm:$0xff]  ;;  %v7572_v14 = vpack.c.bf16 %v2109_v52, %v2105_v50  ;;  %v2145_v52 = vld [vmem:[%s10335_s18 + $0x3200] sm:$0xff] }
 0x3ff   : > { %8579 = vmatprep.subr.bf16.mxu1 %v8578_v36  ;;  %v2117_v36 = vld [vmem:[%s10335_s18 + $0x3120] sm:$0xff]  ;;  %v8598_v62 = vpack.c.bf16 %v2120_v44, %v2116_v56  ;;  %v2158_v56 = vld [vmem:[%s10335_s18 + $0x3268] sm:$0xff]  ;;  %v2156_v44 = vld [vmem:[%s10335_s18 + $0x3258] sm:$0xff] }
 0x401   : > { %7557 = vmatpush1.bf16.msra.mxu0 %v7556_v6  ;;  %v2124_v6 = vld [vmem:[%s10335_s18 + $0x3158] sm:$0xff] }
 0x402   : > { %8581 = vmatpush1.bf16.msra.mxu1 %v8580_v29  ;;  %7559 = vmatprep.subr.bf16.mxu0 %v7558_v7  ;;  %v2128_v29 = vld [vmem:[%s10335_s18 + $0x3178] sm:$0xff]  ;;  %v7576_v7 = vpack.c.bf16 %v2117_v36, %v2113_v58  ;;  %v7594_v58 = vpack.c.bf16 %v2158_v56, %v2154_v10  ;;  %v2153_v36 = vld [vmem:[%s10335_s18 + $0x3240] sm:$0xff]  ;;  %v2191_v10 = vld [vmem:[%s10335_s18 + $0x3370] sm:$0xff] }
 0x403   : > { %8583 = vmatprep.subr.bf16.mxu1 %v8582_v11  ;;  %v2125_v11 = vld [vmem:[%s10335_s18 + $0x3160] sm:$0xff]  ;;  %v8602_v15 = vpack.c.bf16 %v2128_v29, %v2124_v6  ;;  %v2166_v6 = vld [vmem:[%s10335_s18 + $0x32a8] sm:$0xff]  ;;  %v2164_v29 = vld [vmem:[%s10335_s18 + $0x3298] sm:$0xff] }
 0x404   : > { %3615 = vmatmul.mubr.f32.vlgmr.msra.gmra.mrb[0].mxu0 %v11895_v1  ;;  %v2194_v56 = vld [vmem:[%s10335_s18 + $0x3388] sm:$0xff] }
 0x405   : > { %7561 = vmatpush1.bf16.msra.mxu0 %v7560_v20  ;;  %4751 = vmatmul.mubr.f32.vlgmr.msra.gmra.mrb[0].mxu1 %v11895_v1  ;;  %v2108_v1 = vld [vmem:[%s10335_s18 + $0x30d8] sm:$0xff] }
 0x406   : > { %8585 = vmatpush1.bf16.msra.mxu1 %v8584_v21  ;;  %7563 = vmatprep.subr.bf16.mxu0 %v7562_v51  ;;  %v8594_v26 = vpack.c.bf16 %v2112_v42, %v2108_v1  ;;  %v2132_v20 = vld [vmem:[%s10335_s18 + $0x3198] sm:$0xff]  ;;  %v7580_v51 = vpack.c.bf16 %v2125_v11, %v2121_v9  ;;  %v2150_v1 = vld [vmem:[%s10335_s18 + $0x3228] sm:$0xff]  ;;  %v7598_v9 = vpack.c.bf16 %v2166_v6, %v2162_v27  ;;  %v2161_v11 = vld [vmem:[%s10335_s18 + $0x3280] sm:$0xff] }
 0x407   : > { %8587 = vmatprep.subr.bf16.mxu1 %v8586_v24  ;;  %3685 = vmatprep.mubr.f32.mxu0 %v2718_v3  ;;  %v2136_v21 = vld [vmem:[%s10335_s18 + $0x31b8] sm:$0xff]  ;;  %v2133_v24 = vld [vmem:[%s10335_s18 + $0x31a0] sm:$0xff]  ;;  %v7590_v50 = vpack.c.bf16 %v2150_v1, %v2146_v41  ;;  %v2183_v41 = vld [vmem:[%s10335_s18 + $0x3330] sm:$0xff] }
 0x408   : > { %4821 = vmatprep.mubr.f32.mxu1 %v2718_v3  ;;  %v8606_v47 = vpack.c.bf16 %v2136_v21, %v2132_v20  ;;  %v2138_v3 = vld [vmem:[%s10335_s18 + $0x31c8] sm:$0xff]  ;;  %v2148_v42 = vld [vmem:[%s10335_s18 + $0x3218] sm:$0xff]  ;;  %v2199_v27 = vld [vmem:[%s10335_s18 + $0x33b0] sm:$0xff] }
 0x409   : > { %7565 = vmatpush1.bf16.msra.mxu0 %v7564_v32  ;;  %v2144_v32 = vld [vmem:[%s10335_s18 + $0x31f8] sm:$0xff]  ;;  %v7586_v37 = vpack.c.bf16 %v2142_v28, %v2138_v3  ;;  %v2174_v20 = vld [vmem:[%s10335_s18 + $0x32e8] sm:$0xff]  ;;  %v2175_v3 = vld [vmem:[%s10335_s18 + $0x32f0] sm:$0xff] }
 0x40a   : > { %8589 = vmatpush1.bf16.msra.mxu1 %v8588_v34  ;;  %7567 = vmatprep.subr.bf16.mxu0 %v7566_v35  ;;  %v7584_v34 = vpack.c.bf16 %v2133_v24, %v2129_v43  ;;  %v8608_v35 = vpack.c.bf16 %v2135_v25, %v2131_v0  ;;  %v8610_v61 = vpack.c.bf16 %v2144_v32, %v2140_v30  ;;  %v2172_v21 = vld [vmem:[%s10335_s18 + $0x32d8] sm:$0xff]  ;;  %v2169_v24 = vld [vmem:[%s10335_s18 + $0x32c0] sm:$0xff]  ;;  %v2178_v28 = vld [vmem:[%s10335_s18 + $0x3308] sm:$0xff] }
 0x40b   : > { %8591 = vmatprep.subr.bf16.mxu1 %v8590_v39  ;;  %v2139_v39 = vld [vmem:[%s10335_s18 + $0x31d0] sm:$0xff]  ;;  %v7602_v43 = vpack.c.bf16 %v2174_v20, %v2170_v19  ;;  %v2173_v0 = vld [vmem:[%s10335_s18 + $0x32e0] sm:$0xff]  ;;  %v2182_v30 = vld [vmem:[%s10335_s18 + $0x3328] sm:$0xff] }
 0x40c   : > { %v2180_v32 = vld [vmem:[%s10335_s18 + $0x3318] sm:$0xff]  ;;  %v2186_v1 = vld [vmem:[%s10335_s18 + $0x3348] sm:$0xff]  ;;  %v2207_v19 = vld [vmem:[%s10335_s18 + $0x33f0] sm:$0xff] }
 0x40d   : > { %7569 = vmatpush1.bf16.msra.mxu0 %v7568_v45  ;;  %v2152_v45 = vld [vmem:[%s10335_s18 + $0x3238] sm:$0xff]  ;;  %v2202_v6 = vld [vmem:[%s10335_s18 + $0x33c8] sm:$0xff] }
 0x40e   : > { %8593 = vmatpush1.bf16.msra.mxu1 %v8592_v46  ;;  %7571 = vmatprep.subr.bf16.mxu0 %v7570_v48  ;;  %v7588_v46 = vpack.c.bf16 %v2141_v38, %v2137_v59  ;;  %v8612_v48 = vpack.c.bf16 %v2143_v40, %v2139_v39  ;;  %v8614_v54 = vpack.c.bf16 %v2152_v45, %v2148_v42  ;;  %v2177_v38 = vld [vmem:[%s10335_s18 + $0x3300] sm:$0xff]  ;;  %v2190_v42 = vld [vmem:[%s10335_s18 + $0x3368] sm:$0xff]  ;;  %v2188_v45 = vld [vmem:[%s10335_s18 + $0x3358] sm:$0xff] }
 0x40f   : > { %8595 = vmatprep.subr.bf16.mxu1 %v8594_v26  ;;  %v2147_v26 = vld [vmem:[%s10335_s18 + $0x3210] sm:$0xff]  ;;  %v7606_v59 = vpack.c.bf16 %v2182_v30, %v2178_v28  ;;  %v2181_v39 = vld [vmem:[%s10335_s18 + $0x3320] sm:$0xff]  ;;  %v2210_v20 = vld [vmem:[%s10335_s18 + $0x3408] sm:$0xff] }
 0x410   : > { %v2218_v30 = vld [vmem:[%s10335_s18 + $0x3448] sm:$0xff] }
 0x411   : > { %7573 = vmatpush1.bf16.msra.mxu0 %v7572_v14  ;;  %v2160_v14 = vld [vmem:[%s10335_s18 + $0x3278] sm:$0xff] }
 0x412   : > { %8597 = vmatpush1.bf16.msra.mxu1 %v8596_v57  ;;  %7575 = vmatprep.subr.bf16.mxu0 %v7574_v33  ;;  %v7592_v57 = vpack.c.bf16 %v2149_v53, %v2145_v52  ;;  %v8616_v33 = vpack.c.bf16 %v2151_v55, %v2147_v26  ;;  %v8618_v2 = vpack.c.bf16 %v2160_v14, %v2156_v44  ;;  %v2185_v53 = vld [vmem:[%s10335_s18 + $0x3340] sm:$0xff]  ;;  %v2198_v44 = vld [vmem:[%s10335_s18 + $0x33a8] sm:$0xff]  ;;  %v2196_v14 = vld [vmem:[%s10335_s18 + $0x3398] sm:$0xff] }
 0x413   : > { %8599 = vmatprep.subr.bf16.mxu1 %v8598_v62  ;;  %v2155_v62 = vld [vmem:[%s10335_s18 + $0x3250] sm:$0xff]  ;;  %v7610_v52 = vpack.c.bf16 %v2190_v42, %v2186_v1  ;;  %v2189_v26 = vld [vmem:[%s10335_s18 + $0x3360] sm:$0xff] }
 0x414   : > { %v2223_v42 = vld [vmem:[%s10335_s18 + $0x3470] sm:$0xff] }
 0x415   : > { %7577 = vmatpush1.bf16.msra.mxu0 %v7576_v7  ;;  %v2168_v7 = vld [vmem:[%s10335_s18 + $0x32b8] sm:$0xff] }
 0x416   : > { %8601 = vmatpush1.bf16.msra.mxu1 %v8600_v8  ;;  %7579 = vmatprep.subr.bf16.mxu0 %v7578_v31  ;;  %v7596_v8 = vpack.c.bf16 %v2157_v60, %v2153_v36  ;;  %v8620_v31 = vpack.c.bf16 %v2159_v4, %v2155_v62  ;;  %v8622_v16 = vpack.c.bf16 %v2168_v7, %v2164_v29  ;;  %v2193_v60 = vld [vmem:[%s10335_s18 + $0x3380] sm:$0xff]  ;;  %v2206_v29 = vld [vmem:[%s10335_s18 + $0x33e8] sm:$0xff]  ;;  %v2204_v7 = vld [vmem:[%s10335_s18 + $0x33d8] sm:$0xff] }
 0x417   : > { %8603 = vmatprep.subr.bf16.mxu1 %v8602_v15  ;;  %v2163_v15 = vld [vmem:[%s10335_s18 + $0x3290] sm:$0xff]  ;;  %v7614_v36 = vpack.c.bf16 %v2198_v44, %v2194_v56  ;;  %v2197_v62 = vld [vmem:[%s10335_s18 + $0x33a0] sm:$0xff] }
 0x418   : > { %v2227_v56 = vld [vmem:[%s10335_s18 + $0x3490] sm:$0xff] }
 0x419   : > { %7581 = vmatpush1.bf16.msra.mxu0 %v7580_v51  ;;  %v2176_v51 = vld [vmem:[%s10335_s18 + $0x32f8] sm:$0xff] }
 0x41a   : > { %8605 = vmatpush1.bf16.msra.mxu1 %v8604_v22  ;;  %7583 = vmatprep.subr.bf16.mxu0 %v7582_v23  ;;  %v7600_v22 = vpack.c.bf16 %v2165_v13, %v2161_v11  ;;  %v8624_v23 = vpack.c.bf16 %v2167_v18, %v2163_v15  ;;  %v8626_v25 = vpack.c.bf16 %v2176_v51, %v2172_v21  ;;  %v2201_v13 = vld [vmem:[%s10335_s18 + $0x33c0] sm:$0xff]  ;;  %v2214_v21 = vld [vmem:[%s10335_s18 + $0x3428] sm:$0xff] }
 0x41b   : > { %8607 = vmatprep.subr.bf16.mxu1 %v8606_v47  ;;  %v2171_v47 = vld [vmem:[%s10335_s18 + $0x32d0] sm:$0xff]  ;;  %v7618_v11 = vpack.c.bf16 %v2206_v29, %v2202_v6  ;;  %v2205_v15 = vld [vmem:[%s10335_s18 + $0x33e0] sm:$0xff]  ;;  %v2703_v51 = vcombine.high %v12024_v5, %v12024_v5 }
 0x41c   : > { %v2215_v5 = vld [vmem:[%s10335_s18 + $0x3430] sm:$0xff] }
 0x41d   : > { %7585 = vmatpush1.bf16.msra.mxu0 %v7584_v34  ;;  %v2184_v34 = vld [vmem:[%s10335_s18 + $0x3338] sm:$0xff]  ;;  %v2239_v29 = vld [vmem:[%s10335_s18 + $0x34f0] sm:$0xff] }
 0x41e   : > { %8609 = vmatpush1.bf16.msra.mxu1 %v8608_v35  ;;  %7587 = vmatprep.subr.bf16.mxu0 %v7586_v37  ;;  %v7604_v35 = vpack.c.bf16 %v2173_v0, %v2169_v24  ;;  %v8628_v37 = vpack.c.bf16 %v2175_v3, %v2171_v47  ;;  %v8630_v40 = vpack.c.bf16 %v2184_v34, %v2180_v32  ;;  %v2209_v47 = vld [vmem:[%s10335_s18 + $0x3400] sm:$0xff]  ;;  %v2211_v3 = vld [vmem:[%s10335_s18 + $0x3410] sm:$0xff]  ;;  %v2222_v32 = vld [vmem:[%s10335_s18 + $0x3468] sm:$0xff] }
 0x41f   : > { %8611 = vmatprep.subr.bf16.mxu1 %v8610_v61  ;;  %v2179_v61 = vld [vmem:[%s10335_s18 + $0x3310] sm:$0xff]  ;;  %v7622_v0 = vpack.c.bf16 %v2214_v21, %v2210_v20  ;;  %v12171_v34 = vrot.slane %v2703_v51, %v10455_v12  ;;  %v2250_v51 = vld [vmem:[%s10335_s18 + $0x3548] sm:$0xff] }
 0x420   : > { %v2247_v21 = vld [vmem:[%s10335_s18 + $0x3530] sm:$0xff] }
 0x421   : > { %7589 = vmatpush1.bf16.msra.mxu0 %v7588_v46  ;;  %v2192_v46 = vld [vmem:[%s10335_s18 + $0x3378] sm:$0xff] }
 0x422   : > { %8613 = vmatpush1.bf16.msra.mxu1 %v8612_v48  ;;  %7591 = vmatprep.subr.bf16.mxu0 %v7590_v50  ;;  %v7608_v48 = vpack.c.bf16 %v2181_v39, %v2177_v38  ;;  %v8632_v50 = vpack.c.bf16 %v2183_v41, %v2179_v61  ;;  %v8634_v55 = vpack.c.bf16 %v2192_v46, %v2188_v45  ;;  %v2217_v61 = vld [vmem:[%s10335_s18 + $0x3440] sm:$0xff]  ;;  %v2219_v41 = vld [vmem:[%s10335_s18 + $0x3450] sm:$0xff]  ;;  %v2226_v45 = vld [vmem:[%s10335_s18 + $0x3488] sm:$0xff] }
 0x423   : > { %8615 = vmatprep.subr.bf16.mxu1 %v8614_v54  ;;  %v2187_v54 = vld [vmem:[%s10335_s18 + $0x3350] sm:$0xff]  ;;  %v8648_v38 = vpack.c.bf16 %v2215_v5, %v2211_v3  ;;  %v7626_v39 = vpack.c.bf16 %v2222_v32, %v2218_v30  ;;  %v2230_v46 = vld [vmem:[%s10335_s18 + $0x34a8] sm:$0xff]  ;;  %v2253_v3 = vld [vmem:[%s10335_s18 + $0x3560] sm:$0xff] }
 0x424   : > { %v2255_v30 = vld [vmem:[%s10335_s18 + $0x3570] sm:$0xff]  ;;  %v2258_v32 = vld [vmem:[%s10335_s18 + $0x3588] sm:$0xff] }
 0x425   : > { %7593 = vmatpush1.bf16.msra.mxu0 %v7592_v57  ;;  %v2200_v57 = vld [vmem:[%s10335_s18 + $0x33b8] sm:$0xff] }
 0x426   : > { %8617 = vmatpush1.bf16.msra.mxu1 %v8616_v33  ;;  %7595 = vmatprep.subr.bf16.mxu0 %v7594_v58  ;;  %v7612_v33 = vpack.c.bf16 %v2189_v26, %v2185_v53  ;;  %v8636_v58 = vpack.c.bf16 %v2191_v10, %v2187_v54  ;;  %v8638_v4 = vpack.c.bf16 %v2200_v57, %v2196_v14  ;;  %v2229_v10 = vld [vmem:[%s10335_s18 + $0x34a0] sm:$0xff]  ;;  %v2231_v14 = vld [vmem:[%s10335_s18 + $0x34b0] sm:$0xff]  ;;  %v2234_v57 = vld [vmem:[%s10335_s18 + $0x34c8] sm:$0xff] }
 0x427   : > { %8619 = vmatprep.subr.bf16.mxu1 %v8618_v2  ;;  %v2195_v2 = vld [vmem:[%s10335_s18 + $0x3390] sm:$0xff]  ;;  %v8652_v26 = vpack.c.bf16 %v2223_v42, %v2219_v41  ;;  %v7630_v54 = vpack.c.bf16 %v2230_v46, %v2226_v45  ;;  %v2261_v41 = vld [vmem:[%s10335_s18 + $0x35a0] sm:$0xff]  ;;  %v2266_v46 = vld [vmem:[%s10335_s18 + $0x35c8] sm:$0xff] }
 0x428   : > { %v2263_v45 = vld [vmem:[%s10335_s18 + $0x35b0] sm:$0xff] }
 0x429   : > { %7597 = vmatpush1.bf16.msra.mxu0 %v7596_v8  ;;  %v2208_v8 = vld [vmem:[%s10335_s18 + $0x33f8] sm:$0xff] }
 0x42a   : > { %8621 = vmatpush1.bf16.msra.mxu1 %v8620_v31  ;;  %7599 = vmatprep.subr.bf16.mxu0 %v7598_v9  ;;  %v7616_v31 = vpack.c.bf16 %v2197_v62, %v2193_v60  ;;  %v8640_v9 = vpack.c.bf16 %v2199_v27, %v2195_v2  ;;  %v8642_v18 = vpack.c.bf16 %v2208_v8, %v2204_v7  ;;  %v2233_v2 = vld [vmem:[%s10335_s18 + $0x34c0] sm:$0xff]  ;;  %v2235_v27 = vld [vmem:[%s10335_s18 + $0x34d0] sm:$0xff]  ;;  %v2242_v7 = vld [vmem:[%s10335_s18 + $0x3508] sm:$0xff] }
 0x42b   : > { %8623 = vmatprep.subr.bf16.mxu1 %v8622_v16  ;;  %v2203_v16 = vld [vmem:[%s10335_s18 + $0x33d0] sm:$0xff]  ;;  %v8656_v60 = vpack.c.bf16 %v2231_v14, %v2227_v56  ;;  %v2246_v8 = vld [vmem:[%s10335_s18 + $0x3528] sm:$0xff] }
 0x42c   : > { %v8644_v24 = vpack.c.bf16 %v2207_v19, %v2203_v16  ;;  %v2241_v16 = vld [vmem:[%s10335_s18 + $0x3500] sm:$0xff]  ;;  %v2243_v19 = vld [vmem:[%s10335_s18 + $0x3510] sm:$0xff] }
 0x42d   : > { %7601 = vmatpush1.bf16.msra.mxu0 %v7600_v22  ;;  %v2212_v22 = vld [vmem:[%s10335_s18 + $0x3418] sm:$0xff]  ;;  %v2267_v56 = vld [vmem:[%s10335_s18 + $0x35d0] sm:$0xff] }
 0x42e   : > { %8625 = vmatpush1.bf16.msra.mxu1 %v8624_v23  ;;  %7603 = vmatprep.subr.bf16.mxu0 %v7602_v43  ;;  %v2216_v23 = vld [vmem:[%s10335_s18 + $0x3438] sm:$0xff]  ;;  %v7620_v43 = vpack.c.bf16 %v2205_v15, %v2201_v13  ;;  %v8660_v13 = vpack.c.bf16 %v2239_v29, %v2235_v27  ;;  %v7638_v15 = vpack.c.bf16 %v2246_v8, %v2242_v7  ;;  %v2271_v14 = vld [vmem:[%s10335_s18 + $0x35f0] sm:$0xff]  ;;  %v2282_v7 = vld [vmem:[%s10335_s18 + $0x3648] sm:$0xff] }
 0x42f   : > { %8627 = vmatprep.subr.bf16.mxu1 %v8626_v25  ;;  %v2213_v25 = vld [vmem:[%s10335_s18 + $0x3420] sm:$0xff]  ;;  %v8646_v28 = vpack.c.bf16 %v2216_v23, %v2212_v22  ;;  %v2254_v22 = vld [vmem:[%s10335_s18 + $0x3568] sm:$0xff]  ;;  %v2252_v23 = vld [vmem:[%s10335_s18 + $0x3558] sm:$0xff] }
 0x430   : > { %v2275_v27 = vld [vmem:[%s10335_s18 + $0x3610] sm:$0xff]  ;;  %v2286_v8 = vld [vmem:[%s10335_s18 + $0x3668] sm:$0xff] }
 0x431   : > { %7605 = vmatpush1.bf16.msra.mxu0 %v7604_v35  ;;  %v2220_v35 = vld [vmem:[%s10335_s18 + $0x3458] sm:$0xff]  ;;  %v2279_v29 = vld [vmem:[%s10335_s18 + $0x3630] sm:$0xff] }
 0x432   : > { %8629 = vmatpush1.bf16.msra.mxu1 %v8628_v37  ;;  %7607 = vmatprep.subr.bf16.mxu0 %v7606_v59  ;;  %v2224_v37 = vld [vmem:[%s10335_s18 + $0x3478] sm:$0xff]  ;;  %v7624_v59 = vpack.c.bf16 %v2213_v25, %v2209_v47  ;;  %v7642_v47 = vpack.c.bf16 %v2254_v22, %v2250_v51  ;;  %v2249_v25 = vld [vmem:[%s10335_s18 + $0x3540] sm:$0xff]  ;;  %v2290_v51 = vld [vmem:[%s10335_s18 + $0x3688] sm:$0xff] }
 0x433   : > { %8631 = vmatprep.subr.bf16.mxu1 %v8630_v40  ;;  %v2221_v40 = vld [vmem:[%s10335_s18 + $0x3460] sm:$0xff]  ;;  %v8650_v1 = vpack.c.bf16 %v2224_v37, %v2220_v35  ;;  %v2262_v35 = vld [vmem:[%s10335_s18 + $0x35a8] sm:$0xff]  ;;  %v2260_v37 = vld [vmem:[%s10335_s18 + $0x3598] sm:$0xff] }
 0x434   : > { %v7628_v53 = vpack.c.bf16 %v2221_v40, %v2217_v61  ;;  %v7646_v61 = vpack.c.bf16 %v2262_v35, %v2258_v32  ;;  %v2257_v40 = vld [vmem:[%s10335_s18 + $0x3580] sm:$0xff]  ;;  %v2294_v22 = vld [vmem:[%s10335_s18 + $0x36a8] sm:$0xff] }
 0x435   : > { %7609 = vmatpush1.bf16.msra.mxu0 %v7608_v48  ;;  %v2719_v48 = vcombine.high %v12171_v34, %v12171_v34  ;;  %v2298_v32 = vld [vmem:[%s10335_s18 + $0x36c8] sm:$0xff] }
 0x436   : > { %8633 = vmatpush1.bf16.msra.mxu1 %v8632_v50  ;;  %7611 = vmatprep.subr.bf16.mxu0 %v7610_v52  ;;  %v2228_v50 = vld [vmem:[%s10335_s18 + $0x3498] sm:$0xff]  ;;  %v2302_v35 = vld [vmem:[%s10335_s18 + $0x36e8] sm:$0xff] }
 0x437   : > { %8635 = vmatprep.subr.bf16.mxu1 %v8634_v55  ;;  %v2232_v52 = vld [vmem:[%s10335_s18 + $0x34b8] sm:$0xff]  ;;  %v2225_v55 = vld [vmem:[%s10335_s18 + $0x3480] sm:$0xff] }
 0x438   : > { %v8654_v44 = vpack.c.bf16 %v2232_v52, %v2228_v50  ;;  %v2268_v50 = vld [vmem:[%s10335_s18 + $0x35d8] sm:$0xff] }
 0x439   : > { %7613 = vmatpush1.bf16.msra.mxu0 %v7612_v33  ;;  %v2238_v33 = vld [vmem:[%s10335_s18 + $0x34e8] sm:$0xff]  ;;  %v2272_v52 = vld [vmem:[%s10335_s18 + $0x35f8] sm:$0xff] }
 0x43a   : > { %8637 = vmatpush1.bf16.msra.mxu1 %v8636_v58  ;;  %7615 = vmatprep.subr.bf16.mxu0 %v7614_v36  ;;  %v2240_v58 = vld [vmem:[%s10335_s18 + $0x34f8] sm:$0xff]  ;;  %v7632_v36 = vpack.c.bf16 %v2229_v10, %v2225_v55  ;;  %v7634_v62 = vpack.c.bf16 %v2238_v33, %v2234_v57  ;;  %v2265_v55 = vld [vmem:[%s10335_s18 + $0x35c0] sm:$0xff]  ;;  %v2274_v57 = vld [vmem:[%s10335_s18 + $0x3608] sm:$0xff] }
 0x43b   : > { %8639 = vmatprep.subr.bf16.mxu1 %v8638_v4  ;;  %v2237_v4 = vld [vmem:[%s10335_s18 + $0x34e0] sm:$0xff]  ;;  %v2278_v33 = vld [vmem:[%s10335_s18 + $0x3628] sm:$0xff] }
 0x43c   : > { %v2269_v10 = vld [vmem:[%s10335_s18 + $0x35e0] sm:$0xff] }
 0x43d   : > { %7617 = vmatpush1.bf16.msra.mxu0 %v7616_v31  ;;  %v2244_v31 = vld [vmem:[%s10335_s18 + $0x3518] sm:$0xff] }
 0x43e   : > { %8641 = vmatpush1.bf16.msra.mxu1 %v8640_v9  ;;  %7619 = vmatprep.subr.bf16.mxu0 %v7618_v11  ;;  %v2248_v9 = vld [vmem:[%s10335_s18 + $0x3538] sm:$0xff]  ;;  %v7636_v11 = vpack.c.bf16 %v2237_v4, %v2233_v2  ;;  %v2273_v2 = vld [vmem:[%s10335_s18 + $0x3600] sm:$0xff] }
 0x43f   : > { %8643 = vmatprep.subr.bf16.mxu1 %v8642_v18  ;;  %v2245_v18 = vld [vmem:[%s10335_s18 + $0x3520] sm:$0xff]  ;;  %v8662_v20 = vpack.c.bf16 %v2248_v9, %v2244_v31  ;;  %v2284_v31 = vld [vmem:[%s10335_s18 + $0x3658] sm:$0xff] }
 0x440   : > { %v2277_v4 = vld [vmem:[%s10335_s18 + $0x3620] sm:$0xff]  ;;  %v2288_v9 = vld [vmem:[%s10335_s18 + $0x3678] sm:$0xff] }
 0x441   : > { %7621 = vmatpush1.bf16.msra.mxu0 %v7620_v43  ;;  %v2256_v43 = vld [vmem:[%s10335_s18 + $0x3578] sm:$0xff] }
 0x442   : > { %8645 = vmatpush1.bf16.msra.mxu1 %v8644_v24  ;;  %7623 = vmatprep.subr.bf16.mxu0 %v7622_v0  ;;  %v7640_v24 = vpack.c.bf16 %v2245_v18, %v2241_v16  ;;  %v8664_v0 = vpack.c.bf16 %v2247_v21, %v2243_v19  ;;  %v8666_v5 = vpack.c.bf16 %v2256_v43, %v2252_v23  ;;  %v2281_v16 = vld [vmem:[%s10335_s18 + $0x3640] sm:$0xff]  ;;  %v2283_v19 = vld [vmem:[%s10335_s18 + $0x3650] sm:$0xff]  ;;  %v2292_v23 = vld [vmem:[%s10335_s18 + $0x3698] sm:$0xff] }
 0x443   : > { %8647 = vmatprep.subr.bf16.mxu1 %v8646_v28  ;;  %v2251_v28 = vld [vmem:[%s10335_s18 + $0x3550] sm:$0xff]  ;;  %v2285_v18 = vld [vmem:[%s10335_s18 + $0x3660] sm:$0xff]  ;;  %v2296_v43 = vld [vmem:[%s10335_s18 + $0x36b8] sm:$0xff] }
 0x444   : > { %3686 = vmatmul.mubr.f32.vlgmr.msra.gmra.mrb[0].mxu0 %v12034_v17  ;;  %v2287_v21 = vld [vmem:[%s10335_s18 + $0x3670] sm:$0xff] }
 0x445   : > { %7625 = vmatpush1.bf16.msra.mxu0 %v7624_v59  ;;  %4822 = vmatmul.mubr.f32.vlgmr.msra.gmra.mrb[0].mxu1 %v12034_v17  ;;  %v2236_v17 = vld [vmem:[%s10335_s18 + $0x34d8] sm:$0xff] }
 0x446   : > { %8649 = vmatpush1.bf16.msra.mxu1 %v8648_v38  ;;  %7627 = vmatprep.subr.bf16.mxu0 %v7626_v39  ;;  %v8658_v6 = vpack.c.bf16 %v2240_v58, %v2236_v17  ;;  %v2264_v59 = vld [vmem:[%s10335_s18 + $0x35b8] sm:$0xff]  ;;  %v7644_v38 = vpack.c.bf16 %v2253_v3, %v2249_v25  ;;  %v8668_v39 = vpack.c.bf16 %v2255_v30, %v2251_v28  ;;  %v2289_v25 = vld [vmem:[%s10335_s18 + $0x3680] sm:$0xff]  ;;  %v2291_v28 = vld [vmem:[%s10335_s18 + $0x3690] sm:$0xff] }
 0x447   : > { %8651 = vmatprep.subr.bf16.mxu1 %v8650_v1  ;;  %3756 = vmatprep.mubr.f32.mxu0 %v2719_v48  ;;  %v2259_v1 = vld [vmem:[%s10335_s18 + $0x3590] sm:$0xff]  ;;  %v8670_v42 = vpack.c.bf16 %v2264_v59, %v2260_v37  ;;  %v2276_v17 = vld [vmem:[%s10335_s18 + $0x3618] sm:$0xff]  ;;  %v2293_v3 = vld [vmem:[%s10335_s18 + $0x36a0] sm:$0xff] }
 0x448   : > { %4892 = vmatprep.mubr.f32.mxu1 %v2719_v48  ;;  %v2270_v48 = vld [vmem:[%s10335_s18 + $0x35e8] sm:$0xff]  ;;  %v2280_v58 = vld [vmem:[%s10335_s18 + $0x3638] sm:$0xff]  ;;  %v2295_v30 = vld [vmem:[%s10335_s18 + $0x36b0] sm:$0xff] }
 0x449   : > { %7629 = vmatpush1.bf16.msra.mxu0 %v7628_v53  ;;  %v7648_v53 = vpack.c.bf16 %v2261_v41, %v2257_v40  ;;  %v2300_v37 = vld [vmem:[%s10335_s18 + $0x36d8] sm:$0xff]  ;;  %v2297_v40 = vld [vmem:[%s10335_s18 + $0x36c0] sm:$0xff] }
 0x44a   : > { %8653 = vmatpush1.bf16.msra.mxu1 %v8652_v26  ;;  %7631 = vmatprep.subr.bf16.mxu0 %v7630_v54  ;;  %v8672_v26 = vpack.c.bf16 %v2263_v45, %v2259_v1  ;;  %v7650_v54 = vpack.c.bf16 %v2270_v48, %v2266_v46  ;;  %v2304_v59 = vld [vmem:[%s10335_s18 + $0x36f8] sm:$0xff]  ;;  %v2301_v41 = vld [vmem:[%s10335_s18 + $0x36e0] sm:$0xff]  ;;  %v2299_v1 = vld [vmem:[%s10335_s18 + $0x36d0] sm:$0xff] }
 0x44b   : > { %8655 = vmatprep.subr.bf16.mxu1 %v8654_v44  ;;  %v8674_v44 = vpack.c.bf16 %v2272_v52, %v2268_v50  ;;  %v2303_v45 = vld [vmem:[%s10335_s18 + $0x36f0] sm:$0xff]  ;;  %v2306_v46 = vld [vmem:[%s10335_s18 + $0x3708] sm:$0xff]  ;;  %v2308_v50 = vld [vmem:[%s10335_s18 + $0x3718] sm:$0xff] }
 0x44c   : > { %v2310_v48 = vld [vmem:[%s10335_s18 + $0x3728] sm:$0xff]  ;;  %v2312_v52 = vld [vmem:[%s10335_s18 + $0x3738] sm:$0xff] }
 0x44d   : > { %7633 = vmatpush1.bf16.msra.mxu0 %v7632_v36  ;;  %v7652_v36 = vpack.c.bf16 %v2269_v10, %v2265_v55  ;;  %v2305_v55 = vld [vmem:[%s10335_s18 + $0x3700] sm:$0xff] }
 0x44e   : > { %8657 = vmatpush1.bf16.msra.mxu1 %v8656_v60  ;;  %7635 = vmatprep.subr.bf16.mxu0 %v7634_v62  ;;  %v8676_v60 = vpack.c.bf16 %v2271_v14, %v2267_v56  ;;  %v7654_v62 = vpack.c.bf16 %v2278_v33, %v2274_v57  ;;  %v2309_v10 = vld [vmem:[%s10335_s18 + $0x3720] sm:$0xff]  ;;  %v2307_v56 = vld [vmem:[%s10335_s18 + $0x3710] sm:$0xff]  ;;  %v2314_v57 = vld [vmem:[%s10335_s18 + $0x3748] sm:$0xff] }
 0x44f   : > { %8659 = vmatprep.subr.bf16.mxu1 %v8658_v6  ;;  %v8678_v6 = vpack.c.bf16 %v2280_v58, %v2276_v17  ;;  %v2311_v14 = vld [vmem:[%s10335_s18 + $0x3730] sm:$0xff]  ;;  %v2318_v33 = vld [vmem:[%s10335_s18 + $0x3768] sm:$0xff]  ;;  %v2316_v17 = vld [vmem:[%s10335_s18 + $0x3758] sm:$0xff] }
 0x450   : > { %v2320_v58 = vld [vmem:[%s10335_s18 + $0x3778] sm:$0xff] }
 0x451   : > { %7637 = vmatpush1.bf16.msra.mxu0 %v7636_v11  ;;  %v7656_v11 = vpack.c.bf16 %v2277_v4, %v2273_v2  ;;  %v2313_v2 = vld [vmem:[%s10335_s18 + $0x3740] sm:$0xff] }
 0x452   : > { %8661 = vmatpush1.bf16.msra.mxu1 %v8660_v13  ;;  %7639 = vmatprep.subr.bf16.mxu0 %v7638_v15  ;;  %v8680_v13 = vpack.c.bf16 %v2279_v29, %v2275_v27  ;;  %v7658_v15 = vpack.c.bf16 %v2286_v8, %v2282_v7  ;;  %v2317_v4 = vld [vmem:[%s10335_s18 + $0x3760] sm:$0xff]  ;;  %v2315_v27 = vld [vmem:[%s10335_s18 + $0x3750] sm:$0xff]  ;;  %v2322_v7 = vld [vmem:[%s10335_s18 + $0x3788] sm:$0xff] }
 0x453   : > { %8663 = vmatprep.subr.bf16.mxu1 %v8662_v20  ;;  %v8682_v20 = vpack.c.bf16 %v2288_v9, %v2284_v31  ;;  %v2319_v29 = vld [vmem:[%s10335_s18 + $0x3770] sm:$0xff]  ;;  %v2326_v8 = vld [vmem:[%s10335_s18 + $0x37a8] sm:$0xff]  ;;  %v2324_v31 = vld [vmem:[%s10335_s18 + $0x3798] sm:$0xff] }
 0x454   : > { %v2328_v9 = vld [vmem:[%s10335_s18 + $0x37b8] sm:$0xff] }
 0x455   : > { %7641 = vmatpush1.bf16.msra.mxu0 %v7640_v24  ;;  %v7660_v24 = vpack.c.bf16 %v2285_v18, %v2281_v16  ;;  %v2321_v16 = vld [vmem:[%s10335_s18 + $0x3780] sm:$0xff] }
 0x456   : > { %8665 = vmatpush1.bf16.msra.mxu1 %v8664_v0  ;;  %7643 = vmatprep.subr.bf16.mxu0 %v7642_v47  ;;  %v8684_v0 = vpack.c.bf16 %v2287_v21, %v2283_v19  ;;  %v7662_v47 = vpack.c.bf16 %v2294_v22, %v2290_v51  ;;  %v2325_v18 = vld [vmem:[%s10335_s18 + $0x37a0] sm:$0xff]  ;;  %v2323_v19 = vld [vmem:[%s10335_s18 + $0x3790] sm:$0xff]  ;;  %v2330_v51 = vld [vmem:[%s10335_s18 + $0x37c8] sm:$0xff] }
 0x457   : > { %8667 = vmatprep.subr.bf16.mxu1 %v8666_v5  ;;  %v8686_v5 = vpack.c.bf16 %v2296_v43, %v2292_v23  ;;  %v2327_v21 = vld [vmem:[%s10335_s18 + $0x37b0] sm:$0xff]  ;;  %v2334_v22 = vld [vmem:[%s10335_s18 + $0x37e8] sm:$0xff]  ;;  %v2332_v23 = vld [vmem:[%s10335_s18 + $0x37d8] sm:$0xff] }
 0x458   : > { %v2336_v43 = vld [vmem:[%s10335_s18 + $0x37f8] sm:$0xff] }
 0x459   : > { %7645 = vmatpush1.bf16.msra.mxu0 %v7644_v38  ;;  %v7664_v38 = vpack.c.bf16 %v2293_v3, %v2289_v25  ;;  %v2329_v25 = vld [vmem:[%s10335_s18 + $0x37c0] sm:$0xff] }
 0x45a   : > { %8669 = vmatpush1.bf16.msra.mxu1 %v8668_v39  ;;  %7647 = vmatprep.subr.bf16.mxu0 %v7646_v61  ;;  %v8688_v39 = vpack.c.bf16 %v2295_v30, %v2291_v28  ;;  %v7666_v61 = vpack.c.bf16 %v2302_v35, %v2298_v32  ;;  %v2333_v3 = vld [vmem:[%s10335_s18 + $0x37e0] sm:$0xff]  ;;  %v2331_v28 = vld [vmem:[%s10335_s18 + $0x37d0] sm:$0xff]  ;;  %v2338_v32 = vld [vmem:[%s10335_s18 + $0x3808] sm:$0xff] }
 0x45b   : > { %8671 = vmatprep.subr.bf16.mxu1 %v8670_v42  ;;  %v8690_v42 = vpack.c.bf16 %v2304_v59, %v2300_v37  ;;  %v2335_v30 = vld [vmem:[%s10335_s18 + $0x37f0] sm:$0xff]  ;;  %v2342_v35 = vld [vmem:[%s10335_s18 + $0x3828] sm:$0xff]  ;;  %v2340_v37 = vld [vmem:[%s10335_s18 + $0x3818] sm:$0xff] }
 0x45c   : > { %v2344_v59 = vld [vmem:[%s10335_s18 + $0x3838] sm:$0xff] }
 0x45d   : > { %7649 = vmatpush1.bf16.msra.mxu0 %v7648_v53  ;;  %v7668_v53 = vpack.c.bf16 %v2301_v41, %v2297_v40  ;;  %v7686_v40 = vpack.c.bf16 %v2342_v35, %v2338_v32  ;;  %v2337_v41 = vld [vmem:[%s10335_s18 + $0x3800] sm:$0xff]  ;;  %v2375_v35 = vld [vmem:[%s10335_s18 + $0x3930] sm:$0xff] }
 0x45e   : > { %8673 = vmatpush1.bf16.msra.mxu1 %v8672_v26  ;;  %7651 = vmatprep.subr.bf16.mxu0 %v7650_v54  ;;  %v8692_v26 = vpack.c.bf16 %v2303_v45, %v2299_v1  ;;  %v7670_v54 = vpack.c.bf16 %v2310_v48, %v2306_v46  ;;  %v2341_v1 = vld [vmem:[%s10335_s18 + $0x3820] sm:$0xff]  ;;  %v8710_v45 = vpack.c.bf16 %v2344_v59, %v2340_v37  ;;  %v2343_v46 = vld [vmem:[%s10335_s18 + $0x3830] sm:$0xff]  ;;  %v2346_v48 = vld [vmem:[%s10335_s18 + $0x3848] sm:$0xff] }
 0x45f   : > { %8675 = vmatprep.subr.bf16.mxu1 %v8674_v44  ;;  %v8694_v44 = vpack.c.bf16 %v2312_v52, %v2308_v50  ;;  %v2350_v50 = vld [vmem:[%s10335_s18 + $0x3868] sm:$0xff] }
 0x460   : > { %v2378_v37 = vld [vmem:[%s10335_s18 + $0x3948] sm:$0xff] }
 0x461   : > { %7653 = vmatpush1.bf16.msra.mxu0 %v7652_v36  ;;  %v7672_v36 = vpack.c.bf16 %v2309_v10, %v2305_v55  ;;  %v7690_v10 = vpack.c.bf16 %v2350_v50, %v2346_v48  ;;  %v2382_v59 = vld [vmem:[%s10335_s18 + $0x3968] sm:$0xff]  ;;  %v2383_v50 = vld [vmem:[%s10335_s18 + $0x3970] sm:$0xff] }
 0x462   : > { %8677 = vmatpush1.bf16.msra.mxu1 %v8676_v60  ;;  %7655 = vmatprep.subr.bf16.mxu0 %v7654_v62  ;;  %v8696_v60 = vpack.c.bf16 %v2311_v14, %v2307_v56  ;;  %v7674_v62 = vpack.c.bf16 %v2318_v33, %v2314_v57  ;;  %v2345_v56 = vld [vmem:[%s10335_s18 + $0x3840] sm:$0xff]  ;;  %v2347_v14 = vld [vmem:[%s10335_s18 + $0x3850] sm:$0xff] }
 0x463   : > { %8679 = vmatprep.subr.bf16.mxu1 %v8678_v6  ;;  %v8698_v6 = vpack.c.bf16 %v2320_v58, %v2316_v17  ;;  %v2351_v33 = vld [vmem:[%s10335_s18 + $0x3870] sm:$0xff]  ;;  %v2354_v17 = vld [vmem:[%s10335_s18 + $0x3888] sm:$0xff] }
 0x464   : > { %v2358_v58 = vld [vmem:[%s10335_s18 + $0x38a8] sm:$0xff] }
 0x465   : > { %7657 = vmatpush1.bf16.msra.mxu0 %v7656_v11  ;;  %v7676_v11 = vpack.c.bf16 %v2317_v4, %v2313_v2  ;;  %v8716_v4 = vpack.c.bf16 %v2351_v33, %v2347_v14  ;;  %v2385_v14 = vld [vmem:[%s10335_s18 + $0x3980] sm:$0xff]  ;;  %v2387_v33 = vld [vmem:[%s10335_s18 + $0x3990] sm:$0xff] }
 0x466   : > { %8681 = vmatpush1.bf16.msra.mxu1 %v8680_v13  ;;  %7659 = vmatprep.subr.bf16.mxu0 %v7658_v15  ;;  %v8700_v13 = vpack.c.bf16 %v2319_v29, %v2315_v27  ;;  %v7678_v15 = vpack.c.bf16 %v2326_v8, %v2322_v7  ;;  %v7694_v27 = vpack.c.bf16 %v2358_v58, %v2354_v17  ;;  %v2357_v29 = vld [vmem:[%s10335_s18 + $0x38a0] sm:$0xff]  ;;  %v2355_v7 = vld [vmem:[%s10335_s18 + $0x3890] sm:$0xff] }
 0x467   : > { %8683 = vmatprep.subr.bf16.mxu1 %v8682_v20  ;;  %v8702_v20 = vpack.c.bf16 %v2328_v9, %v2324_v31  ;;  %v2359_v31 = vld [vmem:[%s10335_s18 + $0x38b0] sm:$0xff]  ;;  %v2362_v9 = vld [vmem:[%s10335_s18 + $0x38c8] sm:$0xff] }
 0x468   : > { %v2391_v58 = vld [vmem:[%s10335_s18 + $0x39b0] sm:$0xff] }
 0x469   : > { %7661 = vmatpush1.bf16.msra.mxu0 %v7660_v24  ;;  %v7680_v24 = vpack.c.bf16 %v2325_v18, %v2321_v16  ;;  %v8720_v16 = vpack.c.bf16 %v2359_v31, %v2355_v7  ;;  %v2397_v7 = vld [vmem:[%s10335_s18 + $0x39e0] sm:$0xff] }
 0x46a   : > { %8685 = vmatpush1.bf16.msra.mxu1 %v8684_v0  ;;  %7663 = vmatprep.subr.bf16.mxu0 %v7662_v47  ;;  %v8704_v0 = vpack.c.bf16 %v2327_v21, %v2323_v19  ;;  %v7682_v47 = vpack.c.bf16 %v2334_v22, %v2330_v51  ;;  %v2361_v19 = vld [vmem:[%s10335_s18 + $0x38c0] sm:$0xff]  ;;  %v2363_v21 = vld [vmem:[%s10335_s18 + $0x38d0] sm:$0xff] }
 0x46b   : > { %8687 = vmatprep.subr.bf16.mxu1 %v8686_v5  ;;  %v8706_v5 = vpack.c.bf16 %v2336_v43, %v2332_v23  ;;  %v2367_v22 = vld [vmem:[%s10335_s18 + $0x38f0] sm:$0xff]  ;;  %v2370_v23 = vld [vmem:[%s10335_s18 + $0x3908] sm:$0xff] }
 0x46c   : > { %v2374_v43 = vld [vmem:[%s10335_s18 + $0x3928] sm:$0xff] }
 0x46d   : > { %7665 = vmatpush1.bf16.msra.mxu0 %v7664_v38  ;;  %v12300_v38 = vld [vmem:[%s10328_s24 + $0x38] sm:$0xff] }
 0x46e   : > { %8689 = vmatpush1.bf16.msra.mxu1 %v8688_v39  ;;  %7667 = vmatprep.subr.bf16.mxu0 %v7666_v61  ;;  %v7684_v39 = vpack.c.bf16 %v2333_v3, %v2329_v25  ;;  %v8708_v61 = vpack.c.bf16 %v2335_v30, %v2331_v28  ;;  %v12310_v52 = vrot.slane %v12300_v38, %v10455_v12  ;;  %v2369_v28 = vld [vmem:[%s10335_s18 + $0x3900] sm:$0xff]  ;;  %v2371_v30 = vld [vmem:[%s10335_s18 + $0x3910] sm:$0xff] }
 0x46f   : > { %8691 = vmatprep.subr.bf16.mxu1 %v8690_v42  ;;  %v2339_v42 = vld [vmem:[%s10335_s18 + $0x3810] sm:$0xff]  ;;  %v8724_v25 = vpack.c.bf16 %v2367_v22, %v2363_v21  ;;  %v7702_v3 = vpack.c.bf16 %v2374_v43, %v2370_v23  ;;  %v2405_v21 = vld [vmem:[%s10335_s18 + $0x3a20] sm:$0xff]  ;;  %v2410_v43 = vld [vmem:[%s10335_s18 + $0x3a48] sm:$0xff] }
 0x470   : > { %v8712_v55 = vpack.c.bf16 %v2343_v46, %v2339_v42  ;;  %v2377_v42 = vld [vmem:[%s10335_s18 + $0x3940] sm:$0xff]  ;;  %v2379_v46 = vld [vmem:[%s10335_s18 + $0x3950] sm:$0xff] }
 0x471   : > { %7669 = vmatpush1.bf16.msra.mxu0 %v7668_v53  ;;  %v2348_v53 = vld [vmem:[%s10335_s18 + $0x3858] sm:$0xff]  ;;  %v2407_v23 = vld [vmem:[%s10335_s18 + $0x3a30] sm:$0xff] }
 0x472   : > { %8693 = vmatpush1.bf16.msra.mxu1 %v8692_v26  ;;  %7671 = vmatprep.subr.bf16.mxu0 %v7670_v54  ;;  %v2352_v26 = vld [vmem:[%s10335_s18 + $0x3878] sm:$0xff]  ;;  %v7688_v54 = vpack.c.bf16 %v2341_v1, %v2337_v41  ;;  %v8728_v41 = vpack.c.bf16 %v2375_v35, %v2371_v30  ;;  %v7706_v1 = vpack.c.bf16 %v2382_v59, %v2378_v37  ;;  %v2413_v30 = vld [vmem:[%s10335_s18 + $0x3a60] sm:$0xff]  ;;  %v2415_v37 = vld [vmem:[%s10335_s18 + $0x3a70] sm:$0xff] }
 0x473   : > { %8695 = vmatprep.subr.bf16.mxu1 %v8694_v44  ;;  %v2349_v44 = vld [vmem:[%s10335_s18 + $0x3860] sm:$0xff]  ;;  %v8714_v57 = vpack.c.bf16 %v2352_v26, %v2348_v53  ;;  %v2386_v53 = vld [vmem:[%s10335_s18 + $0x3988] sm:$0xff] }
 0x474   : > { %v7692_v2 = vpack.c.bf16 %v2349_v44, %v2345_v56  ;;  %v2390_v26 = vld [vmem:[%s10335_s18 + $0x39a8] sm:$0xff]  ;;  %v8732_v56 = vpack.c.bf16 %v2383_v50, %v2379_v46  ;;  %v2421_v46 = vld [vmem:[%s10335_s18 + $0x3aa0] sm:$0xff] }
 0x475   : > { %7673 = vmatpush1.bf16.msra.mxu0 %v7672_v36  ;;  %v2735_v36 = vcombine.high %v12310_v52, %v12310_v52  ;;  %v7710_v44 = vpack.c.bf16 %v2390_v26, %v2386_v53  ;;  %v2418_v59 = vld [vmem:[%s10335_s18 + $0x3a88] sm:$0xff]  ;;  %v2423_v53 = vld [vmem:[%s10335_s18 + $0x3ab0] sm:$0xff] }
 0x476   : > { %8697 = vmatpush1.bf16.msra.mxu1 %v8696_v60  ;;  %7675 = vmatprep.subr.bf16.mxu0 %v7674_v62  ;;  %v2356_v60 = vld [vmem:[%s10335_s18 + $0x3898] sm:$0xff]  ;;  %v2426_v26 = vld [vmem:[%s10335_s18 + $0x3ac8] sm:$0xff] }
 0x477   : > { %8699 = vmatprep.subr.bf16.mxu1 %v8698_v6  ;;  %v2360_v62 = vld [vmem:[%s10335_s18 + $0x38b8] sm:$0xff]  ;;  %v2353_v6 = vld [vmem:[%s10335_s18 + $0x3880] sm:$0xff] }
 0x478   : > { %v8718_v8 = vpack.c.bf16 %v2360_v62, %v2356_v60  ;;  %v2398_v60 = vld [vmem:[%s10335_s18 + $0x39e8] sm:$0xff]  ;;  %v2396_v62 = vld [vmem:[%s10335_s18 + $0x39d8] sm:$0xff] }
 0x479   : > { %7677 = vmatpush1.bf16.msra.mxu0 %v7676_v11  ;;  %v2366_v11 = vld [vmem:[%s10335_s18 + $0x38e8] sm:$0xff] }
 0x47a   : > { %8701 = vmatpush1.bf16.msra.mxu1 %v8700_v13  ;;  %7679 = vmatprep.subr.bf16.mxu0 %v7678_v15  ;;  %v2368_v13 = vld [vmem:[%s10335_s18 + $0x38f8] sm:$0xff]  ;;  %v7696_v15 = vpack.c.bf16 %v2357_v29, %v2353_v6  ;;  %v7698_v18 = vpack.c.bf16 %v2366_v11, %v2362_v9  ;;  %v2393_v29 = vld [vmem:[%s10335_s18 + $0x39c0] sm:$0xff]  ;;  %v2399_v9 = vld [vmem:[%s10335_s18 + $0x39f0] sm:$0xff] }
 0x47b   : > { %8703 = vmatprep.subr.bf16.mxu1 %v8702_v20  ;;  %v2365_v20 = vld [vmem:[%s10335_s18 + $0x38e0] sm:$0xff]  ;;  %v2402_v11 = vld [vmem:[%s10335_s18 + $0x3a08] sm:$0xff] }
 0x47d   : > { %7681 = vmatpush1.bf16.msra.mxu0 %v7680_v24  ;;  %v2372_v24 = vld [vmem:[%s10335_s18 + $0x3918] sm:$0xff] }
 0x47e   : > { %8705 = vmatpush1.bf16.msra.mxu1 %v8704_v0  ;;  %7683 = vmatprep.subr.bf16.mxu0 %v7682_v47  ;;  %v2376_v0 = vld [vmem:[%s10335_s18 + $0x3938] sm:$0xff]  ;;  %v7700_v47 = vpack.c.bf16 %v2365_v20, %v2361_v19  ;;  %v2401_v20 = vld [vmem:[%s10335_s18 + $0x3a00] sm:$0xff] }
 0x47f   : > { %8707 = vmatprep.subr.bf16.mxu1 %v8706_v5  ;;  %v2373_v5 = vld [vmem:[%s10335_s18 + $0x3920] sm:$0xff]  ;;  %v8726_v32 = vpack.c.bf16 %v2376_v0, %v2372_v24  ;;  %v2414_v24 = vld [vmem:[%s10335_s18 + $0x3a68] sm:$0xff]  ;;  %v2412_v0 = vld [vmem:[%s10335_s18 + $0x3a58] sm:$0xff] }
 0x481   : > { %7685 = vmatpush1.bf16.msra.mxu0 %v7684_v39  ;;  %v2380_v39 = vld [vmem:[%s10335_s18 + $0x3958] sm:$0xff] }
 0x482   : > { %8709 = vmatpush1.bf16.msra.mxu1 %v8708_v61  ;;  %7687 = vmatprep.subr.bf16.mxu0 %v7686_v40  ;;  %v2384_v61 = vld [vmem:[%s10335_s18 + $0x3978] sm:$0xff]  ;;  %v7704_v40 = vpack.c.bf16 %v2373_v5, %v2369_v28  ;;  %v7722_v28 = vpack.c.bf16 %v2414_v24, %v2410_v43  ;;  %v2409_v5 = vld [vmem:[%s10335_s18 + $0x3a40] sm:$0xff]  ;;  %v2447_v43 = vld [vmem:[%s10335_s18 + $0x3b70] sm:$0xff] }
 0x483   : > { %8711 = vmatprep.subr.bf16.mxu1 %v8710_v45  ;;  %v2381_v45 = vld [vmem:[%s10335_s18 + $0x3960] sm:$0xff]  ;;  %v8730_v48 = vpack.c.bf16 %v2384_v61, %v2380_v39  ;;  %v2422_v39 = vld [vmem:[%s10335_s18 + $0x3aa8] sm:$0xff]  ;;  %v2420_v61 = vld [vmem:[%s10335_s18 + $0x3a98] sm:$0xff] }
 0x484   : > { %3757 = vmatmul.mubr.f32.vlgmr.msra.gmra.mrb[0].mxu0 %v12171_v34  ;;  %v2450_v24 = vld [vmem:[%s10335_s18 + $0x3b88] sm:$0xff] }
 0x485   : > { %7689 = vmatpush1.bf16.msra.mxu0 %v7688_v54  ;;  %4893 = vmatmul.mubr.f32.vlgmr.msra.gmra.mrb[0].mxu1 %v12171_v34  ;;  %v2364_v34 = vld [vmem:[%s10335_s18 + $0x38d8] sm:$0xff] }
 0x486   : > { %8713 = vmatpush1.bf16.msra.mxu1 %v8712_v55  ;;  %7691 = vmatprep.subr.bf16.mxu0 %v7690_v10  ;;  %v8722_v51 = vpack.c.bf16 %v2368_v13, %v2364_v34  ;;  %v2388_v54 = vld [vmem:[%s10335_s18 + $0x3998] sm:$0xff]  ;;  %v7708_v10 = vpack.c.bf16 %v2381_v45, %v2377_v42  ;;  %v2406_v34 = vld [vmem:[%s10335_s18 + $0x3a28] sm:$0xff]  ;;  %v7726_v42 = vpack.c.bf16 %v2422_v39, %v2418_v59  ;;  %v2417_v45 = vld [vmem:[%s10335_s18 + $0x3a80] sm:$0xff] }
 0x487   : > { %8715 = vmatprep.subr.bf16.mxu1 %v8714_v57  ;;  %3827 = vmatprep.mubr.f32.mxu0 %v2735_v36  ;;  %v2392_v55 = vld [vmem:[%s10335_s18 + $0x39b8] sm:$0xff]  ;;  %v2389_v57 = vld [vmem:[%s10335_s18 + $0x39a0] sm:$0xff]  ;;  %v7718_v19 = vpack.c.bf16 %v2406_v34, %v2402_v11  ;;  %v2439_v11 = vld [vmem:[%s10335_s18 + $0x3b30] sm:$0xff] }
 0x488   : > { %4963 = vmatprep.mubr.f32.mxu1 %v2735_v36  ;;  %v8734_v17 = vpack.c.bf16 %v2392_v55, %v2388_v54  ;;  %v2394_v36 = vld [vmem:[%s10335_s18 + $0x39c8] sm:$0xff]  ;;  %v2404_v13 = vld [vmem:[%s10335_s18 + $0x3a18] sm:$0xff]  ;;  %v2455_v59 = vld [vmem:[%s10335_s18 + $0x3bb0] sm:$0xff] }
 0x489   : > { %7693 = vmatpush1.bf16.msra.mxu0 %v7692_v2  ;;  %v2400_v2 = vld [vmem:[%s10335_s18 + $0x39f8] sm:$0xff]  ;;  %v7714_v6 = vpack.c.bf16 %v2398_v60, %v2394_v36  ;;  %v2430_v54 = vld [vmem:[%s10335_s18 + $0x3ae8] sm:$0xff]  ;;  %v2431_v36 = vld [vmem:[%s10335_s18 + $0x3af0] sm:$0xff] }
 0x48a   : > { %8717 = vmatpush1.bf16.msra.mxu1 %v8716_v4  ;;  %7695 = vmatprep.subr.bf16.mxu0 %v7694_v27  ;;  %v7712_v4 = vpack.c.bf16 %v2389_v57, %v2385_v14  ;;  %v8736_v27 = vpack.c.bf16 %v2391_v58, %v2387_v33  ;;  %v8738_v31 = vpack.c.bf16 %v2400_v2, %v2396_v62  ;;  %v2428_v55 = vld [vmem:[%s10335_s18 + $0x3ad8] sm:$0xff]  ;;  %v2425_v57 = vld [vmem:[%s10335_s18 + $0x3ac0] sm:$0xff]  ;;  %v2434_v60 = vld [vmem:[%s10335_s18 + $0x3b08] sm:$0xff] }
 0x48b   : > { %8719 = vmatprep.subr.bf16.mxu1 %v8718_v8  ;;  %v2395_v8 = vld [vmem:[%s10335_s18 + $0x39d0] sm:$0xff]  ;;  %v7730_v14 = vpack.c.bf16 %v2430_v54, %v2426_v26  ;;  %v2429_v33 = vld [vmem:[%s10335_s18 + $0x3ae0] sm:$0xff]  ;;  %v2438_v62 = vld [vmem:[%s10335_s18 + $0x3b28] sm:$0xff] }
 0x48c   : > { %v2436_v2 = vld [vmem:[%s10335_s18 + $0x3b18] sm:$0xff]  ;;  %v2442_v34 = vld [vmem:[%s10335_s18 + $0x3b48] sm:$0xff]  ;;  %v2463_v26 = vld [vmem:[%s10335_s18 + $0x3bf0] sm:$0xff] }
 0x48d   : > { %7697 = vmatpush1.bf16.msra.mxu0 %v7696_v15  ;;  %v2408_v15 = vld [vmem:[%s10335_s18 + $0x3a38] sm:$0xff]  ;;  %v2458_v39 = vld [vmem:[%s10335_s18 + $0x3bc8] sm:$0xff] }
 0x48e   : > { %8721 = vmatpush1.bf16.msra.mxu1 %v8720_v16  ;;  %7699 = vmatprep.subr.bf16.mxu0 %v7698_v18  ;;  %v7716_v16 = vpack.c.bf16 %v2397_v7, %v2393_v29  ;;  %v8740_v18 = vpack.c.bf16 %v2399_v9, %v2395_v8  ;;  %v8742_v22 = vpack.c.bf16 %v2408_v15, %v2404_v13  ;;  %v2433_v7 = vld [vmem:[%s10335_s18 + $0x3b00] sm:$0xff]  ;;  %v2446_v13 = vld [vmem:[%s10335_s18 + $0x3b68] sm:$0xff]  ;;  %v2444_v15 = vld [vmem:[%s10335_s18 + $0x3b58] sm:$0xff] }
 0x48f   : > { %8723 = vmatprep.subr.bf16.mxu1 %v8722_v51  ;;  %v2403_v51 = vld [vmem:[%s10335_s18 + $0x3a10] sm:$0xff]  ;;  %v7734_v29 = vpack.c.bf16 %v2438_v62, %v2434_v60  ;;  %v2437_v8 = vld [vmem:[%s10335_s18 + $0x3b20] sm:$0xff]  ;;  %v2466_v54 = vld [vmem:[%s10335_s18 + $0x3c08] sm:$0xff] }
 0x490   : > { %v2474_v62 = vld [vmem:[%s10335_s18 + $0x3c48] sm:$0xff] }
 0x491   : > { %7701 = vmatpush1.bf16.msra.mxu0 %v7700_v47  ;;  %v2416_v47 = vld [vmem:[%s10335_s18 + $0x3a78] sm:$0xff] }
 0x492   : > { %8725 = vmatpush1.bf16.msra.mxu1 %v8724_v25  ;;  %7703 = vmatprep.subr.bf16.mxu0 %v7702_v3  ;;  %v7720_v25 = vpack.c.bf16 %v2405_v21, %v2401_v20  ;;  %v8744_v3 = vpack.c.bf16 %v2407_v23, %v2403_v51  ;;  %v8746_v35 = vpack.c.bf16 %v2416_v47, %v2412_v0  ;;  %v2441_v21 = vld [vmem:[%s10335_s18 + $0x3b40] sm:$0xff]  ;;  %v2454_v0 = vld [vmem:[%s10335_s18 + $0x3ba8] sm:$0xff]  ;;  %v2452_v47 = vld [vmem:[%s10335_s18 + $0x3b98] sm:$0xff] }
 0x493   : > { %8727 = vmatprep.subr.bf16.mxu1 %v8726_v32  ;;  %v2411_v32 = vld [vmem:[%s10335_s18 + $0x3a50] sm:$0xff]  ;;  %v7738_v20 = vpack.c.bf16 %v2446_v13, %v2442_v34  ;;  %v2445_v51 = vld [vmem:[%s10335_s18 + $0x3b60] sm:$0xff] }
 0x494   : > { %v2479_v13 = vld [vmem:[%s10335_s18 + $0x3c70] sm:$0xff] }
 0x495   : > { %7705 = vmatpush1.bf16.msra.mxu0 %v7704_v40  ;;  %v2424_v40 = vld [vmem:[%s10335_s18 + $0x3ab8] sm:$0xff] }
 0x496   : > { %8729 = vmatpush1.bf16.msra.mxu1 %v8728_v41  ;;  %7707 = vmatprep.subr.bf16.mxu0 %v7706_v1  ;;  %v7724_v41 = vpack.c.bf16 %v2413_v30, %v2409_v5  ;;  %v8748_v1 = vpack.c.bf16 %v2415_v37, %v2411_v32  ;;  %v8750_v50 = vpack.c.bf16 %v2424_v40, %v2420_v61  ;;  %v2449_v30 = vld [vmem:[%s10335_s18 + $0x3b80] sm:$0xff]  ;;  %v2462_v61 = vld [vmem:[%s10335_s18 + $0x3be8] sm:$0xff]  ;;  %v2460_v40 = vld [vmem:[%s10335_s18 + $0x3bd8] sm:$0xff] }
 0x497   : > { %8731 = vmatprep.subr.bf16.mxu1 %v8730_v48  ;;  %v2419_v48 = vld [vmem:[%s10335_s18 + $0x3a90] sm:$0xff]  ;;  %v7742_v5 = vpack.c.bf16 %v2454_v0, %v2450_v24  ;;  %v2453_v32 = vld [vmem:[%s10335_s18 + $0x3ba0] sm:$0xff] }
 0x498   : > { %v2483_v24 = vld [vmem:[%s10335_s18 + $0x3c90] sm:$0xff] }
 0x499   : > { %7709 = vmatpush1.bf16.msra.mxu0 %v7708_v10  ;;  %v2432_v10 = vld [vmem:[%s10335_s18 + $0x3af8] sm:$0xff] }
 0x49a   : > { %8733 = vmatpush1.bf16.msra.mxu1 %v8732_v56  ;;  %7711 = vmatprep.subr.bf16.mxu0 %v7710_v44  ;;  %v7728_v56 = vpack.c.bf16 %v2421_v46, %v2417_v45  ;;  %v8752_v44 = vpack.c.bf16 %v2423_v53, %v2419_v48  ;;  %v8754_v58 = vpack.c.bf16 %v2432_v10, %v2428_v55  ;;  %v2457_v46 = vld [vmem:[%s10335_s18 + $0x3bc0] sm:$0xff]  ;;  %v2470_v55 = vld [vmem:[%s10335_s18 + $0x3c28] sm:$0xff] }
 0x49b   : > { %8735 = vmatprep.subr.bf16.mxu1 %v8734_v17  ;;  %v2427_v17 = vld [vmem:[%s10335_s18 + $0x3ad0] sm:$0xff]  ;;  %v7746_v45 = vpack.c.bf16 %v2462_v61, %v2458_v39  ;;  %v2461_v48 = vld [vmem:[%s10335_s18 + $0x3be0] sm:$0xff]  ;;  %v2720_v10 = vcombine.high %v12300_v38, %v12300_v38 }
 0x49c   : > { %v2471_v38 = vld [vmem:[%s10335_s18 + $0x3c30] sm:$0xff] }
 0x49d   : > { %7713 = vmatpush1.bf16.msra.mxu0 %v7712_v4  ;;  %v2440_v4 = vld [vmem:[%s10335_s18 + $0x3b38] sm:$0xff]  ;;  %v2495_v61 = vld [vmem:[%s10335_s18 + $0x3cf0] sm:$0xff] }
 0x49e   : > { %8737 = vmatpush1.bf16.msra.mxu1 %v8736_v27  ;;  %7715 = vmatprep.subr.bf16.mxu0 %v7714_v6  ;;  %v7732_v27 = vpack.c.bf16 %v2429_v33, %v2425_v57  ;;  %v8756_v6 = vpack.c.bf16 %v2431_v36, %v2427_v17  ;;  %v8758_v9 = vpack.c.bf16 %v2440_v4, %v2436_v2  ;;  %v2465_v17 = vld [vmem:[%s10335_s18 + $0x3c00] sm:$0xff]  ;;  %v2467_v36 = vld [vmem:[%s10335_s18 + $0x3c10] sm:$0xff]  ;;  %v2478_v2 = vld [vmem:[%s10335_s18 + $0x3c68] sm:$0xff] }
 0x49f   : > { %8739 = vmatprep.subr.bf16.mxu1 %v8738_v31  ;;  %v2435_v31 = vld [vmem:[%s10335_s18 + $0x3b10] sm:$0xff]  ;;  %v7750_v33 = vpack.c.bf16 %v2470_v55, %v2466_v54  ;;  %v12447_v4 = vrot.slane %v2720_v10, %v10455_v12  ;;  %v2506_v10 = vld [vmem:[%s10335_s18 + $0x3d48] sm:$0xff] }
 0x4a0   : > { %v2503_v55 = vld [vmem:[%s10335_s18 + $0x3d30] sm:$0xff] }
 0x4a1   : > { %7717 = vmatpush1.bf16.msra.mxu0 %v7716_v16  ;;  %v2448_v16 = vld [vmem:[%s10335_s18 + $0x3b78] sm:$0xff] }
 0x4a2   : > { %8741 = vmatpush1.bf16.msra.mxu1 %v8740_v18  ;;  %7719 = vmatprep.subr.bf16.mxu0 %v7718_v19  ;;  %v7736_v18 = vpack.c.bf16 %v2437_v8, %v2433_v7  ;;  %v8760_v19 = vpack.c.bf16 %v2439_v11, %v2435_v31  ;;  %v8762_v23 = vpack.c.bf16 %v2448_v16, %v2444_v15  ;;  %v2473_v31 = vld [vmem:[%s10335_s18 + $0x3c40] sm:$0xff]  ;;  %v2475_v11 = vld [vmem:[%s10335_s18 + $0x3c50] sm:$0xff]  ;;  %v2482_v15 = vld [vmem:[%s10335_s18 + $0x3c88] sm:$0xff] }
 0x4a3   : > { %8743 = vmatprep.subr.bf16.mxu1 %v8742_v22  ;;  %v2443_v22 = vld [vmem:[%s10335_s18 + $0x3b50] sm:$0xff]  ;;  %v8776_v7 = vpack.c.bf16 %v2471_v38, %v2467_v36  ;;  %v7754_v8 = vpack.c.bf16 %v2478_v2, %v2474_v62  ;;  %v2486_v16 = vld [vmem:[%s10335_s18 + $0x3ca8] sm:$0xff]  ;;  %v2509_v36 = vld [vmem:[%s10335_s18 + $0x3d60] sm:$0xff] }
 0x4a4   : > { %v2511_v62 = vld [vmem:[%s10335_s18 + $0x3d70] sm:$0xff]  ;;  %v2514_v2 = vld [vmem:[%s10335_s18 + $0x3d88] sm:$0xff] }
 0x4a5   : > { %7721 = vmatpush1.bf16.msra.mxu0 %v7720_v25  ;;  %v2456_v25 = vld [vmem:[%s10335_s18 + $0x3bb8] sm:$0xff] }
 0x4a6   : > { %8745 = vmatpush1.bf16.msra.mxu1 %v8744_v3  ;;  %7723 = vmatprep.subr.bf16.mxu0 %v7722_v28  ;;  %v7740_v3 = vpack.c.bf16 %v2445_v51, %v2441_v21  ;;  %v8764_v28 = vpack.c.bf16 %v2447_v43, %v2443_v22  ;;  %v8766_v37 = vpack.c.bf16 %v2456_v25, %v2452_v47  ;;  %v2485_v43 = vld [vmem:[%s10335_s18 + $0x3ca0] sm:$0xff]  ;;  %v2487_v47 = vld [vmem:[%s10335_s18 + $0x3cb0] sm:$0xff]  ;;  %v2490_v25 = vld [vmem:[%s10335_s18 + $0x3cc8] sm:$0xff] }
 0x4a7   : > { %8747 = vmatprep.subr.bf16.mxu1 %v8746_v35  ;;  %v2451_v35 = vld [vmem:[%s10335_s18 + $0x3b90] sm:$0xff]  ;;  %v8780_v51 = vpack.c.bf16 %v2479_v13, %v2475_v11  ;;  %v7758_v22 = vpack.c.bf16 %v2486_v16, %v2482_v15  ;;  %v2517_v11 = vld [vmem:[%s10335_s18 + $0x3da0] sm:$0xff]  ;;  %v2522_v16 = vld [vmem:[%s10335_s18 + $0x3dc8] sm:$0xff] }
 0x4a8   : > { %v2519_v15 = vld [vmem:[%s10335_s18 + $0x3db0] sm:$0xff] }
 0x4a9   : > { %7725 = vmatpush1.bf16.msra.mxu0 %v7724_v41  ;;  %v2464_v41 = vld [vmem:[%s10335_s18 + $0x3bf8] sm:$0xff] }
 0x4aa   : > { %8749 = vmatpush1.bf16.msra.mxu1 %v8748_v1  ;;  %7727 = vmatprep.subr.bf16.mxu0 %v7726_v42  ;;  %v7744_v1 = vpack.c.bf16 %v2453_v32, %v2449_v30  ;;  %v8768_v42 = vpack.c.bf16 %v2455_v59, %v2451_v35  ;;  %v8770_v53 = vpack.c.bf16 %v2464_v41, %v2460_v40  ;;  %v2489_v35 = vld [vmem:[%s10335_s18 + $0x3cc0] sm:$0xff]  ;;  %v2491_v59 = vld [vmem:[%s10335_s18 + $0x3cd0] sm:$0xff]  ;;  %v2498_v40 = vld [vmem:[%s10335_s18 + $0x3d08] sm:$0xff] }
 0x4ab   : > { %8751 = vmatprep.subr.bf16.mxu1 %v8750_v50  ;;  %v2459_v50 = vld [vmem:[%s10335_s18 + $0x3bd0] sm:$0xff]  ;;  %v8784_v30 = vpack.c.bf16 %v2487_v47, %v2483_v24  ;;  %v2502_v41 = vld [vmem:[%s10335_s18 + $0x3d28] sm:$0xff] }
 0x4ac   : > { %v8772_v57 = vpack.c.bf16 %v2463_v26, %v2459_v50  ;;  %v2497_v50 = vld [vmem:[%s10335_s18 + $0x3d00] sm:$0xff]  ;;  %v2499_v26 = vld [vmem:[%s10335_s18 + $0x3d10] sm:$0xff] }
 0x4ad   : > { %7729 = vmatpush1.bf16.msra.mxu0 %v7728_v56  ;;  %v2468_v56 = vld [vmem:[%s10335_s18 + $0x3c18] sm:$0xff]  ;;  %v2523_v24 = vld [vmem:[%s10335_s18 + $0x3dd0] sm:$0xff] }
 0x4ae   : > { %8753 = vmatpush1.bf16.msra.mxu1 %v8752_v44  ;;  %7731 = vmatprep.subr.bf16.mxu0 %v7730_v14  ;;  %v2472_v44 = vld [vmem:[%s10335_s18 + $0x3c38] sm:$0xff]  ;;  %v7748_v14 = vpack.c.bf16 %v2461_v48, %v2457_v46  ;;  %v8788_v46 = vpack.c.bf16 %v2495_v61, %v2491_v59  ;;  %v7766_v48 = vpack.c.bf16 %v2502_v41, %v2498_v40  ;;  %v2527_v47 = vld [vmem:[%s10335_s18 + $0x3df0] sm:$0xff]  ;;  %v2538_v40 = vld [vmem:[%s10335_s18 + $0x3e48] sm:$0xff] }
 0x4af   : > { %8755 = vmatprep.subr.bf16.mxu1 %v8754_v58  ;;  %v2469_v58 = vld [vmem:[%s10335_s18 + $0x3c20] sm:$0xff]  ;;  %v8774_v60 = vpack.c.bf16 %v2472_v44, %v2468_v56  ;;  %v2510_v56 = vld [vmem:[%s10335_s18 + $0x3d68] sm:$0xff]  ;;  %v2508_v44 = vld [vmem:[%s10335_s18 + $0x3d58] sm:$0xff] }
 0x4b0   : > { %v2531_v59 = vld [vmem:[%s10335_s18 + $0x3e10] sm:$0xff]  ;;  %v2542_v41 = vld [vmem:[%s10335_s18 + $0x3e68] sm:$0xff] }
 0x4b1   : > { %7733 = vmatpush1.bf16.msra.mxu0 %v7732_v27  ;;  %v2476_v27 = vld [vmem:[%s10335_s18 + $0x3c58] sm:$0xff]  ;;  %v2535_v61 = vld [vmem:[%s10335_s18 + $0x3e30] sm:$0xff] }
 0x4b2   : > { %8757 = vmatpush1.bf16.msra.mxu1 %v8756_v6  ;;  %7735 = vmatprep.subr.bf16.mxu0 %v7734_v29  ;;  %v2480_v6 = vld [vmem:[%s10335_s18 + $0x3c78] sm:$0xff]  ;;  %v7752_v29 = vpack.c.bf16 %v2469_v58, %v2465_v17  ;;  %v7770_v17 = vpack.c.bf16 %v2510_v56, %v2506_v10  ;;  %v2505_v58 = vld [vmem:[%s10335_s18 + $0x3d40] sm:$0xff]  ;;  %v2546_v10 = vld [vmem:[%s10335_s18 + $0x3e88] sm:$0xff] }
 0x4b3   : > { %8759 = vmatprep.subr.bf16.mxu1 %v8758_v9  ;;  %v2477_v9 = vld [vmem:[%s10335_s18 + $0x3c60] sm:$0xff]  ;;  %v8778_v34 = vpack.c.bf16 %v2480_v6, %v2476_v27  ;;  %v2518_v27 = vld [vmem:[%s10335_s18 + $0x3da8] sm:$0xff]  ;;  %v2516_v6 = vld [vmem:[%s10335_s18 + $0x3d98] sm:$0xff] }
 0x4b4   : > { %v7756_v21 = vpack.c.bf16 %v2477_v9, %v2473_v31  ;;  %v7774_v31 = vpack.c.bf16 %v2518_v27, %v2514_v2  ;;  %v2513_v9 = vld [vmem:[%s10335_s18 + $0x3d80] sm:$0xff]  ;;  %v2550_v56 = vld [vmem:[%s10335_s18 + $0x3ea8] sm:$0xff] }
 0x4b5   : > { %7737 = vmatpush1.bf16.msra.mxu0 %v7736_v18  ;;  %v2736_v18 = vcombine.high %v12447_v4, %v12447_v4  ;;  %v2554_v2 = vld [vmem:[%s10335_s18 + $0x3ec8] sm:$0xff] }
 0x4b6   : > { %8761 = vmatpush1.bf16.msra.mxu1 %v8760_v19  ;;  %7739 = vmatprep.subr.bf16.mxu0 %v7738_v20  ;;  %v2484_v19 = vld [vmem:[%s10335_s18 + $0x3c98] sm:$0xff]  ;;  %v2558_v27 = vld [vmem:[%s10335_s18 + $0x3ee8] sm:$0xff] }
 0x4b7   : > { %8763 = vmatprep.subr.bf16.mxu1 %v8762_v23  ;;  %v2488_v20 = vld [vmem:[%s10335_s18 + $0x3cb8] sm:$0xff]  ;;  %v2481_v23 = vld [vmem:[%s10335_s18 + $0x3c80] sm:$0xff] }
 0x4b8   : > { %v8782_v0 = vpack.c.bf16 %v2488_v20, %v2484_v19  ;;  %v2524_v19 = vld [vmem:[%s10335_s18 + $0x3dd8] sm:$0xff] }
 0x4b9   : > { %7741 = vmatpush1.bf16.msra.mxu0 %v7740_v3  ;;  %v2494_v3 = vld [vmem:[%s10335_s18 + $0x3ce8] sm:$0xff]  ;;  %v2528_v20 = vld [vmem:[%s10335_s18 + $0x3df8] sm:$0xff] }
 0x4ba   : > { %8765 = vmatpush1.bf16.msra.mxu1 %v8764_v28  ;;  %7743 = vmatprep.subr.bf16.mxu0 %v7742_v5  ;;  %v2496_v28 = vld [vmem:[%s10335_s18 + $0x3cf8] sm:$0xff]  ;;  %v7760_v5 = vpack.c.bf16 %v2485_v43, %v2481_v23  ;;  %v7762_v32 = vpack.c.bf16 %v2494_v3, %v2490_v25  ;;  %v2521_v23 = vld [vmem:[%s10335_s18 + $0x3dc0] sm:$0xff]  ;;  %v2530_v25 = vld [vmem:[%s10335_s18 + $0x3e08] sm:$0xff] }
 0x4bb   : > { %8767 = vmatprep.subr.bf16.mxu1 %v8766_v37  ;;  %v2493_v37 = vld [vmem:[%s10335_s18 + $0x3ce0] sm:$0xff]  ;;  %v2534_v3 = vld [vmem:[%s10335_s18 + $0x3e28] sm:$0xff] }
 0x4bc   : > { %v2525_v43 = vld [vmem:[%s10335_s18 + $0x3de0] sm:$0xff] }
 0x4bd   : > { %7745 = vmatpush1.bf16.msra.mxu0 %v7744_v1  ;;  %v2500_v1 = vld [vmem:[%s10335_s18 + $0x3d18] sm:$0xff] }
 0x4be   : > { %8769 = vmatpush1.bf16.msra.mxu1 %v8768_v42  ;;  %7747 = vmatprep.subr.bf16.mxu0 %v7746_v45  ;;  %v2504_v42 = vld [vmem:[%s10335_s18 + $0x3d38] sm:$0xff]  ;;  %v7764_v45 = vpack.c.bf16 %v2493_v37, %v2489_v35  ;;  %v2529_v35 = vld [vmem:[%s10335_s18 + $0x3e00] sm:$0xff] }
 0x4bf   : > { %8771 = vmatprep.subr.bf16.mxu1 %v8770_v53  ;;  %v2501_v53 = vld [vmem:[%s10335_s18 + $0x3d20] sm:$0xff]  ;;  %v8790_v54 = vpack.c.bf16 %v2504_v42, %v2500_v1  ;;  %v2540_v1 = vld [vmem:[%s10335_s18 + $0x3e58] sm:$0xff] }
 0x4c0   : > { %v2533_v37 = vld [vmem:[%s10335_s18 + $0x3e20] sm:$0xff]  ;;  %v2544_v42 = vld [vmem:[%s10335_s18 + $0x3e78] sm:$0xff] }
 0x4c1   : > { %7749 = vmatpush1.bf16.msra.mxu0 %v7748_v14  ;;  %v2512_v14 = vld [vmem:[%s10335_s18 + $0x3d78] sm:$0xff] }
 0x4c2   : > { %8773 = vmatpush1.bf16.msra.mxu1 %v8772_v57  ;;  %7751 = vmatprep.subr.bf16.mxu0 %v7750_v33  ;;  %v7768_v57 = vpack.c.bf16 %v2501_v53, %v2497_v50  ;;  %v8792_v33 = vpack.c.bf16 %v2503_v55, %v2499_v26  ;;  %v8794_v38 = vpack.c.bf16 %v2512_v14, %v2508_v44  ;;  %v2537_v50 = vld [vmem:[%s10335_s18 + $0x3e40] sm:$0xff]  ;;  %v2539_v26 = vld [vmem:[%s10335_s18 + $0x3e50] sm:$0xff]  ;;  %v2548_v44 = vld [vmem:[%s10335_s18 + $0x3e98] sm:$0xff] }
 0x4c3   : > { %8775 = vmatprep.subr.bf16.mxu1 %v8774_v60  ;;  %v2507_v60 = vld [vmem:[%s10335_s18 + $0x3d50] sm:$0xff]  ;;  %v2541_v53 = vld [vmem:[%s10335_s18 + $0x3e60] sm:$0xff]  ;;  %v2552_v14 = vld [vmem:[%s10335_s18 + $0x3eb8] sm:$0xff] }
 0x4c4   : > { %3828 = vmatmul.mubr.f32.vlgmr.msra.gmra.mrb[0].mxu0 %v12310_v52  ;;  %v2543_v55 = vld [vmem:[%s10335_s18 + $0x3e70] sm:$0xff] }
 0x4c5   : > { %7753 = vmatpush1.bf16.msra.mxu0 %v7752_v29  ;;  %4964 = vmatmul.mubr.f32.vlgmr.msra.gmra.mrb[0].mxu1 %v12310_v52  ;;  %v2492_v52 = vld [vmem:[%s10335_s18 + $0x3cd8] sm:$0xff] }
 0x4c6   : > { %8777 = vmatpush1.bf16.msra.mxu1 %v8776_v7  ;;  %7755 = vmatprep.subr.bf16.mxu0 %v7754_v8  ;;  %v8786_v39 = vpack.c.bf16 %v2496_v28, %v2492_v52  ;;  %v2520_v29 = vld [vmem:[%s10335_s18 + $0x3db8] sm:$0xff]  ;;  %v7772_v7 = vpack.c.bf16 %v2509_v36, %v2505_v58  ;;  %v8796_v8 = vpack.c.bf16 %v2511_v62, %v2507_v60  ;;  %v2545_v58 = vld [vmem:[%s10335_s18 + $0x3e80] sm:$0xff]  ;;  %v2547_v60 = vld [vmem:[%s10335_s18 + $0x3e90] sm:$0xff] }
 0x4c7   : > { %8779 = vmatprep.subr.bf16.mxu1 %v8778_v34  ;;  %3898 = vmatprep.mubr.f32.mxu0 %v2736_v18  ;;  %v2515_v34 = vld [vmem:[%s10335_s18 + $0x3d90] sm:$0xff]  ;;  %v8798_v13 = vpack.c.bf16 %v2520_v29, %v2516_v6  ;;  %v2532_v52 = vld [vmem:[%s10335_s18 + $0x3e18] sm:$0xff]  ;;  %v2549_v36 = vld [vmem:[%s10335_s18 + $0x3ea0] sm:$0xff] }
 0x4c8   : > { %5034 = vmatprep.mubr.f32.mxu1 %v2736_v18  ;;  %v2526_v18 = vld [vmem:[%s10335_s18 + $0x3de8] sm:$0xff]  ;;  %v2536_v28 = vld [vmem:[%s10335_s18 + $0x3e38] sm:$0xff]  ;;  %v2551_v62 = vld [vmem:[%s10335_s18 + $0x3eb0] sm:$0xff] }
 0x4c9   : > { %7757 = vmatpush1.bf16.msra.mxu0 %v7756_v21  ;;  %v7776_v21 = vpack.c.bf16 %v2517_v11, %v2513_v9  ;;  %v2556_v6 = vld [vmem:[%s10335_s18 + $0x3ed8] sm:$0xff]  ;;  %v2553_v9 = vld [vmem:[%s10335_s18 + $0x3ec0] sm:$0xff] }
 0x4ca   : > { %8781 = vmatpush1.bf16.msra.mxu1 %v8780_v51  ;;  %7759 = vmatprep.subr.bf16.mxu0 %v7758_v22  ;;  %v8800_v51 = vpack.c.bf16 %v2519_v15, %v2515_v34  ;;  %v7778_v22 = vpack.c.bf16 %v2526_v18, %v2522_v16  ;;  %v2560_v29 = vld [vmem:[%s10335_s18 + $0x3ef8] sm:$0xff]  ;;  %v2557_v11 = vld [vmem:[%s10335_s18 + $0x3ee0] sm:$0xff]  ;;  %v2555_v34 = vld [vmem:[%s10335_s18 + $0x3ed0] sm:$0xff] }
 0x4cb   : > { %8783 = vmatprep.subr.bf16.mxu1 %v8782_v0  ;;  %v8802_v0 = vpack.c.bf16 %v2528_v20, %v2524_v19  ;;  %v2559_v15 = vld [vmem:[%s10335_s18 + $0x3ef0] sm:$0xff]  ;;  %v2562_v16 = vld [vmem:[%s10335_s18 + $0x3f08] sm:$0xff]  ;;  %v2564_v19 = vld [vmem:[%s10335_s18 + $0x3f18] sm:$0xff] }
 0x4cc   : > { %v2566_v18 = vld [vmem:[%s10335_s18 + $0x3f28] sm:$0xff]  ;;  %v2568_v20 = vld [vmem:[%s10335_s18 + $0x3f38] sm:$0xff] }
 0x4cd   : > { %7761 = vmatpush1.bf16.msra.mxu0 %v7760_v5  ;;  %v7780_v5 = vpack.c.bf16 %v2525_v43, %v2521_v23  ;;  %v2561_v23 = vld [vmem:[%s10335_s18 + $0x3f00] sm:$0xff] }
 0x4ce   : > { %8785 = vmatpush1.bf16.msra.mxu1 %v8784_v30  ;;  %7763 = vmatprep.subr.bf16.mxu0 %v7762_v32  ;;  %v8804_v30 = vpack.c.bf16 %v2527_v47, %v2523_v24  ;;  %v7782_v32 = vpack.c.bf16 %v2534_v3, %v2530_v25  ;;  %v2565_v43 = vld [vmem:[%s10335_s18 + $0x3f20] sm:$0xff]  ;;  %v2563_v24 = vld [vmem:[%s10335_s18 + $0x3f10] sm:$0xff]  ;;  %v2570_v25 = vld [vmem:[%s10335_s18 + $0x3f48] sm:$0xff] }
 0x4cf   : > { %8787 = vmatprep.subr.bf16.mxu1 %v8786_v39  ;;  %v8806_v39 = vpack.c.bf16 %v2536_v28, %v2532_v52  ;;  %v2567_v47 = vld [vmem:[%s10335_s18 + $0x3f30] sm:$0xff]  ;;  %v2574_v3 = vld [vmem:[%s10335_s18 + $0x3f68] sm:$0xff]  ;;  %v2572_v52 = vld [vmem:[%s10335_s18 + $0x3f58] sm:$0xff] }
 0x4d0   : > { %v2576_v28 = vld [vmem:[%s10335_s18 + $0x3f78] sm:$0xff] }
 0x4d1   : > { %7765 = vmatpush1.bf16.msra.mxu0 %v7764_v45  ;;  %v7784_v45 = vpack.c.bf16 %v2533_v37, %v2529_v35  ;;  %v2569_v35 = vld [vmem:[%s10335_s18 + $0x3f40] sm:$0xff] }
 0x4d2   : > { %8789 = vmatpush1.bf16.msra.mxu1 %v8788_v46  ;;  %7767 = vmatprep.subr.bf16.mxu0 %v7766_v48  ;;  %v8808_v46 = vpack.c.bf16 %v2535_v61, %v2531_v59  ;;  %v7786_v48 = vpack.c.bf16 %v2542_v41, %v2538_v40  ;;  %v2573_v37 = vld [vmem:[%s10335_s18 + $0x3f60] sm:$0xff]  ;;  %v2571_v59 = vld [vmem:[%s10335_s18 + $0x3f50] sm:$0xff]  ;;  %v2578_v40 = vld [vmem:[%s10335_s18 + $0x3f88] sm:$0xff] }
 0x4d3   : > { %8791 = vmatprep.subr.bf16.mxu1 %v8790_v54  ;;  %v8810_v54 = vpack.c.bf16 %v2544_v42, %v2540_v1  ;;  %v2575_v61 = vld [vmem:[%s10335_s18 + $0x3f70] sm:$0xff]  ;;  %v2582_v41 = vld [vmem:[%s10335_s18 + $0x3fa8] sm:$0xff]  ;;  %v2580_v1 = vld [vmem:[%s10335_s18 + $0x3f98] sm:$0xff] }
 0x4d4   : > { %v2584_v42 = vld [vmem:[%s10335_s18 + $0x3fb8] sm:$0xff] }
 0x4d5   : > { %7769 = vmatpush1.bf16.msra.mxu0 %v7768_v57  ;;  %v7788_v57 = vpack.c.bf16 %v2541_v53, %v2537_v50  ;;  %v2577_v50 = vld [vmem:[%s10335_s18 + $0x3f80] sm:$0xff] }
 0x4d6   : > { %8793 = vmatpush1.bf16.msra.mxu1 %v8792_v33  ;;  %7771 = vmatprep.subr.bf16.mxu0 %v7770_v17  ;;  %v8812_v33 = vpack.c.bf16 %v2543_v55, %v2539_v26  ;;  %v7790_v17 = vpack.c.bf16 %v2550_v56, %v2546_v10  ;;  %v2581_v53 = vld [vmem:[%s10335_s18 + $0x3fa0] sm:$0xff]  ;;  %v2579_v26 = vld [vmem:[%s10335_s18 + $0x3f90] sm:$0xff]  ;;  %v2586_v10 = vld [vmem:[%s10335_s18 + $0x3fc8] sm:$0xff] }
 0x4d7   : > { %8795 = vmatprep.subr.bf16.mxu1 %v8794_v38  ;;  %v8814_v38 = vpack.c.bf16 %v2552_v14, %v2548_v44  ;;  %v2583_v55 = vld [vmem:[%s10335_s18 + $0x3fb0] sm:$0xff]  ;;  %v2590_v56 = vld [vmem:[%s10335_s18 + $0x3fe8] sm:$0xff]  ;;  %v2588_v44 = vld [vmem:[%s10335_s18 + $0x3fd8] sm:$0xff] }
 0x4d8   : > { %v2592_v14 = vld [vmem:[%s10335_s18 + $0x3ff8] sm:$0xff] }
 0x4d9   : > { %7773 = vmatpush1.bf16.msra.mxu0 %v7772_v7  ;;  %v7792_v7 = vpack.c.bf16 %v2549_v36, %v2545_v58  ;;  %v2585_v58 = vld [vmem:[%s10335_s18 + $0x3fc0] sm:$0xff] }
 0x4da   : > { %8797 = vmatpush1.bf16.msra.mxu1 %v8796_v8  ;;  %7775 = vmatprep.subr.bf16.mxu0 %v7774_v31  ;;  %v8816_v8 = vpack.c.bf16 %v2551_v62, %v2547_v60  ;;  %v7794_v31 = vpack.c.bf16 %v2558_v27, %v2554_v2  ;;  %v2589_v36 = vld [vmem:[%s10335_s18 + $0x3fe0] sm:$0xff]  ;;  %v8834_v60 = vpack.c.bf16 %v2592_v14, %v2588_v44  ;;  %v2591_v62 = vld [vmem:[%s10335_s18 + $0x3ff0] sm:$0xff] }
 0x4db   : > { %8799 = vmatprep.subr.bf16.mxu1 %v8798_v13  ;;  %v8818_v13 = vpack.c.bf16 %v2560_v29, %v2556_v6  ;;  %v7812_v2 = vpack.c.bf16 %v2589_v36, %v2585_v58  ;;  %v5171_v36 = vld [vmem:[#allocation11 + $0xd0] sm:$0xff] (!%p6774_p4) }
 0x4dd   : > { %7777 = vmatpush1.bf16.msra.mxu0 %v7776_v21  ;;  %v7796_v21 = vpack.c.bf16 %v2557_v11, %v2553_v9 }
 0x4de   : > { %8801 = vmatpush1.bf16.msra.mxu1 %v8800_v51  ;;  %7779 = vmatprep.subr.bf16.mxu0 %v7778_v22  ;;  %v8820_v51 = vpack.c.bf16 %v2559_v15, %v2555_v34  ;;  %v7798_v22 = vpack.c.bf16 %v2566_v18, %v2562_v16  ;;  %v5146_v18 = vld [vmem:[#allocation11 + $0x8] sm:$0xff] (!%p6774_p4) }
 0x4df   : > { %8803 = vmatprep.subr.bf16.mxu1 %v8802_v0  ;;  %v8822_v0 = vpack.c.bf16 %v2568_v20, %v2564_v19  ;;  %v5150_v19 = vld [vmem:[#allocation11 + $0x28] sm:$0xff] (!%p6774_p4) }
 0x4e0   : > { %v8838_v20 = vpack.c.bf16 (!%p6774_p4), %v5150_v19, %v5146_v18  ;;  %v5192_v18 = vld [vmem:[#allocation11 + $0x178] sm:$0xff] (!%p6774_p4) }
 0x4e1   : > { %7781 = vmatpush1.bf16.msra.mxu0 %v7780_v5  ;;  %v7800_v5 = vpack.c.bf16 %v2565_v43, %v2561_v23 }
 0x4e2   : > { %8805 = vmatpush1.bf16.msra.mxu1 %v8804_v30  ;;  %7783 = vmatprep.subr.bf16.mxu0 %v7782_v32  ;;  %v8824_v30 = vpack.c.bf16 %v2567_v47, %v2563_v24  ;;  %v7802_v32 = vpack.c.bf16 %v2574_v3, %v2570_v25  ;;  %v5147_v24 = vld [vmem:[#allocation11 + $0x10] sm:$0xff] (!%p6774_p4)  ;;  %v5154_v47 = vld [vmem:[#allocation11 + $0x48] sm:$0xff] (!%p6774_p4) }
 0x4e3   : > { %8807 = vmatprep.subr.bf16.mxu1 %v8806_v39  ;;  %v8826_v39 = vpack.c.bf16 %v2576_v28, %v2572_v52  ;;  %v5158_v3 = vld [vmem:[#allocation11 + $0x68] sm:$0xff] (!%p6774_p4)  ;;  %v5156_v52 = vld [vmem:[#allocation11 + $0x58] sm:$0xff] (!%p6774_p4) }
 0x4e4   : > { %v5160_v28 = vld [vmem:[#allocation11 + $0x78] sm:$0xff] (!%p6774_p4) }
 0x4e5   : > { %7785 = vmatpush1.bf16.msra.mxu0 %v7784_v45  ;;  %v7804_v45 = vpack.c.bf16 %v2573_v37, %v2569_v35  ;;  %v5157_v35 = vld [vmem:[#allocation11 + $0x60] sm:$0xff] (!%p6774_p4)  ;;  %v5155_v37 = vld [vmem:[#allocation11 + $0x50] sm:$0xff] (!%p6774_p4) }
 0x4e6   : > { %8809 = vmatpush1.bf16.msra.mxu1 %v8808_v46  ;;  %7787 = vmatprep.subr.bf16.mxu0 %v7786_v48  ;;  %v8828_v46 = vpack.c.bf16 %v2575_v61, %v2571_v59  ;;  %v7806_v48 = vpack.c.bf16 %v2582_v41, %v2578_v40  ;;  %v5162_v61 = vld [vmem:[#allocation11 + $0x88] sm:$0xff] (!%p6774_p4) }
 0x4e7   : > { %8811 = vmatprep.subr.bf16.mxu1 %v8810_v54  ;;  %v8830_v54 = vpack.c.bf16 %v2584_v42, %v2580_v1  ;;  %v5166_v40 = vld [vmem:[#allocation11 + $0xa8] sm:$0xff] (!%p6774_p4)  ;;  %v5164_v42 = vld [vmem:[#allocation11 + $0x98] sm:$0xff] (!%p6774_p4) }
 0x4e8   : > { %v8846_v1 = vpack.c.bf16 (!%p6774_p4), %v5166_v40, %v5162_v61  ;;  %v5204_v61 = vld [vmem:[#allocation11 + $0x1d8] sm:$0xff] (!%p6774_p4) }
 0x4e9   : > { %7789 = vmatpush1.bf16.msra.mxu0 %v7788_v57  ;;  %v7808_v57 = vpack.c.bf16 %v2581_v53, %v2577_v50  ;;  %v5165_v50 = vld [vmem:[#allocation11 + $0xa0] sm:$0xff] (!%p6774_p4)  ;;  %v5163_v53 = vld [vmem:[#allocation11 + $0x90] sm:$0xff] (!%p6774_p4)  ;;  %v5208_v40 = vld [vmem:[#allocation11 + $0x1f8] sm:$0xff] (!%p6774_p4) }
 0x4ea   : > { %8813 = vmatpush1.bf16.msra.mxu1 %v8812_v33  ;;  %7791 = vmatprep.subr.bf16.mxu0 %v7790_v17  ;;  %v8832_v33 = vpack.c.bf16 %v2583_v55, %v2579_v26  ;;  %v7810_v17 = vpack.c.bf16 %v2590_v56, %v2586_v10  ;;  %v5167_v26 = vld [vmem:[#allocation11 + $0xb0] sm:$0xff] (!%p6774_p4)  ;;  %v5170_v55 = vld [vmem:[#allocation11 + $0xc8] sm:$0xff] (!%p6774_p4)  ;;  %v5172_v56 = vld [vmem:[#allocation11 + $0xd8] sm:$0xff] (!%p6774_p4) }
 0x4eb   : > { %8815 = vmatprep.subr.bf16.mxu1 %v8814_v38  ;;  %v2587_v38 = vld [vmem:[%s10335_s18 + $0x3fd0] sm:$0xff]  ;;  %v8976_v44 = vpack.c.bf16 (!%p6774_p4), %v5167_v26, %v5163_v53  ;;  %v5207_v53 = vld [vmem:[#allocation11 + $0x1f0] sm:$0xff] (!%p6774_p4) }
 0x4ec   : > { %v8836_v27 = vpack.c.bf16 %v2591_v62, %v2587_v38  ;;  %v5174_v10 = vld [vmem:[#allocation11 + $0xe8] sm:$0xff] (!%p6774_p4) }
 0x4ed   : > { %7793 = vmatpush1.bf16.msra.mxu0 %v7792_v7  ;;  %v8850_v14 = vpack.c.bf16 (!%p6774_p4), %v5174_v10, %v5170_v55  ;;  %v5178_v38 = vld [vmem:[#allocation11 + $0x108] sm:$0xff] (!%p6774_p4)  ;;  %v5212_v55 = vld [vmem:[#allocation11 + $0x218] sm:$0xff] (!%p6774_p4) }
 0x4ee   : > { %8817 = vmatpush1.bf16.msra.mxu1 %v8816_v8  ;;  %7795 = vmatprep.subr.bf16.mxu0 %v7794_v31  ;;  %v5182_v62 = vld [vmem:[#allocation11 + $0x128] sm:$0xff] (!%p6774_p4)  ;;  %v5216_v10 = vld [vmem:[#allocation11 + $0x238] sm:$0xff] (!%p6774_p4) }
 0x4ef   : > { %8819 = vmatprep.subr.bf16.mxu1 %v8818_v13  ;;  %v536_v13 = vld [vmem:[#allocation2] sm:$0xff]  ;;  %v5210_v26 = vld [vmem:[#allocation11 + $0x208] sm:$0xff] (!%p6774_p4) }
 0x4f1   : > { %7797 = vmatpush1.bf16.msra.mxu0 %v7796_v21  ;;  %v5152_v21 = vld [vmem:[#allocation11 + $0x38] sm:$0xff] (!%p6774_p4) }
 0x4f2   : > { %8821 = vmatpush1.bf16.msra.mxu1 %v8820_v51  ;;  %7799 = vmatprep.subr.bf16.mxu0 %v7798_v22  ;;  %v5145_v51 = vld [vmem:[#allocation11] sm:$0xff] (!%p6774_p4) }
 0x4f3   : > { %8823 = vmatprep.subr.bf16.mxu1 %v8822_v0  ;;  %v5149_v22 = vld [vmem:[#allocation11 + $0x20] sm:$0xff] (!%p6774_p4)  ;;  %v5151_v0 = vld [vmem:[#allocation11 + $0x30] sm:$0xff] (!%p6774_p4) }
 0x4f4   : > { %v8840_v43 = vpack.c.bf16 (!%p6774_p4), %v5149_v22, %v5145_v51  ;;  %v8968_v25 = vpack.c.bf16 (!%p6774_p4), %v5151_v0, %v5147_v24  ;;  %v5189_v51 = vld [vmem:[#allocation11 + $0x160] sm:$0xff] (!%p6774_p4)  ;;  %v5187_v22 = vld [vmem:[#allocation11 + $0x150] sm:$0xff] (!%p6774_p4)  ;;  %v5194_v24 = vld [vmem:[#allocation11 + $0x188] sm:$0xff] (!%p6774_p4) }
 0x4f5   : > { %7801 = vmatpush1.bf16.msra.mxu0 %v7800_v5  ;;  %v8842_v5 = vpack.c.bf16 (!%p6774_p4), %v5158_v3, %v5154_v47  ;;  %v5198_v0 = vld [vmem:[#allocation11 + $0x1a8] sm:$0xff] (!%p6774_p4)  ;;  %v5196_v47 = vld [vmem:[#allocation11 + $0x198] sm:$0xff] (!%p6774_p4) }
 0x4f6   : > { %8825 = vmatpush1.bf16.msra.mxu1 %v8824_v30  ;;  %7803 = vmatprep.subr.bf16.mxu0 %v7802_v32  ;;  %v8970_v30 = vpack.c.bf16 (!%p6774_p4), %v5160_v28, %v5156_v52  ;;  %v5153_v32 = vld [vmem:[#allocation11 + $0x40] sm:$0xff] (!%p6774_p4)  ;;  %v8862_v28 = vpack.c.bf16 (!%p6774_p4), %v5198_v0, %v5194_v24  ;;  %v5238_v24 = vld [vmem:[#allocation11 + $0x2e8] sm:$0xff] (!%p6774_p4)  ;;  %v5236_v0 = vld [vmem:[#allocation11 + $0x2d8] sm:$0xff] (!%p6774_p4) }
 0x4f7   : > { %8827 = vmatprep.subr.bf16.mxu1 %v8826_v39  ;;  %v8844_v59 = vpack.c.bf16 (!%p6774_p4), %v5157_v35, %v5153_v32  ;;  %v5159_v39 = vld [vmem:[#allocation11 + $0x70] sm:$0xff] (!%p6774_p4) }
 0x4f8   : > { %v8972_v41 = vpack.c.bf16 (!%p6774_p4), %v5159_v39, %v5155_v37  ;;  %v5195_v32 = vld [vmem:[#allocation11 + $0x190] sm:$0xff] (!%p6774_p4)  ;;  %v5206_v39 = vld [vmem:[#allocation11 + $0x1e8] sm:$0xff] (!%p6774_p4) }
 0x4f9   : > { %7805 = vmatpush1.bf16.msra.mxu0 %v7804_v45  ;;  %v5168_v45 = vld [vmem:[#allocation11 + $0xb8] sm:$0xff] (!%p6774_p4)  ;;  %v5199_v37 = vld [vmem:[#allocation11 + $0x1b0] sm:$0xff] (!%p6774_p4) }
 0x4fa   : > { %8829 = vmatpush1.bf16.msra.mxu1 %v8828_v46  ;;  %7807 = vmatprep.subr.bf16.mxu0 %v7806_v48  ;;  %v5161_v46 = vld [vmem:[#allocation11 + $0x80] sm:$0xff] (!%p6774_p4)  ;;  %v8974_v48 = vpack.c.bf16 (!%p6774_p4), %v5168_v45, %v5164_v42 }
 0x4fb   : > { %8831 = vmatprep.subr.bf16.mxu1 %v8830_v54  ;;  %v8848_v54 = vpack.c.bf16 (!%p6774_p4), %v5165_v50, %v5161_v46  ;;  %v5201_v45 = vld [vmem:[#allocation11 + $0x1c0] sm:$0xff] (!%p6774_p4)  ;;  %v8994_v50 = vpack.c.bf16 (!%p6774_p4), %v5208_v40, %v5204_v61 }
 0x4fc   : > { %v5205_v46 = vld [vmem:[#allocation11 + $0x1e0] sm:$0xff] (!%p6774_p4) }
 0x4fd   : > { %7809 = vmatpush1.bf16.msra.mxu0 %v7808_v57  ;;  %v5176_v57 = vld [vmem:[#allocation11 + $0xf8] sm:$0xff] (!%p6774_p4) }
 0x4fe   : > { %8833 = vmatpush1.bf16.msra.mxu1 %v8832_v33  ;;  %7811 = vmatprep.subr.bf16.mxu0 %v7810_v17  ;;  %v5169_v33 = vld [vmem:[#allocation11 + $0xc0] sm:$0xff] (!%p6774_p4)  ;;  %v8978_v58 = vpack.c.bf16 (!%p6774_p4), %v5176_v57, %v5172_v56  ;;  %v8868_v56 = vpack.c.bf16 (!%p6774_p4), %v5205_v46, %v5201_v45 }
 0x4ff   : > { %8835 = vmatprep.subr.bf16.mxu1 %v8834_v60  ;;  %v5173_v17 = vld [vmem:[#allocation11 + $0xe0] sm:$0xff] (!%p6774_p4)  ;;  %v5175_v60 = vld [vmem:[#allocation11 + $0xf0] sm:$0xff] (!%p6774_p4) }
 0x500   : > { %v5209_v57 = vld [vmem:[#allocation11 + $0x200] sm:$0xff] (!%p6774_p4) }
 0x501   : > { %7813 = vmatpush1.bf16.msra.mxu0 %v7812_v2  ;;  %v5180_v2 = vld [vmem:[#allocation11 + $0x118] sm:$0xff] (!%p6774_p4) }
 0x502   : > { %8837 = vmatpush1.bf16.msra.mxu1 %v8836_v27  ;;  %8839 = vmatprep.subr.bf16.mxu0 (!%p6774_p4), %v8838_v20  ;;  %v5184_v27 = vld [vmem:[#allocation11 + $0x138] sm:$0xff] (!%p6774_p4) }
 0x504   : > { %3899 = vmatmul.mubr.f32.vlgmr.msra.gmra.mrb[0].mxu0 %v12447_v4 }
 0x505   : > { %5035 = vmatmul.mubr.f32.vlgmr.msra.gmra.mrb[0].mxu1 %v12447_v4  ;;  %v5148_v4 = vld [vmem:[#allocation11 + $0x18] sm:$0xff] (!%p6774_p4)  ;;  %8841 = vmatpush1.bf16.msra.mxu0 (!%p6774_p4), %v8840_v43  ;;  %v5191_v43 = vld [vmem:[#allocation11 + $0x170] sm:$0xff] (!%p6774_p4) }
 0x506   : > { %v8966_v23 = vpack.c.bf16 (!%p6774_p4), %v5152_v21, %v5148_v4  ;;  %8843 = vmatprep.subr.bf16.mxu0 (!%p6774_p4), %v8842_v5  ;;  %v5185_v21 = vld [vmem:[#allocation11 + $0x140] sm:$0xff] (!%p6774_p4)  ;;  %v8988_v52 = vpack.c.bf16 (!%p6774_p4), %v5191_v43, %v5187_v22  ;;  %v5231_v22 = vld [vmem:[#allocation11 + $0x2b0] sm:$0xff] (!%p6774_p4) }
 0x507   : > { %v8860_v3 = vpack.c.bf16 (!%p6774_p4), %v5189_v51, %v5185_v21  ;;  %v5193_v5 = vld [vmem:[#allocation11 + $0x180] sm:$0xff] (!%p6774_p4)  ;;  %v5227_v51 = vld [vmem:[#allocation11 + $0x290] sm:$0xff] (!%p6774_p4) }
 0x508   : > { %8967 = vmatprep.subr.bf16.mxu1 (!%p6774_p4), %v8966_v23  ;;  %v9008_v61 = vpack.c.bf16 (!%p6774_p4), %v5231_v22, %v5227_v51  ;;  %v5258_v51 = vld [vmem:[#allocation11 + $0x388] sm:$0xff] (!%p6774_p4) }
 0x509   : > { %8969 = vmatpush1.bf16.msra.mxu1 (!%p6774_p4), %v8968_v25  ;;  %8845 = vmatpush1.bf16.msra.mxu0 (!%p6774_p4), %v8844_v59  ;;  %v5200_v25 = vld [vmem:[#allocation11 + $0x1b8] sm:$0xff] (!%p6774_p4)  ;;  %v5202_v59 = vld [vmem:[#allocation11 + $0x1c8] sm:$0xff] (!%p6774_p4) }
 0x50a   : > { %8971 = vmatprep.subr.bf16.mxu1 (!%p6774_p4), %v8970_v30  ;;  %8847 = vmatprep.subr.bf16.mxu0 (!%p6774_p4), %v8846_v1  ;;  %v5197_v30 = vld [vmem:[#allocation11 + $0x1a0] sm:$0xff] (!%p6774_p4)  ;;  %v8990_v35 = vpack.c.bf16 (!%p6774_p4), %v5200_v25, %v5196_v47  ;;  %v8992_v1 = vpack.c.bf16 (!%p6774_p4), %v5199_v37, %v5195_v32  ;;  %v8866_v42 = vpack.c.bf16 (!%p6774_p4), %v5206_v39, %v5202_v59  ;;  %v5240_v47 = vld [vmem:[#allocation11 + $0x2f8] sm:$0xff] (!%p6774_p4)  ;;  %v5242_v32 = vld [vmem:[#allocation11 + $0x308] sm:$0xff] (!%p6774_p4)  ;;  %v12580_v37 = vsub.s32 (!%p6774_p4), 1, %v10444_v63 }
 0x50b   : > { %v5233_v25 = vld [vmem:[#allocation11 + $0x2c0] sm:$0xff] (!%p6774_p4)  ;;  %v12583_v59 = vsub.s32 (!%p6774_p4), 2, %v10444_v63  ;;  %v12586_v39 = vsub.s32 (!%p6774_p4), 3, %v10444_v63  ;;  %v5262_v22 = vld [vmem:[#allocation11 + $0x3a8] sm:$0xff] (!%p6774_p4) }
 0x50d   : > { %8973 = vmatpush1.bf16.msra.mxu1 (!%p6774_p4), %v8972_v41  ;;  %8849 = vmatpush1.bf16.msra.mxu0 (!%p6774_p4), %v8848_v54  ;;  %v8864_v41 = vpack.c.bf16 (!%p6774_p4), %v5197_v30, %v5193_v5  ;;  %v5214_v54 = vld [vmem:[#allocation11 + $0x228] sm:$0xff] (!%p6774_p4)  ;;  %v5239_v30 = vld [vmem:[#allocation11 + $0x2f0] sm:$0xff] (!%p6774_p4) }
 0x50e   : > { %8975 = vmatprep.subr.bf16.mxu1 (!%p6774_p4), %v8974_v48  ;;  %8851 = vmatprep.subr.bf16.mxu0 (!%p6774_p4), %v8850_v14  ;;  %v5203_v48 = vld [vmem:[#allocation11 + $0x1d0] sm:$0xff] (!%p6774_p4)  ;;  %v8870_v14 = vpack.c.bf16 (!%p6774_p4), %v5214_v54, %v5210_v26 }
 0x511   : > { %8977 = vmatpush1.bf16.msra.mxu1 (!%p6774_p4), %v8976_v44  ;;  %v8996_v44 = vpack.c.bf16 (!%p6774_p4), %v5207_v53, %v5203_v48  ;;  %v5248_v48 = vld [vmem:[#allocation11 + $0x338] sm:$0xff] (!%p6774_p4) }
 0x512   : > { %8979 = vmatprep.subr.bf16.mxu1 (!%p6774_p4), %v8978_v58  ;;  %v8998_v58 = vpack.c.bf16 (!%p6774_p4), %v5216_v10, %v5212_v55  ;;  %v5107_v53 = vld [vmem:[#allocation9] sm:$0xf] (!%p6774_p4) }
 0x5d7   : > { %v3900_v6 = vpop.f32.mrb[0].mxu0 }
 0x5d8   : > { %v5036_v29 = vpop.f32.mrb[0].mxu1  ;;  %v3902_v7 = vpop.f32.mrb[1].mxu0 }
 0x5d9   : > { %v5045_v8 = vcombine.low %v3900_v6, %v3902_v7  ;;  %v5038_v31 = vpop.f32.mrb[1].mxu1  ;;  %v8852_v6 = vpack.c.bf16 (!%p6774_p4), %v5173_v17, %v5169_v33  ;;  %v8854_v7 = vpack.c.bf16 (!%p6774_p4), %v5182_v62, %v5178_v38  ;;  %v5213_v33 = vld [vmem:[#allocation11 + $0x220] sm:$0xff] (!%p6774_p4)  ;;  %v5211_v17 = vld [vmem:[#allocation11 + $0x210] sm:$0xff] (!%p6774_p4)  ;;  %v5222_v38 = vld [vmem:[#allocation11 + $0x268] sm:$0xff] (!%p6774_p4) }
 0x5da   : > { %v5046_v9 = vcombine.low %v5036_v29, %v5038_v31  ;;  %v8980_v29 = vpack.c.bf16 (!%p6774_p4), %v5175_v60, %v5171_v36  ;;  %v5181_v31 = vld [vmem:[#allocation11 + $0x120] sm:$0xff] (!%p6774_p4)  ;;  %v5215_v36 = vld [vmem:[#allocation11 + $0x230] sm:$0xff] (!%p6774_p4)  ;;  %v5218_v60 = vld [vmem:[#allocation11 + $0x248] sm:$0xff] (!%p6774_p4) }
 0x5db   : > { %v5053_v11 = vrot.slane %v5045_v8, %v10455_v12  ;;  %v5177_v8 = vld [vmem:[#allocation11 + $0x100] sm:$0xff] (!%p6774_p4)  ;;  %8853 = vmatpush1.bf16.msra.mxu0 (!%p6774_p4), %v8852_v6  ;;  %v5220_v62 = vld [vmem:[#allocation11 + $0x258] sm:$0xff] (!%p6774_p4)  ;;  %v9000_v6 = vpack.c.bf16 (!%p6774_p4), %v5215_v36, %v5211_v17  ;;  %v5120_v17 = vrot.slane (!%p6774_p4), %v5107_v53, %v12583_v59  ;;  %v5247_v36 = vld [vmem:[#allocation11 + $0x330] sm:$0xff] (!%p6774_p4) }
 0x5dc   : > { %v5060_v34 = vrot.slane %v5046_v9, %v10455_v12  ;;  %5068 = sbr.rel (%p6774_p4) target bundleno = 2800 (0xaf0), region = 96  ;;  %v5179_v9 = vld [vmem:[#allocation11 + $0x110] sm:$0xff] (!%p6774_p4)  ;;  %v8856_v19 = vpack.c.bf16 (!%p6774_p4), %v5181_v31, %v5177_v8  ;;  %8981 = vmatpush1.bf16.msra.mxu1 (!%p6774_p4), %v8980_v29  ;;  %8855 = vmatprep.subr.bf16.mxu0 (!%p6774_p4), %v8854_v7  ;;  %v8874_v29 = vpack.c.bf16 (!%p6774_p4), %v5222_v38, %v5218_v60  ;;  %v5217_v7 = vld [vmem:[#allocation11 + $0x240] sm:$0xff] (!%p6774_p4)  ;;  %v5250_v60 = vld [vmem:[#allocation11 + $0x348] sm:$0xff] (!%p6774_p4) }
 0x5dd   : > { %v5221_v8 = vld [vmem:[#allocation11 + $0x260] sm:$0xff] (!%p6774_p4)  ;;  %v5219_v31 = vld [vmem:[#allocation11 + $0x250] sm:$0xff] (!%p6774_p4)  ;;  %v5254_v38 = vld [vmem:[#allocation11 + $0x368] sm:$0xff] (!%p6774_p4) }
 0x5de   : > { %v5061_v15 = vcombine.low %v5053_v11, %v5060_v34  ;;  %v8982_v11 = vpack.c.bf16 (!%p6774_p4), %v5184_v27, %v5180_v2  ;;  %v5183_v34 = vld [vmem:[#allocation11 + $0x130] sm:$0xff] (!%p6774_p4)  ;;  %v5224_v2 = vld [vmem:[#allocation11 + $0x278] sm:$0xff] (!%p6774_p4)  ;;  %v8872_v27 = vpack.c.bf16 (!%p6774_p4), %v5213_v33, %v5209_v57  ;;  %v5116_v33 = vrot.slane (!%p6774_p4), %v5107_v53, %v12580_v37 }
 0x5df   : > { %v8984_v4 = vpack.c.bf16 (!%p6774_p4), %v5183_v34, %v5179_v9  ;;  %8857 = vmatpush1.bf16.msra.mxu0 (!%p6774_p4), %v8856_v19  ;;  %v9002_v9 = vpack.c.bf16 (!%p6774_p4), %v5224_v2, %v5220_v62  ;;  %v5226_v34 = vld [vmem:[#allocation11 + $0x288] sm:$0xff] (!%p6774_p4)  ;;  %v5225_v19 = vld [vmem:[#allocation11 + $0x280] sm:$0xff] (!%p6774_p4) }
 0x5e0   : > { %v5063_v16 = vadd.f32 %v5061_v15, %v536_v13  ;;  %v5186_v13 = vld [vmem:[#allocation11 + $0x148] sm:$0xff] (!%p6774_p4)  ;;  %8983 = vmatprep.subr.bf16.mxu1 (!%p6774_p4), %v8982_v11  ;;  %v5223_v11 = vld [vmem:[#allocation11 + $0x270] sm:$0xff] (!%p6774_p4) }
 0x5e1   : > { %v5190_v15 = vld [vmem:[#allocation11 + $0x168] sm:$0xff] (!%p6774_p4)  ;;  %8985 = vmatpush1.bf16.msra.mxu1 (!%p6774_p4), %v8984_v4  ;;  %v5229_v4 = vld [vmem:[#allocation11 + $0x2a0] sm:$0xff] (!%p6774_p4) }
 0x5e2   : > { %5064 = vst [vmem:[#allocation2] sm:$0xff] %v5063_v16  ;;  %v5188_v16 = vld [vmem:[#allocation11 + $0x158] sm:$0xff] (!%p6774_p4)  ;;  %v8858_v20 = vpack.c.bf16 (!%p6774_p4), %v5190_v15, %v5186_v13  ;;  %v5230_v13 = vld [vmem:[#allocation11 + $0x2a8] sm:$0xff] (!%p6774_p4)  ;;  %v8880_v5 = vpack.c.bf16 (!%p6774_p4), %v5229_v4, %v5225_v19 }
 0x5e3   : > { %v8986_v23 = vpack.c.bf16 %v5192_v18, %v5188_v16  ;;  %v5228_v15 = vld [vmem:[#allocation11 + $0x298] sm:$0xff]  ;;  %v8876_v18 = vpack.c.bf16 %v5221_v8, %v5217_v7  ;;  %v8878_v21 = vpack.c.bf16 %v5230_v13, %v5226_v34 }
 0x5e4   : > { %8859 = vmatprep.subr.bf16.mxu0 %v8858_v20  ;;  %v5232_v16 = vld [vmem:[#allocation11 + $0x2b8] sm:$0xff]  ;;  %v9004_v20 = vpack.c.bf16 %v5223_v11, %v5219_v31  ;;  %v5249_v31 = vld [vmem:[#allocation11 + $0x340] sm:$0xff] }
 0x5e5   : > { %8987 = vmatprep.subr.bf16.mxu1 %v8986_v23  ;;  %8861 = vmatpush1.bf16.msra.mxu0 %v8860_v3  ;;  %v5234_v23 = vld [vmem:[#allocation11 + $0x2c8] sm:$0xff]  ;;  %v9006_v43 = vpack.c.bf16 %v5232_v16, %v5228_v15  ;;  %v5237_v3 = vld [vmem:[#allocation11 + $0x2e0] sm:$0xff]  ;;  %v8890_v15 = vpack.c.bf16 %v5254_v38, %v5250_v60 }
 0x5e6   : > { %8989 = vmatpush1.bf16.msra.mxu1 %v8988_v52  ;;  %8863 = vmatprep.subr.bf16.mxu0 %v8862_v28  ;;  %v5235_v52 = vld [vmem:[#allocation11 + $0x2d0] sm:$0xff]  ;;  %v12577_v28 = vsub.s32 0, %v10444_v63  ;;  %v8882_v40 = vpack.c.bf16 %v5238_v24, %v5234_v23  ;;  %v5253_v16 = vld [vmem:[#allocation11 + $0x360] sm:$0xff]  ;;  %v5260_v24 = vld [vmem:[#allocation11 + $0x398] sm:$0xff] }
 0x5e7   : > { %8991 = vmatprep.subr.bf16.mxu1 %v8990_v35  ;;  %v5246_v35 = vld [vmem:[#allocation11 + $0x328] sm:$0xff]  ;;  %v9012_v45 = vpack.c.bf16 %v5239_v30, %v5235_v52  ;;  %v5257_v30 = vld [vmem:[#allocation11 + $0x380] sm:$0xff] }
 0x5e8   : > { %v8886_v46 = vpack.c.bf16 %v5246_v35, %v5242_v32  ;;  %v5112_v57 = vrot.slane %v5107_v53, %v12577_v28  ;;  %v5261_v32 = vld [vmem:[#allocation11 + $0x3a0] sm:$0xff]  ;;  %v5259_v35 = vld [vmem:[#allocation11 + $0x390] sm:$0xff] }
 0x5e9   : > { %8865 = vmatpush1.bf16.msra.mxu0 %v8864_v41  ;;  %v9010_v41 = vpack.c.bf16 %v5240_v47, %v5236_v0  ;;  %v5069_v19 = vld [vmem:[#allocation2] sm:$0xff]  ;;  %v5264_v0 = vld [vmem:[#allocation11 + $0x3b8] sm:$0xff]  ;;  %v8892_v47 = vpack.c.bf16 %v5253_v16, %v5249_v31  ;;  %v5286_v31 = vld [vmem:[#allocation11 + $0x468] sm:$0xff] }
 0x5ea   : > { %8993 = vmatpush1.bf16.msra.mxu1 %v8992_v1  ;;  %8867 = vmatprep.subr.bf16.mxu0 %v8866_v42  ;;  %v5244_v1 = vld [vmem:[#allocation11 + $0x318] sm:$0xff]  ;;  %v8884_v42 = vpack.c.bf16 %v5237_v3, %v5233_v25  ;;  %v5125_v7 = vcombine.low %v5112_v57, %v5116_v33  ;;  %v5274_v57 = vld [vmem:[#allocation11 + $0x408] sm:$0xff] }
 0x5eb   : > { %8995 = vmatprep.subr.bf16.mxu1 %v8994_v50  ;;  %v5070_v50 = vld [vmem:[#allocation8] sm:$0xf]  ;;  %v5278_v33 = vld [vmem:[#allocation11 + $0x428] sm:$0xff] }
 0x5ec   : > { %v5075_v26 = vrot.slane %v5070_v50, %v12577_v28  ;;  %v5079_v54 = vrot.slane %v5070_v50, %v12580_v37  ;;  %v5083_v55 = vrot.slane %v5070_v50, %v12583_v59  ;;  %v5087_v10 = vrot.slane %v5070_v50, %v12586_v39 }
 0x5ed   : > { %8869 = vmatpush1.bf16.msra.mxu0 %v8868_v56  ;;  %v5241_v56 = vld [vmem:[#allocation11 + $0x300] sm:$0xff]  ;;  %v5133_v4 = vrot.slane %v5125_v7, %v10455_v12  ;;  %v5279_v7 = vld [vmem:[#allocation11 + $0x430] sm:$0xff] }
 0x5ee   : > { %8997 = vmatpush1.bf16.msra.mxu1 %v8996_v44  ;;  %8871 = vmatprep.subr.bf16.mxu0 %v8870_v14  ;;  %v5245_v44 = vld [vmem:[#allocation11 + $0x320] sm:$0xff]  ;;  %v5243_v14 = vld [vmem:[#allocation11 + $0x310] sm:$0xff]  ;;  %v5088_v62 = vcombine.low %v5075_v26, %v5079_v54  ;;  %v5089_v2 = vcombine.low %v5083_v55, %v5087_v10 }
 0x5ef   : > { %8999 = vmatprep.subr.bf16.mxu1 %v8998_v58  ;;  %v9014_v58 = vpack.c.bf16 %v5248_v48, %v5244_v1  ;;  %v8888_v8 = vpack.c.bf16 %v5245_v44, %v5241_v56  ;;  %v9016_v13 = vpack.c.bf16 %v5247_v36, %v5243_v14  ;;  %v5270_v1 = vld [vmem:[#allocation11 + $0x3e8] sm:$0xff]  ;;  %v8896_v48 = vpack.c.bf16 %v5261_v32, %v5257_v30  ;;  %v5265_v54 = vld [vmem:[#allocation11 + $0x3c0] sm:$0xff]  ;;  %v5267_v10 = vld [vmem:[#allocation11 + $0x3d0] sm:$0xff] }
 0x5f0   : > { %v5103_v11 = vrot.slane %v5089_v2, %v10455_v12  ;;  %v5269_v55 = vld [vmem:[#allocation11 + $0x3e0] sm:$0xff]  ;;  %v5271_v44 = vld [vmem:[#allocation11 + $0x3f0] sm:$0xff]  ;;  %v5280_v36 = vld [vmem:[#allocation11 + $0x438] sm:$0xff] }
 0x5f1   : > { %8873 = vmatpush1.bf16.msra.mxu0 %v8872_v27  ;;  %v5124_v27 = vrot.slane %v5107_v53, %v12586_v39  ;;  %v8900_v60 = vpack.c.bf16 %v5269_v55, %v5265_v54  ;;  %v9028_v38 = vpack.c.bf16 %v5271_v44, %v5267_v10  ;;  %v5273_v2 = vld [vmem:[#allocation11 + $0x400] sm:$0xff]  ;;  %v5295_v32 = vld [vmem:[#allocation11 + $0x4b0] sm:$0xff]  ;;  %v5306_v54 = vld [vmem:[#allocation11 + $0x508] sm:$0xff] }
 0x5f2   : > { %9001 = vmatpush1.bf16.msra.mxu1 %v9000_v6  ;;  %8875 = vmatprep.subr.bf16.mxu0 %v8874_v29  ;;  %v5252_v6 = vld [vmem:[#allocation11 + $0x358] sm:$0xff]  ;;  %v5310_v55 = vld [vmem:[#allocation11 + $0x528] sm:$0xff] }
 0x5f3   : > { %9003 = vmatprep.subr.bf16.mxu1 %v9002_v9  ;;  %v5256_v29 = vld [vmem:[#allocation11 + $0x378] sm:$0xff]  ;;  %v5096_v9 = vrot.slane %v5088_v62, %v10455_v12  ;;  %v5126_v34 = vcombine.low %v5120_v17, %v5124_v27  ;;  %v8902_v62 = vpack.c.bf16 %v5278_v33, %v5274_v57  ;;  %v5277_v27 = vld [vmem:[#allocation11 + $0x420] sm:$0xff]  ;;  %v8918_v57 = vpack.c.bf16 %v5310_v55, %v5306_v54  ;;  %v5339_v55 = vld [vmem:[#allocation11 + $0x610] sm:$0xff] }
 0x5f4   : > { %v5308_v10 = vld [vmem:[#allocation11 + $0x518] sm:$0xff]  ;;  %v5305_v33 = vld [vmem:[#allocation11 + $0x500] sm:$0xff] }
 0x5f5   : > { %8877 = vmatpush1.bf16.msra.mxu0 %v8876_v18  ;;  %v5251_v18 = vld [vmem:[#allocation11 + $0x350] sm:$0xff]  ;;  %v5104_v23 = vcombine.low %v5096_v9, %v5103_v11  ;;  %v5284_v11 = vld [vmem:[#allocation11 + $0x458] sm:$0xff]  ;;  %v5341_v54 = vld [vmem:[#allocation11 + $0x620] sm:$0xff] }
 0x5f6   : > { %9005 = vmatpush1.bf16.msra.mxu1 %v9004_v20  ;;  %8879 = vmatprep.subr.bf16.mxu0 %v8878_v21  ;;  %v9018_v20 = vpack.c.bf16 %v5256_v29, %v5252_v6  ;;  %v5255_v21 = vld [vmem:[#allocation11 + $0x370] sm:$0xff] }
 0x5f7   : > { %9007 = vmatprep.subr.bf16.mxu1 %v9006_v43  ;;  %v5140_v43 = vrot.slane %v5126_v34, %v10455_v12  ;;  %v5106_v25 = vmul.f32 %v5104_v23, %v5069_v19  ;;  %v9020_v52 = vpack.c.bf16 %v5255_v21, %v5251_v18  ;;  %v5275_v6 = vld [vmem:[#allocation11 + $0x410] sm:$0xff]  ;;  %v5288_v34 = vld [vmem:[#allocation11 + $0x478] sm:$0xff]  ;;  %v5281_v18 = vld [vmem:[#allocation11 + $0x440] sm:$0xff] }
 0x5f8   : > { %v5285_v19 = vld [vmem:[#allocation11 + $0x460] sm:$0xff]  ;;  %v5287_v21 = vld [vmem:[#allocation11 + $0x470] sm:$0xff] }
 0x5f9   : > { %8881 = vmatpush1.bf16.msra.mxu0 %v8880_v5  ;;  %v5141_v3 = vcombine.low %v5133_v4, %v5140_v43  ;;  %v8894_v5 = vpack.c.bf16 %v5262_v22, %v5258_v51  ;;  %v5283_v4 = vld [vmem:[#allocation11 + $0x450] sm:$0xff]  ;;  %v5290_v51 = vld [vmem:[#allocation11 + $0x488] sm:$0xff]  ;;  %v5292_v43 = vld [vmem:[#allocation11 + $0x498] sm:$0xff] }
 0x5fa   : > { %9009 = vmatpush1.bf16.msra.mxu1 %v9008_v61  ;;  %8883 = vmatprep.subr.bf16.mxu0 %v8882_v40  ;;  %v9022_v61 = vpack.c.bf16 %v5264_v0, %v5260_v24  ;;  %v5263_v40 = vld [vmem:[#allocation11 + $0x3b0] sm:$0xff]  ;;  %v5294_v22 = vld [vmem:[#allocation11 + $0x4a8] sm:$0xff]  ;;  %v5296_v24 = vld [vmem:[#allocation11 + $0x4b8] sm:$0xff]  ;;  %v8908_v0 = vpack.c.bf16 %v5285_v19, %v5281_v18 }
 0x5fb   : > { %9011 = vmatprep.subr.bf16.mxu1 %v9010_v41  ;;  %v5266_v41 = vld [vmem:[#allocation11 + $0x3c8] sm:$0xff]  ;;  %v9024_v53 = vpack.c.bf16 %v5263_v40, %v5259_v35  ;;  %v9038_v30 = vpack.c.bf16 %v5296_v24, %v5292_v43  ;;  %v5300_v40 = vld [vmem:[#allocation11 + $0x4d8] sm:$0xff]  ;;  %v5327_v24 = vld [vmem:[#allocation11 + $0x5b0] sm:$0xff] }
 0x5fc   : > { %v8898_v26 = vpack.c.bf16 %v5270_v1, %v5266_v41  ;;  %v5298_v35 = vld [vmem:[#allocation11 + $0x4c8] sm:$0xff]  ;;  %v5304_v41 = vld [vmem:[#allocation11 + $0x4f8] sm:$0xff] }
 0x5fd   : > { %8885 = vmatpush1.bf16.msra.mxu0 %v8884_v42  ;;  %v5143_v42 = vadd.f32 %v5141_v3, %v5106_v25  ;;  %v8910_v25 = vpack.c.bf16 %v5294_v22, %v5290_v51  ;;  %v5289_v3 = vld [vmem:[#allocation11 + $0x480] sm:$0xff]  ;;  %v5324_v18 = vld [vmem:[#allocation11 + $0x598] sm:$0xff] }
 0x5fe   : > { %9013 = vmatpush1.bf16.msra.mxu1 %v9012_v45  ;;  %8887 = vmatprep.subr.bf16.mxu0 %v8886_v46  ;;  %v5268_v45 = vld [vmem:[#allocation11 + $0x3d8] sm:$0xff]  ;;  %v5321_v51 = vld [vmem:[#allocation11 + $0x580] sm:$0xff] }
 0x5ff   : > { %9015 = vmatprep.subr.bf16.mxu1 %v9014_v58  ;;  %v5272_v46 = vld [vmem:[#allocation11 + $0x3f8] sm:$0xff]  ;;  %5144 = vst [vmem:[#allocation17] sm:$0xff] %v5143_v42  ;;  %v5431_v50 = vrot.slane %v5143_v42, %v10455_v12  ;;  %v5424_v17 = vcombine.high %v5143_v42, %v5143_v42  ;;  %v5325_v22 = vld [vmem:[#allocation11 + $0x5a0] sm:$0xff] }
 0x600   : > { %v9026_v56 = vpack.c.bf16 %v5272_v46, %v5268_v45  ;;  %v5276_v58 = vld [vmem:[#allocation11 + $0x418] sm:$0xff]  ;;  %v5297_v46 = vld [vmem:[#allocation11 + $0x4c0] sm:$0xff] }
 0x601   : > { %8889 = vmatpush1.bf16.msra.mxu0 %v8888_v8  ;;  %v5439_v14 = vcombine.high %v5431_v50, %v5431_v50  ;;  %v9030_v29 = vpack.c.bf16 %v5280_v36, %v5276_v58  ;;  %v5282_v8 = vld [vmem:[#allocation11 + $0x448] sm:$0xff]  ;;  %v12602_v9 = vrot.slane %v5424_v17, %v10455_v12  ;;  %v5309_v17 = vld [vmem:[#allocation11 + $0x520] sm:$0xff]  ;;  %v5307_v58 = vld [vmem:[#allocation11 + $0x510] sm:$0xff] }
 0x602   : > { %9017 = vmatpush1.bf16.msra.mxu1 %v9016_v13  ;;  %8891 = vmatprep.subr.bf16.mxu0 %v8890_v15  ;;  %v8904_v13 = vpack.c.bf16 %v5277_v27, %v5273_v2  ;;  %v9032_v15 = vpack.c.bf16 %v5279_v7, %v5275_v6  ;;  %v8906_v16 = vpack.c.bf16 %v5286_v31, %v5282_v8  ;;  %v5316_v2 = vld [vmem:[#allocation11 + $0x558] sm:$0xff]  ;;  %v5313_v8 = vld [vmem:[#allocation11 + $0x540] sm:$0xff] }
 0x603   : > { %9019 = vmatprep.subr.bf16.mxu1 %v9018_v20  ;;  %5509 = vmatprep.mubr.f32.mxu0 %v5439_v14  ;;  %v9034_v20 = vpack.c.bf16 %v5288_v34, %v5284_v11  ;;  %v5440_v23 = vcombine.high %v12602_v9, %v12602_v9  ;;  %v5320_v27 = vld [vmem:[#allocation11 + $0x578] sm:$0xff]  ;;  %v8920_v6 = vpack.c.bf16 %v5309_v17, %v5305_v33  ;;  %v5317_v31 = vld [vmem:[#allocation11 + $0x560] sm:$0xff]  ;;  %v5315_v11 = vld [vmem:[#allocation11 + $0x550] sm:$0xff] }
 0x604   : > { %5651 = vmatprep.mubr.f32.mxu1 %v5439_v14  ;;  %v9050_v34 = vpack.c.bf16 %v5320_v27, %v5316_v2  ;;  %v5328_v19 = vld [vmem:[#allocation11 + $0x5b8] sm:$0xff]  ;;  %v5351_v27 = vld [vmem:[#allocation11 + $0x670] sm:$0xff] }
 0x605   : > { %8893 = vmatpush1.bf16.msra.mxu0 %v8892_v47  ;;  %v9036_v47 = vpack.c.bf16 %v5287_v21, %v5283_v4  ;;  %v8924_v4 = vpack.c.bf16 %v5317_v31, %v5313_v8  ;;  %v9054_v43 = vpack.c.bf16 %v5328_v19, %v5324_v18  ;;  %v5352_v33 = vld [vmem:[#allocation11 + $0x678] sm:$0xff]  ;;  %v5359_v19 = vld [vmem:[#allocation11 + $0x6b0] sm:$0xff] }
 0x606   : > { %9021 = vmatpush1.bf16.msra.mxu1 %v9020_v52  ;;  %8895 = vmatprep.subr.bf16.mxu0 %v8894_v5  ;;  %v5293_v52 = vld [vmem:[#allocation11 + $0x4a0] sm:$0xff]  ;;  %v5291_v5 = vld [vmem:[#allocation11 + $0x490] sm:$0xff]  ;;  %v5360_v8 = vld [vmem:[#allocation11 + $0x6b8] sm:$0xff] }
 0x607   : > { %9023 = vmatprep.subr.bf16.mxu1 %v9022_v61  ;;  %v5302_v61 = vld [vmem:[#allocation11 + $0x4e8] sm:$0xff]  ;;  %v8912_v1 = vpack.c.bf16 %v5293_v52, %v5289_v3  ;;  %v9040_v42 = vpack.c.bf16 %v5295_v32, %v5291_v5  ;;  %v5336_v3 = vld [vmem:[#allocation11 + $0x5f8] sm:$0xff]  ;;  %v8928_v52 = vpack.c.bf16 %v5325_v22, %v5321_v51  ;;  %v5329_v32 = vld [vmem:[#allocation11 + $0x5c0] sm:$0xff] }
 0x608   : > { %v8914_v45 = vpack.c.bf16 %v5302_v61, %v5298_v35  ;;  %v5333_v35 = vld [vmem:[#allocation11 + $0x5e0] sm:$0xff]  ;;  %v5331_v61 = vld [vmem:[#allocation11 + $0x5d0] sm:$0xff]  ;;  %v5368_v51 = vld [vmem:[#allocation11 + $0x6f8] sm:$0xff] }
 0x609   : > { %8897 = vmatpush1.bf16.msra.mxu0 %v8896_v48  ;;  %v5301_v48 = vld [vmem:[#allocation11 + $0x4e0] sm:$0xff] }
 0x60a   : > { %9025 = vmatpush1.bf16.msra.mxu1 %v9024_v53  ;;  %8899 = vmatprep.subr.bf16.mxu0 %v8898_v26  ;;  %v9042_v53 = vpack.c.bf16 %v5304_v41, %v5300_v40  ;;  %v5303_v26 = vld [vmem:[#allocation11 + $0x4f0] sm:$0xff]  ;;  %v8916_v44 = vpack.c.bf16 %v5301_v48, %v5297_v46  ;;  %v5344_v46 = vld [vmem:[#allocation11 + $0x638] sm:$0xff]  ;;  %v8932_v48 = vpack.c.bf16 %v5333_v35, %v5329_v32 }
 0x60b   : > { %9027 = vmatprep.subr.bf16.mxu1 %v9026_v56  ;;  %v5312_v56 = vld [vmem:[#allocation11 + $0x538] sm:$0xff]  ;;  %v5335_v41 = vld [vmem:[#allocation11 + $0x5f0] sm:$0xff] }
 0x60c   : > { %v9046_v36 = vpack.c.bf16 %v5312_v56, %v5308_v10  ;;  %v5343_v56 = vld [vmem:[#allocation11 + $0x630] sm:$0xff]  ;;  %v5376_v32 = vld [vmem:[#allocation11 + $0x738] sm:$0xff] }
 0x60d   : > { %8901 = vmatpush1.bf16.msra.mxu0 %v8900_v60  ;;  %v5311_v60 = vld [vmem:[#allocation11 + $0x530] sm:$0xff] }
 0x60e   : > { %9029 = vmatpush1.bf16.msra.mxu1 %v9028_v38  ;;  %8903 = vmatprep.subr.bf16.mxu0 %v8902_v62  ;;  %v5314_v38 = vld [vmem:[#allocation11 + $0x548] sm:$0xff] }
 0x60f   : > { %9031 = vmatprep.subr.bf16.mxu1 %v9030_v29  ;;  %v5318_v62 = vld [vmem:[#allocation11 + $0x568] sm:$0xff]  ;;  %v9048_v29 = vpack.c.bf16 %v5311_v60, %v5307_v58  ;;  %v9064_v58 = vpack.c.bf16 %v5343_v56, %v5339_v55  ;;  %v5345_v60 = vld [vmem:[#allocation11 + $0x640] sm:$0xff] }
 0x610   : > { %5510 = vmatmul.mubr.f32.vlgmr.msra.gmra.mrb[0].mxu0 %v5431_v50  ;;  %v8922_v7 = vpack.c.bf16 %v5318_v62, %v5314_v38  ;;  %v5349_v38 = vld [vmem:[#allocation11 + $0x660] sm:$0xff]  ;;  %v5347_v62 = vld [vmem:[#allocation11 + $0x650] sm:$0xff] }
 0x611   : > { %8905 = vmatpush1.bf16.msra.mxu0 %v8904_v13  ;;  %5652 = vmatmul.mubr.f32.vlgmr.msra.gmra.mrb[0].mxu1 %v5431_v50  ;;  %v5299_v50 = vld [vmem:[#allocation11 + $0x4d0] sm:$0xff]  ;;  %v8940_v31 = vpack.c.bf16 %v5349_v38, %v5345_v60  ;;  %v5377_v56 = vld [vmem:[#allocation11 + $0x740] sm:$0xff]  ;;  %v5392_v60 = vld [vmem:[#allocation11 + $0x7b8] sm:$0xff] }
 0x612   : > { %9033 = vmatpush1.bf16.msra.mxu1 %v9032_v15  ;;  %8907 = vmatprep.subr.bf16.mxu0 %v8906_v16  ;;  %v9044_v14 = vpack.c.bf16 %v5303_v26, %v5299_v50  ;;  %v5319_v13 = vld [vmem:[#allocation11 + $0x570] sm:$0xff]  ;;  %v5322_v15 = vld [vmem:[#allocation11 + $0x588] sm:$0xff]  ;;  %v9060_v50 = vpack.c.bf16 %v5335_v41, %v5331_v61  ;;  %v5337_v26 = vld [vmem:[#allocation11 + $0x600] sm:$0xff] }
 0x613   : > { %9035 = vmatprep.subr.bf16.mxu1 %v9034_v20  ;;  %5580 = vmatprep.mubr.f32.mxu0 %v5440_v23  ;;  %v5326_v16 = vld [vmem:[#allocation11 + $0x5a8] sm:$0xff]  ;;  %v9052_v20 = vpack.c.bf16 %v5319_v13, %v5315_v11  ;;  %v8936_v17 = vpack.c.bf16 %v5341_v54, %v5337_v26  ;;  %v9068_v11 = vpack.c.bf16 %v5351_v27, %v5347_v62  ;;  %v5353_v13 = vld [vmem:[#allocation11 + $0x680] sm:$0xff]  ;;  %v5384_v26 = vld [vmem:[#allocation11 + $0x778] sm:$0xff] }
 0x614   : > { %5722 = vmatprep.mubr.f32.mxu1 %v5440_v23  ;;  %v8926_v21 = vpack.c.bf16 %v5326_v16, %v5322_v15  ;;  %v5323_v23 = vld [vmem:[#allocation11 + $0x590] sm:$0xff]  ;;  %v5357_v15 = vld [vmem:[#allocation11 + $0x6a0] sm:$0xff] }
 0x615   : > { %8909 = vmatpush1.bf16.msra.mxu0 %v8908_v0  ;;  %v5330_v0 = vld [vmem:[#allocation11 + $0x5c8] sm:$0xff]  ;;  %v9056_v5 = vpack.c.bf16 %v5327_v24, %v5323_v23  ;;  %v5355_v16 = vld [vmem:[#allocation11 + $0x690] sm:$0xff]  ;;  %v8944_v22 = vpack.c.bf16 %v5357_v15, %v5353_v13  ;;  %v5361_v24 = vld [vmem:[#allocation11 + $0x6c0] sm:$0xff] }
 0x616   : > { %9037 = vmatpush1.bf16.msra.mxu1 %v9036_v47  ;;  %8911 = vmatprep.subr.bf16.mxu0 %v8910_v25  ;;  %v5334_v47 = vld [vmem:[#allocation11 + $0x5e8] sm:$0xff]  ;;  %v5332_v25 = vld [vmem:[#allocation11 + $0x5d8] sm:$0xff]  ;;  %v9072_v23 = vpack.c.bf16 %v5359_v19, %v5355_v16  ;;  %v5369_v41 = vld [vmem:[#allocation11 + $0x700] sm:$0xff] }
 0x617   : > { %9039 = vmatprep.subr.bf16.mxu1 %v9038_v30  ;;  %v8930_v30 = vpack.c.bf16 %v5334_v47, %v5330_v0  ;;  %v9058_v40 = vpack.c.bf16 %v5336_v3, %v5332_v25  ;;  %v5365_v0 = vld [vmem:[#allocation11 + $0x6e0] sm:$0xff]  ;;  %v5363_v47 = vld [vmem:[#allocation11 + $0x6d0] sm:$0xff]  ;;  %v5400_v13 = vld [vmem:[#allocation11 + $0x7f8] sm:$0xff] }
 0x618   : > { %v5367_v3 = vld [vmem:[#allocation11 + $0x6f0] sm:$0xff]  ;;  %v8948_v35 = vpack.c.bf16 %v5365_v0, %v5361_v24  ;;  %v5385_v27 = vld [vmem:[#allocation11 + $0x780] sm:$0xff]  ;;  %v5788_v24 = vld [vmem:[%s13559_s7 + $0x58] sm:$0xff] }
 0x619   : > { %8913 = vmatpush1.bf16.msra.mxu0 %v8912_v1  ;;  %v5338_v1 = vld [vmem:[#allocation11 + $0x608] sm:$0xff]  ;;  %v9076_v61 = vpack.c.bf16 %v5367_v3, %v5363_v47  ;;  %v5393_v19 = vld [vmem:[#allocation11 + $0x7c0] sm:$0xff]  ;;  %v5777_v3 = vld [vmem:[%s13559_s7] sm:$0xff] }
 0x61a   : > { %9041 = vmatpush1.bf16.msra.mxu1 %v9040_v42  ;;  %8915 = vmatprep.subr.bf16.mxu0 %v8914_v45  ;;  %v5342_v42 = vld [vmem:[#allocation11 + $0x628] sm:$0xff]  ;;  %v5340_v45 = vld [vmem:[#allocation11 + $0x618] sm:$0xff] }
 0x61b   : > { %9043 = vmatprep.subr.bf16.mxu1 %v9042_v53  ;;  %v8934_v53 = vpack.c.bf16 %v5342_v42, %v5338_v1  ;;  %v9062_v10 = vpack.c.bf16 %v5344_v46, %v5340_v45  ;;  %v5373_v1 = vld [vmem:[#allocation11 + $0x720] sm:$0xff]  ;;  %v5371_v42 = vld [vmem:[#allocation11 + $0x710] sm:$0xff] }
 0x61c   : > { %v5375_v46 = vld [vmem:[#allocation11 + $0x730] sm:$0xff]  ;;  %v8952_v54 = vpack.c.bf16 %v5373_v1, %v5369_v41  ;;  %v5804_v41 = vld [vmem:[%s13559_s7 + $0xd8] sm:$0xff] }
 0x61d   : > { %8917 = vmatpush1.bf16.msra.mxu0 %v8916_v44  ;;  %v5346_v44 = vld [vmem:[#allocation11 + $0x648] sm:$0xff]  ;;  %v9080_v55 = vpack.c.bf16 %v5375_v46, %v5371_v42  ;;  %v5793_v46 = vld [vmem:[%s13559_s7 + $0x80] sm:$0xff] }
 0x61e   : > { %9045 = vmatpush1.bf16.msra.mxu1 %v9044_v14  ;;  %8919 = vmatprep.subr.bf16.mxu0 %v8918_v57  ;;  %v5350_v14 = vld [vmem:[#allocation11 + $0x668] sm:$0xff]  ;;  %v5348_v57 = vld [vmem:[#allocation11 + $0x658] sm:$0xff] }
 0x61f   : > { %9047 = vmatprep.subr.bf16.mxu1 %v9046_v36  ;;  %v8938_v36 = vpack.c.bf16 %v5350_v14, %v5346_v44  ;;  %v9066_v2 = vpack.c.bf16 %v5352_v33, %v5348_v57  ;;  %v5381_v44 = vld [vmem:[#allocation11 + $0x760] sm:$0xff]  ;;  %v5379_v14 = vld [vmem:[#allocation11 + $0x750] sm:$0xff] }
 0x620   : > { %v5383_v33 = vld [vmem:[#allocation11 + $0x770] sm:$0xff]  ;;  %v8956_v38 = vpack.c.bf16 %v5381_v44, %v5377_v56  ;;  %v5820_v56 = vld [vmem:[%s13559_s7 + $0x158] sm:$0xff] }
 0x621   : > { %8921 = vmatpush1.bf16.msra.mxu0 %v8920_v6  ;;  %v5354_v6 = vld [vmem:[#allocation11 + $0x688] sm:$0xff]  ;;  %v9084_v62 = vpack.c.bf16 %v5383_v33, %v5379_v14  ;;  %v5809_v33 = vld [vmem:[%s13559_s7 + $0x100] sm:$0xff] }
 0x622   : > { %9049 = vmatpush1.bf16.msra.mxu1 %v9048_v29  ;;  %8923 = vmatprep.subr.bf16.mxu0 %v8922_v7  ;;  %v5358_v29 = vld [vmem:[#allocation11 + $0x6a8] sm:$0xff]  ;;  %v5356_v7 = vld [vmem:[#allocation11 + $0x698] sm:$0xff] }
 0x623   : > { %9051 = vmatprep.subr.bf16.mxu1 %v9050_v34  ;;  %v8942_v34 = vpack.c.bf16 %v5358_v29, %v5354_v6  ;;  %v9070_v18 = vpack.c.bf16 %v5360_v8, %v5356_v7  ;;  %v5389_v6 = vld [vmem:[#allocation11 + $0x7a0] sm:$0xff]  ;;  %v5387_v29 = vld [vmem:[#allocation11 + $0x790] sm:$0xff] }
 0x624   : > { %v5391_v8 = vld [vmem:[#allocation11 + $0x7b0] sm:$0xff]  ;;  %v8960_v15 = vpack.c.bf16 %v5389_v6, %v5385_v27 }
 0x625   : > { %8925 = vmatpush1.bf16.msra.mxu0 %v8924_v4  ;;  %v5362_v4 = vld [vmem:[#allocation11 + $0x6c8] sm:$0xff]  ;;  %v9088_v16 = vpack.c.bf16 %v5391_v8, %v5387_v29  ;;  %v5833_v8 = vld [vmem:[%s13559_s7 + $0x1c0] sm:$0xff] }
 0x626   : > { %9053 = vmatpush1.bf16.msra.mxu1 %v9052_v20  ;;  %8927 = vmatprep.subr.bf16.mxu0 %v8926_v21  ;;  %v5366_v20 = vld [vmem:[#allocation11 + $0x6e8] sm:$0xff]  ;;  %v5364_v21 = vld [vmem:[#allocation11 + $0x6d8] sm:$0xff] }
 0x627   : > { %9055 = vmatprep.subr.bf16.mxu1 %v9054_v43  ;;  %v8946_v43 = vpack.c.bf16 %v5366_v20, %v5362_v4  ;;  %v9074_v25 = vpack.c.bf16 %v5368_v51, %v5364_v21  ;;  %v5397_v4 = vld [vmem:[#allocation11 + $0x7e0] sm:$0xff]  ;;  %v5395_v20 = vld [vmem:[#allocation11 + $0x7d0] sm:$0xff] }
 0x628   : > { %v5399_v51 = vld [vmem:[#allocation11 + $0x7f0] sm:$0xff]  ;;  %v8964_v0 = vpack.c.bf16 %v5397_v4, %v5393_v19 }
 0x629   : > { %8929 = vmatpush1.bf16.msra.mxu0 %v8928_v52  ;;  %v5370_v52 = vld [vmem:[#allocation11 + $0x708] sm:$0xff]  ;;  %v9092_v47 = vpack.c.bf16 %v5399_v51, %v5395_v20  ;;  %v5849_v51 = vld [vmem:[%s13559_s7 + $0x240] sm:$0xff] }
 0x62a   : > { %9057 = vmatpush1.bf16.msra.mxu1 %v9056_v5  ;;  %8931 = vmatprep.subr.bf16.mxu0 %v8930_v30  ;;  %v5374_v5 = vld [vmem:[#allocation11 + $0x728] sm:$0xff]  ;;  %v5372_v30 = vld [vmem:[#allocation11 + $0x718] sm:$0xff] }
 0x62b   : > { %9059 = vmatprep.subr.bf16.mxu1 %v9058_v40  ;;  %v8950_v40 = vpack.c.bf16 %v5374_v5, %v5370_v52  ;;  %v9078_v45 = vpack.c.bf16 %v5376_v32, %v5372_v30  ;;  %v5785_v52 = vld [vmem:[%s13559_s7 + $0x40] sm:$0xff]  ;;  %v5779_v5 = vld [vmem:[%s13559_s7 + $0x10] sm:$0xff] }
 0x62c   : > { %v5787_v32 = vld [vmem:[%s13559_s7 + $0x50] sm:$0xff]  ;;  %v9096_v1 = vpack.c.bf16 %v5785_v52, %v5777_v3  ;;  %v5860_v3 = vld [vmem:[%s13559_s7 + $0x298] sm:$0xff] }
 0x62d   : > { %8933 = vmatpush1.bf16.msra.mxu0 %v8932_v48  ;;  %v5378_v48 = vld [vmem:[#allocation11 + $0x748] sm:$0xff]  ;;  %v9160_v42 = vpack.c.bf16 %v5787_v32, %v5779_v5  ;;  %v5865_v32 = vld [vmem:[%s13559_s7 + $0x2c0] sm:$0xff] }
 0x62e   : > { %9061 = vmatpush1.bf16.msra.mxu1 %v9060_v50  ;;  %8935 = vmatprep.subr.bf16.mxu0 %v8934_v53  ;;  %v5382_v50 = vld [vmem:[#allocation11 + $0x768] sm:$0xff]  ;;  %v5380_v53 = vld [vmem:[#allocation11 + $0x758] sm:$0xff] }
 0x62f   : > { %9063 = vmatprep.subr.bf16.mxu1 %v9062_v10  ;;  %v8954_v10 = vpack.c.bf16 %v5382_v50, %v5378_v48  ;;  %v9082_v57 = vpack.c.bf16 %v5384_v26, %v5380_v53  ;;  %v5801_v48 = vld [vmem:[%s13559_s7 + $0xc0] sm:$0xff]  ;;  %v5795_v50 = vld [vmem:[%s13559_s7 + $0x90] sm:$0xff]  ;;  %v5868_v5 = vld [vmem:[%s13559_s7 + $0x2d8] sm:$0xff] }
 0x630   : > { %v5803_v26 = vld [vmem:[%s13559_s7 + $0xd0] sm:$0xff]  ;;  %v9100_v44 = vpack.c.bf16 %v5801_v48, %v5793_v46  ;;  %v5876_v46 = vld [vmem:[%s13559_s7 + $0x318] sm:$0xff] }
 0x631   : > { %8937 = vmatpush1.bf16.msra.mxu0 %v8936_v17  ;;  %v5386_v17 = vld [vmem:[#allocation11 + $0x788] sm:$0xff]  ;;  %v9164_v14 = vpack.c.bf16 %v5803_v26, %v5795_v50  ;;  %v5881_v26 = vld [vmem:[%s13559_s7 + $0x340] sm:$0xff] }
 0x632   : > { %9065 = vmatpush1.bf16.msra.mxu1 %v9064_v58  ;;  %8939 = vmatprep.subr.bf16.mxu0 %v8938_v36  ;;  %v5390_v58 = vld [vmem:[#allocation11 + $0x7a8] sm:$0xff]  ;;  %v5388_v36 = vld [vmem:[#allocation11 + $0x798] sm:$0xff] }
 0x633   : > { %9067 = vmatprep.subr.bf16.mxu1 %v9066_v2  ;;  %v8958_v2 = vpack.c.bf16 %v5390_v58, %v5386_v17  ;;  %v9086_v7 = vpack.c.bf16 %v5392_v60, %v5388_v36  ;;  %v5817_v17 = vld [vmem:[%s13559_s7 + $0x140] sm:$0xff]  ;;  %v5811_v58 = vld [vmem:[%s13559_s7 + $0x110] sm:$0xff]  ;;  %v5826_v60 = vld [vmem:[%s13559_s7 + $0x188] sm:$0xff] }
 0x634   : > { %v5819_v36 = vld [vmem:[%s13559_s7 + $0x150] sm:$0xff]  ;;  %v9104_v27 = vpack.c.bf16 %v5817_v17, %v5809_v33  ;;  %v5884_v50 = vld [vmem:[%s13559_s7 + $0x358] sm:$0xff] }
 0x635   : > { %8941 = vmatpush1.bf16.msra.mxu0 %v8940_v31  ;;  %v5394_v31 = vld [vmem:[#allocation11 + $0x7c8] sm:$0xff]  ;;  %v9168_v6 = vpack.c.bf16 %v5819_v36, %v5811_v58  ;;  %v5897_v36 = vld [vmem:[%s13559_s7 + $0x3c0] sm:$0xff] }
 0x636   : > { %9069 = vmatpush1.bf16.msra.mxu1 %v9068_v11  ;;  %8943 = vmatprep.subr.bf16.mxu0 %v8942_v34  ;;  %v5398_v11 = vld [vmem:[#allocation11 + $0x7e8] sm:$0xff]  ;;  %v5396_v34 = vld [vmem:[#allocation11 + $0x7d8] sm:$0xff] }
 0x637   : > { %9071 = vmatprep.subr.bf16.mxu1 %v9070_v18  ;;  %v8962_v18 = vpack.c.bf16 %v5398_v11, %v5394_v31  ;;  %v9090_v21 = vpack.c.bf16 %v5400_v13, %v5396_v34  ;;  %v5827_v31 = vld [vmem:[%s13559_s7 + $0x190] sm:$0xff]  ;;  %v5842_v13 = vld [vmem:[%s13559_s7 + $0x208] sm:$0xff]  ;;  %v5892_v33 = vld [vmem:[%s13559_s7 + $0x398] sm:$0xff] }
 0x638   : > { %v5835_v34 = vld [vmem:[%s13559_s7 + $0x1d0] sm:$0xff]  ;;  %v5900_v58 = vld [vmem:[%s13559_s7 + $0x3d8] sm:$0xff] }
 0x639   : > { %8945 = vmatpush1.bf16.msra.mxu0 %v8944_v22  ;;  %v5778_v22 = vld [vmem:[%s13559_s7 + $0x8] sm:$0xff]  ;;  %v9172_v4 = vpack.c.bf16 %v5835_v34, %v5827_v31  ;;  %v5916_v31 = vld [vmem:[%s13559_s7 + $0x458] sm:$0xff]  ;;  %v5913_v34 = vld [vmem:[%s13559_s7 + $0x440] sm:$0xff] }
 0x63a   : > { %9073 = vmatpush1.bf16.msra.mxu1 %v9072_v23  ;;  %8947 = vmatprep.subr.bf16.mxu0 %v8946_v43  ;;  %v5786_v23 = vld [vmem:[%s13559_s7 + $0x48] sm:$0xff]  ;;  %v5780_v43 = vld [vmem:[%s13559_s7 + $0x18] sm:$0xff] }
 0x63b   : > { %9075 = vmatprep.subr.bf16.mxu1 %v9074_v25  ;;  %v9094_v25 = vpack.c.bf16 %v5786_v23, %v5778_v22  ;;  %v9158_v30 = vpack.c.bf16 %v5788_v24, %v5780_v43  ;;  %v5843_v23 = vld [vmem:[%s13559_s7 + $0x210] sm:$0xff] }
 0x63c   : > { %v5851_v43 = vld [vmem:[%s13559_s7 + $0x250] sm:$0xff] }
 0x63d   : > { %8949 = vmatpush1.bf16.msra.mxu0 %v8948_v35  ;;  %v5794_v35 = vld [vmem:[%s13559_s7 + $0x88] sm:$0xff] }
 0x63e   : > { %9077 = vmatpush1.bf16.msra.mxu1 %v9076_v61  ;;  %8951 = vmatprep.subr.bf16.mxu0 %v8950_v40  ;;  %v5802_v61 = vld [vmem:[%s13559_s7 + $0xc8] sm:$0xff]  ;;  %v5796_v40 = vld [vmem:[%s13559_s7 + $0x98] sm:$0xff] }
 0x63f   : > { %9079 = vmatprep.subr.bf16.mxu1 %v9078_v45  ;;  %v9098_v45 = vpack.c.bf16 %v5802_v61, %v5794_v35  ;;  %v9162_v53 = vpack.c.bf16 %v5804_v41, %v5796_v40  ;;  %v9178_v35 = vpack.c.bf16 %v5868_v5, %v5860_v3  ;;  %v5859_v40 = vld [vmem:[%s13559_s7 + $0x290] sm:$0xff]  ;;  %v5946_v5 = vld [vmem:[%s13559_s7 + $0x548] sm:$0xff] }
 0x640   : > { %v5867_v41 = vld [vmem:[%s13559_s7 + $0x2d0] sm:$0xff] }
 0x641   : > { %8953 = vmatpush1.bf16.msra.mxu0 %v8952_v54  ;;  %v5810_v54 = vld [vmem:[%s13559_s7 + $0x108] sm:$0xff] }
 0x642   : > { %9081 = vmatpush1.bf16.msra.mxu1 %v9080_v55  ;;  %8955 = vmatprep.subr.bf16.mxu0 %v8954_v10  ;;  %v5818_v55 = vld [vmem:[%s13559_s7 + $0x148] sm:$0xff]  ;;  %v5812_v10 = vld [vmem:[%s13559_s7 + $0x118] sm:$0xff] }
 0x643   : > { %9083 = vmatprep.subr.bf16.mxu1 %v9082_v57  ;;  %v9102_v57 = vpack.c.bf16 %v5818_v55, %v5810_v54  ;;  %v9182_v54 = vpack.c.bf16 %v5884_v50, %v5876_v46  ;;  %v5962_v50 = vld [vmem:[%s13559_s7 + $0x5c8] sm:$0xff] }
 0x645   : > { %8957 = vmatpush1.bf16.msra.mxu0 %v8956_v38  ;;  %v5834_v38 = vld [vmem:[%s13559_s7 + $0x1c8] sm:$0xff] }
 0x646   : > { %9085 = vmatpush1.bf16.msra.mxu1 %v9084_v62  ;;  %8959 = vmatprep.subr.bf16.mxu0 %v8958_v2  ;;  %v5828_v62 = vld [vmem:[%s13559_s7 + $0x198] sm:$0xff]  ;;  %v9106_v29 = vpack.c.bf16 %v5834_v38, %v5826_v60  ;;  %v9186_v60 = vpack.c.bf16 %v5900_v58, %v5892_v33  ;;  %v5978_v58 = vld [vmem:[%s13559_s7 + $0x648] sm:$0xff] }
 0x647   : > { %9087 = vmatprep.subr.bf16.mxu1 %v9086_v7  ;;  %v5836_v2 = vld [vmem:[%s13559_s7 + $0x1d8] sm:$0xff]  ;;  %v5825_v7 = vld [vmem:[%s13559_s7 + $0x180] sm:$0xff] }
 0x648   : > { %v9170_v11 = vpack.c.bf16 %v5836_v2, %v5828_v62  ;;  %v9108_v19 = vpack.c.bf16 %v5833_v8, %v5825_v7  ;;  %v5891_v62 = vld [vmem:[%s13559_s7 + $0x390] sm:$0xff]  ;;  %v5908_v7 = vld [vmem:[%s13559_s7 + $0x418] sm:$0xff] }
 0x649   : > { %8961 = vmatpush1.bf16.msra.mxu0 %v8960_v15  ;;  %v5850_v15 = vld [vmem:[%s13559_s7 + $0x248] sm:$0xff]  ;;  %v5899_v2 = vld [vmem:[%s13559_s7 + $0x3d0] sm:$0xff] }
 0x64a   : > { %9089 = vmatpush1.bf16.msra.mxu1 %v9088_v16  ;;  %8963 = vmatprep.subr.bf16.mxu0 %v8962_v18  ;;  %v5844_v16 = vld [vmem:[%s13559_s7 + $0x218] sm:$0xff]  ;;  %v9110_v20 = vpack.c.bf16 %v5850_v15, %v5842_v13  ;;  %v9190_v13 = vpack.c.bf16 %v5916_v31, %v5908_v7  ;;  %v5994_v31 = vld [vmem:[%s13559_s7 + $0x6c8] sm:$0xff] }
 0x64b   : > { %9091 = vmatprep.subr.bf16.mxu1 %v9090_v21  ;;  %v5852_v18 = vld [vmem:[%s13559_s7 + $0x258] sm:$0xff]  ;;  %v5841_v21 = vld [vmem:[%s13559_s7 + $0x200] sm:$0xff] }
 0x64c   : > { %v9174_v22 = vpack.c.bf16 %v5852_v18, %v5844_v16  ;;  %v9112_v24 = vpack.c.bf16 %v5849_v51, %v5841_v21  ;;  %v5907_v16 = vld [vmem:[%s13559_s7 + $0x410] sm:$0xff]  ;;  %v5924_v21 = vld [vmem:[%s13559_s7 + $0x498] sm:$0xff] }
 0x64d   : > { %8965 = vmatpush1.bf16.msra.mxu0 %v8964_v0  ;;  %v9176_v0 = vpack.c.bf16 %v5851_v43, %v5843_v23  ;;  %v5915_v18 = vld [vmem:[%s13559_s7 + $0x450] sm:$0xff]  ;;  %v5921_v23 = vld [vmem:[%s13559_s7 + $0x480] sm:$0xff] }
 0x64e   : > { %9093 = vmatpush1.bf16.msra.mxu1 %v9092_v47  ;;  %9095 = vmatprep.subr.bf16.mxu0 %v9094_v25  ;;  %v5858_v47 = vld [vmem:[%s13559_s7 + $0x288] sm:$0xff]  ;;  %v5929_v43 = vld [vmem:[%s13559_s7 + $0x4c0] sm:$0xff] }
 0x64f   : > { %9159 = vmatprep.subr.bf16.mxu1 %v9158_v30  ;;  %v5866_v25 = vld [vmem:[%s13559_s7 + $0x2c8] sm:$0xff]  ;;  %v5857_v30 = vld [vmem:[%s13559_s7 + $0x280] sm:$0xff] }
 0x650   : > { %5581 = vmatmul.mubr.f32.vlgmr.msra.gmra.mrb[0].mxu0 %v12602_v9  ;;  %v9114_v52 = vpack.c.bf16 %v5866_v25, %v5858_v47  ;;  %v9116_v61 = vpack.c.bf16 %v5865_v32, %v5857_v30  ;;  %v5923_v47 = vld [vmem:[%s13559_s7 + $0x490] sm:$0xff]  ;;  %v5940_v30 = vld [vmem:[%s13559_s7 + $0x518] sm:$0xff] }
 0x651   : > { %5723 = vmatmul.mubr.f32.vlgmr.msra.gmra.mrb[0].mxu1 %v12602_v9  ;;  %9097 = vmatpush1.bf16.msra.mxu0 %v9096_v1  ;;  %v9166_v9 = vpack.c.bf16 %v5820_v56, %v5812_v10  ;;  %v9180_v1 = vpack.c.bf16 %v5867_v41, %v5859_v40  ;;  %v5875_v10 = vld [vmem:[%s13559_s7 + $0x310] sm:$0xff]  ;;  %v5945_v40 = vld [vmem:[%s13559_s7 + $0x540] sm:$0xff] }
 0x652   : > { %9161 = vmatpush1.bf16.msra.mxu1 %v9160_v42  ;;  %9099 = vmatprep.subr.bf16.mxu0 %v9098_v45  ;;  %v5874_v42 = vld [vmem:[%s13559_s7 + $0x308] sm:$0xff]  ;;  %v5883_v56 = vld [vmem:[%s13559_s7 + $0x350] sm:$0xff] }
 0x653   : > { %9163 = vmatprep.subr.bf16.mxu1 %v9162_v53  ;;  %v5882_v45 = vld [vmem:[%s13559_s7 + $0x348] sm:$0xff]  ;;  %v5873_v53 = vld [vmem:[%s13559_s7 + $0x300] sm:$0xff]  ;;  %v5931_v25 = vld [vmem:[%s13559_s7 + $0x4d0] sm:$0xff] }
 0x654   : > { %v9118_v48 = vpack.c.bf16 %v5882_v45, %v5874_v42  ;;  %v9120_v55 = vpack.c.bf16 %v5881_v26, %v5873_v53  ;;  %v9196_v3 = vpack.c.bf16 %v5931_v25, %v5923_v47  ;;  %v5939_v42 = vld [vmem:[%s13559_s7 + $0x510] sm:$0xff]  ;;  %v5956_v53 = vld [vmem:[%s13559_s7 + $0x598] sm:$0xff]  ;;  %v6009_v47 = vld [vmem:[%s13559_s7 + $0x740] sm:$0xff] }
 0x655   : > { %9101 = vmatpush1.bf16.msra.mxu0 %v9100_v44  ;;  %v9184_v44 = vpack.c.bf16 %v5883_v56, %v5875_v10  ;;  %v5947_v45 = vld [vmem:[%s13559_s7 + $0x550] sm:$0xff]  ;;  %v5961_v10 = vld [vmem:[%s13559_s7 + $0x5c0] sm:$0xff] }
 0x656   : > { %9165 = vmatpush1.bf16.msra.mxu1 %v9164_v14  ;;  %9103 = vmatprep.subr.bf16.mxu0 %v9102_v57  ;;  %v5890_v14 = vld [vmem:[%s13559_s7 + $0x388] sm:$0xff]  ;;  %v9200_v46 = vpack.c.bf16 %v5947_v45, %v5939_v42  ;;  %v6025_v45 = vld [vmem:[%s13559_s7 + $0x7c0] sm:$0xff] }
 0x657   : > { %9167 = vmatprep.subr.bf16.mxu1 %v9166_v9  ;;  %v5898_v57 = vld [vmem:[%s13559_s7 + $0x3c8] sm:$0xff]  ;;  %v5889_v9 = vld [vmem:[%s13559_s7 + $0x380] sm:$0xff] }
 0x658   : > { %v9122_v17 = vpack.c.bf16 %v5898_v57, %v5890_v14  ;;  %v9124_v38 = vpack.c.bf16 %v5897_v36, %v5889_v9  ;;  %v5955_v14 = vld [vmem:[%s13559_s7 + $0x590] sm:$0xff]  ;;  %v5972_v9 = vld [vmem:[%s13559_s7 + $0x618] sm:$0xff] }
 0x659   : > { %9105 = vmatpush1.bf16.msra.mxu0 %v9104_v27  ;;  %v9188_v27 = vpack.c.bf16 %v5899_v2, %v5891_v62  ;;  %v5963_v57 = vld [vmem:[%s13559_s7 + $0x5d0] sm:$0xff]  ;;  %v5977_v62 = vld [vmem:[%s13559_s7 + $0x640] sm:$0xff] }
 0x65a   : > { %9169 = vmatpush1.bf16.msra.mxu1 %v9168_v6  ;;  %9107 = vmatprep.subr.bf16.mxu0 %v9106_v29  ;;  %v5906_v6 = vld [vmem:[%s13559_s7 + $0x408] sm:$0xff]  ;;  %v9204_v33 = vpack.c.bf16 %v5963_v57, %v5955_v14  ;;  %v5401_v14 = vld [vmem:[#allocation12] sm:$0xf] }
 0x65b   : > { %9171 = vmatprep.subr.bf16.mxu1 %v9170_v11  ;;  %v5914_v29 = vld [vmem:[%s13559_s7 + $0x448] sm:$0xff]  ;;  %v5905_v11 = vld [vmem:[%s13559_s7 + $0x400] sm:$0xff]  ;;  %v5406_v57 = vrot.slane %v5401_v14, %v12577_v28 }
 0x65c   : > { %v9126_v8 = vpack.c.bf16 %v5914_v29, %v5906_v6  ;;  %v9128_v15 = vpack.c.bf16 %v5913_v34, %v5905_v11  ;;  %v5971_v6 = vld [vmem:[%s13559_s7 + $0x610] sm:$0xff]  ;;  %v5988_v11 = vld [vmem:[%s13559_s7 + $0x698] sm:$0xff] }
 0x65d   : > { %9109 = vmatpush1.bf16.msra.mxu0 %v9108_v19  ;;  %v9192_v19 = vpack.c.bf16 %v5915_v18, %v5907_v16  ;;  %v5979_v29 = vld [vmem:[%s13559_s7 + $0x650] sm:$0xff]  ;;  %v5993_v16 = vld [vmem:[%s13559_s7 + $0x6c0] sm:$0xff] }
 0x65e   : > { %9173 = vmatpush1.bf16.msra.mxu1 %v9172_v4  ;;  %9111 = vmatprep.subr.bf16.mxu0 %v9110_v20  ;;  %v5922_v4 = vld [vmem:[%s13559_s7 + $0x488] sm:$0xff]  ;;  %v9208_v7 = vpack.c.bf16 %v5979_v29, %v5971_v6 }
 0x65f   : > { %9175 = vmatprep.subr.bf16.mxu1 %v9174_v22  ;;  %v5930_v20 = vld [vmem:[%s13559_s7 + $0x4c8] sm:$0xff]  ;;  %v5932_v22 = vld [vmem:[%s13559_s7 + $0x4d8] sm:$0xff] }
 0x660   : > { %v9130_v51 = vpack.c.bf16 %v5930_v20, %v5922_v4  ;;  %v5987_v4 = vld [vmem:[%s13559_s7 + $0x690] sm:$0xff] }
 0x661   : > { %9113 = vmatpush1.bf16.msra.mxu0 %v9112_v24  ;;  %v9194_v24 = vpack.c.bf16 %v5932_v22, %v5924_v21  ;;  %v5995_v20 = vld [vmem:[%s13559_s7 + $0x6d0] sm:$0xff]  ;;  %v6010_v22 = vld [vmem:[%s13559_s7 + $0x748] sm:$0xff] }
 0x662   : > { %9177 = vmatpush1.bf16.msra.mxu1 %v9176_v0  ;;  %9115 = vmatprep.subr.bf16.mxu0 %v9114_v52  ;;  %v9132_v0 = vpack.c.bf16 %v5929_v43, %v5921_v23  ;;  %v5938_v52 = vld [vmem:[%s13559_s7 + $0x508] sm:$0xff]  ;;  %v9212_v21 = vpack.c.bf16 %v5995_v20, %v5987_v4  ;;  %v6004_v23 = vld [vmem:[%s13559_s7 + $0x718] sm:$0xff] }
 0x663   : > { %9179 = vmatprep.subr.bf16.mxu1 %v9178_v35  ;;  %v9134_v32 = vpack.c.bf16 %v5946_v5, %v5938_v52  ;;  %v5948_v35 = vld [vmem:[%s13559_s7 + $0x558] sm:$0xff]  ;;  %v6003_v52 = vld [vmem:[%s13559_s7 + $0x710] sm:$0xff] }
 0x664   : > { %v9198_v41 = vpack.c.bf16 %v5948_v35, %v5940_v30  ;;  %v6011_v5 = vld [vmem:[%s13559_s7 + $0x750] sm:$0xff]  ;;  %v6026_v35 = vld [vmem:[%s13559_s7 + $0x7c8] sm:$0xff] }
 0x665   : > { %9117 = vmatpush1.bf16.msra.mxu0 %v9116_v61  ;;  %v5937_v61 = vld [vmem:[%s13559_s7 + $0x500] sm:$0xff]  ;;  %v9216_v30 = vpack.c.bf16 %v6011_v5, %v6003_v52 }
 0x666   : > { %9181 = vmatpush1.bf16.msra.mxu1 %v9180_v1  ;;  %9119 = vmatprep.subr.bf16.mxu0 %v9118_v48  ;;  %v9136_v1 = vpack.c.bf16 %v5945_v40, %v5937_v61  ;;  %v5954_v48 = vld [vmem:[%s13559_s7 + $0x588] sm:$0xff]  ;;  %v6020_v40 = vld [vmem:[%s13559_s7 + $0x798] sm:$0xff] }
 0x667   : > { %9183 = vmatprep.subr.bf16.mxu1 %v9182_v54  ;;  %v9138_v26 = vpack.c.bf16 %v5962_v50, %v5954_v48  ;;  %v5964_v54 = vld [vmem:[%s13559_s7 + $0x5d8] sm:$0xff]  ;;  %v6027_v48 = vld [vmem:[%s13559_s7 + $0x7d0] sm:$0xff] }
 0x668   : > { %v9202_v56 = vpack.c.bf16 %v5964_v54, %v5956_v53  ;;  %v5790_v54 = vld [vmem:[%s13559_s7 + $0x68] sm:$0xff] }
 0x669   : > { %9121 = vmatpush1.bf16.msra.mxu0 %v9120_v55  ;;  %v5953_v55 = vld [vmem:[%s13559_s7 + $0x580] sm:$0xff] }
 0x66a   : > { %9185 = vmatpush1.bf16.msra.mxu1 %v9184_v44  ;;  %9123 = vmatprep.subr.bf16.mxu0 %v9122_v17  ;;  %v9140_v44 = vpack.c.bf16 %v5961_v10, %v5953_v55  ;;  %v5970_v17 = vld [vmem:[%s13559_s7 + $0x608] sm:$0xff]  ;;  %v5784_v55 = vld [vmem:[%s13559_s7 + $0x38] sm:$0xff] }
 0x66b   : > { %9187 = vmatprep.subr.bf16.mxu1 %v9186_v60  ;;  %v9142_v36 = vpack.c.bf16 %v5978_v58, %v5970_v17  ;;  %v5980_v60 = vld [vmem:[%s13559_s7 + $0x658] sm:$0xff]  ;;  %v5410_v17 = vrot.slane %v5401_v14, %v12580_v37  ;;  %v5418_v58 = vrot.slane %v5401_v14, %v12586_v39 }
 0x66c   : > { %v9206_v2 = vpack.c.bf16 %v5980_v60, %v5972_v9 }
 0x66d   : > { %9125 = vmatpush1.bf16.msra.mxu0 %v9124_v38  ;;  %v5969_v38 = vld [vmem:[%s13559_s7 + $0x600] sm:$0xff] }
 0x66e   : > { %9189 = vmatpush1.bf16.msra.mxu1 %v9188_v27  ;;  %9127 = vmatprep.subr.bf16.mxu0 %v9126_v8  ;;  %v9144_v27 = vpack.c.bf16 %v5977_v62, %v5969_v38  ;;  %v5986_v8 = vld [vmem:[%s13559_s7 + $0x688] sm:$0xff] }
 0x66f   : > { %9191 = vmatprep.subr.bf16.mxu1 %v9190_v13  ;;  %v9146_v34 = vpack.c.bf16 %v5994_v31, %v5986_v8  ;;  %v5996_v13 = vld [vmem:[%s13559_s7 + $0x6d8] sm:$0xff] }
 0x670   : > { %v9210_v18 = vpack.c.bf16 %v5996_v13, %v5988_v11 }
 0x671   : > { %9129 = vmatpush1.bf16.msra.mxu0 %v9128_v15  ;;  %v5985_v15 = vld [vmem:[%s13559_s7 + $0x680] sm:$0xff] }
 0x672   : > { %9193 = vmatpush1.bf16.msra.mxu1 %v9192_v19  ;;  %9131 = vmatprep.subr.bf16.mxu0 %v9130_v51  ;;  %v9148_v19 = vpack.c.bf16 %v5993_v16, %v5985_v15  ;;  %v6002_v51 = vld [vmem:[%s13559_s7 + $0x708] sm:$0xff] }
 0x673   : > { %9195 = vmatprep.subr.bf16.mxu1 %v9194_v24  ;;  %v9150_v43 = vpack.c.bf16 %v6010_v22, %v6002_v51  ;;  %v6012_v24 = vld [vmem:[%s13559_s7 + $0x758] sm:$0xff] }
 0x674   : > { %v9214_v25 = vpack.c.bf16 %v6012_v24, %v6004_v23 }
 0x675   : > { %9133 = vmatpush1.bf16.msra.mxu0 %v9132_v0  ;;  %v6001_v0 = vld [vmem:[%s13559_s7 + $0x700] sm:$0xff] }
 0x676   : > { %9197 = vmatpush1.bf16.msra.mxu1 %v9196_v3  ;;  %9135 = vmatprep.subr.bf16.mxu0 %v9134_v32  ;;  %v9152_v3 = vpack.c.bf16 %v6009_v47, %v6001_v0  ;;  %v6018_v32 = vld [vmem:[%s13559_s7 + $0x788] sm:$0xff]  ;;  %v6777_v47 = vld.sshfl [vmem:[#allocation14] sm:$0x33 pattern:$0x76325410] }
 0x677   : > { %9199 = vmatprep.subr.bf16.mxu1 %v9198_v41  ;;  %v9154_v61 = vpack.c.bf16 %v6026_v35, %v6018_v32  ;;  %v6028_v41 = vld [vmem:[%s13559_s7 + $0x7d8] sm:$0xff] }
 0x678   : > { %v9218_v42 = vpack.c.bf16 %v6028_v41, %v6020_v40  ;;  %v5770_v40 = vcombine.high %v6777_v47, %v6777_v47 }
 0x679   : > { %9137 = vmatpush1.bf16.msra.mxu0 %v9136_v1  ;;  %v6017_v1 = vld [vmem:[%s13559_s7 + $0x780] sm:$0xff] }
 0x67a   : > { %9201 = vmatpush1.bf16.msra.mxu1 %v9200_v46  ;;  %9139 = vmatprep.subr.bf16.mxu0 %v9138_v26  ;;  %v6019_v46 = vld [vmem:[%s13559_s7 + $0x790] sm:$0xff]  ;;  %v9156_v50 = vpack.c.bf16 %v6025_v45, %v6017_v1  ;;  %v5782_v26 = vld [vmem:[%s13559_s7 + $0x28] sm:$0xff]  ;;  %v5781_v45 = vld [vmem:[%s13559_s7 + $0x20] sm:$0xff] }
 0x67b   : > { %9203 = vmatprep.subr.bf16.mxu1 %v9202_v56  ;;  %v9220_v53 = vpack.c.bf16 %v6027_v48, %v6019_v46  ;;  %v9222_v10 = vpack.c.bf16 %v5790_v54, %v5782_v26  ;;  %v5792_v56 = vld [vmem:[%s13559_s7 + $0x78] sm:$0xff]  ;;  %v5789_v48 = vld [vmem:[%s13559_s7 + $0x60] sm:$0xff]  ;;  %v5798_v54 = vld [vmem:[%s13559_s7 + $0xa8] sm:$0xff] }
 0x67d   : > { %9141 = vmatpush1.bf16.msra.mxu0 %v9140_v44  ;;  %v9286_v44 = vpack.c.bf16 %v5792_v56, %v5784_v55  ;;  %v5800_v56 = vld [vmem:[%s13559_s7 + $0xb8] sm:$0xff] }
 0x67e   : > { %9205 = vmatpush1.bf16.msra.mxu1 %v9204_v33  ;;  %9143 = vmatprep.subr.bf16.mxu0 %v9142_v36  ;;  %v5414_v33 = vrot.slane %v5401_v14, %v12583_v59 }
 0x67f   : > { %9207 = vmatprep.subr.bf16.mxu1 %v9206_v2 }
 0x681   : > { %9145 = vmatpush1.bf16.msra.mxu0 %v9144_v27 }
 0x682   : > { %9209 = vmatpush1.bf16.msra.mxu1 %v9208_v7  ;;  %9147 = vmatprep.subr.bf16.mxu0 %v9146_v34 }
 0x683   : > { %9211 = vmatprep.subr.bf16.mxu1 %v9210_v18 }
 0x685   : > { %9149 = vmatpush1.bf16.msra.mxu0 %v9148_v19 }
 0x686   : > { %9213 = vmatpush1.bf16.msra.mxu1 %v9212_v21  ;;  %9151 = vmatprep.subr.bf16.mxu0 %v9150_v43 }
 0x687   : > { %9215 = vmatprep.subr.bf16.mxu1 %v9214_v25 }
 0x689   : > { %9153 = vmatpush1.bf16.msra.mxu0 %v9152_v3 }
 0x68a   : > { %9217 = vmatpush1.bf16.msra.mxu1 %v9216_v30  ;;  %9155 = vmatprep.subr.bf16.mxu0 %v9154_v61 }
 0x68b   : > { %9219 = vmatprep.subr.bf16.mxu1 %v9218_v42 }
 0x68d   : > { %9157 = vmatpush1.bf16.msra.mxu0 %v9156_v50  ;;  %v5783_v50 = vld [vmem:[%s13559_s7 + $0x30] sm:$0xff] }
 0x68e   : > { %9221 = vmatpush1.bf16.msra.mxu1 %v9220_v53  ;;  %9223 = vmatprep.subr.bf16.mxu0 %v9222_v10  ;;  %v5791_v53 = vld [vmem:[%s13559_s7 + $0x70] sm:$0xff]  ;;  %v5806_v10 = vld [vmem:[%s13559_s7 + $0xe8] sm:$0xff] }
 0x68f   : > { %9287 = vmatprep.subr.bf16.mxu1 %v9286_v44  ;;  %v5808_v44 = vld [vmem:[%s13559_s7 + $0xf8] sm:$0xff] }
 0x723   : > { %v5582_v9 = vpop.f32.mrb[0].mxu0 }
 0x724   : > { %v9410_v36 = vadd.f32 %v5582_v9, %v5406_v57  ;;  %v5724_v60 = vpop.f32.mrb[0].mxu1  ;;  %v5584_v38 = vpop.f32.mrb[1].mxu0  ;;  %v9224_v57 = vpack.c.bf16 %v5789_v48, %v5781_v45  ;;  %v5799_v9 = vld [vmem:[%s13559_s7 + $0xb0] sm:$0xff]  ;;  %v5870_v45 = vld [vmem:[%s13559_s7 + $0x2e8] sm:$0xff]  ;;  %v5872_v48 = vld [vmem:[%s13559_s7 + $0x2f8] sm:$0xff] }
 0x725   : > { %v9412_v62 = vadd.f32 %v5724_v60, %v5414_v33  ;;  %v9411_v2 = vadd.f32 %v5584_v38, %v5410_v17  ;;  %v5726_v27 = vpop.f32.mrb[1].mxu1  ;;  %v9288_v33 = vpack.c.bf16 %v5791_v53, %v5783_v50  ;;  %v5797_v17 = vld [vmem:[%s13559_s7 + $0xa0] sm:$0xff]  ;;  %v5814_v60 = vld [vmem:[%s13559_s7 + $0x128] sm:$0xff]  ;;  %v9226_v38 = vpack.c.bf16 %v5806_v10, %v5798_v54 }
 0x726   : > { %v9413_v6 = vadd.f32 %v5726_v27, %v5418_v58  ;;  %v5805_v58 = vld [vmem:[%s13559_s7 + $0xe0] sm:$0xff]  ;;  %v5816_v27 = vld [vmem:[%s13559_s7 + $0x138] sm:$0xff] }
 0x727   : > { %v6775_v29 = vadd.f32 -5.0, %v9412_v62  ;;  %v6482_v7 = vcombine.low %v9410_v36, %v9411_v2  ;;  %v9290_v62 = vpack.c.bf16 %v5808_v44, %v5800_v56  ;;  %v5869_v54 = vld [vmem:[%s13559_s7 + $0x2e0] sm:$0xff]  ;;  %v5863_v44 = vld [vmem:[%s13559_s7 + $0x2b0] sm:$0xff] }
 0x728   : > { %v6776_v8 = vadd.f32 -5.0, %v9413_v6  ;;  %v5824_v6 = vld [vmem:[%s13559_s7 + $0x178] sm:$0xff] }
 0x729   : > { %v5733_v31 = vand.u32 2147483647, %v6775_v29  ;;  %6778 = vst.sshfl [vmem:[#allocation20] sm:$0x33 pattern:$0x76325410] %v6482_v7 }
 0x72a   : > { %v5734_v11 = vand.u32 2147483647, %v6776_v8  ;;  %v5731_v5 = vmax.f32 %v6775_v29, 0.0  ;;  %v5732_v61 = vmax.f32 %v6776_v8, 0.0  ;;  %v9228_v29 = vpack.c.bf16 %v5805_v58, %v5797_v17  ;;  %v5813_v8 = vld [vmem:[%s13559_s7 + $0x120] sm:$0xff]  ;;  %v5880_v17 = vld [vmem:[%s13559_s7 + $0x338] sm:$0xff] }
 0x72b   : > { %v5735_v34 = vsub.f32 0.0, %v5733_v31  ;;  %v5821_v31 = vld [vmem:[%s13559_s7 + $0x160] sm:$0xff]  ;;  %v5888_v58 = vld [vmem:[%s13559_s7 + $0x378] sm:$0xff] }
 0x72c   : > { %v5736_v13 = vsub.f32 0.0, %v5734_v11 }
 0x72d   : > { %v5737_v15 = vmul.f32 1.442695, %v5735_v34  ;;  %v9294_v34 = vpack.c.bf16 %v5824_v6, %v5816_v27  ;;  %v5879_v27 = vld [vmem:[%s13559_s7 + $0x330] sm:$0xff] }
 0x72e   : > { %v5739_v16 = vmul.f32 1.442695, %v5736_v13  ;;  %v5815_v13 = vld [vmem:[%s13559_s7 + $0x130] sm:$0xff] }
 0x72f   : > { %9558 = vpow2.f32 %v5737_v15  ;;  %v5823_v15 = vld [vmem:[%s13559_s7 + $0x170] sm:$0xff] }
 0x730   : > { %9560 = vpow2.f32 %v5739_v16  ;;  %v5830_v16 = vld [vmem:[%s13559_s7 + $0x1a8] sm:$0xff]  ;;  %v5887_v6 = vld [vmem:[%s13559_s7 + $0x370] sm:$0xff] }
 0x739   : > { %v9559_v18 = vpop.eup %9558 }
 0x73a   : > { %v9561_v19 = vpop.eup %9560  ;;  %v5741_v4 = vadd.f32 1.0, %v9559_v18  ;;  %v5744_v21 = vmul.f32 -0.5, %v9559_v18  ;;  %v5747_v23 = vand.u32 2147483647, %v9559_v18 }
 0x73b   : > { %v5750_v20 = vadd.f32 1.0, %v9561_v19  ;;  %v5753_v51 = vmul.f32 -0.5, %v9561_v19  ;;  %v5756_v24 = vand.u32 2147483647, %v9561_v19 }
 0x73c   : > { %9562 = vlog2.f32 %v5741_v4  ;;  %v5745_v22 = vadd.f32 1.0, %v5744_v21  ;;  %vm5748_vm0 = vcmp.lt.f32.partialorder %v5747_v23, 0.0004427343  ;;  %v5840_v4 = vld [vmem:[%s13559_s7 + $0x1f8] sm:$0xff]  ;;  %v9296_v21 = vpack.c.bf16 %v5823_v15, %v5815_v13  ;;  %v5893_v13 = vld [vmem:[%s13559_s7 + $0x3a0] sm:$0xff] }
 0x73d   : > { %9564 = vlog2.f32 %v5750_v20  ;;  %v5754_v43 = vadd.f32 1.0, %v5753_v51  ;;  %vm5757_vm1 = vcmp.lt.f32.partialorder %v5756_v24, 0.0004427343  ;;  %v9232_v20 = vpack.c.bf16 %v5821_v31, %v5813_v8  ;;  %v5829_v51 = vld [vmem:[%s13559_s7 + $0x1a0] sm:$0xff]  ;;  %v5831_v24 = vld [vmem:[%s13559_s7 + $0x1b0] sm:$0xff]  ;;  %v5896_v8 = vld [vmem:[%s13559_s7 + $0x3b8] sm:$0xff] }
 0x73e   : > { %v5746_v52 = vmul.f32 %v9559_v18, %v5745_v22  ;;  %v5838_v18 = vld [vmem:[%s13559_s7 + $0x1e8] sm:$0xff]  ;;  %v5837_v22 = vld [vmem:[%s13559_s7 + $0x1e0] sm:$0xff]  ;;  %v5904_v31 = vld [vmem:[%s13559_s7 + $0x3f8] sm:$0xff] }
 0x73f   : > { %v5755_v32 = vmul.f32 %v9561_v19, %v5754_v43  ;;  %v5832_v19 = vld [vmem:[%s13559_s7 + $0x1b8] sm:$0xff]  ;;  %v9234_v23 = vpack.c.bf16 %v5838_v18, %v5830_v16  ;;  %v5901_v15 = vld [vmem:[%s13559_s7 + $0x3e0] sm:$0xff]  ;;  %v9314_v18 = vpack.c.bf16 %v5904_v31, %v5896_v8  ;;  %v5959_v8 = vld [vmem:[%s13559_s7 + $0x5b0] sm:$0xff] }
 0x740   : > { %v9298_v43 = vpack.c.bf16 %v5840_v4, %v5832_v19  ;;  %v5895_v19 = vld [vmem:[%s13559_s7 + $0x3b0] sm:$0xff] }
 0x741   : > { %v5903_v4 = vld [vmem:[%s13559_s7 + $0x3f0] sm:$0xff] }
 0x742   : > { %v5967_v31 = vld [vmem:[%s13559_s7 + $0x5f0] sm:$0xff] }
 0x746   : > { %v9563_v0 = vpop.eup %9562 }
 0x747   : > { %v9565_v25 = vpop.eup %9564  ;;  %v5743_v3 = vmul.f32 0.6931472, %v9563_v0  ;;  %v5839_v0 = vld [vmem:[%s13559_s7 + $0x1f0] sm:$0xff] }
 0x748   : > { %v5752_v30 = vmul.f32 0.6931472, %v9565_v25  ;;  %v5854_v25 = vld [vmem:[%s13559_s7 + $0x268] sm:$0xff] }
 0x749   : > { %v5749_v35 = vsel %vm5748_vm0, %v5746_v52, %v5743_v3  ;;  %v5848_v3 = vld [vmem:[%s13559_s7 + $0x238] sm:$0xff] }
 0x74a   : > { %v5759_v41 = vadd.f32 %v5749_v35, %v5731_v5  ;;  %v5758_v1 = vsel %vm5757_vm1, %v5755_v32, %v5752_v30  ;;  %v5856_v52 = vld [vmem:[%s13559_s7 + $0x278] sm:$0xff]  ;;  %v9236_v5 = vpack.c.bf16 %v5837_v22, %v5829_v51  ;;  %v9300_v30 = vpack.c.bf16 %v5839_v0, %v5831_v24  ;;  %v5845_v32 = vld [vmem:[%s13559_s7 + $0x220] sm:$0xff] }
 0x74b   : > { %v5760_v42 = vadd.f32 %v5758_v1, %v5732_v61  ;;  %v5853_v35 = vld [vmem:[%s13559_s7 + $0x260] sm:$0xff]  ;;  %v5855_v1 = vld [vmem:[%s13559_s7 + $0x270] sm:$0xff]  ;;  %v5912_v51 = vld [vmem:[%s13559_s7 + $0x438] sm:$0xff] }
 0x74c   : > { %v5773_v46 = vmul.f32 %v6777_v47, %v5759_v41  ;;  %v5846_v47 = vld [vmem:[%s13559_s7 + $0x228] sm:$0xff]  ;;  %v5847_v41 = vld [vmem:[%s13559_s7 + $0x230] sm:$0xff]  ;;  %v9240_v50 = vpack.c.bf16 %v5853_v35, %v5845_v32  ;;  %v5920_v22 = vld [vmem:[%s13559_s7 + $0x478] sm:$0xff] }
 0x74d   : > { %v5774_v26 = vmul.f32 %v5770_v40, %v5760_v42  ;;  %v9238_v61 = vpack.c.bf16 %v5854_v25, %v5846_v47  ;;  %v9302_v40 = vpack.c.bf16 %v5856_v52, %v5848_v3  ;;  %v5862_v42 = vld [vmem:[%s13559_s7 + $0x2a8] sm:$0xff]  ;;  %v9304_v53 = vpack.c.bf16 %v5855_v1, %v5847_v41  ;;  %v5909_v24 = vld [vmem:[%s13559_s7 + $0x420] sm:$0xff]  ;;  %v5911_v3 = vld [vmem:[%s13559_s7 + $0x430] sm:$0xff] }
 0x74e   : > { %v13023_v55 = vadd.f32 %v9410_v36, %v5773_v46  ;;  %v5807_v36 = vld [vmem:[%s13559_s7 + $0xf0] sm:$0xff]  ;;  %v5864_v46 = vld [vmem:[%s13559_s7 + $0x2b8] sm:$0xff]  ;;  %v9242_v10 = vpack.c.bf16 %v5870_v45, %v5862_v42  ;;  %v5917_v0 = vld [vmem:[%s13559_s7 + $0x460] sm:$0xff]  ;;  %v9318_v25 = vpack.c.bf16 %v5920_v22, %v5912_v51 }
 0x74f   : > { %v5776_v14 = vadd.f32 %v9411_v2, %v5774_v26  ;;  %v5822_v2 = vld [vmem:[%s13559_s7 + $0x168] sm:$0xff]  ;;  %v9292_v7 = vpack.c.bf16 %v5807_v36, %v5799_v9  ;;  %v5861_v26 = vld [vmem:[%s13559_s7 + $0x2a0] sm:$0xff]  ;;  %v9306_v56 = vpack.c.bf16 %v5872_v48, %v5864_v46  ;;  %v5919_v52 = vld [vmem:[%s13559_s7 + $0x470] sm:$0xff] }
 0x750   : > { %v9230_v11 = vpack.c.bf16 %v5822_v2, %v5814_v60  ;;  %v9244_v9 = vpack.c.bf16 %v5869_v54, %v5861_v26  ;;  %v5877_v60 = vld [vmem:[%s13559_s7 + $0x320] sm:$0xff]  ;;  %v9310_v2 = vpack.c.bf16 %v5888_v58, %v5880_v17  ;;  %v5928_v32 = vld [vmem:[%s13559_s7 + $0x4b8] sm:$0xff]  ;;  %v5927_v46 = vld [vmem:[%s13559_s7 + $0x4b0] sm:$0xff] }
 0x751   : > { %6139 = vmatprep.mubr.f32.mxu0 %v5776_v14  ;;  %6210 = vmatprep.mubr.f32.mxu1 %v5776_v14  ;;  %v5936_v35 = vld [vmem:[%s13559_s7 + $0x4f8] sm:$0xff]  ;;  %v5925_v41 = vld [vmem:[%s13559_s7 + $0x4a0] sm:$0xff]  ;;  %v5935_v48 = vld [vmem:[%s13559_s7 + $0x4f0] sm:$0xff] }
 0x752   : > { %6140 = vmatmul.mubr.f32.vlgmr.msra.gmra.mrb[2].mxu0 %v13023_v55  ;;  %6211 = vmatmul.mubr.f32.vlgmr.msra.gmra.mrb[2].mxu1 %v13023_v55  ;;  %v5933_v1 = vld [vmem:[%s13559_s7 + $0x4e0] sm:$0xff]  ;;  %v9322_v45 = vpack.c.bf16 %v5936_v35, %v5928_v32  ;;  %v5944_v26 = vld [vmem:[%s13559_s7 + $0x538] sm:$0xff]  ;;  %v5943_v17 = vld [vmem:[%s13559_s7 + $0x530] sm:$0xff] }
 0x753   : > { %9225 = vmatpush1.bf16.msra.mxu0 %v9224_v57  ;;  %9289 = vmatpush1.bf16.msra.mxu1 %v9288_v33  ;;  %v5878_v57 = vld [vmem:[%s13559_s7 + $0x328] sm:$0xff]  ;;  %v5952_v54 = vld [vmem:[%s13559_s7 + $0x578] sm:$0xff]  ;;  %v5951_v58 = vld [vmem:[%s13559_s7 + $0x570] sm:$0xff] }
 0x754   : > { %6281 = vmatprep.mubr.f32.mxu0 %v5776_v14  ;;  %6352 = vmatprep.mubr.f32.mxu1 %v5776_v14  ;;  %v5871_v14 = vld [vmem:[%s13559_s7 + $0x2f0] sm:$0xff]  ;;  %v5886_v33 = vld [vmem:[%s13559_s7 + $0x368] sm:$0xff] }
 0x755   : > { %9227 = vmatprep.subr.bf16.mxu0 %v9226_v38  ;;  %9291 = vmatprep.subr.bf16.mxu1 %v9290_v62  ;;  %v9308_v36 = vpack.c.bf16 %v5871_v14, %v5863_v44  ;;  %v5885_v38 = vld [vmem:[%s13559_s7 + $0x360] sm:$0xff]  ;;  %v9246_v62 = vpack.c.bf16 %v5886_v33, %v5878_v57  ;;  %v9326_v33 = vpack.c.bf16 %v5952_v54, %v5944_v26  ;;  %v5975_v51 = vld [vmem:[%s13559_s7 + $0x630] sm:$0xff] }
 0x756   : > { %v5941_v44 = vld [vmem:[%s13559_s7 + $0x520] sm:$0xff]  ;;  %v5983_v22 = vld [vmem:[%s13559_s7 + $0x670] sm:$0xff] }
 0x757   : > { %9229 = vmatpush1.bf16.msra.mxu0 %v9228_v29  ;;  %9293 = vmatpush1.bf16.msra.mxu1 %v9292_v7  ;;  %v5894_v29 = vld [vmem:[%s13559_s7 + $0x3a8] sm:$0xff]  ;;  %v5949_v14 = vld [vmem:[%s13559_s7 + $0x560] sm:$0xff]  ;;  %v5991_v32 = vld [vmem:[%s13559_s7 + $0x6b0] sm:$0xff] }
 0x758   : > { %9231 = vmatprep.subr.bf16.mxu0 %v9230_v11  ;;  %9295 = vmatprep.subr.bf16.mxu1 %v9294_v34  ;;  %v5902_v7 = vld [vmem:[%s13559_s7 + $0x3e8] sm:$0xff]  ;;  %v9248_v11 = vpack.c.bf16 %v5885_v38, %v5877_v60  ;;  %v9312_v34 = vpack.c.bf16 %v5887_v6, %v5879_v27  ;;  %v5960_v60 = vld [vmem:[%s13559_s7 + $0x5b8] sm:$0xff]  ;;  %v5957_v27 = vld [vmem:[%s13559_s7 + $0x5a0] sm:$0xff] }
 0x759   : > { %v9250_v16 = vpack.c.bf16 %v5902_v7, %v5894_v29  ;;  %v5968_v38 = vld [vmem:[%s13559_s7 + $0x5f8] sm:$0xff]  ;;  %v5965_v6 = vld [vmem:[%s13559_s7 + $0x5e0] sm:$0xff]  ;;  %v5999_v35 = vld [vmem:[%s13559_s7 + $0x6f0] sm:$0xff] }
 0x75a   : > { %v9330_v7 = vpack.c.bf16 %v5968_v38, %v5960_v60  ;;  %v6007_v26 = vld [vmem:[%s13559_s7 + $0x730] sm:$0xff] }
 0x75b   : > { %9233 = vmatpush1.bf16.msra.mxu0 %v9232_v20  ;;  %9297 = vmatpush1.bf16.msra.mxu1 %v9296_v21  ;;  %v5910_v20 = vld [vmem:[%s13559_s7 + $0x428] sm:$0xff]  ;;  %v6015_v54 = vld [vmem:[%s13559_s7 + $0x770] sm:$0xff] }
 0x75c   : > { %9235 = vmatprep.subr.bf16.mxu0 %v9234_v23  ;;  %9299 = vmatprep.subr.bf16.mxu1 %v9298_v43  ;;  %v5918_v21 = vld [vmem:[%s13559_s7 + $0x468] sm:$0xff]  ;;  %v9252_v23 = vpack.c.bf16 %v5901_v15, %v5893_v13  ;;  %v9316_v43 = vpack.c.bf16 %v5903_v4, %v5895_v19  ;;  %v5976_v13 = vld [vmem:[%s13559_s7 + $0x638] sm:$0xff]  ;;  %v5973_v19 = vld [vmem:[%s13559_s7 + $0x620] sm:$0xff] }
 0x75d   : > { %v9254_v47 = vpack.c.bf16 %v5918_v21, %v5910_v20  ;;  %v5984_v15 = vld [vmem:[%s13559_s7 + $0x678] sm:$0xff]  ;;  %v5981_v4 = vld [vmem:[%s13559_s7 + $0x660] sm:$0xff]  ;;  %v6023_v60 = vld [vmem:[%s13559_s7 + $0x7b0] sm:$0xff] }
 0x75e   : > { %v9334_v21 = vpack.c.bf16 %v5984_v15, %v5976_v13  ;;  %v6031_v38 = vld [vmem:[%s13559_s7 + $0x7f0] sm:$0xff]  ;;  %v6057_v15 = vsub.s32 5, %v10444_v63 }
 0x75f   : > { %9237 = vmatpush1.bf16.msra.mxu0 %v9236_v5  ;;  %9301 = vmatpush1.bf16.msra.mxu1 %v9300_v30  ;;  %v5926_v5 = vld [vmem:[%s13559_s7 + $0x4a8] sm:$0xff] }
 0x760   : > { %9239 = vmatprep.subr.bf16.mxu0 %v9238_v61  ;;  %9303 = vmatprep.subr.bf16.mxu1 %v9302_v40  ;;  %v5934_v30 = vld [vmem:[%s13559_s7 + $0x4e8] sm:$0xff]  ;;  %v9256_v61 = vpack.c.bf16 %v5917_v0, %v5909_v24  ;;  %v9320_v40 = vpack.c.bf16 %v5919_v52, %v5911_v3  ;;  %v5992_v24 = vld [vmem:[%s13559_s7 + $0x6b8] sm:$0xff]  ;;  %v5989_v3 = vld [vmem:[%s13559_s7 + $0x6a0] sm:$0xff] }
 0x761   : > { %v9258_v42 = vpack.c.bf16 %v5934_v30, %v5926_v5  ;;  %v6000_v0 = vld [vmem:[%s13559_s7 + $0x6f8] sm:$0xff]  ;;  %v5997_v52 = vld [vmem:[%s13559_s7 + $0x6e0] sm:$0xff] }
 0x762   : > { %v9338_v30 = vpack.c.bf16 %v6000_v0, %v5992_v24 }
 0x763   : > { %9241 = vmatpush1.bf16.msra.mxu0 %v9240_v50  ;;  %9305 = vmatpush1.bf16.msra.mxu1 %v9304_v53  ;;  %v5942_v50 = vld [vmem:[%s13559_s7 + $0x528] sm:$0xff] }
 0x764   : > { %9243 = vmatprep.subr.bf16.mxu0 %v9242_v10  ;;  %9307 = vmatprep.subr.bf16.mxu1 %v9306_v56  ;;  %v5950_v53 = vld [vmem:[%s13559_s7 + $0x568] sm:$0xff]  ;;  %v9260_v10 = vpack.c.bf16 %v5933_v1, %v5925_v41  ;;  %v9324_v56 = vpack.c.bf16 %v5935_v48, %v5927_v46  ;;  %v6008_v41 = vld [vmem:[%s13559_s7 + $0x738] sm:$0xff]  ;;  %v6005_v46 = vld [vmem:[%s13559_s7 + $0x720] sm:$0xff] }
 0x765   : > { %v9262_v57 = vpack.c.bf16 %v5950_v53, %v5942_v50  ;;  %v6016_v1 = vld [vmem:[%s13559_s7 + $0x778] sm:$0xff]  ;;  %v6013_v48 = vld [vmem:[%s13559_s7 + $0x760] sm:$0xff] }
 0x766   : > { %v9342_v53 = vpack.c.bf16 %v6016_v1, %v6008_v41 }
 0x767   : > { %9245 = vmatpush1.bf16.msra.mxu0 %v9244_v9  ;;  %9309 = vmatpush1.bf16.msra.mxu1 %v9308_v36  ;;  %v5958_v9 = vld [vmem:[%s13559_s7 + $0x5a8] sm:$0xff] }
 0x768   : > { %9247 = vmatprep.subr.bf16.mxu0 %v9246_v62  ;;  %9311 = vmatprep.subr.bf16.mxu1 %v9310_v2  ;;  %v5966_v36 = vld [vmem:[%s13559_s7 + $0x5e8] sm:$0xff]  ;;  %v9264_v62 = vpack.c.bf16 %v5949_v14, %v5941_v44  ;;  %v9328_v2 = vpack.c.bf16 %v5951_v58, %v5943_v17  ;;  %v6024_v44 = vld [vmem:[%s13559_s7 + $0x7b8] sm:$0xff]  ;;  %v6021_v17 = vld [vmem:[%s13559_s7 + $0x7a0] sm:$0xff] }
 0x769   : > { %v9266_v29 = vpack.c.bf16 %v5966_v36, %v5958_v9  ;;  %v6032_v14 = vld [vmem:[%s13559_s7 + $0x7f8] sm:$0xff]  ;;  %v6029_v36 = vld [vmem:[%s13559_s7 + $0x7e0] sm:$0xff] }
 0x76a   : > { %v9346_v9 = vpack.c.bf16 %v6032_v14, %v6024_v44 }
 0x76b   : > { %9249 = vmatpush1.bf16.msra.mxu0 %v9248_v11  ;;  %9313 = vmatpush1.bf16.msra.mxu1 %v9312_v34  ;;  %v5974_v11 = vld [vmem:[%s13559_s7 + $0x628] sm:$0xff] }
 0x76c   : > { %9251 = vmatprep.subr.bf16.mxu0 %v9250_v16  ;;  %9315 = vmatprep.subr.bf16.mxu1 %v9314_v18  ;;  %v5982_v34 = vld [vmem:[%s13559_s7 + $0x668] sm:$0xff]  ;;  %v9268_v16 = vpack.c.bf16 %v5965_v6, %v5957_v27  ;;  %v9332_v18 = vpack.c.bf16 %v5967_v31, %v5959_v8  ;;  %v6033_v8 = vld [vmem:[#allocation15] sm:$0xff]  ;;  %v6053_v31 = vsub.s32 4, %v10444_v63 }
 0x76d   : > { %v9270_v20 = vpack.c.bf16 %v5982_v34, %v5974_v11  ;;  %v6061_v11 = vsub.s32 6, %v10444_v63  ;;  %v6038_v34 = vrot.slane %v6033_v8, %v12577_v28  ;;  %v6046_v13 = vrot.slane %v6033_v8, %v12583_v59 }
 0x76f   : > { %9253 = vmatpush1.bf16.msra.mxu0 %v9252_v23  ;;  %9317 = vmatpush1.bf16.msra.mxu1 %v9316_v43  ;;  %v5990_v23 = vld [vmem:[%s13559_s7 + $0x6a8] sm:$0xff] }
 0x770   : > { %9255 = vmatprep.subr.bf16.mxu0 %v9254_v47  ;;  %9319 = vmatprep.subr.bf16.mxu1 %v9318_v25  ;;  %v5998_v43 = vld [vmem:[%s13559_s7 + $0x6e8] sm:$0xff]  ;;  %v9272_v47 = vpack.c.bf16 %v5981_v4, %v5973_v19  ;;  %v9336_v25 = vpack.c.bf16 %v5983_v22, %v5975_v51  ;;  %v6054_v19 = vrot.slane %v6033_v8, %v6053_v31 }
 0x771   : > { %v9274_v5 = vpack.c.bf16 %v5998_v43, %v5990_v23  ;;  %v6062_v4 = vrot.slane %v6033_v8, %v6061_v11  ;;  %v6058_v51 = vrot.slane %v6033_v8, %v6057_v15 }
 0x773   : > { %9257 = vmatpush1.bf16.msra.mxu0 %v9256_v61  ;;  %9321 = vmatpush1.bf16.msra.mxu1 %v9320_v40  ;;  %v6006_v61 = vld [vmem:[%s13559_s7 + $0x728] sm:$0xff] }
 0x774   : > { %9259 = vmatprep.subr.bf16.mxu0 %v9258_v42  ;;  %9323 = vmatprep.subr.bf16.mxu1 %v9322_v45  ;;  %v6014_v40 = vld [vmem:[%s13559_s7 + $0x768] sm:$0xff]  ;;  %v9276_v42 = vpack.c.bf16 %v5997_v52, %v5989_v3  ;;  %v9340_v45 = vpack.c.bf16 %v5999_v35, %v5991_v32 }
 0x775   : > { %v9278_v50 = vpack.c.bf16 %v6014_v40, %v6006_v61 }
 0x777   : > { %9261 = vmatpush1.bf16.msra.mxu0 %v9260_v10  ;;  %9325 = vmatpush1.bf16.msra.mxu1 %v9324_v56  ;;  %v6022_v10 = vld [vmem:[%s13559_s7 + $0x7a8] sm:$0xff] }
 0x778   : > { %9263 = vmatprep.subr.bf16.mxu0 %v9262_v57  ;;  %9327 = vmatprep.subr.bf16.mxu1 %v9326_v33  ;;  %v6030_v56 = vld [vmem:[%s13559_s7 + $0x7e8] sm:$0xff]  ;;  %v9280_v57 = vpack.c.bf16 %v6013_v48, %v6005_v46  ;;  %v9344_v33 = vpack.c.bf16 %v6015_v54, %v6007_v26 }
 0x779   : > { %v9282_v58 = vpack.c.bf16 %v6030_v56, %v6022_v10 }
 0x77b   : > { %9265 = vmatpush1.bf16.msra.mxu0 %v9264_v62  ;;  %9329 = vmatpush1.bf16.msra.mxu1 %v9328_v2  ;;  %v9284_v62 = vpack.c.bf16 %v6029_v36, %v6021_v17  ;;  %v9348_v2 = vpack.c.bf16 %v6031_v38, %v6023_v60 }
 0x77c   : > { %9267 = vmatprep.subr.bf16.mxu0 %v9266_v29  ;;  %9331 = vmatprep.subr.bf16.mxu1 %v9330_v7 }
 0x77f   : > { %9269 = vmatpush1.bf16.msra.mxu0 %v9268_v16  ;;  %9333 = vmatpush1.bf16.msra.mxu1 %v9332_v18  ;;  %v6065_v16 = vsub.s32 7, %v10444_v63  ;;  %v6042_v18 = vrot.slane %v6033_v8, %v12580_v37 }
 0x780   : > { %9271 = vmatprep.subr.bf16.mxu0 %v9270_v20  ;;  %9335 = vmatprep.subr.bf16.mxu1 %v9334_v21 }
 0x781   : > { %v6066_v22 = vrot.slane %v6033_v8, %v6065_v16 }
 0x783   : > { %9273 = vmatpush1.bf16.msra.mxu0 %v9272_v47  ;;  %9337 = vmatpush1.bf16.msra.mxu1 %v9336_v25 }
 0x784   : > { %9275 = vmatprep.subr.bf16.mxu0 %v9274_v5  ;;  %9339 = vmatprep.subr.bf16.mxu1 %v9338_v30 }
 0x787   : > { %9277 = vmatpush1.bf16.msra.mxu0 %v9276_v42  ;;  %9341 = vmatpush1.bf16.msra.mxu1 %v9340_v45 }
 0x788   : > { %9279 = vmatprep.subr.bf16.mxu0 %v9278_v50  ;;  %9343 = vmatprep.subr.bf16.mxu1 %v9342_v53 }
 0x78b   : > { %9281 = vmatpush1.bf16.msra.mxu0 %v9280_v57  ;;  %9345 = vmatpush1.bf16.msra.mxu1 %v9344_v33 }
 0x78c   : > { %9283 = vmatprep.subr.bf16.mxu0 %v9282_v58  ;;  %9347 = vmatprep.subr.bf16.mxu1 %v9346_v9 }
 0x78f   : > { %9285 = vmatpush1.bf16.msra.mxu0 %v9284_v62  ;;  %9349 = vmatpush1.bf16.msra.mxu1 %v9348_v2 }
 0x792   : > { %6282 = vmatmul.mubr.f32.vlgmr.msra.gmra.mrb[4].mxu0 %v13023_v55  ;;  %6353 = vmatmul.mubr.f32.vlgmr.msra.gmra.mrb[4].mxu1 %v13023_v55  ;;  %v6050_v55 = vrot.slane %v6033_v8, %v12586_v39 }
 0x825   : > { %v6141_v27 = vpop.f32.mrb[2].mxu0  ;;  %v6212_v6 = vpop.f32.mrb[2].mxu1 }
 0x826   : > { %v6143_v29 = vpop.f32.mrb[3].mxu0  ;;  %v6214_v7 = vpop.f32.mrb[3].mxu1  ;;  %v6142_v20 = vadd.f32 %v6141_v27, %v6038_v34  ;;  %v6213_v21 = vadd.f32 %v6212_v6, %v6046_v13 }
 0x827   : > { %v6144_v23 = vadd.f32 %v6143_v29, %v6042_v18  ;;  %v6215_v43 = vadd.f32 %v6214_v7, %v6050_v55 }
 0x828   : > { %v6360_v63 = vsel %vm6359_vm2, %v6142_v20, -inf  ;;  %v6362_v37 = vsel %vm6359_vm2, %v6213_v21, -inf }
 0x829   : > { %v6361_v52 = vsel %vm6359_vm2, %v6144_v23, -inf  ;;  %v6363_v5 = vsel %vm6359_vm2, %v6215_v43, -inf }
 0x865   : > { %v6283_v28 = vpop.f32.mrb[4].mxu0  ;;  %v6354_v24 = vpop.f32.mrb[4].mxu1 }
 0x866   : > { %v6284_v59 = vadd.f32 %v6283_v28, %v6054_v19  ;;  %v6355_v0 = vadd.f32 %v6354_v24, %v6062_v4  ;;  %v6285_v47 = vpop.f32.mrb[5].mxu0  ;;  %v6356_v25 = vpop.f32.mrb[5].mxu1 }
 0x867   : > { %v6286_v39 = vadd.f32 %v6285_v47, %v6058_v51  ;;  %v6357_v3 = vadd.f32 %v6356_v25, %v6066_v22 }
 0x868   : > { %v6364_v30 = vsel %vm6359_vm2, %v6284_v59, -inf  ;;  %v6368_v32 = vsel %vm6359_vm2, %v6355_v0, -inf }
 0x869   : > { %v6365_v35 = vmax.f32 %v6360_v63, %v6364_v30  ;;  %v6369_v61 = vmax.f32 %v6362_v37, %v6368_v32  ;;  %v6366_v40 = vsel %vm6359_vm2, %v6286_v39, -inf  ;;  %v6371_v41 = vsel %vm6370_vm3, %v6357_v3, -inf }
 0x86a   : > { %v6367_v1 = vmax.f32 %v6361_v52, %v6366_v40  ;;  %v6372_v42 = vmax.f32 %v6363_v5, %v6371_v41 }
 0x86c   : > { %v6373_v45 = vmax.f32 %v6365_v35, %v6367_v1  ;;  %v6374_v46 = vmax.f32 %v6369_v61, %v6372_v42 }
 0x86e   : > { %v6375_v48 = vmax.f32 %v6373_v45, %v6374_v46 }
 0x870   : > { %6376 = vmax.xlane.f32.xlu0 %v6375_v48 }
 0x8fd   : > { %v6377_v50 = vpop.xlane.xlu0 %6376 }
 0x8fe   : > { %v6378_v53 = vsub.f32 %v6142_v20, %v6377_v50  ;;  %v6379_v26 = vsub.f32 %v6144_v23, %v6377_v50  ;;  %v6380_v54 = vsub.f32 %v6213_v21, %v6377_v50  ;;  %v6381_v10 = vsub.f32 %v6215_v43, %v6377_v50 }
 0x8ff   : > { %v6382_v56 = vsub.f32 %v6284_v59, %v6377_v50  ;;  %v6383_v17 = vsub.f32 %v6286_v39, %v6377_v50  ;;  %v6384_v58 = vsub.f32 %v6355_v0, %v6377_v50  ;;  %v6385_v36 = vsub.f32 %v6357_v3, %v6377_v50 }
 0x900   : > { %v6386_v44 = vmul.f32 1.442695, %v6378_v53  ;;  %v6388_v14 = vmul.f32 1.442695, %v6379_v26  ;;  %v6390_v57 = vmul.f32 1.442695, %v6380_v54 }
 0x901   : > { %v6392_v33 = vmul.f32 1.442695, %v6381_v10  ;;  %v6394_v9 = vmul.f32 1.442695, %v6382_v56  ;;  %v6396_v60 = vmul.f32 1.442695, %v6383_v17 }
 0x902   : > { %9566 = vpow2.f32 %v6386_v44  ;;  %v6398_v38 = vmul.f32 1.442695, %v6384_v58  ;;  %v6400_v62 = vmul.f32 1.442695, %v6385_v36  ;;  %v6493_v36 = vand.u32 127, %v2605_v49 }
 0x903   : > { %9568 = vpow2.f32 %v6388_v14 }
 0x904   : > { %9570 = vpow2.f32 %v6390_v57 }
 0x905   : > { %9572 = vpow2.f32 %v6392_v33 }
 0x906   : > { %9574 = vpow2.f32 %v6394_v9 }
 0x907   : > { %9576 = vpow2.f32 %v6396_v60  ;;  %v6494_v60 = vadd.s32 128, %v6493_v36 }
 0x908   : > { %9578 = vpow2.f32 %v6398_v38  ;;  %v6495_v38 = vadd.s32 256, %v6493_v36 }
 0x909   : > { %9580 = vpow2.f32 %v6400_v62  ;;  %v6496_v62 = vadd.s32 384, %v6493_v36 }
 0x90c   : > { %v9567_v2 = vpop.eup %9566 }
 0x90d   : > { %v9569_v27 = vpop.eup %9568  ;;  %v6402_v6 = vsel %vm6359_vm2, %v9567_v2, 0.0 }
 0x90e   : > { %v9571_v29 = vpop.eup %9570  ;;  %v6403_v7 = vsel %vm6359_vm2, %v9569_v27, 0.0 }
 0x90f   : > { %v9573_v8 = vpop.eup %9572  ;;  %v6404_v31 = vadd.f32 %v6403_v7, %v6402_v6  ;;  %v6405_v11 = vsel %vm6359_vm2, %v9571_v29, 0.0  ;;  %v6499_v6 = vadd.s32 768, %v6493_v36  ;;  %v6501_v7 = vcvt.s32.f32 %v6493_v36 }
 0x910   : > { %v9575_v34 = vpop.eup %9574  ;;  %v6407_v15 = vsel %vm6359_vm2, %v9573_v8, 0.0 }
 0x911   : > { %v6406_v13 = vadd.f32 %v6405_v11, %v6404_v31  ;;  %v9577_v16 = vpop.eup %9576  ;;  %v6409_v55 = vsel %vm6359_vm2, %v9575_v34, 0.0  ;;  %v6503_v31 = vcvt.s32.f32 %v6495_v38  ;;  %v6504_v11 = vcvt.s32.f32 %v6496_v62 }
 0x912   : > { %v9579_v19 = vpop.eup %9578  ;;  %v6411_v20 = vsel %vm6359_vm2, %v9577_v16, 0.0 }
 0x913   : > { %v6408_v18 = vadd.f32 %v6407_v15, %v6406_v13  ;;  %v9581_v21 = vpop.eup %9580  ;;  %v6413_v22 = vsel %vm6359_vm2, %v9579_v19, 0.0  ;;  %v6507_v15 = vcvt.s32.f32 %v6499_v6 }
 0x914   : > { %v6415_v43 = vsel %vm6370_vm3, %v9581_v21, 0.0 }
 0x915   : > { %v6410_v4 = vadd.f32 %v6409_v55, %v6408_v18 }
 0x917   : > { %v6412_v51 = vadd.f32 %v6411_v20, %v6410_v4 }
 0x919   : > { %v6414_v23 = vadd.f32 %v6413_v22, %v6412_v51 }
 0x91b   : > { %v6416_v28 = vadd.f32 %v6415_v43, %v6414_v23 }
 0x91d   : > { %6417 = vadd.xlane.f32.xlu0 %v6416_v28 }
 0x9aa   : > { %v6418_v24 = vpop.xlane.xlu0 %6417 }
 0x9ab   : > { %9582 = vrcp.f32 %v6418_v24 }
 0x9b5   : > { %v9583_v59 = vpop.eup %9582 }
 0x9b6   : > { %v13410_v0 = vmul.f32 %v9583_v59, %v9567_v2  ;;  %v13412_v47 = vmul.f32 %v9583_v59, %v9569_v27  ;;  %v13414_v25 = vmul.f32 %v9583_v59, %v9571_v29  ;;  %v13416_v63 = vmul.f32 %v9583_v59, %v9573_v8 }
 0x9b7   : > { %v13419_v37 = vmul.f32 %v9583_v59, %v9575_v34  ;;  %v13421_v39 = vmul.f32 %v9583_v59, %v9577_v16  ;;  %v13423_v3 = vmul.f32 %v9583_v59, %v9579_v19  ;;  %v13425_v52 = vmul.f32 %v9583_v59, %v9581_v21 }
 0x9b8   : > { %v6437_v5 = vcombine.low %v13414_v25, %v13416_v63  ;;  %v6509_v30 = vsel %vm6359_vm2, %v13410_v0, -inf  ;;  %v6510_v32 = vsel %vm6359_vm2, %v13412_v47, -inf  ;;  %v6511_v35 = vsel %vm6359_vm2, %v13414_v25, -inf }
 0x9b9   : > { %v6453_v61 = vcombine.low %v13419_v37, %v13421_v39  ;;  %v6454_v40 = vcombine.low %v13423_v3, %v13425_v52  ;;  %v6513_v41 = vsel %vm6359_vm2, %v13419_v37, -inf  ;;  %v6512_v1 = vsel %vm6359_vm2, %v13416_v63, -inf }
 0x9ba   : > { %v6514_v42 = vmax.f32 %v6509_v30, %v6513_v41  ;;  %v6515_v45 = vsel %vm6359_vm2, %v13421_v39, -inf  ;;  %v6517_v46 = vsel %vm6359_vm2, %v13423_v3, -inf  ;;  %v6451_v54 = vrot.slane %v6437_v5, %v10455_v12 }
 0x9bb   : > { %v6461_v48 = vrot.slane %v6453_v61, %v10455_v12  ;;  %v6468_v50 = vrot.slane %v6454_v40, %v10455_v12  ;;  %v6516_v53 = vmax.f32 %v6510_v32, %v6515_v45  ;;  %v6518_v26 = vmax.f32 %v6511_v35, %v6517_v46 }
 0x9bc   : > { %v6519_v10 = vsel %vm6370_vm3, %v13425_v52, -inf  ;;  %v6436_v56 = vcombine.low %v13410_v0, %v13412_v47  ;;  %v6497_v2 = vadd.s32 512, %v6493_v36  ;;  %v6498_v27 = vadd.s32 640, %v6493_v36 }
 0x9bd   : > { %v6469_v44 = vcombine.low %v6461_v48, %v6468_v50  ;;  %v6520_v14 = vmax.f32 %v6512_v1, %v6519_v10  ;;  %v6521_v57 = vmax.f32 %v6514_v42, %v6516_v53  ;;  %v6500_v29 = vadd.s32 896, %v6493_v36 }
 0x9be   : > { %v6444_v33 = vrot.slane %v6436_v56, %v10455_v12  ;;  %v6502_v8 = vcvt.s32.f32 %v6494_v60  ;;  %v6505_v34 = vcvt.s32.f32 %v6497_v2  ;;  %v6506_v13 = vcvt.s32.f32 %v6498_v27 }
 0x9bf   : > { %6479 = vst.msk [vmem:[#allocation18 + $0x8] sm:$0xff] %vm6478_vm9, %v6469_v44  ;;  %v6522_v17 = vmax.f32 %v6518_v26, %v6520_v14  ;;  %v6508_v16 = vcvt.s32.f32 %v6500_v29 }
 0x9c0   : > { %v6452_v58 = vcombine.low %v6444_v33, %v6451_v54 }
 0x9c1   : > { %v6523_v9 = vmax.f32 %v6521_v57, %v6522_v17 }
 0x9c2   : > { %6472 = vst [vmem:[#allocation18] sm:$0xff] %v6452_v58 }
 0x9c3   : > { %6524 = vmax.xlane.f32.xlu1 %v6523_v9 }
 0xa50   : > { %v6525_v12 = vpop.xlane.xlu1 %6524 }
 0xa51   : > { %vm6526_vm10 = vcmp.ge.f32.partialorder %v13410_v0, %v6525_v12  ;;  %vm6527_vm11 = vcmp.ge.f32.partialorder %v13412_v47, %v6525_v12  ;;  %vm6528_vm12 = vcmp.ge.f32.partialorder %v13414_v25, %v6525_v12  ;;  %vm6529_vm13 = vcmp.ge.f32.partialorder %v13416_v63, %v6525_v12 }
 0xa52   : > { %vm6530_vm14 = vcmp.ge.f32.partialorder %v13419_v37, %v6525_v12  ;;  %vm6531_vm15 = vcmp.ge.f32.partialorder %v13421_v39, %v6525_v12  ;;  %vm6532_vm0 = vcmp.ge.f32.partialorder %v13423_v3, %v6525_v12  ;;  %vm6533_vm1 = vcmp.ge.f32.partialorder %v13425_v52, %v6525_v12 }
 0xa53   : > { %v6534_v49 = vsel %vm6526_vm10, %v6501_v7, 1000.0  ;;  %v6535_v18 = vsel %vm6527_vm11, %v6502_v8, 1000.0  ;;  %v6536_v55 = vsel %vm6528_vm12, %v6503_v31, 1000.0  ;;  %v6537_v19 = vsel %vm6529_vm13, %v6504_v11, 1000.0 }
 0xa54   : > { %v6538_v4 = vsel %vm6530_vm14, %v6505_v34, 1000.0  ;;  %v6539_v20 = vsel %vm6531_vm15, %v6506_v13, 1000.0  ;;  %v6540_v21 = vsel %vm6532_vm0, %v6507_v15, 1000.0  ;;  %v6541_v51 = vsel %vm6533_vm1, %v6508_v16, 1000.0 }
 0xa55   : > { %v6542_v22 = vsel %vm6359_vm2, %v6534_v49, inf  ;;  %v6543_v23 = vsel %vm6359_vm2, %v6535_v18, inf  ;;  %v6544_v43 = vsel %vm6359_vm2, %v6536_v55, inf  ;;  %v6545_v28 = vsel %vm6359_vm2, %v6537_v19, inf }
 0xa56   : > { %v6546_v24 = vsel %vm6359_vm2, %v6538_v4, inf  ;;  %v6548_v59 = vsel %vm6359_vm2, %v6539_v20, inf  ;;  %v6550_v0 = vsel %vm6359_vm2, %v6540_v21, inf  ;;  %v6552_v47 = vsel %vm6370_vm3, %v6541_v51, inf }
 0xa57   : > { %v6547_v25 = vmin.f32 %v6542_v22, %v6546_v24  ;;  %v6549_v63 = vmin.f32 %v6543_v23, %v6548_v59  ;;  %v6551_v37 = vmin.f32 %v6544_v43, %v6550_v0  ;;  %v6553_v39 = vmin.f32 %v6545_v28, %v6552_v47 }
 0xa59   : > { %v6554_v3 = vmin.f32 %v6547_v25, %v6549_v63  ;;  %v6555_v52 = vmin.f32 %v6551_v37, %v6553_v39 }
 0xa5b   : > { %v6556_v5 = vmin.f32 %v6554_v3, %v6555_v52 }
 0xa5d   : > { %6557 = vmin.xlane.f32.xlu1 %v6556_v5 }
 0xaea   : > { %v6558_v30 = vpop.xlane.xlu1 %6557 }
 0xaeb   : > { %v9418_v32 = vtrunc.f32 %v6558_v30 }
 0xaed   : > { %v9419_v35 = vcvt.f32.s32 %v9418_v32 }
 0xaef   : > { %6561 = vst.msk [vmem:[%s13563_s11] sm:$0x3] %vm6560_vm4, %v9419_v35 }
 0xaf0 PF: > { %p9499_p0 = scmp.eq.s32.totalorder %s10055_s27, 1  ;;  %s9966_s16 = smov [#allocation18]  }
 0xaf1   : > { %s6580_s29 = sshll.u32 %s9966_s16, 4  ;;  %s9967_s21 = smov [#allocation17]   ;;  %s6581_s29 = int_to_ptr.vmem [resolvable:$true] %s6580_s29 }
 0xaf2   : > { %s6569_s24 = sshll.u32 %s9967_s21, 4  ;;  %s9812_s9 = scalar_lea.vmem %s6581_s29, 256  ;;  %s6570_s24 = int_to_ptr.vmem [resolvable:$true] %s6569_s24 }
 0xaf3   : > { %p9813_p2 = scmp.ne.s32.totalorder %s6581_s29, %s9812_s9  ;;  %p9819_p6 = scmp.lt.s32.totalorder %s6581_s29, %s6581_s29 }
 0xaf4   : > { %p9820_p13 = scmp.lt.s32.totalorder %s9812_s9, %s9812_s9 }
 0xaf5   : > { %p9814_p5 = pnand %p9813_p2, %p9499_p0 }
 0xaf6   : > { %p9821_p9 = por %p9820_p13, %p9819_p6 }
 0xaf7   : > { %p9815_p10 = pneg %p9814_p5 }
 0xaf9   : > { %p9822_p3 = pnand %p9821_p9, %p9815_p10 }
 0xafb   : > { %9825 = shalt.err (!%p9822_p3)
}
 0xafc   : > { %s13597_s18 = sld [smem:[#allocation32_spill]] }
 0xb02   : > { %s9826_s28 = scalar_lea.hbm %s13597_s18, 256 }
 0xb03   : > { %p9827_p12 = scmp.ne.s32.totalorder %s13597_s18, %s9826_s28  ;;  %p9832_p1 = scmp.lt.u32.totalorder %s9826_s28, %s13597_s18 }
 0xb05   : > { %p9828_p8 = pnand %p9827_p12, %p9499_p0 }
 0xb07   : > { %p9829_p7 = pneg %p9828_p8 }
 0xb09   : > { %p9834_p11 = pnand %p9832_p1, %p9829_p7 }
 0xb0b   : > { %9837 = shalt.err (!%p9834_p11)
}
 0xb0c   : > { %9451 = dma.vmem_to_hbm [thread:$0]  (%p9499_p0), %s6581_s29, 256, %s13597_s18, [#allocation19]  }
 0xb0d   : > { %s9838_s20 = scalar_lea.vmem %s6570_s24, 128  ;;  %p9845_p10 = scmp.lt.s32.totalorder %s6570_s24, %s6570_s24 }
 0xb0e   : > { %p9839_p4 = scmp.ne.s32.totalorder %s6570_s24, %s9838_s20  ;;  %p9846_p6 = scmp.lt.s32.totalorder %s9838_s20, %s9838_s20 }
 0xb10   : > { %p9840_p2 = pnand %p9839_p4, %p9499_p0  ;;  %p9847_p13 = por %p9846_p6, %p9845_p10 }
 0xb12   : > { %p9841_p5 = pneg %p9840_p2 }
 0xb14   : > { %p9848_p9 = pnand %p9847_p13, %p9841_p5 }
 0xb16   : > { %9851 = shalt.err (!%p9848_p9)
}
 0xb17   : > { %s13598_s16 = sld [smem:[#allocation31_spill]] }
 0xb1d   : > { %s9852_s21 = scalar_lea.hbm %s13598_s16, 128 }
 0xb1e   : > { %p9853_p3 = scmp.ne.s32.totalorder %s13598_s16, %s9852_s21  ;;  %p9858_p7 = scmp.lt.u32.totalorder %s9852_s21, %s13598_s16 }
 0xb20   : > { %p9854_p12 = pnand %p9853_p3, %p9499_p0 }
 0xb22   : > { %p9855_p8 = pneg %p9854_p12 }
 0xb24   : > { %p9860_p1 = pnand %p9858_p7, %p9855_p8 }
 0xb26   : > { %9863 = shalt.err (!%p9860_p1)
}
 0xb27   : > { %9449 = dma.vmem_to_hbm [thread:$0]  (%p9499_p0), %s6570_s24, 128, %s13598_s16, [#allocation5]  }
 0xb28   : > { %s9968_s26 = smov [#allocation20]  }
 0xb29   : > { %s6594_s2 = sshll.u32 %s9968_s26, 4  ;;  %s6595_s2 = int_to_ptr.vmem [resolvable:$true] %s6594_s2 }
 0xb2a   : > { %s9864_s15 = scalar_lea.vmem %s6595_s2, 64  ;;  %p9871_p5 = scmp.lt.s32.totalorder %s6595_s2, %s6595_s2 }
 0xb2b   : > { %p9865_p11 = scmp.ne.s32.totalorder %s6595_s2, %s9864_s15  ;;  %p9872_p10 = scmp.lt.s32.totalorder %s9864_s15, %s9864_s15 }
 0xb2d   : > { %p9866_p4 = pnand %p9865_p11, %p9499_p0  ;;  %p9873_p6 = por %p9872_p10, %p9871_p5 }
 0xb2f   : > { %p9867_p2 = pneg %p9866_p4 }
 0xb31   : > { %p9874_p13 = pnand %p9873_p6, %p9867_p2 }
 0xb33   : > { %9877 = shalt.err (!%p9874_p13)
}
 0xb34   : > { %s13599_s20 = sld [smem:[#allocation33_spill]] }
 0xb3a   : > { %s9878_s0 = scalar_lea.hbm %s13599_s20, 64 }
 0xb3b   : > { %p9879_p9 = scmp.ne.s32.totalorder %s13599_s20, %s9878_s0  ;;  %p9884_p8 = scmp.lt.u32.totalorder %s9878_s0, %s13599_s20 }
 0xb3d   : > { %p9880_p3 = pnand %p9879_p9, %p9499_p0 }
 0xb3f   : > { %p9881_p12 = pneg %p9880_p3 }
 0xb41   : > { %p9886_p7 = pnand %p9884_p8, %p9881_p12 }
 0xb43   : > { %9889 = shalt.err (!%p9886_p7)
}
 0xb44   : > { %9453 = dma.vmem_to_hbm [thread:$0]  (%p9499_p0), %s6595_s2, 64, %s13599_s20, [#allocation19]  }
 0xb45   : > { %9931 = dma.done.wait (%p9499_p0), [#allocation5], 128  }
 0xb46   : > { %9933 = vsyncadd (%p9499_p0), [#allocation5], 4294967168 }
 0xb47   : > { %9935 = dma.done.wait (%p9499_p0), [#allocation19], 320  }
 0xb48   : > { %9937 = vsyncadd (%p9499_p0), [#allocation19], 4294966976 }
 0xb49 PF: > { %p31_p1 = scmp.ge.s32.totalorder %s10222_s13, 4   ;;  %s13600_s21 = smov %s9944_s22 }
 0xb4a   : > { %s13601_s22 = smov %s9948_s23  ;;  %s13602_s23 = smov %s10234_s19 }
 0xb4b   : > { %s13603_s24 = smov %s10222_s13  ;;  %33 = sbr.rel (!%p31_p1) target bundleno = 16 (0x10), region = 162 }
 0xb52   :  { %6618 = vsyncpa [#allocation4], 1 }
 0xb53   :  { %6620 = vsyncpa [#allocation4 + $0x1], 1 }
 0xb54   :  { %6621 = vsyncpa [#allocation7], 1 }
 0xb55   :  { %6623 = vsyncpa [#allocation7 + $0x1], 1 }
 0xb56   :  { %6624 = vsyncpa [#allocation10], 1 }
 0xb57   :  { %6625 = vsyncpa [#allocation13], 1 }
 0xb58   :  { %6626 = vsyncpa [#allocation16], 1 }
 0xb59   :  { %6627 = vsyncpa [#allocation5], 1 }
 0xb5a   :  { %6629 = vsyncpa [#allocation5 + $0x1], 1 }
 0xb5b   :  { %6630 = vsyncpa [#allocation19], 1 }

</bundles_post_ra>
